<compile_context>
chip_gen: v7x
topology: tpu7x:2x2x1
jax: 0.10.0
libtpu: 0.0.40
codegen_flags: <defaults>
</compile_context>

<pallas_src>
import functools
import math

import numpy as np
import jax
import jax.numpy as jnp
from jax.experimental import pallas as pl
from jax.experimental.pallas import tpu as pltpu

OUT_CHANNELS = 8  # cfg.MODEL.OUT_CHANNELS (configurable; small synthetic value)

MM_TM, MM_TN, MM_TK = 256, 256, 512
CONV_TC = 256
VMEM_LIMIT_BYTES = 32 * 1024 * 1024   # headroom under v7x's 64 MiB physical VMEM


def _round_up(x, m):
    return ((x + m - 1) // m) * m


def _pick_tile(dim, base, max_tile):
    """Largest tile (multiple of `base`, <= max_tile) that divides `dim` rounded up to base."""
    padded = _round_up(max(dim, 1), base)
    tile = min(max_tile, padded)
    while padded % tile:
        tile -= base
    return tile, padded


# ----------------------------------------------------------------------------
# Tiled fused matmul (+ bias, + optional ReLU) -- used only by the backbone stand-in.
# ----------------------------------------------------------------------------
def _matmul_bias_act_kernel(a_ref, b_ref, bias_ref, o_ref, acc_ref, *, relu):
    @pl.when(pl.program_id(2) == 0)
    def _():
        acc_ref[...] = jnp.zeros_like(acc_ref)

    acc_ref[...] += jnp.dot(a_ref[...], b_ref[...],
                            preferred_element_type=jnp.float32)

    @pl.when(pl.program_id(2) == pl.num_programs(2) - 1)
    def _():
        y = acc_ref[...] + bias_ref[...]
        if relu:
            y = jnp.maximum(y, 0.0)
        o_ref[...] = y.astype(o_ref.dtype)


def matmul_bias_act(a, b, bias, relu):
    """A:(M,K) @ B:(K,N) + bias(N,) [+ReLU].  bf16 operands/output, f32 accumulation.
    M uses a 16-row base (bf16 packs 16 sublanes/vreg); N/K padded to 128-lane multiples."""
    M, K = a.shape
    _, N = b.shape
    tm, Mp = _pick_tile(M, 16, MM_TM)
    tn, Np = _pick_tile(N, 128, MM_TN)
    tk, Kp = _pick_tile(K, 128, MM_TK)
    a_p = jnp.pad(a.astype(jnp.bfloat16), ((0, Mp - M), (0, Kp - K)))
    b_p = jnp.pad(b.astype(jnp.bfloat16), ((0, Kp - K), (0, Np - N)))
    bias_p = jnp.pad(bias.astype(jnp.float32), (0, Np - N)).reshape(1, Np)
    out = pl.pallas_call(
        functools.partial(_matmul_bias_act_kernel, relu=relu),
        out_shape=jax.ShapeDtypeStruct((Mp, Np), jnp.bfloat16),
        grid=(Mp // tm, Np // tn, Kp // tk),
        in_specs=[
            pl.BlockSpec((tm, tk), lambda i, j, k: (i, k)),
            pl.BlockSpec((tk, tn), lambda i, j, k: (k, j)),
            pl.BlockSpec((1, tn), lambda i, j, k: (0, j)),
        ],
        out_specs=pl.BlockSpec((tm, tn), lambda i, j, k: (i, j)),
        scratch_shapes=[pltpu.VMEM((tm, tn), jnp.float32)],
        compiler_params=pltpu.CompilerParams(
            dimension_semantics=("parallel", "parallel", "arbitrary"),
            vmem_limit_bytes=VMEM_LIMIT_BYTES),
    )(a_p, b_p, bias_p)
    return out[:M, :N]


# ----------------------------------------------------------------------------
# Fused conv_dw: depthwise KxK + BN + ReLU + pointwise 1x1 + BN + ReLU (+ optional
# tiny 1x1 head), one pallas_call.  Flattened-tap depthwise (K*K slices total).
# ----------------------------------------------------------------------------
def _conv_dw_kernel(x_ref, dww_ref, dws_ref, dwb_ref, pww_ref, pws_ref, pwb_ref,
                    *rest, K, Wp, L, has_head):
    if has_head:
        hw_ref, hb_ref, o_ref, acc_ref = rest
    else:
        o_ref, acc_ref = rest
    c = pl.program_id(1)

    @pl.when(c == 0)
    def _():
        acc_ref[...] = jnp.zeros_like(acc_ref)

    # Depthwise KxK + folded BN + ReLU: whole-plane tap accumulation over the flattened
    # (Hp*Wp, tc) view.  Each tap is ONE contiguous static slice of length L; the few
    # "wrap" rows (right-pad columns) are computed but sliced off in the wrapper.
    dw = None
    for kh in range(K):
        for kw in range(K):
            s = kh * Wp + kw
            t = x_ref[0, s:s + L, :].astype(jnp.float32) * dww_ref[kh * K + kw]
            dw = t if dw is None else dw + t
    dw = jnp.maximum(dw * dws_ref[...] + dwb_ref[...], 0.0)

    # Fused pointwise 1x1: partial MXU matmul over this channel tile, f32 accumulation.
    acc_ref[...] += jnp.dot(dw.astype(jnp.bfloat16), pww_ref[...],
                            preferred_element_type=jnp.float32)

    @pl.when(c == pl.num_programs(1) - 1)
    def _():
        y = jnp.maximum(acc_ref[...] * pws_ref[...] + pwb_ref[...], 0.0)
        if has_head:
            # Fused tiny 1x1 head (conv5_2 / Mconv7): one extra MXU matmul on the
            # resident accumulator -- saves an HBM round-trip + a pallas_call.
            y = jnp.dot(y.astype(jnp.bfloat16), hw_ref[...],
                        preferred_element_type=jnp.float32) + hb_ref[...]
        o_ref[0] = y.astype(o_ref.dtype)


def conv_dw(x, p, padding=0, head=None, prepadded=False):
    """Torch conv_dw equivalent (depthwise KxK conv + BN + ReLU, 1x1 conv + BN + ReLU),
    BN folded to scale/shift, NHWC, bf16 activations.  `head=(w,b)` additionally fuses a
    trailing bias-only 1x1 conv and returns ONLY the head map (f32).  `prepadded=True`
    means x is already bf16, spatially padded and channel-padded to a 128 multiple."""
    K = p["dw_w"].shape[0]
    C = p["dw_w"].shape[-1]
    Cout = p["pw_w"].shape[1]

    if prepadded:
        xp = x
        N, Hp, Wp, Cp = xp.shape
        tc, _ = _pick_tile(Cp, 128, CONV_TC)
    else:
        N, H, W, _ = x.shape
        tc, Cp = _pick_tile(C, 128, CONV_TC)
        xp = jnp.pad(x.astype(jnp.bfloat16),
                     ((0, 0), (padding, padding), (padding, padding), (0, Cp - C)))
        Hp, Wp = H + 2 * padding, W + 2 * padding
    pad_c = Cp - C
    Ho, Wo = Hp - K + 1, Wp - K + 1
    L = (Ho - 1) * Wp + Wo            # exact-fit flattened tap length

    xf = xp.reshape(N, Hp * Wp, Cp)
    dww = jnp.pad(p["dw_w"].astype(jnp.float32).reshape(K * K, 1, C),
                  ((0, 0), (0, 0), (0, pad_c)))
    dws = jnp.pad(p["dw_scale"].astype(jnp.float32), (0, pad_c)).reshape(1, Cp)
    dwb = jnp.pad(p["dw_shift"].astype(jnp.float32), (0, pad_c)).reshape(1, Cp)
    pww = jnp.pad(p["pw_w"].astype(jnp.bfloat16), ((0, pad_c), (0, 0)))
    pws = p["pw_scale"].astype(jnp.float32).reshape(1, Cout)
    pwb = p["pw_shift"].astype(jnp.float32).reshape(1, Cout)

    inputs = [xf, dww, dws, dwb, pww, pws, pwb]
    in_specs = [
        pl.BlockSpec((1, Hp * Wp, tc), lambda n, c: (n, 0, c)),
        pl.BlockSpec((K * K, 1, tc), lambda n, c: (0, 0, c)),
        pl.BlockSpec((1, tc), lambda n, c: (0, c)),
        pl.BlockSpec((1, tc), lambda n, c: (0, c)),
        pl.BlockSpec((tc, Cout), lambda n, c: (c, 0)),
        pl.BlockSpec((1, Cout), lambda n, c: (0, 0)),
        pl.BlockSpec((1, Cout), lambda n, c: (0, 0)),
    ]
    if head is not None:
        hw, hb = head
        Ch = hw.shape[1]
        inputs += [hw.astype(jnp.bfloat16), hb.astype(jnp.float32).reshape(1, Ch)]
        in_specs += [pl.BlockSpec((Cout, Ch), lambda n, c: (0, 0)),
                     pl.BlockSpec((1, Ch), lambda n, c: (0, 0))]
        out_c, out_dtype = Ch, jnp.float32
    else:
        out_c, out_dtype = Cout, jnp.bfloat16

    kern = functools.partial(_conv_dw_kernel, K=K, Wp=Wp, L=L,
                             has_head=head is not None)
    out = pl.pallas_call(
        kern,
        out_shape=jax.ShapeDtypeStruct((N, L, out_c), out_dtype),
        grid=(N, Cp // tc),
        in_specs=in_specs,
        out_specs=pl.BlockSpec((1, L, out_c), lambda n, c: (n, 0, 0)),
        scratch_shapes=[pltpu.VMEM((L, Cout), jnp.float32)],
        compiler_params=pltpu.CompilerParams(
            dimension_semantics=("parallel", "arbitrary"),
            vmem_limit_bytes=VMEM_LIMIT_BYTES),
    )(*inputs)
    # Drop the (K-1) wrap/junk columns per row and restore (N, Ho, Wo, out_c).
    out = jnp.pad(out, ((0, 0), (0, Ho * Wp - L), (0, 0)))
    return out.reshape(N, Ho, Wp, out_c)[:, :, :Wo, :]


# ----------------------------------------------------------------------------
# Fused dense KxK stride-1 conv (conv4_7): one contiguous flattened tap slice +
# one MXU matmul per tap; no im2col, no VMEM tap staging copies.
# ----------------------------------------------------------------------------
def _dense_conv_kernel(x_ref, w_ref, b_ref, o_ref, acc_ref, *, K, Wp, L, relu):
    c = pl.program_id(1)

    @pl.when(c == 0)
    def _():
        acc_ref[...] = jnp.zeros_like(acc_ref)

    part = None
    for kh in range(K):
        for kw in range(K):
            s = kh * Wp + kw
            d = jnp.dot(x_ref[0, s:s + L, :], w_ref[kh * K + kw],
                        preferred_element_type=jnp.float32)
            part = d if part is None else part + d
    acc_ref[...] += part

    @pl.when(c == pl.num_programs(1) - 1)
    def _():
        y = acc_ref[...] + b_ref[...]
        if relu:
            y = jnp.maximum(y, 0.0)
        o_ref[0] = y.astype(o_ref.dtype)


def dense_conv_fused(x, w, bias, padding, relu):
    """Full (non-grouped) KxK stride-1 conv, taps fused in-kernel.  w:(K,K,Cin,Cout)."""
    N, H, W, C = x.shape
    K = w.shape[0]
    Cout = w.shape[-1]
    tc, Cp = _pick_tile(C, 128, CONV_TC)
    pad_c = Cp - C
    xp = jnp.pad(x.astype(jnp.bfloat16),
                 ((0, 0), (padding, padding), (padding, padding), (0, pad_c)))
    Hp, Wp = H + 2 * padding, W + 2 * padding
    Ho, Wo = Hp - K + 1, Wp - K + 1
    L = (Ho - 1) * Wp + Wo
    xf = xp.reshape(N, Hp * Wp, Cp)
    wk = jnp.pad(w.astype(jnp.bfloat16).reshape(K * K, C, Cout),
                 ((0, 0), (0, pad_c), (0, 0)))
    bias2 = bias.astype(jnp.float32).reshape(1, Cout)
    kern = functools.partial(_dense_conv_kernel, K=K, Wp=Wp, L=L, relu=relu)
    out = pl.pallas_call(
        kern,
        out_shape=jax.ShapeDtypeStruct((N, L, Cout), jnp.bfloat16),
        grid=(N, Cp // tc),
        in_specs=[
            pl.BlockSpec((1, Hp * Wp, tc), lambda n, c: (n, 0, c)),
            pl.BlockSpec((K * K, tc, Cout), lambda n, c: (0, c, 0)),
            pl.BlockSpec((1, Cout), lambda n, c: (0, 0)),
        ],
        out_specs=pl.BlockSpec((1, L, Cout), lambda n, c: (n, 0, 0)),
        scratch_shapes=[pltpu.VMEM((L, Cout), jnp.float32)],
        compiler_params=pltpu.CompilerParams(
            dimension_semantics=("parallel", "arbitrary"),
            vmem_limit_bytes=VMEM_LIMIT_BYTES),
    )(xf, wk, bias2)
    out = jnp.pad(out, ((0, 0), (0, Ho * Wp - L), (0, 0)))
    return out.reshape(N, Ho, Wp, Cout)[:, :, :Wo, :]


# ----------------------------------------------------------------------------
# Strided (backbone stand-in) conv wrapper: bf16 im2col + tiled matmul.
# ----------------------------------------------------------------------------
def _im2col(x, K, stride, padding):
    N, H, W, C = x.shape
    xp = jnp.pad(x, ((0, 0), (padding, padding), (padding, padding), (0, 0)))
    Hp, Wp = H + 2 * padding, W + 2 * padding
    Ho = (Hp - K) // stride + 1
    Wo = (Wp - K) // stride + 1
    cols = []
    for kh in range(K):
        for kw in range(K):
            cols.append(xp[:, kh:kh + stride * (Ho - 1) + 1:stride,
                           kw:kw + stride * (Wo - 1) + 1:stride, :])
    patches = jnp.concatenate(cols, axis=-1)
    return patches.reshape(N * Ho * Wo, K * K * C), (N, Ho, Wo)


def dense_conv_strided(x, w, bias, stride, padding, relu):
    """Strided dense conv via bf16 im2col + tiled matmul.  Only used by the backbone
    stand-in (the real model's GoogLeNet slice is an external torchvision module)."""
    K, _, Cin, Cout = w.shape
    a, (N, Ho, Wo) = _im2col(x.astype(jnp.bfloat16), K, stride, padding)
    out = matmul_bias_act(a, w.reshape(K * K * Cin, Cout), bias, relu)
    return out.reshape(N, Ho, Wo, Cout)


# ----------------------------------------------------------------------------
# Center-map average pool (tiny 2x2 output -> plain XLA, no Pallas launch overhead).
# ----------------------------------------------------------------------------
def _pool_out(n, k, s):
    o = int(math.ceil((n - k) / s)) + 1        # ceil_mode=True, padding=0
    if (o - 1) * s >= n:
        o -= 1
    return max(o, 1)


def avgpool_center(cm, kernel=9, stride=8):
    """nn.AvgPool2d(kernel_size=9, stride=8, ceil_mode=True) on (N,H,W), no padding.
    Boundary windows divide by the number of valid elements (PyTorch behavior, pad=0)."""
    N, H, W = cm.shape
    Ho, Wo = _pool_out(H, kernel, stride), _pool_out(W, kernel, stride)
    ph = np.zeros((Ho, H), np.float32)
    for oh in range(Ho):
        hs = oh * stride
        he = min(hs + kernel, H)
        ph[oh, hs:he] = 1.0 / (he - hs)
    pw = np.zeros((Wo, W), np.float32)
    for ow in range(Wo):
        ws = ow * stride
        we = min(ws + kernel, W)
        pw[ow, ws:we] = 1.0 / (we - ws)
    t = jnp.einsum('oh,nhw->now', jnp.asarray(ph), cm.astype(jnp.float32))
    return jnp.einsum('now,pw->nop', t, jnp.asarray(pw))


# ----------------------------------------------------------------------------
# Parameter initialization (deterministic, std=0.01 like init_weights; BN folded identity)
# ----------------------------------------------------------------------------
def _init_conv(key, cin, cout, k):
    return dict(
        w=0.01 * jax.random.normal(key, (k, k, cin, cout), jnp.float32),
        b=jnp.zeros((cout,), jnp.float32),
    )


def _init_conv_dw(key, cin, cout, k):
    k1, k2 = jax.random.split(key)
    return dict(
        dw_w=0.01 * jax.random.normal(k1, (k, k, cin), jnp.float32),
        dw_scale=jnp.ones((cin,), jnp.float32),      # folded BN (identity at init)
        dw_shift=jnp.zeros((cin,), jnp.float32),
        pw_w=0.01 * jax.random.normal(k2, (cin, cout), jnp.float32),
        pw_scale=jnp.ones((cout,), jnp.float32),
        pw_shift=jnp.zeros((cout,), jnp.float32),
    )


def init_cpm_params(key):
    keys = list(jax.random.split(key, 32))
    ki = iter(keys)
    p = {}
    # TODO(synk): torchvision GoogLeNet children[0:9] (inception backbone) is an external
    # module not in the provided source; stand-in = three stride-2 3x3 convs that reproduce
    # its interface (/8 spatial downsampling, 512 output channels).
    p["backbone"] = [
        _init_conv(next(ki), 3, 64, 3),
        _init_conv(next(ki), 64, 192, 3),
        _init_conv(next(ki), 192, 512, 3),
    ]
    p["conv4_3"] = _init_conv_dw(next(ki), 512, 256, 3)
    p["conv4_4"] = _init_conv_dw(next(ki), 256, 256, 3)
    p["conv4_5"] = _init_conv_dw(next(ki), 256, 256, 3)
    p["conv4_6"] = _init_conv_dw(next(ki), 256, 256, 3)
    p["conv4_7"] = _init_conv(next(ki), 256, 128, 3)
    p["conv5_1"] = _init_conv_dw(next(ki), 128, 512, 1)
    p["conv5_2"] = _init_conv(next(ki), 512, OUT_CHANNELS, 1)
    cin2 = 128 + 1 + OUT_CHANNELS
    p["Mconv1_s2"] = _init_conv_dw(next(ki), cin2, 128, 7)
    p["Mconv2_s2"] = _init_conv_dw(next(ki), 128, 128, 7)
    p["Mconv3_s2"] = _init_conv_dw(next(ki), 128, 128, 7)
    p["Mconv4_s2"] = _init_conv_dw(next(ki), 128, 128, 7)
    p["Mconv5_s2"] = _init_conv_dw(next(ki), 128, 128, 7)
    p["Mconv6_s2"] = _init_conv_dw(next(ki), 128, 128, 1)
    p["Mconv7_s2"] = _init_conv(next(ki), 128, OUT_CHANNELS, 1)
    # Stage-3 weights exist in the torch module but forward() reuses _stage2 -> not needed.
    return p


# ----------------------------------------------------------------------------
# CPM forward
# ----------------------------------------------------------------------------
def cpm_forward(params, image_nchw, center_map):
    x = jnp.transpose(image_nchw.astype(jnp.float32), (0, 2, 3, 1))   # NCHW -> NHWC

    # _main: backbone -> conv4_3..4_6 (conv_dw 3x3, pad 1) -> conv4_7 (conv 3x3, pad 1, no bn/relu)
    for bp in params["backbone"]:
        x = dense_conv_strided(x, bp["w"], bp["b"], stride=2, padding=1, relu=True)
    for name in ("conv4_3", "conv4_4", "conv4_5", "conv4_6"):
        x = conv_dw(x, params[name], padding=1)
    conv4_7 = dense_conv_fused(x, params["conv4_7"]["w"], params["conv4_7"]["b"],
                               padding=1, relu=False)

    # _stage1: conv5_1 (conv_dw 1x1) with conv5_2 (1x1, bias only) fused as its head.
    conv5_2_map = conv_dw(conv4_7, params["conv5_1"], padding=0,
                          head=(params["conv5_2"]["w"].reshape(-1, OUT_CHANNELS),
                                params["conv5_2"]["b"]))

    # pool_center_lower + unsqueeze(1) -> single NHWC channel
    pool_center = avgpool_center(center_map)                           # (N, Ho, Wo)

    # Stage-2 input assembly hoisted: conv4_7 + pool_center are stage-invariant, so build
    # the spatially-padded (pad=3), 256-lane, bf16 concat buffer ONCE; each stage only
    # updates the OUT_CHANNELS-wide prev_map slice (channel order matches torch.cat).
    N, Hf, Wf, _ = conv4_7.shape
    pad2 = 3
    Cp2 = _round_up(128 + OUT_CHANNELS + 1, 128)                       # 137 -> 256 lanes
    base = jnp.zeros((N, Hf + 2 * pad2, Wf + 2 * pad2, Cp2), jnp.bfloat16)
    base = base.at[:, pad2:pad2 + Hf, pad2:pad2 + Wf, :128].set(
        conv4_7.astype(jnp.bfloat16))
    base = base.at[:, pad2:pad2 + Hf, pad2:pad2 + Wf, 128 + OUT_CHANNELS].set(
        pool_center.astype(jnp.bfloat16))

    def stage2(prev_map):
        y = base.at[:, pad2:pad2 + Hf, pad2:pad2 + Wf,
                    128:128 + OUT_CHANNELS].set(prev_map.astype(jnp.bfloat16))
        y = conv_dw(y, params["Mconv1_s2"], prepadded=True)
        for name in ("Mconv2_s2", "Mconv3_s2", "Mconv4_s2", "Mconv5_s2"):
            y = conv_dw(y, params[name], padding=3)
        # Mconv6 (conv_dw 1x1) with Mconv7 (1x1, bias only) fused as its head.
        return conv_dw(y, params["Mconv6_s2"], padding=0,
                       head=(params["Mconv7_s2"]["w"].reshape(-1, OUT_CHANNELS),
                             params["Mconv7_s2"]["b"]))

    stage2_map = stage2(conv5_2_map)
    # Original forward calls self._stage2 again for stage 3 (reuses stage-2 weights).
    stage3_map = stage2(stage2_map)

    # eval mode -> return Mconv7_stage3_map only, back in NCHW
    return jnp.transpose(stage3_map, (0, 3, 1, 2))


# ----------------------------------------------------------------------------
if __name__ == "__main__":
    key = jax.random.PRNGKey(0)
    k_param, k_img, k_cm = jax.random.split(key, 3)

    params = init_cpm_params(k_param)
    image = jax.random.normal(k_img, (2, 3, 16, 16), jnp.float32)       # NCHW
    center_map = jax.random.uniform(k_cm, (2, 16, 16), jnp.float32)     # (N, H, W)

    fwd = jax.jit(cpm_forward)
    out = jax.block_until_ready(fwd(params, image, center_map))
    assert out.shape == (2, OUT_CHANNELS, 2, 2), out.shape
    assert bool(jnp.all(jnp.isfinite(out)))
    print("KERNEL_OK")
</pallas_src>

<mosaic_0001>
module attributes {stable_mosaic.version = 11 : i64} {
  func.func @_matmul_bias_act_kernel(%arg0: i32, %arg1: i32, %arg2: i32, %arg3: memref<128x128xbf16, #tpu.memory_space<vmem>>, %arg4: memref<128x128xbf16, #tpu.memory_space<vmem>>, %arg5: memref<1x128xf32, #tpu.memory_space<vmem>>, %arg6: memref<128x128xbf16, #tpu.memory_space<vmem>>, %arg7: memref<128x128xf32, #tpu.memory_space<vmem>>) attributes {dimension_semantics = [#tpu.dimension_semantics<parallel>, #tpu.dimension_semantics<parallel>, #tpu.dimension_semantics<arbitrary>], iteration_bounds = array<i64: 1, 1, 1>, scalar_prefetch = 0 : i64, scratch_operands = 1 : i64, tpu.core_type = #tpu.core_type<tc>, window_params = [{transform_indices = @transform_0, window_bounds = array<i64: 128, 128>}, {transform_indices = @transform_1, window_bounds = array<i64: 128, 128>}, {transform_indices = @transform_2, window_bounds = array<i64: 1, 128>}, {transform_indices = @transform_3, window_bounds = array<i64: 128, 128>}]} {
    %c0_i32 = arith.constant 0 : i32
    %0 = arith.cmpi eq, %arg2, %c0_i32 : i32
    %1 = arith.extui %0 : i1 to i32
    %c0_i32_0 = arith.constant 0 : i32
    %2 = arith.cmpi ne, %1, %c0_i32_0 : i32
    scf.if %2 {
      %cst_10 = arith.constant 0.000000e+00 : f32
      %12 = vector.broadcast %cst_10 : f32 to vector<128x128xf32>
      %c0_11 = arith.constant 0 : index
      %c0_12 = arith.constant 0 : index
      %13 = vector.load %arg7[%c0_11, %c0_12] : memref<128x128xf32, #tpu.memory_space<vmem>>, vector<128x128xf32>
      tpu.vector_store %arg7[%c0_11, %c0_12], %12 {strides = array<i32>} : memref<128x128xf32, #tpu.memory_space<vmem>>, vector<128x128xf32>,
    } else {
    }
    %c0 = arith.constant 0 : index
    %c0_1 = arith.constant 0 : index
    %3 = vector.load %arg7[%c0, %c0_1] : memref<128x128xf32, #tpu.memory_space<vmem>>, vector<128x128xf32>
    %c0_2 = arith.constant 0 : index
    %c0_3 = arith.constant 0 : index
    %4 = vector.load %arg3[%c0_2, %c0_3] : memref<128x128xbf16, #tpu.memory_space<vmem>>, vector<128x128xbf16>
    %c0_4 = arith.constant 0 : index
    %c0_5 = arith.constant 0 : index
    %5 = vector.load %arg4[%c0_4, %c0_5] : memref<128x128xbf16, #tpu.memory_space<vmem>>, vector<128x128xbf16>
    %cst = arith.constant dense<0.000000e+00> : vector<128x128xf32>
    %6 = tpu.matmul %4, %5, %cst {dimension_numbers = #tpu.dot_dimension_numbers<[1], [0], [0], [1], [0, 0, 1, 1], [], []>} : vector<128x128xbf16>, vector<128x128xbf16>, vector<128x128xf32> -> vector<128x128xf32>
    %7 = arith.addf %3, %6 : vector<128x128xf32>
    %c0_6 = arith.constant 0 : index
    %c0_7 = arith.constant 0 : index
    %8 = vector.load %arg7[%c0_6, %c0_7] : memref<128x128xf32, #tpu.memory_space<vmem>>, vector<128x128xf32>
    tpu.vector_store %arg7[%c0_6, %c0_7], %7 {strides = array<i32>} : memref<128x128xf32, #tpu.memory_space<vmem>>, vector<128x128xf32>,
    %c0_i32_8 = arith.constant 0 : i32
    %9 = arith.cmpi eq, %arg2, %c0_i32_8 : i32
    %10 = arith.extui %9 : i1 to i32
    %c0_i32_9 = arith.constant 0 : i32
    %11 = arith.cmpi ne, %10, %c0_i32_9 : i32
    scf.if %11 {
      %c0_10 = arith.constant 0 : index
      %c0_11 = arith.constant 0 : index
      %12 = vector.load %arg7[%c0_10, %c0_11] : memref<128x128xf32, #tpu.memory_space<vmem>>, vector<128x128xf32>
      %c0_12 = arith.constant 0 : index
      %c0_13 = arith.constant 0 : index
      %13 = vector.load %arg5[%c0_12, %c0_13] : memref<1x128xf32, #tpu.memory_space<vmem>>, vector<1x128xf32>
      %14 = vector.broadcast %13 : vector<1x128xf32> to vector<128x128xf32>
      %15 = arith.addf %12, %14 : vector<128x128xf32>
      %cst_14 = arith.constant 0.000000e+00 : f32
      %16 = vector.broadcast %cst_14 : f32 to vector<128x128xf32>
      %17 = arith.maximumf %15, %16 : vector<128x128xf32>
      %18 = arith.truncf %17 : vector<128x128xf32> to vector<128x128xbf16>
      %c0_15 = arith.constant 0 : index
      %c0_16 = arith.constant 0 : index
      %19 = vector.load %arg6[%c0_15, %c0_16] : memref<128x128xbf16, #tpu.memory_space<vmem>>, vector<128x128xbf16>
      tpu.vector_store %arg6[%c0_15, %c0_16], %18 {strides = array<i32>} : memref<128x128xbf16, #tpu.memory_space<vmem>>, vector<128x128xbf16>,
    } else {
    }
    return
  }
  func.func @transform_0(%arg0: i32, %arg1: i32, %arg2: i32) -> (i32, i32) {
    %c0_i32 = arith.constant 0 : i32
    return %arg0, %arg2 : i32, i32
  }
  func.func @transform_1(%arg0: i32, %arg1: i32, %arg2: i32) -> (i32, i32) {
    %c0_i32 = arith.constant 0 : i32
    return %arg2, %arg1 : i32, i32
  }
  func.func @transform_2(%arg0: i32, %arg1: i32, %arg2: i32) -> (i32, i32) {
    %c0_i32 = arith.constant 0 : i32
    %c0_i32_0 = arith.constant 0 : i32
    return %c0_i32, %arg1 : i32, i32
  }
  func.func @transform_3(%arg0: i32, %arg1: i32, %arg2: i32) -> (i32, i32) {
    %c0_i32 = arith.constant 0 : i32
    return %arg0, %arg1 : i32, i32
  }
}

module attributes {stable_mosaic.version = 11 : i64} {
  func.func @_matmul_bias_act_kernel(%arg0: i32, %arg1: i32, %arg2: i32, %arg3: memref<32x128xbf16, #tpu.memory_space<vmem>>, %arg4: memref<128x256xbf16, #tpu.memory_space<vmem>>, %arg5: memref<1x256xf32, #tpu.memory_space<vmem>>, %arg6: memref<32x256xbf16, #tpu.memory_space<vmem>>, %arg7: memref<32x256xf32, #tpu.memory_space<vmem>>) attributes {dimension_semantics = [#tpu.dimension_semantics<parallel>, #tpu.dimension_semantics<parallel>, #tpu.dimension_semantics<arbitrary>], iteration_bounds = array<i64: 1, 1, 5>, scalar_prefetch = 0 : i64, scratch_operands = 1 : i64, tpu.core_type = #tpu.core_type<tc>, window_params = [{transform_indices = @transform_0, window_bounds = array<i64: 32, 128>}, {transform_indices = @transform_1, window_bounds = array<i64: 128, 256>}, {transform_indices = @transform_2, window_bounds = array<i64: 1, 256>}, {transform_indices = @transform_3, window_bounds = array<i64: 32, 256>}]} {
    %c0_i32 = arith.constant 0 : i32
    %0 = arith.cmpi eq, %arg2, %c0_i32 : i32
    %1 = arith.extui %0 : i1 to i32
    %c0_i32_0 = arith.constant 0 : i32
    %2 = arith.cmpi ne, %1, %c0_i32_0 : i32
    scf.if %2 {
      %cst_9 = arith.constant 0.000000e+00 : f32
      %12 = vector.broadcast %cst_9 : f32 to vector<32x256xf32>
      %c0_10 = arith.constant 0 : index
      %c0_11 = arith.constant 0 : index
      %13 = vector.load %arg7[%c0_10, %c0_11] : memref<32x256xf32, #tpu.memory_space<vmem>>, vector<32x256xf32>
      tpu.vector_store %arg7[%c0_10, %c0_11], %12 {strides = array<i32>} : memref<32x256xf32, #tpu.memory_space<vmem>>, vector<32x256xf32>,
    } else {
    }
    %c0 = arith.constant 0 : index
    %c0_1 = arith.constant 0 : index
    %3 = vector.load %arg7[%c0, %c0_1] : memref<32x256xf32, #tpu.memory_space<vmem>>, vector<32x256xf32>
    %c0_2 = arith.constant 0 : index
    %c0_3 = arith.constant 0 : index
    %4 = vector.load %arg3[%c0_2, %c0_3] : memref<32x128xbf16, #tpu.memory_space<vmem>>, vector<32x128xbf16>
    %c0_4 = arith.constant 0 : index
    %c0_5 = arith.constant 0 : index
    %5 = vector.load %arg4[%c0_4, %c0_5] : memref<128x256xbf16, #tpu.memory_space<vmem>>, vector<128x256xbf16>
    %cst = arith.constant dense<0.000000e+00> : vector<32x256xf32>
    %6 = tpu.matmul %4, %5, %cst {dimension_numbers = #tpu.dot_dimension_numbers<[1], [0], [0], [1], [0, 0, 1, 1], [], []>} : vector<32x128xbf16>, vector<128x256xbf16>, vector<32x256xf32> -> vector<32x256xf32>
    %7 = arith.addf %3, %6 : vector<32x256xf32>
    %c0_6 = arith.constant 0 : index
    %c0_7 = arith.constant 0 : index
    %8 = vector.load %arg7[%c0_6, %c0_7] : memref<32x256xf32, #tpu.memory_space<vmem>>, vector<32x256xf32>
    tpu.vector_store %arg7[%c0_6, %c0_7], %7 {strides = array<i32>} : memref<32x256xf32, #tpu.memory_space<vmem>>, vector<32x256xf32>,
    %c4_i32 = arith.constant 4 : i32
    %9 = arith.cmpi eq, %arg2, %c4_i32 : i32
    %10 = arith.extui %9 : i1 to i32
    %c0_i32_8 = arith.constant 0 : i32
    %11 = arith.cmpi ne, %10, %c0_i32_8 : i32
    scf.if %11 {
      %c0_9 = arith.constant 0 : index
      %c0_10 = arith.constant 0 : index
      %12 = vector.load %arg7[%c0_9, %c0_10] : memref<32x256xf32, #tpu.memory_space<vmem>>, vector<32x256xf32>
      %c0_11 = arith.constant 0 : index
      %c0_12 = arith.constant 0 : index
      %13 = vector.load %arg5[%c0_11, %c0_12] : memref<1x256xf32, #tpu.memory_space<vmem>>, vector<1x256xf32>
      %14 = vector.broadcast %13 : vector<1x256xf32> to vector<32x256xf32>
      %15 = arith.addf %12, %14 : vector<32x256xf32>
      %cst_13 = arith.constant 0.000000e+00 : f32
      %16 = vector.broadcast %cst_13 : f32 to vector<32x256xf32>
      %17 = arith.maximumf %15, %16 : vector<32x256xf32>
      %18 = arith.truncf %17 : vector<32x256xf32> to vector<32x256xbf16>
      %c0_14 = arith.constant 0 : index
      %c0_15 = arith.constant 0 : index
      %19 = vector.load %arg6[%c0_14, %c0_15] : memref<32x256xbf16, #tpu.memory_space<vmem>>, vector<32x256xbf16>
      tpu.vector_store %arg6[%c0_14, %c0_15], %18 {strides = array<i32>} : memref<32x256xbf16, #tpu.memory_space<vmem>>, vector<32x256xbf16>,
    } else {
    }
    return
  }
  func.func @transform_0(%arg0: i32, %arg1: i32, %arg2: i32) -> (i32, i32) {
    %c0_i32 = arith.constant 0 : i32
    return %arg0, %arg2 : i32, i32
  }
  func.func @transform_1(%arg0: i32, %arg1: i32, %arg2: i32) -> (i32, i32) {
    %c0_i32 = arith.constant 0 : i32
    return %arg2, %arg1 : i32, i32
  }
  func.func @transform_2(%arg0: i32, %arg1: i32, %arg2: i32) -> (i32, i32) {
    %c0_i32 = arith.constant 0 : i32
    %c0_i32_0 = arith.constant 0 : i32
    return %c0_i32, %arg1 : i32, i32
  }
  func.func @transform_3(%arg0: i32, %arg1: i32, %arg2: i32) -> (i32, i32) {
    %c0_i32 = arith.constant 0 : i32
    return %arg0, %arg1 : i32, i32
  }
}

module attributes {stable_mosaic.version = 11 : i64} {
  func.func @_matmul_bias_act_kernel(%arg0: i32, %arg1: i32, %arg2: i32, %arg3: memref<16x256xbf16, #tpu.memory_space<vmem>>, %arg4: memref<256x256xbf16, #tpu.memory_space<vmem>>, %arg5: memref<1x256xf32, #tpu.memory_space<vmem>>, %arg6: memref<16x256xbf16, #tpu.memory_space<vmem>>, %arg7: memref<16x256xf32, #tpu.memory_space<vmem>>) attributes {dimension_semantics = [#tpu.dimension_semantics<parallel>, #tpu.dimension_semantics<parallel>, #tpu.dimension_semantics<arbitrary>], iteration_bounds = array<i64: 1, 2, 7>, scalar_prefetch = 0 : i64, scratch_operands = 1 : i64, tpu.core_type = #tpu.core_type<tc>, window_params = [{transform_indices = @transform_0, window_bounds = array<i64: 16, 256>}, {transform_indices = @transform_1, window_bounds = array<i64: 256, 256>}, {transform_indices = @transform_2, window_bounds = array<i64: 1, 256>}, {transform_indices = @transform_3, window_bounds = array<i64: 16, 256>}]} {
    %c0_i32 = arith.constant 0 : i32
    %0 = arith.cmpi eq, %arg2, %c0_i32 : i32
    %1 = arith.extui %0 : i1 to i32
    %c0_i32_0 = arith.constant 0 : i32
    %2 = arith.cmpi ne, %1, %c0_i32_0 : i32
    scf.if %2 {
      %cst_9 = arith.constant 0.000000e+00 : f32
      %12 = vector.broadcast %cst_9 : f32 to vector<16x256xf32>
      %c0_10 = arith.constant 0 : index
      %c0_11 = arith.constant 0 : index
      %13 = vector.load %arg7[%c0_10, %c0_11] : memref<16x256xf32, #tpu.memory_space<vmem>>, vector<16x256xf32>
      tpu.vector_store %arg7[%c0_10, %c0_11], %12 {strides = array<i32>} : memref<16x256xf32, #tpu.memory_space<vmem>>, vector<16x256xf32>,
    } else {
    }
    %c0 = arith.constant 0 : index
    %c0_1 = arith.constant 0 : index
    %3 = vector.load %arg7[%c0, %c0_1] : memref<16x256xf32, #tpu.memory_space<vmem>>, vector<16x256xf32>
    %c0_2 = arith.constant 0 : index
    %c0_3 = arith.constant 0 : index
    %4 = vector.load %arg3[%c0_2, %c0_3] : memref<16x256xbf16, #tpu.memory_space<vmem>>, vector<16x256xbf16>
    %c0_4 = arith.constant 0 : index
    %c0_5 = arith.constant 0 : index
    %5 = vector.load %arg4[%c0_4, %c0_5] : memref<256x256xbf16, #tpu.memory_space<vmem>>, vector<256x256xbf16>
    %cst = arith.constant dense<0.000000e+00> : vector<16x256xf32>
    %6 = tpu.matmul %4, %5, %cst {dimension_numbers = #tpu.dot_dimension_numbers<[1], [0], [0], [1], [0, 0, 1, 1], [], []>} : vector<16x256xbf16>, vector<256x256xbf16>, vector<16x256xf32> -> vector<16x256xf32>
    %7 = arith.addf %3, %6 : vector<16x256xf32>
    %c0_6 = arith.constant 0 : index
    %c0_7 = arith.constant 0 : index
    %8 = vector.load %arg7[%c0_6, %c0_7] : memref<16x256xf32, #tpu.memory_space<vmem>>, vector<16x256xf32>
    tpu.vector_store %arg7[%c0_6, %c0_7], %7 {strides = array<i32>} : memref<16x256xf32, #tpu.memory_space<vmem>>, vector<16x256xf32>,
    %c6_i32 = arith.constant 6 : i32
    %9 = arith.cmpi eq, %arg2, %c6_i32 : i32
    %10 = arith.extui %9 : i1 to i32
    %c0_i32_8 = arith.constant 0 : i32
    %11 = arith.cmpi ne, %10, %c0_i32_8 : i32
    scf.if %11 {
      %c0_9 = arith.constant 0 : index
      %c0_10 = arith.constant 0 : index
      %12 = vector.load %arg7[%c0_9, %c0_10] : memref<16x256xf32, #tpu.memory_space<vmem>>, vector<16x256xf32>
      %c0_11 = arith.constant 0 : index
      %c0_12 = arith.constant 0 : index
      %13 = vector.load %arg5[%c0_11, %c0_12] : memref<1x256xf32, #tpu.memory_space<vmem>>, vector<1x256xf32>
      %14 = vector.broadcast %13 : vector<1x256xf32> to vector<16x256xf32>
      %15 = arith.addf %12, %14 : vector<16x256xf32>
      %cst_13 = arith.constant 0.000000e+00 : f32
      %16 = vector.broadcast %cst_13 : f32 to vector<16x256xf32>
      %17 = arith.maximumf %15, %16 : vector<16x256xf32>
      %18 = arith.truncf %17 : vector<16x256xf32> to vector<16x256xbf16>
      %c0_14 = arith.constant 0 : index
      %c0_15 = arith.constant 0 : index
      %19 = vector.load %arg6[%c0_14, %c0_15] : memref<16x256xbf16, #tpu.memory_space<vmem>>, vector<16x256xbf16>
      tpu.vector_store %arg6[%c0_14, %c0_15], %18 {strides = array<i32>} : memref<16x256xbf16, #tpu.memory_space<vmem>>, vector<16x256xbf16>,
    } else {
    }
    return
  }
  func.func @transform_0(%arg0: i32, %arg1: i32, %arg2: i32) -> (i32, i32) {
    %c0_i32 = arith.constant 0 : i32
    return %arg0, %arg2 : i32, i32
  }
  func.func @transform_1(%arg0: i32, %arg1: i32, %arg2: i32) -> (i32, i32) {
    %c0_i32 = arith.constant 0 : i32
    return %arg2, %arg1 : i32, i32
  }
  func.func @transform_2(%arg0: i32, %arg1: i32, %arg2: i32) -> (i32, i32) {
    %c0_i32 = arith.constant 0 : i32
    %c0_i32_0 = arith.constant 0 : i32
    return %c0_i32, %arg1 : i32, i32
  }
  func.func @transform_3(%arg0: i32, %arg1: i32, %arg2: i32) -> (i32, i32) {
    %c0_i32 = arith.constant 0 : i32
    return %arg0, %arg1 : i32, i32
  }
}

module attributes {stable_mosaic.version = 11 : i64} {
  func.func @_conv_dw_kernel(%arg0: i32, %arg1: i32, %arg2: memref<1x16x256xbf16, #tpu.memory_space<vmem>>, %arg3: memref<9x1x256xf32, #tpu.memory_space<vmem>>, %arg4: memref<1x256xf32, #tpu.memory_space<vmem>>, %arg5: memref<1x256xf32, #tpu.memory_space<vmem>>, %arg6: memref<256x256xbf16, #tpu.memory_space<vmem>>, %arg7: memref<1x256xf32, #tpu.memory_space<vmem>>, %arg8: memref<1x256xf32, #tpu.memory_space<vmem>>, %arg9: memref<1x6x256xbf16, #tpu.memory_space<vmem>>, %arg10: memref<6x256xf32, #tpu.memory_space<vmem>>) attributes {dimension_semantics = [#tpu.dimension_semantics<parallel>, #tpu.dimension_semantics<arbitrary>], iteration_bounds = array<i64: 2, 2>, scalar_prefetch = 0 : i64, scratch_operands = 1 : i64, tpu.core_type = #tpu.core_type<tc>, window_params = [{transform_indices = @transform_0, window_bounds = array<i64: 1, 16, 256>}, {transform_indices = @transform_1, window_bounds = array<i64: 9, 1, 256>}, {transform_indices = @transform_2, window_bounds = array<i64: 1, 256>}, {transform_indices = @transform_3, window_bounds = array<i64: 1, 256>}, {transform_indices = @transform_4, window_bounds = array<i64: 256, 256>}, {pipeline_mode = #tpu.pipeline_mode<synchronous>, transform_indices = @transform_5, window_bounds = array<i64: 1, 256>}, {pipeline_mode = #tpu.pipeline_mode<synchronous>, transform_indices = @transform_6, window_bounds = array<i64: 1, 256>}, {transform_indices = @transform_7, window_bounds = array<i64: 1, 6, 256>}]} {
    %c0_i32 = arith.constant 0 : i32
    %0 = arith.cmpi eq, %arg1, %c0_i32 : i32
    %1 = arith.extui %0 : i1 to i32
    %c0_i32_0 = arith.constant 0 : i32
    %2 = arith.cmpi ne, %1, %c0_i32_0 : i32
    scf.if %2 {
      %cst_56 = arith.constant 0.000000e+00 : f32
      %91 = vector.broadcast %cst_56 : f32 to vector<6x256xf32>
      %c0_57 = arith.constant 0 : index
      %c0_58 = arith.constant 0 : index
      %92 = vector.load %arg10[%c0_57, %c0_58] : memref<6x256xf32, #tpu.memory_space<vmem>>, vector<6x256xf32>
      tpu.vector_store %arg10[%c0_57, %c0_58], %91 {strides = array<i32>} : memref<6x256xf32, #tpu.memory_space<vmem>>, vector<6x256xf32>,
    } else {
    }
    %c0 = arith.constant 0 : index
    %c0_1 = arith.constant 0 : index
    %c0_2 = arith.constant 0 : index
    %3 = vector.load %arg2[%c0, %c0_1, %c0_2] : memref<1x16x256xbf16, #tpu.memory_space<vmem>>, vector<1x6x256xbf16>
    %4 = vector.shape_cast %3 : vector<1x6x256xbf16> to vector<6x256xbf16>
    %5 = arith.extf %4 : vector<6x256xbf16> to vector<6x256xf32>
    %c0_3 = arith.constant 0 : index
    %c0_4 = arith.constant 0 : index
    %c0_5 = arith.constant 0 : index
    %6 = vector.load %arg3[%c0_3, %c0_4, %c0_5] : memref<9x1x256xf32, #tpu.memory_space<vmem>>, vector<1x1x256xf32>
    %7 = vector.shape_cast %6 : vector<1x1x256xf32> to vector<1x256xf32>
    %8 = vector.broadcast %7 : vector<1x256xf32> to vector<6x256xf32>
    %9 = arith.mulf %5, %8 : vector<6x256xf32>
    %c0_6 = arith.constant 0 : index
    %c1 = arith.constant 1 : index
    %c0_7 = arith.constant 0 : index
    %10 = vector.load %arg2[%c0_6, %c1, %c0_7] : memref<1x16x256xbf16, #tpu.memory_space<vmem>>, vector<1x6x256xbf16>
    %11 = vector.shape_cast %10 : vector<1x6x256xbf16> to vector<6x256xbf16>
    %12 = arith.extf %11 : vector<6x256xbf16> to vector<6x256xf32>
    %c1_8 = arith.constant 1 : index
    %c0_9 = arith.constant 0 : index
    %c0_10 = arith.constant 0 : index
    %13 = vector.load %arg3[%c1_8, %c0_9, %c0_10] : memref<9x1x256xf32, #tpu.memory_space<vmem>>, vector<1x1x256xf32>
    %14 = vector.shape_cast %13 : vector<1x1x256xf32> to vector<1x256xf32>
    %15 = vector.broadcast %14 : vector<1x256xf32> to vector<6x256xf32>
    %16 = arith.mulf %12, %15 : vector<6x256xf32>
    %17 = arith.addf %9, %16 : vector<6x256xf32>
    %c0_11 = arith.constant 0 : index
    %c2 = arith.constant 2 : index
    %c0_12 = arith.constant 0 : index
    %18 = vector.load %arg2[%c0_11, %c2, %c0_12] : memref<1x16x256xbf16, #tpu.memory_space<vmem>>, vector<1x6x256xbf16>
    %19 = vector.shape_cast %18 : vector<1x6x256xbf16> to vector<6x256xbf16>
    %20 = arith.extf %19 : vector<6x256xbf16> to vector<6x256xf32>
    %c2_13 = arith.constant 2 : index
    %c0_14 = arith.constant 0 : index
    %c0_15 = arith.constant 0 : index
    %21 = vector.load %arg3[%c2_13, %c0_14, %c0_15] : memref<9x1x256xf32, #tpu.memory_space<vmem>>, vector<1x1x256xf32>
    %22 = vector.shape_cast %21 : vector<1x1x256xf32> to vector<1x256xf32>
    %23 = vector.broadcast %22 : vector<1x256xf32> to vector<6x256xf32>
    %24 = arith.mulf %20, %23 : vector<6x256xf32>
    %25 = arith.addf %17, %24 : vector<6x256xf32>
    %c0_16 = arith.constant 0 : index
    %c4 = arith.constant 4 : index
    %c0_17 = arith.constant 0 : index
    %26 = vector.load %arg2[%c0_16, %c4, %c0_17] : memref<1x16x256xbf16, #tpu.memory_space<vmem>>, vector<1x6x256xbf16>
    %27 = vector.shape_cast %26 : vector<1x6x256xbf16> to vector<6x256xbf16>
    %28 = arith.extf %27 : vector<6x256xbf16> to vector<6x256xf32>
    %c3 = arith.constant 3 : index
    %c0_18 = arith.constant 0 : index
    %c0_19 = arith.constant 0 : index
    %29 = vector.load %arg3[%c3, %c0_18, %c0_19] : memref<9x1x256xf32, #tpu.memory_space<vmem>>, vector<1x1x256xf32>
    %30 = vector.shape_cast %29 : vector<1x1x256xf32> to vector<1x256xf32>
    %31 = vector.broadcast %30 : vector<1x256xf32> to vector<6x256xf32>
    %32 = arith.mulf %28, %31 : vector<6x256xf32>
    %33 = arith.addf %25, %32 : vector<6x256xf32>
    %c0_20 = arith.constant 0 : index
    %c5 = arith.constant 5 : index
    %c0_21 = arith.constant 0 : index
    %34 = vector.load %arg2[%c0_20, %c5, %c0_21] : memref<1x16x256xbf16, #tpu.memory_space<vmem>>, vector<1x6x256xbf16>
    %35 = vector.shape_cast %34 : vector<1x6x256xbf16> to vector<6x256xbf16>
    %36 = arith.extf %35 : vector<6x256xbf16> to vector<6x256xf32>
    %c4_22 = arith.constant 4 : index
    %c0_23 = arith.constant 0 : index
    %c0_24 = arith.constant 0 : index
    %37 = vector.load %arg3[%c4_22, %c0_23, %c0_24] : memref<9x1x256xf32, #tpu.memory_space<vmem>>, vector<1x1x256xf32>
    %38 = vector.shape_cast %37 : vector<1x1x256xf32> to vector<1x256xf32>
    %39 = vector.broadcast %38 : vector<1x256xf32> to vector<6x256xf32>
    %40 = arith.mulf %36, %39 : vector<6x256xf32>
    %41 = arith.addf %33, %40 : vector<6x256xf32>
    %c0_25 = arith.constant 0 : index
    %c6 = arith.constant 6 : index
    %c0_26 = arith.constant 0 : index
    %42 = vector.load %arg2[%c0_25, %c6, %c0_26] : memref<1x16x256xbf16, #tpu.memory_space<vmem>>, vector<1x6x256xbf16>
    %43 = vector.shape_cast %42 : vector<1x6x256xbf16> to vector<6x256xbf16>
    %44 = arith.extf %43 : vector<6x256xbf16> to vector<6x256xf32>
    %c5_27 = arith.constant 5 : index
    %c0_28 = arith.constant 0 : index
    %c0_29 = arith.constant 0 : index
    %45 = vector.load %arg3[%c5_27, %c0_28, %c0_29] : memref<9x1x256xf32, #tpu.memory_space<vmem>>, vector<1x1x256xf32>
    %46 = vector.shape_cast %45 : vector<1x1x256xf32> to vector<1x256xf32>
    %47 = vector.broadcast %46 : vector<1x256xf32> to vector<6x256xf32>
    %48 = arith.mulf %44, %47 : vector<6x256xf32>
    %49 = arith.addf %41, %48 : vector<6x256xf32>
    %c0_30 = arith.constant 0 : index
    %c8 = arith.constant 8 : index
    %c0_31 = arith.constant 0 : index
    %50 = vector.load %arg2[%c0_30, %c8, %c0_31] : memref<1x16x256xbf16, #tpu.memory_space<vmem>>, vector<1x6x256xbf16>
    %51 = vector.shape_cast %50 : vector<1x6x256xbf16> to vector<6x256xbf16>
    %52 = arith.extf %51 : vector<6x256xbf16> to vector<6x256xf32>
    %c6_32 = arith.constant 6 : index
    %c0_33 = arith.constant 0 : index
    %c0_34 = arith.constant 0 : index
    %53 = vector.load %arg3[%c6_32, %c0_33, %c0_34] : memref<9x1x256xf32, #tpu.memory_space<vmem>>, vector<1x1x256xf32>
    %54 = vector.shape_cast %53 : vector<1x1x256xf32> to vector<1x256xf32>
    %55 = vector.broadcast %54 : vector<1x256xf32> to vector<6x256xf32>
    %56 = arith.mulf %52, %55 : vector<6x256xf32>
    %57 = arith.addf %49, %56 : vector<6x256xf32>
    %c0_35 = arith.constant 0 : index
    %c9 = arith.constant 9 : index
    %c0_36 = arith.constant 0 : index
    %58 = vector.load %arg2[%c0_35, %c9, %c0_36] : memref<1x16x256xbf16, #tpu.memory_space<vmem>>, vector<1x6x256xbf16>
    %59 = vector.shape_cast %58 : vector<1x6x256xbf16> to vector<6x256xbf16>
    %60 = arith.extf %59 : vector<6x256xbf16> to vector<6x256xf32>
    %c7 = arith.constant 7 : index
    %c0_37 = arith.constant 0 : index
    %c0_38 = arith.constant 0 : index
    %61 = vector.load %arg3[%c7, %c0_37, %c0_38] : memref<9x1x256xf32, #tpu.memory_space<vmem>>, vector<1x1x256xf32>
    %62 = vector.shape_cast %61 : vector<1x1x256xf32> to vector<1x256xf32>
    %63 = vector.broadcast %62 : vector<1x256xf32> to vector<6x256xf32>
    %64 = arith.mulf %60, %63 : vector<6x256xf32>
    %65 = arith.addf %57, %64 : vector<6x256xf32>
    %c0_39 = arith.constant 0 : index
    %c10 = arith.constant 10 : index
    %c0_40 = arith.constant 0 : index
    %66 = vector.load %arg2[%c0_39, %c10, %c0_40] : memref<1x16x256xbf16, #tpu.memory_space<vmem>>, vector<1x6x256xbf16>
    %67 = vector.shape_cast %66 : vector<1x6x256xbf16> to vector<6x256xbf16>
    %68 = arith.extf %67 : vector<6x256xbf16> to vector<6x256xf32>
    %c8_41 = arith.constant 8 : index
    %c0_42 = arith.constant 0 : index
    %c0_43 = arith.constant 0 : index
    %69 = vector.load %arg3[%c8_41, %c0_42, %c0_43] : memref<9x1x256xf32, #tpu.memory_space<vmem>>, vector<1x1x256xf32>
    %70 = vector.shape_cast %69 : vector<1x1x256xf32> to vector<1x256xf32>
    %71 = vector.broadcast %70 : vector<1x256xf32> to vector<6x256xf32>
    %72 = arith.mulf %68, %71 : vector<6x256xf32>
    %73 = arith.addf %65, %72 : vector<6x256xf32>
    %c0_44 = arith.constant 0 : index
    %c0_45 = arith.constant 0 : index
    %74 = vector.load %arg4[%c0_44, %c0_45] : memref<1x256xf32, #tpu.memory_space<vmem>>, vector<1x256xf32>
    %75 = vector.broadcast %74 : vector<1x256xf32> to vector<6x256xf32>
    %76 = arith.mulf %73, %75 : vector<6x256xf32>
    %c0_46 = arith.constant 0 : index
    %c0_47 = arith.constant 0 : index
    %77 = vector.load %arg5[%c0_46, %c0_47] : memref<1x256xf32, #tpu.memory_space<vmem>>, vector<1x256xf32>
    %78 = vector.broadcast %77 : vector<1x256xf32> to vector<6x256xf32>
    %79 = arith.addf %76, %78 : vector<6x256xf32>
    %cst = arith.constant 0.000000e+00 : f32
    %80 = vector.broadcast %cst : f32 to vector<6x256xf32>
    %81 = arith.maximumf %79, %80 : vector<6x256xf32>
    %c0_48 = arith.constant 0 : index
    %c0_49 = arith.constant 0 : index
    %82 = vector.load %arg10[%c0_48, %c0_49] : memref<6x256xf32, #tpu.memory_space<vmem>>, vector<6x256xf32>
    %83 = arith.truncf %81 : vector<6x256xf32> to vector<6x256xbf16>
    %c0_50 = arith.constant 0 : index
    %c0_51 = arith.constant 0 : index
    %84 = vector.load %arg6[%c0_50, %c0_51] : memref<256x256xbf16, #tpu.memory_space<vmem>>, vector<256x256xbf16>
    %cst_52 = arith.constant dense<0.000000e+00> : vector<6x256xf32>
    %85 = tpu.matmul %83, %84, %cst_52 {dimension_numbers = #tpu.dot_dimension_numbers<[1], [0], [0], [1], [0, 0, 1, 1], [], []>} : vector<6x256xbf16>, vector<256x256xbf16>, vector<6x256xf32> -> vector<6x256xf32>
    %86 = arith.addf %82, %85 : vector<6x256xf32>
    %c0_53 = arith.constant 0 : index
    %c0_54 = arith.constant 0 : index
    %87 = vector.load %arg10[%c0_53, %c0_54] : memref<6x256xf32, #tpu.memory_space<vmem>>, vector<6x256xf32>
    tpu.vector_store %arg10[%c0_53, %c0_54], %86 {strides = array<i32>} : memref<6x256xf32, #tpu.memory_space<vmem>>, vector<6x256xf32>,
    %c1_i32 = arith.constant 1 : i32
    %88 = arith.cmpi eq, %arg1, %c1_i32 : i32
    %89 = arith.extui %88 : i1 to i32
    %c0_i32_55 = arith.constant 0 : i32
    %90 = arith.cmpi ne, %89, %c0_i32_55 : i32
    scf.if %90 {
      %c0_56 = arith.constant 0 : index
      %c0_57 = arith.constant 0 : index
      %91 = vector.load %arg10[%c0_56, %c0_57] : memref<6x256xf32, #tpu.memory_space<vmem>>, vector<6x256xf32>
      %c0_58 = arith.constant 0 : index
      %c0_59 = arith.constant 0 : index
      %92 = vector.load %arg7[%c0_58, %c0_59] : memref<1x256xf32, #tpu.memory_space<vmem>>, vector<1x256xf32>
      %93 = vector.broadcast %92 : vector<1x256xf32> to vector<6x256xf32>
      %94 = arith.mulf %91, %93 : vector<6x256xf32>
      %c0_60 = arith.constant 0 : index
      %c0_61 = arith.constant 0 : index
      %95 = vector.load %arg8[%c0_60, %c0_61] : memref<1x256xf32, #tpu.memory_space<vmem>>, vector<1x256xf32>
      %96 = vector.broadcast %95 : vector<1x256xf32> to vector<6x256xf32>
      %97 = arith.addf %94, %96 : vector<6x256xf32>
      %cst_62 = arith.constant 0.000000e+00 : f32
      %98 = vector.broadcast %cst_62 : f32 to vector<6x256xf32>
      %99 = arith.maximumf %97, %98 : vector<6x256xf32>
      %100 = arith.truncf %99 : vector<6x256xf32> to vector<6x256xbf16>
      %c0_63 = arith.constant 0 : index
      %c0_64 = arith.constant 0 : index
      %c0_65 = arith.constant 0 : index
      %101 = vector.load %arg9[%c0_63, %c0_64, %c0_65] : memref<1x6x256xbf16, #tpu.memory_space<vmem>>, vector<1x6x256xbf16>
      %102 = vector.shape_cast %101 : vector<1x6x256xbf16> to vector<6x256xbf16>
      %103 = vector.shape_cast %100 : vector<6x256xbf16> to vector<1x6x256xbf16>
      tpu.vector_store %arg9[%c0_63, %c0_64, %c0_65], %103 {strides = array<i32>} : memref<1x6x256xbf16, #tpu.memory_space<vmem>>, vector<1x6x256xbf16>,
    } else {
    }
    return
  }
  func.func @transform_0(%arg0: i32, %arg1: i32) -> (i32, i32, i32) {
    %c0_i32 = arith.constant 0 : i32
    %c0_i32_0 = arith.constant 0 : i32
    return %arg0, %c0_i32, %arg1 : i32, i32, i32
  }
  func.func @transform_1(%arg0: i32, %arg1: i32) -> (i32, i32, i32) {
    %c0_i32 = arith.constant 0 : i32
    %c0_i32_0 = arith.constant 0 : i32
    %c0_i32_1 = arith.constant 0 : i32
    return %c0_i32, %c0_i32_0, %arg1 : i32, i32, i32
  }
  func.func @transform_2(%arg0: i32, %arg1: i32) -> (i32, i32) {
    %c0_i32 = arith.constant 0 : i32
    %c0_i32_0 = arith.constant 0 : i32
    return %c0_i32, %arg1 : i32, i32
  }
  func.func @transform_3(%arg0: i32, %arg1: i32) -> (i32, i32) {
    %c0_i32 = arith.constant 0 : i32
    %c0_i32_0 = arith.constant 0 : i32
    return %c0_i32, %arg1 : i32, i32
  }
  func.func @transform_4(%arg0: i32, %arg1: i32) -> (i32, i32) {
    %c0_i32 = arith.constant 0 : i32
    %c0_i32_0 = arith.constant 0 : i32
    return %arg1, %c0_i32 : i32, i32
  }
  func.func @transform_5(%arg0: i32, %arg1: i32) -> (i32, i32) {
    %c0_i32 = arith.constant 0 : i32
    %c0_i32_0 = arith.constant 0 : i32
    %c0_i32_1 = arith.constant 0 : i32
    return %c0_i32, %c0_i32_0 : i32, i32
  }
  func.func @transform_6(%arg0: i32, %arg1: i32) -> (i32, i32) {
    %c0_i32 = arith.constant 0 : i32
    %c0_i32_0 = arith.constant 0 : i32
    %c0_i32_1 = arith.constant 0 : i32
    return %c0_i32, %c0_i32_0 : i32, i32
  }
  func.func @transform_7(%arg0: i32, %arg1: i32) -> (i32, i32, i32) {
    %c0_i32 = arith.constant 0 : i32
    %c0_i32_0 = arith.constant 0 : i32
    %c0_i32_1 = arith.constant 0 : i32
    return %arg0, %c0_i32, %c0_i32_0 : i32, i32, i32
  }
}

module attributes {stable_mosaic.version = 11 : i64} {
  func.func @_conv_dw_kernel(%arg0: i32, %arg1: i32, %arg2: memref<1x16x256xbf16, #tpu.memory_space<vmem>>, %arg3: memref<9x1x256xf32, #tpu.memory_space<vmem>>, %arg4: memref<1x256xf32, #tpu.memory_space<vmem>>, %arg5: memref<1x256xf32, #tpu.memory_space<vmem>>, %arg6: memref<256x256xbf16, #tpu.memory_space<vmem>>, %arg7: memref<1x256xf32, #tpu.memory_space<vmem>>, %arg8: memref<1x256xf32, #tpu.memory_space<vmem>>, %arg9: memref<1x6x256xbf16, #tpu.memory_space<vmem>>, %arg10: memref<6x256xf32, #tpu.memory_space<vmem>>) attributes {dimension_semantics = [#tpu.dimension_semantics<parallel>, #tpu.dimension_semantics<arbitrary>], iteration_bounds = array<i64: 2, 1>, scalar_prefetch = 0 : i64, scratch_operands = 1 : i64, tpu.core_type = #tpu.core_type<tc>, window_params = [{transform_indices = @transform_0, window_bounds = array<i64: 1, 16, 256>}, {transform_indices = @transform_1, window_bounds = array<i64: 9, 1, 256>}, {transform_indices = @transform_2, window_bounds = array<i64: 1, 256>}, {transform_indices = @transform_3, window_bounds = array<i64: 1, 256>}, {transform_indices = @transform_4, window_bounds = array<i64: 256, 256>}, {pipeline_mode = #tpu.pipeline_mode<synchronous>, transform_indices = @transform_5, window_bounds = array<i64: 1, 256>}, {pipeline_mode = #tpu.pipeline_mode<synchronous>, transform_indices = @transform_6, window_bounds = array<i64: 1, 256>}, {transform_indices = @transform_7, window_bounds = array<i64: 1, 6, 256>}]} {
    %c0_i32 = arith.constant 0 : i32
    %0 = arith.cmpi eq, %arg1, %c0_i32 : i32
    %1 = arith.extui %0 : i1 to i32
    %c0_i32_0 = arith.constant 0 : i32
    %2 = arith.cmpi ne, %1, %c0_i32_0 : i32
    scf.if %2 {
      %cst_57 = arith.constant 0.000000e+00 : f32
      %91 = vector.broadcast %cst_57 : f32 to vector<6x256xf32>
      %c0_58 = arith.constant 0 : index
      %c0_59 = arith.constant 0 : index
      %92 = vector.load %arg10[%c0_58, %c0_59] : memref<6x256xf32, #tpu.memory_space<vmem>>, vector<6x256xf32>
      tpu.vector_store %arg10[%c0_58, %c0_59], %91 {strides = array<i32>} : memref<6x256xf32, #tpu.memory_space<vmem>>, vector<6x256xf32>,
    } else {
    }
    %c0 = arith.constant 0 : index
    %c0_1 = arith.constant 0 : index
    %c0_2 = arith.constant 0 : index
    %3 = vector.load %arg2[%c0, %c0_1, %c0_2] : memref<1x16x256xbf16, #tpu.memory_space<vmem>>, vector<1x6x256xbf16>
    %4 = vector.shape_cast %3 : vector<1x6x256xbf16> to vector<6x256xbf16>
    %5 = arith.extf %4 : vector<6x256xbf16> to vector<6x256xf32>
    %c0_3 = arith.constant 0 : index
    %c0_4 = arith.constant 0 : index
    %c0_5 = arith.constant 0 : index
    %6 = vector.load %arg3[%c0_3, %c0_4, %c0_5] : memref<9x1x256xf32, #tpu.memory_space<vmem>>, vector<1x1x256xf32>
    %7 = vector.shape_cast %6 : vector<1x1x256xf32> to vector<1x256xf32>
    %8 = vector.broadcast %7 : vector<1x256xf32> to vector<6x256xf32>
    %9 = arith.mulf %5, %8 : vector<6x256xf32>
    %c0_6 = arith.constant 0 : index
    %c1 = arith.constant 1 : index
    %c0_7 = arith.constant 0 : index
    %10 = vector.load %arg2[%c0_6, %c1, %c0_7] : memref<1x16x256xbf16, #tpu.memory_space<vmem>>, vector<1x6x256xbf16>
    %11 = vector.shape_cast %10 : vector<1x6x256xbf16> to vector<6x256xbf16>
    %12 = arith.extf %11 : vector<6x256xbf16> to vector<6x256xf32>
    %c1_8 = arith.constant 1 : index
    %c0_9 = arith.constant 0 : index
    %c0_10 = arith.constant 0 : index
    %13 = vector.load %arg3[%c1_8, %c0_9, %c0_10] : memref<9x1x256xf32, #tpu.memory_space<vmem>>, vector<1x1x256xf32>
    %14 = vector.shape_cast %13 : vector<1x1x256xf32> to vector<1x256xf32>
    %15 = vector.broadcast %14 : vector<1x256xf32> to vector<6x256xf32>
    %16 = arith.mulf %12, %15 : vector<6x256xf32>
    %17 = arith.addf %9, %16 : vector<6x256xf32>
    %c0_11 = arith.constant 0 : index
    %c2 = arith.constant 2 : index
    %c0_12 = arith.constant 0 : index
    %18 = vector.load %arg2[%c0_11, %c2, %c0_12] : memref<1x16x256xbf16, #tpu.memory_space<vmem>>, vector<1x6x256xbf16>
    %19 = vector.shape_cast %18 : vector<1x6x256xbf16> to vector<6x256xbf16>
    %20 = arith.extf %19 : vector<6x256xbf16> to vector<6x256xf32>
    %c2_13 = arith.constant 2 : index
    %c0_14 = arith.constant 0 : index
    %c0_15 = arith.constant 0 : index
    %21 = vector.load %arg3[%c2_13, %c0_14, %c0_15] : memref<9x1x256xf32, #tpu.memory_space<vmem>>, vector<1x1x256xf32>
    %22 = vector.shape_cast %21 : vector<1x1x256xf32> to vector<1x256xf32>
    %23 = vector.broadcast %22 : vector<1x256xf32> to vector<6x256xf32>
    %24 = arith.mulf %20, %23 : vector<6x256xf32>
    %25 = arith.addf %17, %24 : vector<6x256xf32>
    %c0_16 = arith.constant 0 : index
    %c4 = arith.constant 4 : index
    %c0_17 = arith.constant 0 : index
    %26 = vector.load %arg2[%c0_16, %c4, %c0_17] : memref<1x16x256xbf16, #tpu.memory_space<vmem>>, vector<1x6x256xbf16>
    %27 = vector.shape_cast %26 : vector<1x6x256xbf16> to vector<6x256xbf16>
    %28 = arith.extf %27 : vector<6x256xbf16> to vector<6x256xf32>
    %c3 = arith.constant 3 : index
    %c0_18 = arith.constant 0 : index
    %c0_19 = arith.constant 0 : index
    %29 = vector.load %arg3[%c3, %c0_18, %c0_19] : memref<9x1x256xf32, #tpu.memory_space<vmem>>, vector<1x1x256xf32>
    %30 = vector.shape_cast %29 : vector<1x1x256xf32> to vector<1x256xf32>
    %31 = vector.broadcast %30 : vector<1x256xf32> to vector<6x256xf32>
    %32 = arith.mulf %28, %31 : vector<6x256xf32>
    %33 = arith.addf %25, %32 : vector<6x256xf32>
    %c0_20 = arith.constant 0 : index
    %c5 = arith.constant 5 : index
    %c0_21 = arith.constant 0 : index
    %34 = vector.load %arg2[%c0_20, %c5, %c0_21] : memref<1x16x256xbf16, #tpu.memory_space<vmem>>, vector<1x6x256xbf16>
    %35 = vector.shape_cast %34 : vector<1x6x256xbf16> to vector<6x256xbf16>
    %36 = arith.extf %35 : vector<6x256xbf16> to vector<6x256xf32>
    %c4_22 = arith.constant 4 : index
    %c0_23 = arith.constant 0 : index
    %c0_24 = arith.constant 0 : index
    %37 = vector.load %arg3[%c4_22, %c0_23, %c0_24] : memref<9x1x256xf32, #tpu.memory_space<vmem>>, vector<1x1x256xf32>
    %38 = vector.shape_cast %37 : vector<1x1x256xf32> to vector<1x256xf32>
    %39 = vector.broadcast %38 : vector<1x256xf32> to vector<6x256xf32>
    %40 = arith.mulf %36, %39 : vector<6x256xf32>
    %41 = arith.addf %33, %40 : vector<6x256xf32>
    %c0_25 = arith.constant 0 : index
    %c6 = arith.constant 6 : index
    %c0_26 = arith.constant 0 : index
    %42 = vector.load %arg2[%c0_25, %c6, %c0_26] : memref<1x16x256xbf16, #tpu.memory_space<vmem>>, vector<1x6x256xbf16>
    %43 = vector.shape_cast %42 : vector<1x6x256xbf16> to vector<6x256xbf16>
    %44 = arith.extf %43 : vector<6x256xbf16> to vector<6x256xf32>
    %c5_27 = arith.constant 5 : index
    %c0_28 = arith.constant 0 : index
    %c0_29 = arith.constant 0 : index
    %45 = vector.load %arg3[%c5_27, %c0_28, %c0_29] : memref<9x1x256xf32, #tpu.memory_space<vmem>>, vector<1x1x256xf32>
    %46 = vector.shape_cast %45 : vector<1x1x256xf32> to vector<1x256xf32>
    %47 = vector.broadcast %46 : vector<1x256xf32> to vector<6x256xf32>
    %48 = arith.mulf %44, %47 : vector<6x256xf32>
    %49 = arith.addf %41, %48 : vector<6x256xf32>
    %c0_30 = arith.constant 0 : index
    %c8 = arith.constant 8 : index
    %c0_31 = arith.constant 0 : index
    %50 = vector.load %arg2[%c0_30, %c8, %c0_31] : memref<1x16x256xbf16, #tpu.memory_space<vmem>>, vector<1x6x256xbf16>
    %51 = vector.shape_cast %50 : vector<1x6x256xbf16> to vector<6x256xbf16>
    %52 = arith.extf %51 : vector<6x256xbf16> to vector<6x256xf32>
    %c6_32 = arith.constant 6 : index
    %c0_33 = arith.constant 0 : index
    %c0_34 = arith.constant 0 : index
    %53 = vector.load %arg3[%c6_32, %c0_33, %c0_34] : memref<9x1x256xf32, #tpu.memory_space<vmem>>, vector<1x1x256xf32>
    %54 = vector.shape_cast %53 : vector<1x1x256xf32> to vector<1x256xf32>
    %55 = vector.broadcast %54 : vector<1x256xf32> to vector<6x256xf32>
    %56 = arith.mulf %52, %55 : vector<6x256xf32>
    %57 = arith.addf %49, %56 : vector<6x256xf32>
    %c0_35 = arith.constant 0 : index
    %c9 = arith.constant 9 : index
    %c0_36 = arith.constant 0 : index
    %58 = vector.load %arg2[%c0_35, %c9, %c0_36] : memref<1x16x256xbf16, #tpu.memory_space<vmem>>, vector<1x6x256xbf16>
    %59 = vector.shape_cast %58 : vector<1x6x256xbf16> to vector<6x256xbf16>
    %60 = arith.extf %59 : vector<6x256xbf16> to vector<6x256xf32>
    %c7 = arith.constant 7 : index
    %c0_37 = arith.constant 0 : index
    %c0_38 = arith.constant 0 : index
    %61 = vector.load %arg3[%c7, %c0_37, %c0_38] : memref<9x1x256xf32, #tpu.memory_space<vmem>>, vector<1x1x256xf32>
    %62 = vector.shape_cast %61 : vector<1x1x256xf32> to vector<1x256xf32>
    %63 = vector.broadcast %62 : vector<1x256xf32> to vector<6x256xf32>
    %64 = arith.mulf %60, %63 : vector<6x256xf32>
    %65 = arith.addf %57, %64 : vector<6x256xf32>
    %c0_39 = arith.constant 0 : index
    %c10 = arith.constant 10 : index
    %c0_40 = arith.constant 0 : index
    %66 = vector.load %arg2[%c0_39, %c10, %c0_40] : memref<1x16x256xbf16, #tpu.memory_space<vmem>>, vector<1x6x256xbf16>
    %67 = vector.shape_cast %66 : vector<1x6x256xbf16> to vector<6x256xbf16>
    %68 = arith.extf %67 : vector<6x256xbf16> to vector<6x256xf32>
    %c8_41 = arith.constant 8 : index
    %c0_42 = arith.constant 0 : index
    %c0_43 = arith.constant 0 : index
    %69 = vector.load %arg3[%c8_41, %c0_42, %c0_43] : memref<9x1x256xf32, #tpu.memory_space<vmem>>, vector<1x1x256xf32>
    %70 = vector.shape_cast %69 : vector<1x1x256xf32> to vector<1x256xf32>
    %71 = vector.broadcast %70 : vector<1x256xf32> to vector<6x256xf32>
    %72 = arith.mulf %68, %71 : vector<6x256xf32>
    %73 = arith.addf %65, %72 : vector<6x256xf32>
    %c0_44 = arith.constant 0 : index
    %c0_45 = arith.constant 0 : index
    %74 = vector.load %arg4[%c0_44, %c0_45] : memref<1x256xf32, #tpu.memory_space<vmem>>, vector<1x256xf32>
    %75 = vector.broadcast %74 : vector<1x256xf32> to vector<6x256xf32>
    %76 = arith.mulf %73, %75 : vector<6x256xf32>
    %c0_46 = arith.constant 0 : index
    %c0_47 = arith.constant 0 : index
    %77 = vector.load %arg5[%c0_46, %c0_47] : memref<1x256xf32, #tpu.memory_space<vmem>>, vector<1x256xf32>
    %78 = vector.broadcast %77 : vector<1x256xf32> to vector<6x256xf32>
    %79 = arith.addf %76, %78 : vector<6x256xf32>
    %cst = arith.constant 0.000000e+00 : f32
    %80 = vector.broadcast %cst : f32 to vector<6x256xf32>
    %81 = arith.maximumf %79, %80 : vector<6x256xf32>
    %c0_48 = arith.constant 0 : index
    %c0_49 = arith.constant 0 : index
    %82 = vector.load %arg10[%c0_48, %c0_49] : memref<6x256xf32, #tpu.memory_space<vmem>>, vector<6x256xf32>
    %83 = arith.truncf %81 : vector<6x256xf32> to vector<6x256xbf16>
    %c0_50 = arith.constant 0 : index
    %c0_51 = arith.constant 0 : index
    %84 = vector.load %arg6[%c0_50, %c0_51] : memref<256x256xbf16, #tpu.memory_space<vmem>>, vector<256x256xbf16>
    %cst_52 = arith.constant dense<0.000000e+00> : vector<6x256xf32>
    %85 = tpu.matmul %83, %84, %cst_52 {dimension_numbers = #tpu.dot_dimension_numbers<[1], [0], [0], [1], [0, 0, 1, 1], [], []>} : vector<6x256xbf16>, vector<256x256xbf16>, vector<6x256xf32> -> vector<6x256xf32>
    %86 = arith.addf %82, %85 : vector<6x256xf32>
    %c0_53 = arith.constant 0 : index
    %c0_54 = arith.constant 0 : index
    %87 = vector.load %arg10[%c0_53, %c0_54] : memref<6x256xf32, #tpu.memory_space<vmem>>, vector<6x256xf32>
    tpu.vector_store %arg10[%c0_53, %c0_54], %86 {strides = array<i32>} : memref<6x256xf32, #tpu.memory_space<vmem>>, vector<6x256xf32>,
    %c0_i32_55 = arith.constant 0 : i32
    %88 = arith.cmpi eq, %arg1, %c0_i32_55 : i32
    %89 = arith.extui %88 : i1 to i32
    %c0_i32_56 = arith.constant 0 : i32
    %90 = arith.cmpi ne, %89, %c0_i32_56 : i32
    scf.if %90 {
      %c0_57 = arith.constant 0 : index
      %c0_58 = arith.constant 0 : index
      %91 = vector.load %arg10[%c0_57, %c0_58] : memref<6x256xf32, #tpu.memory_space<vmem>>, vector<6x256xf32>
      %c0_59 = arith.constant 0 : index
      %c0_60 = arith.constant 0 : index
      %92 = vector.load %arg7[%c0_59, %c0_60] : memref<1x256xf32, #tpu.memory_space<vmem>>, vector<1x256xf32>
      %93 = vector.broadcast %92 : vector<1x256xf32> to vector<6x256xf32>
      %94 = arith.mulf %91, %93 : vector<6x256xf32>
      %c0_61 = arith.constant 0 : index
      %c0_62 = arith.constant 0 : index
      %95 = vector.load %arg8[%c0_61, %c0_62] : memref<1x256xf32, #tpu.memory_space<vmem>>, vector<1x256xf32>
      %96 = vector.broadcast %95 : vector<1x256xf32> to vector<6x256xf32>
      %97 = arith.addf %94, %96 : vector<6x256xf32>
      %cst_63 = arith.constant 0.000000e+00 : f32
      %98 = vector.broadcast %cst_63 : f32 to vector<6x256xf32>
      %99 = arith.maximumf %97, %98 : vector<6x256xf32>
      %100 = arith.truncf %99 : vector<6x256xf32> to vector<6x256xbf16>
      %c0_64 = arith.constant 0 : index
      %c0_65 = arith.constant 0 : index
      %c0_66 = arith.constant 0 : index
      %101 = vector.load %arg9[%c0_64, %c0_65, %c0_66] : memref<1x6x256xbf16, #tpu.memory_space<vmem>>, vector<1x6x256xbf16>
      %102 = vector.shape_cast %101 : vector<1x6x256xbf16> to vector<6x256xbf16>
      %103 = vector.shape_cast %100 : vector<6x256xbf16> to vector<1x6x256xbf16>
      tpu.vector_store %arg9[%c0_64, %c0_65, %c0_66], %103 {strides = array<i32>} : memref<1x6x256xbf16, #tpu.memory_space<vmem>>, vector<1x6x256xbf16>,
    } else {
    }
    return
  }
  func.func @transform_0(%arg0: i32, %arg1: i32) -> (i32, i32, i32) {
    %c0_i32 = arith.constant 0 : i32
    %c0_i32_0 = arith.constant 0 : i32
    return %arg0, %c0_i32, %arg1 : i32, i32, i32
  }
  func.func @transform_1(%arg0: i32, %arg1: i32) -> (i32, i32, i32) {
    %c0_i32 = arith.constant 0 : i32
    %c0_i32_0 = arith.constant 0 : i32
    %c0_i32_1 = arith.constant 0 : i32
    return %c0_i32, %c0_i32_0, %arg1 : i32, i32, i32
  }
  func.func @transform_2(%arg0: i32, %arg1: i32) -> (i32, i32) {
    %c0_i32 = arith.constant 0 : i32
    %c0_i32_0 = arith.constant 0 : i32
    return %c0_i32, %arg1 : i32, i32
  }
  func.func @transform_3(%arg0: i32, %arg1: i32) -> (i32, i32) {
    %c0_i32 = arith.constant 0 : i32
    %c0_i32_0 = arith.constant 0 : i32
    return %c0_i32, %arg1 : i32, i32
  }
  func.func @transform_4(%arg0: i32, %arg1: i32) -> (i32, i32) {
    %c0_i32 = arith.constant 0 : i32
    %c0_i32_0 = arith.constant 0 : i32
    return %arg1, %c0_i32 : i32, i32
  }
  func.func @transform_5(%arg0: i32, %arg1: i32) -> (i32, i32) {
    %c0_i32 = arith.constant 0 : i32
    %c0_i32_0 = arith.constant 0 : i32
    %c0_i32_1 = arith.constant 0 : i32
    return %c0_i32, %c0_i32_0 : i32, i32
  }
  func.func @transform_6(%arg0: i32, %arg1: i32) -> (i32, i32) {
    %c0_i32 = arith.constant 0 : i32
    %c0_i32_0 = arith.constant 0 : i32
    %c0_i32_1 = arith.constant 0 : i32
    return %c0_i32, %c0_i32_0 : i32, i32
  }
  func.func @transform_7(%arg0: i32, %arg1: i32) -> (i32, i32, i32) {
    %c0_i32 = arith.constant 0 : i32
    %c0_i32_0 = arith.constant 0 : i32
    %c0_i32_1 = arith.constant 0 : i32
    return %arg0, %c0_i32, %c0_i32_0 : i32, i32, i32
  }
}

module attributes {stable_mosaic.version = 11 : i64} {
  func.func @_dense_conv_kernel(%arg0: i32, %arg1: i32, %arg2: memref<1x16x256xbf16, #tpu.memory_space<vmem>>, %arg3: memref<9x256x128xbf16, #tpu.memory_space<vmem>>, %arg4: memref<1x128xf32, #tpu.memory_space<vmem>>, %arg5: memref<1x6x128xbf16, #tpu.memory_space<vmem>>, %arg6: memref<6x128xf32, #tpu.memory_space<vmem>>) attributes {dimension_semantics = [#tpu.dimension_semantics<parallel>, #tpu.dimension_semantics<arbitrary>], iteration_bounds = array<i64: 2, 1>, scalar_prefetch = 0 : i64, scratch_operands = 1 : i64, tpu.core_type = #tpu.core_type<tc>, window_params = [{transform_indices = @transform_0, window_bounds = array<i64: 1, 16, 256>}, {transform_indices = @transform_1, window_bounds = array<i64: 9, 256, 128>}, {pipeline_mode = #tpu.pipeline_mode<synchronous>, transform_indices = @transform_2, window_bounds = array<i64: 1, 128>}, {transform_indices = @transform_3, window_bounds = array<i64: 1, 6, 128>}]} {
    %c0_i32 = arith.constant 0 : i32
    %0 = arith.cmpi eq, %arg1, %c0_i32 : i32
    %1 = arith.extui %0 : i1 to i32
    %c0_i32_0 = arith.constant 0 : i32
    %2 = arith.cmpi ne, %1, %c0_i32_0 : i32
    scf.if %2 {
      %cst_58 = arith.constant 0.000000e+00 : f32
      %62 = vector.broadcast %cst_58 : f32 to vector<6x128xf32>
      %c0_59 = arith.constant 0 : index
      %c0_60 = arith.constant 0 : index
      %63 = vector.load %arg6[%c0_59, %c0_60] : memref<6x128xf32, #tpu.memory_space<vmem>>, vector<6x128xf32>
      tpu.vector_store %arg6[%c0_59, %c0_60], %62 {strides = array<i32>} : memref<6x128xf32, #tpu.memory_space<vmem>>, vector<6x128xf32>,
    } else {
    }
    %c0 = arith.constant 0 : index
    %c0_1 = arith.constant 0 : index
    %c0_2 = arith.constant 0 : index
    %3 = vector.load %arg2[%c0, %c0_1, %c0_2] : memref<1x16x256xbf16, #tpu.memory_space<vmem>>, vector<1x6x256xbf16>
    %4 = vector.shape_cast %3 : vector<1x6x256xbf16> to vector<6x256xbf16>
    %c0_3 = arith.constant 0 : index
    %c0_4 = arith.constant 0 : index
    %c0_5 = arith.constant 0 : index
    %5 = vector.load %arg3[%c0_3, %c0_4, %c0_5] : memref<9x256x128xbf16, #tpu.memory_space<vmem>>, vector<1x256x128xbf16>
    %6 = vector.shape_cast %5 : vector<1x256x128xbf16> to vector<256x128xbf16>
    %cst = arith.constant dense<0.000000e+00> : vector<6x128xf32>
    %7 = tpu.matmul %4, %6, %cst {dimension_numbers = #tpu.dot_dimension_numbers<[1], [0], [0], [1], [0, 0, 1, 1], [], []>} : vector<6x256xbf16>, vector<256x128xbf16>, vector<6x128xf32> -> vector<6x128xf32>
    %c0_6 = arith.constant 0 : index
    %c1 = arith.constant 1 : index
    %c0_7 = arith.constant 0 : index
    %8 = vector.load %arg2[%c0_6, %c1, %c0_7] : memref<1x16x256xbf16, #tpu.memory_space<vmem>>, vector<1x6x256xbf16>
    %9 = vector.shape_cast %8 : vector<1x6x256xbf16> to vector<6x256xbf16>
    %c1_8 = arith.constant 1 : index
    %c0_9 = arith.constant 0 : index
    %c0_10 = arith.constant 0 : index
    %10 = vector.load %arg3[%c1_8, %c0_9, %c0_10] : memref<9x256x128xbf16, #tpu.memory_space<vmem>>, vector<1x256x128xbf16>
    %11 = vector.shape_cast %10 : vector<1x256x128xbf16> to vector<256x128xbf16>
    %cst_11 = arith.constant dense<0.000000e+00> : vector<6x128xf32>
    %12 = tpu.matmul %9, %11, %cst_11 {dimension_numbers = #tpu.dot_dimension_numbers<[1], [0], [0], [1], [0, 0, 1, 1], [], []>} : vector<6x256xbf16>, vector<256x128xbf16>, vector<6x128xf32> -> vector<6x128xf32>
    %13 = arith.addf %7, %12 : vector<6x128xf32>
    %c0_12 = arith.constant 0 : index
    %c2 = arith.constant 2 : index
    %c0_13 = arith.constant 0 : index
    %14 = vector.load %arg2[%c0_12, %c2, %c0_13] : memref<1x16x256xbf16, #tpu.memory_space<vmem>>, vector<1x6x256xbf16>
    %15 = vector.shape_cast %14 : vector<1x6x256xbf16> to vector<6x256xbf16>
    %c2_14 = arith.constant 2 : index
    %c0_15 = arith.constant 0 : index
    %c0_16 = arith.constant 0 : index
    %16 = vector.load %arg3[%c2_14, %c0_15, %c0_16] : memref<9x256x128xbf16, #tpu.memory_space<vmem>>, vector<1x256x128xbf16>
    %17 = vector.shape_cast %16 : vector<1x256x128xbf16> to vector<256x128xbf16>
    %cst_17 = arith.constant dense<0.000000e+00> : vector<6x128xf32>
    %18 = tpu.matmul %15, %17, %cst_17 {dimension_numbers = #tpu.dot_dimension_numbers<[1], [0], [0], [1], [0, 0, 1, 1], [], []>} : vector<6x256xbf16>, vector<256x128xbf16>, vector<6x128xf32> -> vector<6x128xf32>
    %19 = arith.addf %13, %18 : vector<6x128xf32>
    %c0_18 = arith.constant 0 : index
    %c4 = arith.constant 4 : index
    %c0_19 = arith.constant 0 : index
    %20 = vector.load %arg2[%c0_18, %c4, %c0_19] : memref<1x16x256xbf16, #tpu.memory_space<vmem>>, vector<1x6x256xbf16>
    %21 = vector.shape_cast %20 : vector<1x6x256xbf16> to vector<6x256xbf16>
    %c3 = arith.constant 3 : index
    %c0_20 = arith.constant 0 : index
    %c0_21 = arith.constant 0 : index
    %22 = vector.load %arg3[%c3, %c0_20, %c0_21] : memref<9x256x128xbf16, #tpu.memory_space<vmem>>, vector<1x256x128xbf16>
    %23 = vector.shape_cast %22 : vector<1x256x128xbf16> to vector<256x128xbf16>
    %cst_22 = arith.constant dense<0.000000e+00> : vector<6x128xf32>
    %24 = tpu.matmul %21, %23, %cst_22 {dimension_numbers = #tpu.dot_dimension_numbers<[1], [0], [0], [1], [0, 0, 1, 1], [], []>} : vector<6x256xbf16>, vector<256x128xbf16>, vector<6x128xf32> -> vector<6x128xf32>
    %25 = arith.addf %19, %24 : vector<6x128xf32>
    %c0_23 = arith.constant 0 : index
    %c5 = arith.constant 5 : index
    %c0_24 = arith.constant 0 : index
    %26 = vector.load %arg2[%c0_23, %c5, %c0_24] : memref<1x16x256xbf16, #tpu.memory_space<vmem>>, vector<1x6x256xbf16>
    %27 = vector.shape_cast %26 : vector<1x6x256xbf16> to vector<6x256xbf16>
    %c4_25 = arith.constant 4 : index
    %c0_26 = arith.constant 0 : index
    %c0_27 = arith.constant 0 : index
    %28 = vector.load %arg3[%c4_25, %c0_26, %c0_27] : memref<9x256x128xbf16, #tpu.memory_space<vmem>>, vector<1x256x128xbf16>
    %29 = vector.shape_cast %28 : vector<1x256x128xbf16> to vector<256x128xbf16>
    %cst_28 = arith.constant dense<0.000000e+00> : vector<6x128xf32>
    %30 = tpu.matmul %27, %29, %cst_28 {dimension_numbers = #tpu.dot_dimension_numbers<[1], [0], [0], [1], [0, 0, 1, 1], [], []>} : vector<6x256xbf16>, vector<256x128xbf16>, vector<6x128xf32> -> vector<6x128xf32>
    %31 = arith.addf %25, %30 : vector<6x128xf32>
    %c0_29 = arith.constant 0 : index
    %c6 = arith.constant 6 : index
    %c0_30 = arith.constant 0 : index
    %32 = vector.load %arg2[%c0_29, %c6, %c0_30] : memref<1x16x256xbf16, #tpu.memory_space<vmem>>, vector<1x6x256xbf16>
    %33 = vector.shape_cast %32 : vector<1x6x256xbf16> to vector<6x256xbf16>
    %c5_31 = arith.constant 5 : index
    %c0_32 = arith.constant 0 : index
    %c0_33 = arith.constant 0 : index
    %34 = vector.load %arg3[%c5_31, %c0_32, %c0_33] : memref<9x256x128xbf16, #tpu.memory_space<vmem>>, vector<1x256x128xbf16>
    %35 = vector.shape_cast %34 : vector<1x256x128xbf16> to vector<256x128xbf16>
    %cst_34 = arith.constant dense<0.000000e+00> : vector<6x128xf32>
    %36 = tpu.matmul %33, %35, %cst_34 {dimension_numbers = #tpu.dot_dimension_numbers<[1], [0], [0], [1], [0, 0, 1, 1], [], []>} : vector<6x256xbf16>, vector<256x128xbf16>, vector<6x128xf32> -> vector<6x128xf32>
    %37 = arith.addf %31, %36 : vector<6x128xf32>
    %c0_35 = arith.constant 0 : index
    %c8 = arith.constant 8 : index
    %c0_36 = arith.constant 0 : index
    %38 = vector.load %arg2[%c0_35, %c8, %c0_36] : memref<1x16x256xbf16, #tpu.memory_space<vmem>>, vector<1x6x256xbf16>
    %39 = vector.shape_cast %38 : vector<1x6x256xbf16> to vector<6x256xbf16>
    %c6_37 = arith.constant 6 : index
    %c0_38 = arith.constant 0 : index
    %c0_39 = arith.constant 0 : index
    %40 = vector.load %arg3[%c6_37, %c0_38, %c0_39] : memref<9x256x128xbf16, #tpu.memory_space<vmem>>, vector<1x256x128xbf16>
    %41 = vector.shape_cast %40 : vector<1x256x128xbf16> to vector<256x128xbf16>
    %cst_40 = arith.constant dense<0.000000e+00> : vector<6x128xf32>
    %42 = tpu.matmul %39, %41, %cst_40 {dimension_numbers = #tpu.dot_dimension_numbers<[1], [0], [0], [1], [0, 0, 1, 1], [], []>} : vector<6x256xbf16>, vector<256x128xbf16>, vector<6x128xf32> -> vector<6x128xf32>
    %43 = arith.addf %37, %42 : vector<6x128xf32>
    %c0_41 = arith.constant 0 : index
    %c9 = arith.constant 9 : index
    %c0_42 = arith.constant 0 : index
    %44 = vector.load %arg2[%c0_41, %c9, %c0_42] : memref<1x16x256xbf16, #tpu.memory_space<vmem>>, vector<1x6x256xbf16>
    %45 = vector.shape_cast %44 : vector<1x6x256xbf16> to vector<6x256xbf16>
    %c7 = arith.constant 7 : index
    %c0_43 = arith.constant 0 : index
    %c0_44 = arith.constant 0 : index
    %46 = vector.load %arg3[%c7, %c0_43, %c0_44] : memref<9x256x128xbf16, #tpu.memory_space<vmem>>, vector<1x256x128xbf16>
    %47 = vector.shape_cast %46 : vector<1x256x128xbf16> to vector<256x128xbf16>
    %cst_45 = arith.constant dense<0.000000e+00> : vector<6x128xf32>
    %48 = tpu.matmul %45, %47, %cst_45 {dimension_numbers = #tpu.dot_dimension_numbers<[1], [0], [0], [1], [0, 0, 1, 1], [], []>} : vector<6x256xbf16>, vector<256x128xbf16>, vector<6x128xf32> -> vector<6x128xf32>
    %49 = arith.addf %43, %48 : vector<6x128xf32>
    %c0_46 = arith.constant 0 : index
    %c10 = arith.constant 10 : index
    %c0_47 = arith.constant 0 : index
    %50 = vector.load %arg2[%c0_46, %c10, %c0_47] : memref<1x16x256xbf16, #tpu.memory_space<vmem>>, vector<1x6x256xbf16>
    %51 = vector.shape_cast %50 : vector<1x6x256xbf16> to vector<6x256xbf16>
    %c8_48 = arith.constant 8 : index
    %c0_49 = arith.constant 0 : index
    %c0_50 = arith.constant 0 : index
    %52 = vector.load %arg3[%c8_48, %c0_49, %c0_50] : memref<9x256x128xbf16, #tpu.memory_space<vmem>>, vector<1x256x128xbf16>
    %53 = vector.shape_cast %52 : vector<1x256x128xbf16> to vector<256x128xbf16>
    %cst_51 = arith.constant dense<0.000000e+00> : vector<6x128xf32>
    %54 = tpu.matmul %51, %53, %cst_51 {dimension_numbers = #tpu.dot_dimension_numbers<[1], [0], [0], [1], [0, 0, 1, 1], [], []>} : vector<6x256xbf16>, vector<256x128xbf16>, vector<6x128xf32> -> vector<6x128xf32>
    %55 = arith.addf %49, %54 : vector<6x128xf32>
    %c0_52 = arith.constant 0 : index
    %c0_53 = arith.constant 0 : index
    %56 = vector.load %arg6[%c0_52, %c0_53] : memref<6x128xf32, #tpu.memory_space<vmem>>, vector<6x128xf32>
    %57 = arith.addf %56, %55 : vector<6x128xf32>
    %c0_54 = arith.constant 0 : index
    %c0_55 = arith.constant 0 : index
    %58 = vector.load %arg6[%c0_54, %c0_55] : memref<6x128xf32, #tpu.memory_space<vmem>>, vector<6x128xf32>
    tpu.vector_store %arg6[%c0_54, %c0_55], %57 {strides = array<i32>} : memref<6x128xf32, #tpu.memory_space<vmem>>, vector<6x128xf32>,
    %c0_i32_56 = arith.constant 0 : i32
    %59 = arith.cmpi eq, %arg1, %c0_i32_56 : i32
    %60 = arith.extui %59 : i1 to i32
    %c0_i32_57 = arith.constant 0 : i32
    %61 = arith.cmpi ne, %60, %c0_i32_57 : i32
    scf.if %61 {
      %c0_58 = arith.constant 0 : index
      %c0_59 = arith.constant 0 : index
      %62 = vector.load %arg6[%c0_58, %c0_59] : memref<6x128xf32, #tpu.memory_space<vmem>>, vector<6x128xf32>
      %c0_60 = arith.constant 0 : index
      %c0_61 = arith.constant 0 : index
      %63 = vector.load %arg4[%c0_60, %c0_61] : memref<1x128xf32, #tpu.memory_space<vmem>>, vector<1x128xf32>
      %64 = vector.broadcast %63 : vector<1x128xf32> to vector<6x128xf32>
      %65 = arith.addf %62, %64 : vector<6x128xf32>
      %66 = arith.truncf %65 : vector<6x128xf32> to vector<6x128xbf16>
      %c0_62 = arith.constant 0 : index
      %c0_63 = arith.constant 0 : index
      %c0_64 = arith.constant 0 : index
      %67 = vector.load %arg5[%c0_62, %c0_63, %c0_64] : memref<1x6x128xbf16, #tpu.memory_space<vmem>>, vector<1x6x128xbf16>
      %68 = vector.shape_cast %67 : vector<1x6x128xbf16> to vector<6x128xbf16>
      %69 = vector.shape_cast %66 : vector<6x128xbf16> to vector<1x6x128xbf16>
      tpu.vector_store %arg5[%c0_62, %c0_63, %c0_64], %69 {strides = array<i32>} : memref<1x6x128xbf16, #tpu.memory_space<vmem>>, vector<1x6x128xbf16>,
    } else {
    }
    return
  }
  func.func @transform_0(%arg0: i32, %arg1: i32) -> (i32, i32, i32) {
    %c0_i32 = arith.constant 0 : i32
    %c0_i32_0 = arith.constant 0 : i32
    return %arg0, %c0_i32, %arg1 : i32, i32, i32
  }
  func.func @transform_1(%arg0: i32, %arg1: i32) -> (i32, i32, i32) {
    %c0_i32 = arith.constant 0 : i32
    %c0_i32_0 = arith.constant 0 : i32
    %c0_i32_1 = arith.constant 0 : i32
    return %c0_i32, %arg1, %c0_i32_0 : i32, i32, i32
  }
  func.func @transform_2(%arg0: i32, %arg1: i32) -> (i32, i32) {
    %c0_i32 = arith.constant 0 : i32
    %c0_i32_0 = arith.constant 0 : i32
    %c0_i32_1 = arith.constant 0 : i32
    return %c0_i32, %c0_i32_0 : i32, i32
  }
  func.func @transform_3(%arg0: i32, %arg1: i32) -> (i32, i32, i32) {
    %c0_i32 = arith.constant 0 : i32
    %c0_i32_0 = arith.constant 0 : i32
    %c0_i32_1 = arith.constant 0 : i32
    return %arg0, %c0_i32, %c0_i32_0 : i32, i32, i32
  }
}

module attributes {stable_mosaic.version = 11 : i64} {
  func.func @_conv_dw_kernel(%arg0: i32, %arg1: i32, %arg2: memref<1x4x128xbf16, #tpu.memory_space<vmem>>, %arg3: memref<1x1x128xf32, #tpu.memory_space<vmem>>, %arg4: memref<1x128xf32, #tpu.memory_space<vmem>>, %arg5: memref<1x128xf32, #tpu.memory_space<vmem>>, %arg6: memref<128x512xbf16, #tpu.memory_space<vmem>>, %arg7: memref<1x512xf32, #tpu.memory_space<vmem>>, %arg8: memref<1x512xf32, #tpu.memory_space<vmem>>, %arg9: memref<512x8xbf16, #tpu.memory_space<vmem>>, %arg10: memref<1x8xf32, #tpu.memory_space<vmem>>, %arg11: memref<1x4x8xf32, #tpu.memory_space<vmem>>, %arg12: memref<4x512xf32, #tpu.memory_space<vmem>>) attributes {dimension_semantics = [#tpu.dimension_semantics<parallel>, #tpu.dimension_semantics<arbitrary>], iteration_bounds = array<i64: 2, 1>, scalar_prefetch = 0 : i64, scratch_operands = 1 : i64, tpu.core_type = #tpu.core_type<tc>, window_params = [{transform_indices = @transform_0, window_bounds = array<i64: 1, 4, 128>}, {transform_indices = @transform_1, window_bounds = array<i64: 1, 1, 128>}, {transform_indices = @transform_2, window_bounds = array<i64: 1, 128>}, {transform_indices = @transform_3, window_bounds = array<i64: 1, 128>}, {transform_indices = @transform_4, window_bounds = array<i64: 128, 512>}, {pipeline_mode = #tpu.pipeline_mode<synchronous>, transform_indices = @transform_5, window_bounds = array<i64: 1, 512>}, {pipeline_mode = #tpu.pipeline_mode<synchronous>, transform_indices = @transform_6, window_bounds = array<i64: 1, 512>}, {pipeline_mode = #tpu.pipeline_mode<synchronous>, transform_indices = @transform_7, window_bounds = array<i64: 512, 8>}, {pipeline_mode = #tpu.pipeline_mode<synchronous>, transform_indices = @transform_8, window_bounds = array<i64: 1, 8>}, {transform_indices = @transform_9, window_bounds = array<i64: 1, 4, 8>}]} {
    %c0_i32 = arith.constant 0 : i32
    %0 = arith.cmpi eq, %arg1, %c0_i32 : i32
    %1 = arith.extui %0 : i1 to i32
    %c0_i32_0 = arith.constant 0 : i32
    %2 = arith.cmpi ne, %1, %c0_i32_0 : i32
    scf.if %2 {
      %cst_19 = arith.constant 0.000000e+00 : f32
      %27 = vector.broadcast %cst_19 : f32 to vector<4x512xf32>
      %c0_20 = arith.constant 0 : index
      %c0_21 = arith.constant 0 : index
      %28 = vector.load %arg12[%c0_20, %c0_21] : memref<4x512xf32, #tpu.memory_space<vmem>>, vector<4x512xf32>
      tpu.vector_store %arg12[%c0_20, %c0_21], %27 {strides = array<i32>} : memref<4x512xf32, #tpu.memory_space<vmem>>, vector<4x512xf32>,
    } else {
    }
    %c0 = arith.constant 0 : index
    %c0_1 = arith.constant 0 : index
    %c0_2 = arith.constant 0 : index
    %3 = vector.load %arg2[%c0, %c0_1, %c0_2] : memref<1x4x128xbf16, #tpu.memory_space<vmem>>, vector<1x4x128xbf16>
    %4 = vector.shape_cast %3 : vector<1x4x128xbf16> to vector<4x128xbf16>
    %5 = arith.extf %4 : vector<4x128xbf16> to vector<4x128xf32>
    %c0_3 = arith.constant 0 : index
    %c0_4 = arith.constant 0 : index
    %c0_5 = arith.constant 0 : index
    %6 = vector.load %arg3[%c0_3, %c0_4, %c0_5] : memref<1x1x128xf32, #tpu.memory_space<vmem>>, vector<1x1x128xf32>
    %7 = vector.shape_cast %6 : vector<1x1x128xf32> to vector<1x128xf32>
    %8 = vector.broadcast %7 : vector<1x128xf32> to vector<4x128xf32>
    %9 = arith.mulf %5, %8 : vector<4x128xf32>
    %c0_6 = arith.constant 0 : index
    %c0_7 = arith.constant 0 : index
    %10 = vector.load %arg4[%c0_6, %c0_7] : memref<1x128xf32, #tpu.memory_space<vmem>>, vector<1x128xf32>
    %11 = vector.broadcast %10 : vector<1x128xf32> to vector<4x128xf32>
    %12 = arith.mulf %9, %11 : vector<4x128xf32>
    %c0_8 = arith.constant 0 : index
    %c0_9 = arith.constant 0 : index
    %13 = vector.load %arg5[%c0_8, %c0_9] : memref<1x128xf32, #tpu.memory_space<vmem>>, vector<1x128xf32>
    %14 = vector.broadcast %13 : vector<1x128xf32> to vector<4x128xf32>
    %15 = arith.addf %12, %14 : vector<4x128xf32>
    %cst = arith.constant 0.000000e+00 : f32
    %16 = vector.broadcast %cst : f32 to vector<4x128xf32>
    %17 = arith.maximumf %15, %16 : vector<4x128xf32>
    %c0_10 = arith.constant 0 : index
    %c0_11 = arith.constant 0 : index
    %18 = vector.load %arg12[%c0_10, %c0_11] : memref<4x512xf32, #tpu.memory_space<vmem>>, vector<4x512xf32>
    %19 = arith.truncf %17 : vector<4x128xf32> to vector<4x128xbf16>
    %c0_12 = arith.constant 0 : index
    %c0_13 = arith.constant 0 : index
    %20 = vector.load %arg6[%c0_12, %c0_13] : memref<128x512xbf16, #tpu.memory_space<vmem>>, vector<128x512xbf16>
    %cst_14 = arith.constant dense<0.000000e+00> : vector<4x512xf32>
    %21 = tpu.matmul %19, %20, %cst_14 {dimension_numbers = #tpu.dot_dimension_numbers<[1], [0], [0], [1], [0, 0, 1, 1], [], []>} : vector<4x128xbf16>, vector<128x512xbf16>, vector<4x512xf32> -> vector<4x512xf32>
    %22 = arith.addf %18, %21 : vector<4x512xf32>
    %c0_15 = arith.constant 0 : index
    %c0_16 = arith.constant 0 : index
    %23 = vector.load %arg12[%c0_15, %c0_16] : memref<4x512xf32, #tpu.memory_space<vmem>>, vector<4x512xf32>
    tpu.vector_store %arg12[%c0_15, %c0_16], %22 {strides = array<i32>} : memref<4x512xf32, #tpu.memory_space<vmem>>, vector<4x512xf32>,
    %c0_i32_17 = arith.constant 0 : i32
    %24 = arith.cmpi eq, %arg1, %c0_i32_17 : i32
    %25 = arith.extui %24 : i1 to i32
    %c0_i32_18 = arith.constant 0 : i32
    %26 = arith.cmpi ne, %25, %c0_i32_18 : i32
    scf.if %26 {
      %c0_19 = arith.constant 0 : index
      %c0_20 = arith.constant 0 : index
      %27 = vector.load %arg12[%c0_19, %c0_20] : memref<4x512xf32, #tpu.memory_space<vmem>>, vector<4x512xf32>
      %c0_21 = arith.constant 0 : index
      %c0_22 = arith.constant 0 : index
      %28 = vector.load %arg7[%c0_21, %c0_22] : memref<1x512xf32, #tpu.memory_space<vmem>>, vector<1x512xf32>
      %29 = vector.broadcast %28 : vector<1x512xf32> to vector<4x512xf32>
      %30 = arith.mulf %27, %29 : vector<4x512xf32>
      %c0_23 = arith.constant 0 : index
      %c0_24 = arith.constant 0 : index
      %31 = vector.load %arg8[%c0_23, %c0_24] : memref<1x512xf32, #tpu.memory_space<vmem>>, vector<1x512xf32>
      %32 = vector.broadcast %31 : vector<1x512xf32> to vector<4x512xf32>
      %33 = arith.addf %30, %32 : vector<4x512xf32>
      %cst_25 = arith.constant 0.000000e+00 : f32
      %34 = vector.broadcast %cst_25 : f32 to vector<4x512xf32>
      %35 = arith.maximumf %33, %34 : vector<4x512xf32>
      %36 = arith.truncf %35 : vector<4x512xf32> to vector<4x512xbf16>
      %c0_26 = arith.constant 0 : index
      %c0_27 = arith.constant 0 : index
      %37 = vector.load %arg9[%c0_26, %c0_27] : memref<512x8xbf16, #tpu.memory_space<vmem>>, vector<512x8xbf16>
      %cst_28 = arith.constant dense<0.000000e+00> : vector<4x8xf32>
      %38 = tpu.matmul %36, %37, %cst_28 {dimension_numbers = #tpu.dot_dimension_numbers<[1], [0], [0], [1], [0, 0, 1, 1], [], []>} : vector<4x512xbf16>, vector<512x8xbf16>, vector<4x8xf32> -> vector<4x8xf32>
      %c0_29 = arith.constant 0 : index
      %c0_30 = arith.constant 0 : index
      %39 = vector.load %arg10[%c0_29, %c0_30] : memref<1x8xf32, #tpu.memory_space<vmem>>, vector<1x8xf32>
      %40 = vector.broadcast %39 : vector<1x8xf32> to vector<4x8xf32>
      %41 = arith.addf %38, %40 : vector<4x8xf32>
      %c0_31 = arith.constant 0 : index
      %c0_32 = arith.constant 0 : index
      %c0_33 = arith.constant 0 : index
      %42 = vector.load %arg11[%c0_31, %c0_32, %c0_33] : memref<1x4x8xf32, #tpu.memory_space<vmem>>, vector<1x4x8xf32>
      %43 = vector.shape_cast %42 : vector<1x4x8xf32> to vector<4x8xf32>
      %44 = vector.shape_cast %41 : vector<4x8xf32> to vector<1x4x8xf32>
      tpu.vector_store %arg11[%c0_31, %c0_32, %c0_33], %44 {strides = array<i32>} : memref<1x4x8xf32, #tpu.memory_space<vmem>>, vector<1x4x8xf32>,
    } else {
    }
    return
  }
  func.func @transform_0(%arg0: i32, %arg1: i32) -> (i32, i32, i32) {
    %c0_i32 = arith.constant 0 : i32
    %c0_i32_0 = arith.constant 0 : i32
    return %arg0, %c0_i32, %arg1 : i32, i32, i32
  }
  func.func @transform_1(%arg0: i32, %arg1: i32) -> (i32, i32, i32) {
    %c0_i32 = arith.constant 0 : i32
    %c0_i32_0 = arith.constant 0 : i32
    %c0_i32_1 = arith.constant 0 : i32
    return %c0_i32, %c0_i32_0, %arg1 : i32, i32, i32
  }
  func.func @transform_2(%arg0: i32, %arg1: i32) -> (i32, i32) {
    %c0_i32 = arith.constant 0 : i32
    %c0_i32_0 = arith.constant 0 : i32
    return %c0_i32, %arg1 : i32, i32
  }
  func.func @transform_3(%arg0: i32, %arg1: i32) -> (i32, i32) {
    %c0_i32 = arith.constant 0 : i32
    %c0_i32_0 = arith.constant 0 : i32
    return %c0_i32, %arg1 : i32, i32
  }
  func.func @transform_4(%arg0: i32, %arg1: i32) -> (i32, i32) {
    %c0_i32 = arith.constant 0 : i32
    %c0_i32_0 = arith.constant 0 : i32
    return %arg1, %c0_i32 : i32, i32
  }
  func.func @transform_5(%arg0: i32, %arg1: i32) -> (i32, i32) {
    %c0_i32 = arith.constant 0 : i32
    %c0_i32_0 = arith.constant 0 : i32
    %c0_i32_1 = arith.constant 0 : i32
    return %c0_i32, %c0_i32_0 : i32, i32
  }
  func.func @transform_6(%arg0: i32, %arg1: i32) -> (i32, i32) {
    %c0_i32 = arith.constant 0 : i32
    %c0_i32_0 = arith.constant 0 : i32
    %c0_i32_1 = arith.constant 0 : i32
    return %c0_i32, %c0_i32_0 : i32, i32
  }
  func.func @transform_7(%arg0: i32, %arg1: i32) -> (i32, i32) {
    %c0_i32 = arith.constant 0 : i32
    %c0_i32_0 = arith.constant 0 : i32
    %c0_i32_1 = arith.constant 0 : i32
    return %c0_i32, %c0_i32_0 : i32, i32
  }
  func.func @transform_8(%arg0: i32, %arg1: i32) -> (i32, i32) {
    %c0_i32 = arith.constant 0 : i32
    %c0_i32_0 = arith.constant 0 : i32
    %c0_i32_1 = arith.constant 0 : i32
    return %c0_i32, %c0_i32_0 : i32, i32
  }
  func.func @transform_9(%arg0: i32, %arg1: i32) -> (i32, i32, i32) {
    %c0_i32 = arith.constant 0 : i32
    %c0_i32_0 = arith.constant 0 : i32
    %c0_i32_1 = arith.constant 0 : i32
    return %arg0, %c0_i32, %c0_i32_0 : i32, i32, i32
  }
}

module attributes {stable_mosaic.version = 11 : i64} {
  func.func @_conv_dw_kernel(%arg0: i32, %arg1: i32, %arg2: memref<1x64x256xbf16, #tpu.memory_space<vmem>>, %arg3: memref<49x1x256xf32, #tpu.memory_space<vmem>>, %arg4: memref<1x256xf32, #tpu.memory_space<vmem>>, %arg5: memref<1x256xf32, #tpu.memory_space<vmem>>, %arg6: memref<256x128xbf16, #tpu.memory_space<vmem>>, %arg7: memref<1x128xf32, #tpu.memory_space<vmem>>, %arg8: memref<1x128xf32, #tpu.memory_space<vmem>>, %arg9: memref<1x10x128xbf16, #tpu.memory_space<vmem>>, %arg10: memref<10x128xf32, #tpu.memory_space<vmem>>) attributes {dimension_semantics = [#tpu.dimension_semantics<parallel>, #tpu.dimension_semantics<arbitrary>], iteration_bounds = array<i64: 2, 1>, scalar_prefetch = 0 : i64, scratch_operands = 1 : i64, tpu.core_type = #tpu.core_type<tc>, window_params = [{transform_indices = @transform_0, window_bounds = array<i64: 1, 64, 256>}, {transform_indices = @transform_1, window_bounds = array<i64: 49, 1, 256>}, {transform_indices = @transform_2, window_bounds = array<i64: 1, 256>}, {transform_indices = @transform_3, window_bounds = array<i64: 1, 256>}, {transform_indices = @transform_4, window_bounds = array<i64: 256, 128>}, {pipeline_mode = #tpu.pipeline_mode<synchronous>, transform_indices = @transform_5, window_bounds = array<i64: 1, 128>}, {pipeline_mode = #tpu.pipeline_mode<synchronous>, transform_indices = @transform_6, window_bounds = array<i64: 1, 128>}, {transform_indices = @transform_7, window_bounds = array<i64: 1, 10, 128>}]} {
    %c0_i32 = arith.constant 0 : i32
    %0 = arith.cmpi eq, %arg1, %c0_i32 : i32
    %1 = arith.extui %0 : i1 to i32
    %c0_i32_0 = arith.constant 0 : i32
    %2 = arith.cmpi ne, %1, %c0_i32_0 : i32
    scf.if %2 {
      %cst_253 = arith.constant 0.000000e+00 : f32
      %411 = vector.broadcast %cst_253 : f32 to vector<10x128xf32>
      %c0_254 = arith.constant 0 : index
      %c0_255 = arith.constant 0 : index
      %412 = vector.load %arg10[%c0_254, %c0_255] : memref<10x128xf32, #tpu.memory_space<vmem>>, vector<10x128xf32>
      tpu.vector_store %arg10[%c0_254, %c0_255], %411 {strides = array<i32>} : memref<10x128xf32, #tpu.memory_space<vmem>>, vector<10x128xf32>,
    } else {
    }
    %c0 = arith.constant 0 : index
    %c0_1 = arith.constant 0 : index
    %c0_2 = arith.constant 0 : index
    %3 = vector.load %arg2[%c0, %c0_1, %c0_2] : memref<1x64x256xbf16, #tpu.memory_space<vmem>>, vector<1x10x256xbf16>
    %4 = vector.shape_cast %3 : vector<1x10x256xbf16> to vector<10x256xbf16>
    %5 = arith.extf %4 : vector<10x256xbf16> to vector<10x256xf32>
    %c0_3 = arith.constant 0 : index
    %c0_4 = arith.constant 0 : index
    %c0_5 = arith.constant 0 : index
    %6 = vector.load %arg3[%c0_3, %c0_4, %c0_5] : memref<49x1x256xf32, #tpu.memory_space<vmem>>, vector<1x1x256xf32>
    %7 = vector.shape_cast %6 : vector<1x1x256xf32> to vector<1x256xf32>
    %8 = vector.broadcast %7 : vector<1x256xf32> to vector<10x256xf32>
    %9 = arith.mulf %5, %8 : vector<10x256xf32>
    %c0_6 = arith.constant 0 : index
    %c1 = arith.constant 1 : index
    %c0_7 = arith.constant 0 : index
    %10 = vector.load %arg2[%c0_6, %c1, %c0_7] : memref<1x64x256xbf16, #tpu.memory_space<vmem>>, vector<1x10x256xbf16>
    %11 = vector.shape_cast %10 : vector<1x10x256xbf16> to vector<10x256xbf16>
    %12 = arith.extf %11 : vector<10x256xbf16> to vector<10x256xf32>
    %c1_8 = arith.constant 1 : index
    %c0_9 = arith.constant 0 : index
    %c0_10 = arith.constant 0 : index
    %13 = vector.load %arg3[%c1_8, %c0_9, %c0_10] : memref<49x1x256xf32, #tpu.memory_space<vmem>>, vector<1x1x256xf32>
    %14 = vector.shape_cast %13 : vector<1x1x256xf32> to vector<1x256xf32>
    %15 = vector.broadcast %14 : vector<1x256xf32> to vector<10x256xf32>
    %16 = arith.mulf %12, %15 : vector<10x256xf32>
    %17 = arith.addf %9, %16 : vector<10x256xf32>
    %c0_11 = arith.constant 0 : index
    %c2 = arith.constant 2 : index
    %c0_12 = arith.constant 0 : index
    %18 = vector.load %arg2[%c0_11, %c2, %c0_12] : memref<1x64x256xbf16, #tpu.memory_space<vmem>>, vector<1x10x256xbf16>
    %19 = vector.shape_cast %18 : vector<1x10x256xbf16> to vector<10x256xbf16>
    %20 = arith.extf %19 : vector<10x256xbf16> to vector<10x256xf32>
    %c2_13 = arith.constant 2 : index
    %c0_14 = arith.constant 0 : index
    %c0_15 = arith.constant 0 : index
    %21 = vector.load %arg3[%c2_13, %c0_14, %c0_15] : memref<49x1x256xf32, #tpu.memory_space<vmem>>, vector<1x1x256xf32>
    %22 = vector.shape_cast %21 : vector<1x1x256xf32> to vector<1x256xf32>
    %23 = vector.broadcast %22 : vector<1x256xf32> to vector<10x256xf32>
    %24 = arith.mulf %20, %23 : vector<10x256xf32>
    %25 = arith.addf %17, %24 : vector<10x256xf32>
    %c0_16 = arith.constant 0 : index
    %c3 = arith.constant 3 : index
    %c0_17 = arith.constant 0 : index
    %26 = vector.load %arg2[%c0_16, %c3, %c0_17] : memref<1x64x256xbf16, #tpu.memory_space<vmem>>, vector<1x10x256xbf16>
    %27 = vector.shape_cast %26 : vector<1x10x256xbf16> to vector<10x256xbf16>
    %28 = arith.extf %27 : vector<10x256xbf16> to vector<10x256xf32>
    %c3_18 = arith.constant 3 : index
    %c0_19 = arith.constant 0 : index
    %c0_20 = arith.constant 0 : index
    %29 = vector.load %arg3[%c3_18, %c0_19, %c0_20] : memref<49x1x256xf32, #tpu.memory_space<vmem>>, vector<1x1x256xf32>
    %30 = vector.shape_cast %29 : vector<1x1x256xf32> to vector<1x256xf32>
    %31 = vector.broadcast %30 : vector<1x256xf32> to vector<10x256xf32>
    %32 = arith.mulf %28, %31 : vector<10x256xf32>
    %33 = arith.addf %25, %32 : vector<10x256xf32>
    %c0_21 = arith.constant 0 : index
    %c4 = arith.constant 4 : index
    %c0_22 = arith.constant 0 : index
    %34 = vector.load %arg2[%c0_21, %c4, %c0_22] : memref<1x64x256xbf16, #tpu.memory_space<vmem>>, vector<1x10x256xbf16>
    %35 = vector.shape_cast %34 : vector<1x10x256xbf16> to vector<10x256xbf16>
    %36 = arith.extf %35 : vector<10x256xbf16> to vector<10x256xf32>
    %c4_23 = arith.constant 4 : index
    %c0_24 = arith.constant 0 : index
    %c0_25 = arith.constant 0 : index
    %37 = vector.load %arg3[%c4_23, %c0_24, %c0_25] : memref<49x1x256xf32, #tpu.memory_space<vmem>>, vector<1x1x256xf32>
    %38 = vector.shape_cast %37 : vector<1x1x256xf32> to vector<1x256xf32>
    %39 = vector.broadcast %38 : vector<1x256xf32> to vector<10x256xf32>
    %40 = arith.mulf %36, %39 : vector<10x256xf32>
    %41 = arith.addf %33, %40 : vector<10x256xf32>
    %c0_26 = arith.constant 0 : index
    %c5 = arith.constant 5 : index
    %c0_27 = arith.constant 0 : index
    %42 = vector.load %arg2[%c0_26, %c5, %c0_27] : memref<1x64x256xbf16, #tpu.memory_space<vmem>>, vector<1x10x256xbf16>
    %43 = vector.shape_cast %42 : vector<1x10x256xbf16> to vector<10x256xbf16>
    %44 = arith.extf %43 : vector<10x256xbf16> to vector<10x256xf32>
    %c5_28 = arith.constant 5 : index
    %c0_29 = arith.constant 0 : index
    %c0_30 = arith.constant 0 : index
    %45 = vector.load %arg3[%c5_28, %c0_29, %c0_30] : memref<49x1x256xf32, #tpu.memory_space<vmem>>, vector<1x1x256xf32>
    %46 = vector.shape_cast %45 : vector<1x1x256xf32> to vector<1x256xf32>
    %47 = vector.broadcast %46 : vector<1x256xf32> to vector<10x256xf32>
    %48 = arith.mulf %44, %47 : vector<10x256xf32>
    %49 = arith.addf %41, %48 : vector<10x256xf32>
    %c0_31 = arith.constant 0 : index
    %c6 = arith.constant 6 : index
    %c0_32 = arith.constant 0 : index
    %50 = vector.load %arg2[%c0_31, %c6, %c0_32] : memref<1x64x256xbf16, #tpu.memory_space<vmem>>, vector<1x10x256xbf16>
    %51 = vector.shape_cast %50 : vector<1x10x256xbf16> to vector<10x256xbf16>
    %52 = arith.extf %51 : vector<10x256xbf16> to vector<10x256xf32>
    %c6_33 = arith.constant 6 : index
    %c0_34 = arith.constant 0 : index
    %c0_35 = arith.constant 0 : index
    %53 = vector.load %arg3[%c6_33, %c0_34, %c0_35] : memref<49x1x256xf32, #tpu.memory_space<vmem>>, vector<1x1x256xf32>
    %54 = vector.shape_cast %53 : vector<1x1x256xf32> to vector<1x256xf32>
    %55 = vector.broadcast %54 : vector<1x256xf32> to vector<10x256xf32>
    %56 = arith.mulf %52, %55 : vector<10x256xf32>
    %57 = arith.addf %49, %56 : vector<10x256xf32>
    %c0_36 = arith.constant 0 : index
    %c8 = arith.constant 8 : index
    %c0_37 = arith.constant 0 : index
    %58 = vector.load %arg2[%c0_36, %c8, %c0_37] : memref<1x64x256xbf16, #tpu.memory_space<vmem>>, vector<1x10x256xbf16>
    %59 = vector.shape_cast %58 : vector<1x10x256xbf16> to vector<10x256xbf16>
    %60 = arith.extf %59 : vector<10x256xbf16> to vector<10x256xf32>
    %c7 = arith.constant 7 : index
    %c0_38 = arith.constant 0 : index
    %c0_39 = arith.constant 0 : index
    %61 = vector.load %arg3[%c7, %c0_38, %c0_39] : memref<49x1x256xf32, #tpu.memory_space<vmem>>, vector<1x1x256xf32>
    %62 = vector.shape_cast %61 : vector<1x1x256xf32> to vector<1x256xf32>
    %63 = vector.broadcast %62 : vector<1x256xf32> to vector<10x256xf32>
    %64 = arith.mulf %60, %63 : vector<10x256xf32>
    %65 = arith.addf %57, %64 : vector<10x256xf32>
    %c0_40 = arith.constant 0 : index
    %c9 = arith.constant 9 : index
    %c0_41 = arith.constant 0 : index
    %66 = vector.load %arg2[%c0_40, %c9, %c0_41] : memref<1x64x256xbf16, #tpu.memory_space<vmem>>, vector<1x10x256xbf16>
    %67 = vector.shape_cast %66 : vector<1x10x256xbf16> to vector<10x256xbf16>
    %68 = arith.extf %67 : vector<10x256xbf16> to vector<10x256xf32>
    %c8_42 = arith.constant 8 : index
    %c0_43 = arith.constant 0 : index
    %c0_44 = arith.constant 0 : index
    %69 = vector.load %arg3[%c8_42, %c0_43, %c0_44] : memref<49x1x256xf32, #tpu.memory_space<vmem>>, vector<1x1x256xf32>
    %70 = vector.shape_cast %69 : vector<1x1x256xf32> to vector<1x256xf32>
    %71 = vector.broadcast %70 : vector<1x256xf32> to vector<10x256xf32>
    %72 = arith.mulf %68, %71 : vector<10x256xf32>
    %73 = arith.addf %65, %72 : vector<10x256xf32>
    %c0_45 = arith.constant 0 : index
    %c10 = arith.constant 10 : index
    %c0_46 = arith.constant 0 : index
    %74 = vector.load %arg2[%c0_45, %c10, %c0_46] : memref<1x64x256xbf16, #tpu.memory_space<vmem>>, vector<1x10x256xbf16>
    %75 = vector.shape_cast %74 : vector<1x10x256xbf16> to vector<10x256xbf16>
    %76 = arith.extf %75 : vector<10x256xbf16> to vector<10x256xf32>
    %c9_47 = arith.constant 9 : index
    %c0_48 = arith.constant 0 : index
    %c0_49 = arith.constant 0 : index
    %77 = vector.load %arg3[%c9_47, %c0_48, %c0_49] : memref<49x1x256xf32, #tpu.memory_space<vmem>>, vector<1x1x256xf32>
    %78 = vector.shape_cast %77 : vector<1x1x256xf32> to vector<1x256xf32>
    %79 = vector.broadcast %78 : vector<1x256xf32> to vector<10x256xf32>
    %80 = arith.mulf %76, %79 : vector<10x256xf32>
    %81 = arith.addf %73, %80 : vector<10x256xf32>
    %c0_50 = arith.constant 0 : index
    %c11 = arith.constant 11 : index
    %c0_51 = arith.constant 0 : index
    %82 = vector.load %arg2[%c0_50, %c11, %c0_51] : memref<1x64x256xbf16, #tpu.memory_space<vmem>>, vector<1x10x256xbf16>
    %83 = vector.shape_cast %82 : vector<1x10x256xbf16> to vector<10x256xbf16>
    %84 = arith.extf %83 : vector<10x256xbf16> to vector<10x256xf32>
    %c10_52 = arith.constant 10 : index
    %c0_53 = arith.constant 0 : index
    %c0_54 = arith.constant 0 : index
    %85 = vector.load %arg3[%c10_52, %c0_53, %c0_54] : memref<49x1x256xf32, #tpu.memory_space<vmem>>, vector<1x1x256xf32>
    %86 = vector.shape_cast %85 : vector<1x1x256xf32> to vector<1x256xf32>
    %87 = vector.broadcast %86 : vector<1x256xf32> to vector<10x256xf32>
    %88 = arith.mulf %84, %87 : vector<10x256xf32>
    %89 = arith.addf %81, %88 : vector<10x256xf32>
    %c0_55 = arith.constant 0 : index
    %c12 = arith.constant 12 : index
    %c0_56 = arith.constant 0 : index
    %90 = vector.load %arg2[%c0_55, %c12, %c0_56] : memref<1x64x256xbf16, #tpu.memory_space<vmem>>, vector<1x10x256xbf16>
    %91 = vector.shape_cast %90 : vector<1x10x256xbf16> to vector<10x256xbf16>
    %92 = arith.extf %91 : vector<10x256xbf16> to vector<10x256xf32>
    %c11_57 = arith.constant 11 : index
    %c0_58 = arith.constant 0 : index
    %c0_59 = arith.constant 0 : index
    %93 = vector.load %arg3[%c11_57, %c0_58, %c0_59] : memref<49x1x256xf32, #tpu.memory_space<vmem>>, vector<1x1x256xf32>
    %94 = vector.shape_cast %93 : vector<1x1x256xf32> to vector<1x256xf32>
    %95 = vector.broadcast %94 : vector<1x256xf32> to vector<10x256xf32>
    %96 = arith.mulf %92, %95 : vector<10x256xf32>
    %97 = arith.addf %89, %96 : vector<10x256xf32>
    %c0_60 = arith.constant 0 : index
    %c13 = arith.constant 13 : index
    %c0_61 = arith.constant 0 : index
    %98 = vector.load %arg2[%c0_60, %c13, %c0_61] : memref<1x64x256xbf16, #tpu.memory_space<vmem>>, vector<1x10x256xbf16>
    %99 = vector.shape_cast %98 : vector<1x10x256xbf16> to vector<10x256xbf16>
    %100 = arith.extf %99 : vector<10x256xbf16> to vector<10x256xf32>
    %c12_62 = arith.constant 12 : index
    %c0_63 = arith.constant 0 : index
    %c0_64 = arith.constant 0 : index
    %101 = vector.load %arg3[%c12_62, %c0_63, %c0_64] : memref<49x1x256xf32, #tpu.memory_space<vmem>>, vector<1x1x256xf32>
    %102 = vector.shape_cast %101 : vector<1x1x256xf32> to vector<1x256xf32>
    %103 = vector.broadcast %102 : vector<1x256xf32> to vector<10x256xf32>
    %104 = arith.mulf %100, %103 : vector<10x256xf32>
    %105 = arith.addf %97, %104 : vector<10x256xf32>
    %c0_65 = arith.constant 0 : index
    %c14 = arith.constant 14 : index
    %c0_66 = arith.constant 0 : index
    %106 = vector.load %arg2[%c0_65, %c14, %c0_66] : memref<1x64x256xbf16, #tpu.memory_space<vmem>>, vector<1x10x256xbf16>
    %107 = vector.shape_cast %106 : vector<1x10x256xbf16> to vector<10x256xbf16>
    %108 = arith.extf %107 : vector<10x256xbf16> to vector<10x256xf32>
    %c13_67 = arith.constant 13 : index
    %c0_68 = arith.constant 0 : index
    %c0_69 = arith.constant 0 : index
    %109 = vector.load %arg3[%c13_67, %c0_68, %c0_69] : memref<49x1x256xf32, #tpu.memory_space<vmem>>, vector<1x1x256xf32>
    %110 = vector.shape_cast %109 : vector<1x1x256xf32> to vector<1x256xf32>
    %111 = vector.broadcast %110 : vector<1x256xf32> to vector<10x256xf32>
    %112 = arith.mulf %108, %111 : vector<10x256xf32>
    %113 = arith.addf %105, %112 : vector<10x256xf32>
    %c0_70 = arith.constant 0 : index
    %c16 = arith.constant 16 : index
    %c0_71 = arith.constant 0 : index
    %114 = vector.load %arg2[%c0_70, %c16, %c0_71] : memref<1x64x256xbf16, #tpu.memory_space<vmem>>, vector<1x10x256xbf16>
    %115 = vector.shape_cast %114 : vector<1x10x256xbf16> to vector<10x256xbf16>
    %116 = arith.extf %115 : vector<10x256xbf16> to vector<10x256xf32>
    %c14_72 = arith.constant 14 : index
    %c0_73 = arith.constant 0 : index
    %c0_74 = arith.constant 0 : index
    %117 = vector.load %arg3[%c14_72, %c0_73, %c0_74] : memref<49x1x256xf32, #tpu.memory_space<vmem>>, vector<1x1x256xf32>
    %118 = vector.shape_cast %117 : vector<1x1x256xf32> to vector<1x256xf32>
    %119 = vector.broadcast %118 : vector<1x256xf32> to vector<10x256xf32>
    %120 = arith.mulf %116, %119 : vector<10x256xf32>
    %121 = arith.addf %113, %120 : vector<10x256xf32>
    %c0_75 = arith.constant 0 : index
    %c17 = arith.constant 17 : index
    %c0_76 = arith.constant 0 : index
    %122 = vector.load %arg2[%c0_75, %c17, %c0_76] : memref<1x64x256xbf16, #tpu.memory_space<vmem>>, vector<1x10x256xbf16>
    %123 = vector.shape_cast %122 : vector<1x10x256xbf16> to vector<10x256xbf16>
    %124 = arith.extf %123 : vector<10x256xbf16> to vector<10x256xf32>
    %c15 = arith.constant 15 : index
    %c0_77 = arith.constant 0 : index
    %c0_78 = arith.constant 0 : index
    %125 = vector.load %arg3[%c15, %c0_77, %c0_78] : memref<49x1x256xf32, #tpu.memory_space<vmem>>, vector<1x1x256xf32>
    %126 = vector.shape_cast %125 : vector<1x1x256xf32> to vector<1x256xf32>
    %127 = vector.broadcast %126 : vector<1x256xf32> to vector<10x256xf32>
    %128 = arith.mulf %124, %127 : vector<10x256xf32>
    %129 = arith.addf %121, %128 : vector<10x256xf32>
    %c0_79 = arith.constant 0 : index
    %c18 = arith.constant 18 : index
    %c0_80 = arith.constant 0 : index
    %130 = vector.load %arg2[%c0_79, %c18, %c0_80] : memref<1x64x256xbf16, #tpu.memory_space<vmem>>, vector<1x10x256xbf16>
    %131 = vector.shape_cast %130 : vector<1x10x256xbf16> to vector<10x256xbf16>
    %132 = arith.extf %131 : vector<10x256xbf16> to vector<10x256xf32>
    %c16_81 = arith.constant 16 : index
    %c0_82 = arith.constant 0 : index
    %c0_83 = arith.constant 0 : index
    %133 = vector.load %arg3[%c16_81, %c0_82, %c0_83] : memref<49x1x256xf32, #tpu.memory_space<vmem>>, vector<1x1x256xf32>
    %134 = vector.shape_cast %133 : vector<1x1x256xf32> to vector<1x256xf32>
    %135 = vector.broadcast %134 : vector<1x256xf32> to vector<10x256xf32>
    %136 = arith.mulf %132, %135 : vector<10x256xf32>
    %137 = arith.addf %129, %136 : vector<10x256xf32>
    %c0_84 = arith.constant 0 : index
    %c19 = arith.constant 19 : index
    %c0_85 = arith.constant 0 : index
    %138 = vector.load %arg2[%c0_84, %c19, %c0_85] : memref<1x64x256xbf16, #tpu.memory_space<vmem>>, vector<1x10x256xbf16>
    %139 = vector.shape_cast %138 : vector<1x10x256xbf16> to vector<10x256xbf16>
    %140 = arith.extf %139 : vector<10x256xbf16> to vector<10x256xf32>
    %c17_86 = arith.constant 17 : index
    %c0_87 = arith.constant 0 : index
    %c0_88 = arith.constant 0 : index
    %141 = vector.load %arg3[%c17_86, %c0_87, %c0_88] : memref<49x1x256xf32, #tpu.memory_space<vmem>>, vector<1x1x256xf32>
    %142 = vector.shape_cast %141 : vector<1x1x256xf32> to vector<1x256xf32>
    %143 = vector.broadcast %142 : vector<1x256xf32> to vector<10x256xf32>
    %144 = arith.mulf %140, %143 : vector<10x256xf32>
    %145 = arith.addf %137, %144 : vector<10x256xf32>
    %c0_89 = arith.constant 0 : index
    %c20 = arith.constant 20 : index
    %c0_90 = arith.constant 0 : index
    %146 = vector.load %arg2[%c0_89, %c20, %c0_90] : memref<1x64x256xbf16, #tpu.memory_space<vmem>>, vector<1x10x256xbf16>
    %147 = vector.shape_cast %146 : vector<1x10x256xbf16> to vector<10x256xbf16>
    %148 = arith.extf %147 : vector<10x256xbf16> to vector<10x256xf32>
    %c18_91 = arith.constant 18 : index
    %c0_92 = arith.constant 0 : index
    %c0_93 = arith.constant 0 : index
    %149 = vector.load %arg3[%c18_91, %c0_92, %c0_93] : memref<49x1x256xf32, #tpu.memory_space<vmem>>, vector<1x1x256xf32>
    %150 = vector.shape_cast %149 : vector<1x1x256xf32> to vector<1x256xf32>
    %151 = vector.broadcast %150 : vector<1x256xf32> to vector<10x256xf32>
    %152 = arith.mulf %148, %151 : vector<10x256xf32>
    %153 = arith.addf %145, %152 : vector<10x256xf32>
    %c0_94 = arith.constant 0 : index
    %c21 = arith.constant 21 : index
    %c0_95 = arith.constant 0 : index
    %154 = vector.load %arg2[%c0_94, %c21, %c0_95] : memref<1x64x256xbf16, #tpu.memory_space<vmem>>, vector<1x10x256xbf16>
    %155 = vector.shape_cast %154 : vector<1x10x256xbf16> to vector<10x256xbf16>
    %156 = arith.extf %155 : vector<10x256xbf16> to vector<10x256xf32>
    %c19_96 = arith.constant 19 : index
    %c0_97 = arith.constant 0 : index
    %c0_98 = arith.constant 0 : index
    %157 = vector.load %arg3[%c19_96, %c0_97, %c0_98] : memref<49x1x256xf32, #tpu.memory_space<vmem>>, vector<1x1x256xf32>
    %158 = vector.shape_cast %157 : vector<1x1x256xf32> to vector<1x256xf32>
    %159 = vector.broadcast %158 : vector<1x256xf32> to vector<10x256xf32>
    %160 = arith.mulf %156, %159 : vector<10x256xf32>
    %161 = arith.addf %153, %160 : vector<10x256xf32>
    %c0_99 = arith.constant 0 : index
    %c22 = arith.constant 22 : index
    %c0_100 = arith.constant 0 : index
    %162 = vector.load %arg2[%c0_99, %c22, %c0_100] : memref<1x64x256xbf16, #tpu.memory_space<vmem>>, vector<1x10x256xbf16>
    %163 = vector.shape_cast %162 : vector<1x10x256xbf16> to vector<10x256xbf16>
    %164 = arith.extf %163 : vector<10x256xbf16> to vector<10x256xf32>
    %c20_101 = arith.constant 20 : index
    %c0_102 = arith.constant 0 : index
    %c0_103 = arith.constant 0 : index
    %165 = vector.load %arg3[%c20_101, %c0_102, %c0_103] : memref<49x1x256xf32, #tpu.memory_space<vmem>>, vector<1x1x256xf32>
    %166 = vector.shape_cast %165 : vector<1x1x256xf32> to vector<1x256xf32>
    %167 = vector.broadcast %166 : vector<1x256xf32> to vector<10x256xf32>
    %168 = arith.mulf %164, %167 : vector<10x256xf32>
    %169 = arith.addf %161, %168 : vector<10x256xf32>
    %c0_104 = arith.constant 0 : index
    %c24 = arith.constant 24 : index
    %c0_105 = arith.constant 0 : index
    %170 = vector.load %arg2[%c0_104, %c24, %c0_105] : memref<1x64x256xbf16, #tpu.memory_space<vmem>>, vector<1x10x256xbf16>
    %171 = vector.shape_cast %170 : vector<1x10x256xbf16> to vector<10x256xbf16>
    %172 = arith.extf %171 : vector<10x256xbf16> to vector<10x256xf32>
    %c21_106 = arith.constant 21 : index
    %c0_107 = arith.constant 0 : index
    %c0_108 = arith.constant 0 : index
    %173 = vector.load %arg3[%c21_106, %c0_107, %c0_108] : memref<49x1x256xf32, #tpu.memory_space<vmem>>, vector<1x1x256xf32>
    %174 = vector.shape_cast %173 : vector<1x1x256xf32> to vector<1x256xf32>
    %175 = vector.broadcast %174 : vector<1x256xf32> to vector<10x256xf32>
    %176 = arith.mulf %172, %175 : vector<10x256xf32>
    %177 = arith.addf %169, %176 : vector<10x256xf32>
    %c0_109 = arith.constant 0 : index
    %c25 = arith.constant 25 : index
    %c0_110 = arith.constant 0 : index
    %178 = vector.load %arg2[%c0_109, %c25, %c0_110] : memref<1x64x256xbf16, #tpu.memory_space<vmem>>, vector<1x10x256xbf16>
    %179 = vector.shape_cast %178 : vector<1x10x256xbf16> to vector<10x256xbf16>
    %180 = arith.extf %179 : vector<10x256xbf16> to vector<10x256xf32>
    %c22_111 = arith.constant 22 : index
    %c0_112 = arith.constant 0 : index
    %c0_113 = arith.constant 0 : index
    %181 = vector.load %arg3[%c22_111, %c0_112, %c0_113] : memref<49x1x256xf32, #tpu.memory_space<vmem>>, vector<1x1x256xf32>
    %182 = vector.shape_cast %181 : vector<1x1x256xf32> to vector<1x256xf32>
    %183 = vector.broadcast %182 : vector<1x256xf32> to vector<10x256xf32>
    %184 = arith.mulf %180, %183 : vector<10x256xf32>
    %185 = arith.addf %177, %184 : vector<10x256xf32>
    %c0_114 = arith.constant 0 : index
    %c26 = arith.constant 26 : index
    %c0_115 = arith.constant 0 : index
    %186 = vector.load %arg2[%c0_114, %c26, %c0_115] : memref<1x64x256xbf16, #tpu.memory_space<vmem>>, vector<1x10x256xbf16>
    %187 = vector.shape_cast %186 : vector<1x10x256xbf16> to vector<10x256xbf16>
    %188 = arith.extf %187 : vector<10x256xbf16> to vector<10x256xf32>
    %c23 = arith.constant 23 : index
    %c0_116 = arith.constant 0 : index
    %c0_117 = arith.constant 0 : index
    %189 = vector.load %arg3[%c23, %c0_116, %c0_117] : memref<49x1x256xf32, #tpu.memory_space<vmem>>, vector<1x1x256xf32>
    %190 = vector.shape_cast %189 : vector<1x1x256xf32> to vector<1x256xf32>
    %191 = vector.broadcast %190 : vector<1x256xf32> to vector<10x256xf32>
    %192 = arith.mulf %188, %191 : vector<10x256xf32>
    %193 = arith.addf %185, %192 : vector<10x256xf32>
    %c0_118 = arith.constant 0 : index
    %c27 = arith.constant 27 : index
    %c0_119 = arith.constant 0 : index
    %194 = vector.load %arg2[%c0_118, %c27, %c0_119] : memref<1x64x256xbf16, #tpu.memory_space<vmem>>, vector<1x10x256xbf16>
    %195 = vector.shape_cast %194 : vector<1x10x256xbf16> to vector<10x256xbf16>
    %196 = arith.extf %195 : vector<10x256xbf16> to vector<10x256xf32>
    %c24_120 = arith.constant 24 : index
    %c0_121 = arith.constant 0 : index
    %c0_122 = arith.constant 0 : index
    %197 = vector.load %arg3[%c24_120, %c0_121, %c0_122] : memref<49x1x256xf32, #tpu.memory_space<vmem>>, vector<1x1x256xf32>
    %198 = vector.shape_cast %197 : vector<1x1x256xf32> to vector<1x256xf32>
    %199 = vector.broadcast %198 : vector<1x256xf32> to vector<10x256xf32>
    %200 = arith.mulf %196, %199 : vector<10x256xf32>
    %201 = arith.addf %193, %200 : vector<10x256xf32>
    %c0_123 = arith.constant 0 : index
    %c28 = arith.constant 28 : index
    %c0_124 = arith.constant 0 : index
    %202 = vector.load %arg2[%c0_123, %c28, %c0_124] : memref<1x64x256xbf16, #tpu.memory_space<vmem>>, vector<1x10x256xbf16>
    %203 = vector.shape_cast %202 : vector<1x10x256xbf16> to vector<10x256xbf16>
    %204 = arith.extf %203 : vector<10x256xbf16> to vector<10x256xf32>
    %c25_125 = arith.constant 25 : index
    %c0_126 = arith.constant 0 : index
    %c0_127 = arith.constant 0 : index
    %205 = vector.load %arg3[%c25_125, %c0_126, %c0_127] : memref<49x1x256xf32, #tpu.memory_space<vmem>>, vector<1x1x256xf32>
    %206 = vector.shape_cast %205 : vector<1x1x256xf32> to vector<1x256xf32>
    %207 = vector.broadcast %206 : vector<1x256xf32> to vector<10x256xf32>
    %208 = arith.mulf %204, %207 : vector<10x256xf32>
    %209 = arith.addf %201, %208 : vector<10x256xf32>
    %c0_128 = arith.constant 0 : index
    %c29 = arith.constant 29 : index
    %c0_129 = arith.constant 0 : index
    %210 = vector.load %arg2[%c0_128, %c29, %c0_129] : memref<1x64x256xbf16, #tpu.memory_space<vmem>>, vector<1x10x256xbf16>
    %211 = vector.shape_cast %210 : vector<1x10x256xbf16> to vector<10x256xbf16>
    %212 = arith.extf %211 : vector<10x256xbf16> to vector<10x256xf32>
    %c26_130 = arith.constant 26 : index
    %c0_131 = arith.constant 0 : index
    %c0_132 = arith.constant 0 : index
    %213 = vector.load %arg3[%c26_130, %c0_131, %c0_132] : memref<49x1x256xf32, #tpu.memory_space<vmem>>, vector<1x1x256xf32>
    %214 = vector.shape_cast %213 : vector<1x1x256xf32> to vector<1x256xf32>
    %215 = vector.broadcast %214 : vector<1x256xf32> to vector<10x256xf32>
    %216 = arith.mulf %212, %215 : vector<10x256xf32>
    %217 = arith.addf %209, %216 : vector<10x256xf32>
    %c0_133 = arith.constant 0 : index
    %c30 = arith.constant 30 : index
    %c0_134 = arith.constant 0 : index
    %218 = vector.load %arg2[%c0_133, %c30, %c0_134] : memref<1x64x256xbf16, #tpu.memory_space<vmem>>, vector<1x10x256xbf16>
    %219 = vector.shape_cast %218 : vector<1x10x256xbf16> to vector<10x256xbf16>
    %220 = arith.extf %219 : vector<10x256xbf16> to vector<10x256xf32>
    %c27_135 = arith.constant 27 : index
    %c0_136 = arith.constant 0 : index
    %c0_137 = arith.constant 0 : index
    %221 = vector.load %arg3[%c27_135, %c0_136, %c0_137] : memref<49x1x256xf32, #tpu.memory_space<vmem>>, vector<1x1x256xf32>
    %222 = vector.shape_cast %221 : vector<1x1x256xf32> to vector<1x256xf32>
    %223 = vector.broadcast %222 : vector<1x256xf32> to vector<10x256xf32>
    %224 = arith.mulf %220, %223 : vector<10x256xf32>
    %225 = arith.addf %217, %224 : vector<10x256xf32>
    %c0_138 = arith.constant 0 : index
    %c32 = arith.constant 32 : index
    %c0_139 = arith.constant 0 : index
    %226 = vector.load %arg2[%c0_138, %c32, %c0_139] : memref<1x64x256xbf16, #tpu.memory_space<vmem>>, vector<1x10x256xbf16>
    %227 = vector.shape_cast %226 : vector<1x10x256xbf16> to vector<10x256xbf16>
    %228 = arith.extf %227 : vector<10x256xbf16> to vector<10x256xf32>
    %c28_140 = arith.constant 28 : index
    %c0_141 = arith.constant 0 : index
    %c0_142 = arith.constant 0 : index
    %229 = vector.load %arg3[%c28_140, %c0_141, %c0_142] : memref<49x1x256xf32, #tpu.memory_space<vmem>>, vector<1x1x256xf32>
    %230 = vector.shape_cast %229 : vector<1x1x256xf32> to vector<1x256xf32>
    %231 = vector.broadcast %230 : vector<1x256xf32> to vector<10x256xf32>
    %232 = arith.mulf %228, %231 : vector<10x256xf32>
    %233 = arith.addf %225, %232 : vector<10x256xf32>
    %c0_143 = arith.constant 0 : index
    %c33 = arith.constant 33 : index
    %c0_144 = arith.constant 0 : index
    %234 = vector.load %arg2[%c0_143, %c33, %c0_144] : memref<1x64x256xbf16, #tpu.memory_space<vmem>>, vector<1x10x256xbf16>
    %235 = vector.shape_cast %234 : vector<1x10x256xbf16> to vector<10x256xbf16>
    %236 = arith.extf %235 : vector<10x256xbf16> to vector<10x256xf32>
    %c29_145 = arith.constant 29 : index
    %c0_146 = arith.constant 0 : index
    %c0_147 = arith.constant 0 : index
    %237 = vector.load %arg3[%c29_145, %c0_146, %c0_147] : memref<49x1x256xf32, #tpu.memory_space<vmem>>, vector<1x1x256xf32>
    %238 = vector.shape_cast %237 : vector<1x1x256xf32> to vector<1x256xf32>
    %239 = vector.broadcast %238 : vector<1x256xf32> to vector<10x256xf32>
    %240 = arith.mulf %236, %239 : vector<10x256xf32>
    %241 = arith.addf %233, %240 : vector<10x256xf32>
    %c0_148 = arith.constant 0 : index
    %c34 = arith.constant 34 : index
    %c0_149 = arith.constant 0 : index
    %242 = vector.load %arg2[%c0_148, %c34, %c0_149] : memref<1x64x256xbf16, #tpu.memory_space<vmem>>, vector<1x10x256xbf16>
    %243 = vector.shape_cast %242 : vector<1x10x256xbf16> to vector<10x256xbf16>
    %244 = arith.extf %243 : vector<10x256xbf16> to vector<10x256xf32>
    %c30_150 = arith.constant 30 : index
    %c0_151 = arith.constant 0 : index
    %c0_152 = arith.constant 0 : index
    %245 = vector.load %arg3[%c30_150, %c0_151, %c0_152] : memref<49x1x256xf32, #tpu.memory_space<vmem>>, vector<1x1x256xf32>
    %246 = vector.shape_cast %245 : vector<1x1x256xf32> to vector<1x256xf32>
    %247 = vector.broadcast %246 : vector<1x256xf32> to vector<10x256xf32>
    %248 = arith.mulf %244, %247 : vector<10x256xf32>
    %249 = arith.addf %241, %248 : vector<10x256xf32>
    %c0_153 = arith.constant 0 : index
    %c35 = arith.constant 35 : index
    %c0_154 = arith.constant 0 : index
    %250 = vector.load %arg2[%c0_153, %c35, %c0_154] : memref<1x64x256xbf16, #tpu.memory_space<vmem>>, vector<1x10x256xbf16>
    %251 = vector.shape_cast %250 : vector<1x10x256xbf16> to vector<10x256xbf16>
    %252 = arith.extf %251 : vector<10x256xbf16> to vector<10x256xf32>
    %c31 = arith.constant 31 : index
    %c0_155 = arith.constant 0 : index
    %c0_156 = arith.constant 0 : index
    %253 = vector.load %arg3[%c31, %c0_155, %c0_156] : memref<49x1x256xf32, #tpu.memory_space<vmem>>, vector<1x1x256xf32>
    %254 = vector.shape_cast %253 : vector<1x1x256xf32> to vector<1x256xf32>
    %255 = vector.broadcast %254 : vector<1x256xf32> to vector<10x256xf32>
    %256 = arith.mulf %252, %255 : vector<10x256xf32>
    %257 = arith.addf %249, %256 : vector<10x256xf32>
    %c0_157 = arith.constant 0 : index
    %c36 = arith.constant 36 : index
    %c0_158 = arith.constant 0 : index
    %258 = vector.load %arg2[%c0_157, %c36, %c0_158] : memref<1x64x256xbf16, #tpu.memory_space<vmem>>, vector<1x10x256xbf16>
    %259 = vector.shape_cast %258 : vector<1x10x256xbf16> to vector<10x256xbf16>
    %260 = arith.extf %259 : vector<10x256xbf16> to vector<10x256xf32>
    %c32_159 = arith.constant 32 : index
    %c0_160 = arith.constant 0 : index
    %c0_161 = arith.constant 0 : index
    %261 = vector.load %arg3[%c32_159, %c0_160, %c0_161] : memref<49x1x256xf32, #tpu.memory_space<vmem>>, vector<1x1x256xf32>
    %262 = vector.shape_cast %261 : vector<1x1x256xf32> to vector<1x256xf32>
    %263 = vector.broadcast %262 : vector<1x256xf32> to vector<10x256xf32>
    %264 = arith.mulf %260, %263 : vector<10x256xf32>
    %265 = arith.addf %257, %264 : vector<10x256xf32>
    %c0_162 = arith.constant 0 : index
    %c37 = arith.constant 37 : index
    %c0_163 = arith.constant 0 : index
    %266 = vector.load %arg2[%c0_162, %c37, %c0_163] : memref<1x64x256xbf16, #tpu.memory_space<vmem>>, vector<1x10x256xbf16>
    %267 = vector.shape_cast %266 : vector<1x10x256xbf16> to vector<10x256xbf16>
    %268 = arith.extf %267 : vector<10x256xbf16> to vector<10x256xf32>
    %c33_164 = arith.constant 33 : index
    %c0_165 = arith.constant 0 : index
    %c0_166 = arith.constant 0 : index
    %269 = vector.load %arg3[%c33_164, %c0_165, %c0_166] : memref<49x1x256xf32, #tpu.memory_space<vmem>>, vector<1x1x256xf32>
    %270 = vector.shape_cast %269 : vector<1x1x256xf32> to vector<1x256xf32>
    %271 = vector.broadcast %270 : vector<1x256xf32> to vector<10x256xf32>
    %272 = arith.mulf %268, %271 : vector<10x256xf32>
    %273 = arith.addf %265, %272 : vector<10x256xf32>
    %c0_167 = arith.constant 0 : index
    %c38 = arith.constant 38 : index
    %c0_168 = arith.constant 0 : index
    %274 = vector.load %arg2[%c0_167, %c38, %c0_168] : memref<1x64x256xbf16, #tpu.memory_space<vmem>>, vector<1x10x256xbf16>
    %275 = vector.shape_cast %274 : vector<1x10x256xbf16> to vector<10x256xbf16>
    %276 = arith.extf %275 : vector<10x256xbf16> to vector<10x256xf32>
    %c34_169 = arith.constant 34 : index
    %c0_170 = arith.constant 0 : index
    %c0_171 = arith.constant 0 : index
    %277 = vector.load %arg3[%c34_169, %c0_170, %c0_171] : memref<49x1x256xf32, #tpu.memory_space<vmem>>, vector<1x1x256xf32>
    %278 = vector.shape_cast %277 : vector<1x1x256xf32> to vector<1x256xf32>
    %279 = vector.broadcast %278 : vector<1x256xf32> to vector<10x256xf32>
    %280 = arith.mulf %276, %279 : vector<10x256xf32>
    %281 = arith.addf %273, %280 : vector<10x256xf32>
    %c0_172 = arith.constant 0 : index
    %c40 = arith.constant 40 : index
    %c0_173 = arith.constant 0 : index
    %282 = vector.load %arg2[%c0_172, %c40, %c0_173] : memref<1x64x256xbf16, #tpu.memory_space<vmem>>, vector<1x10x256xbf16>
    %283 = vector.shape_cast %282 : vector<1x10x256xbf16> to vector<10x256xbf16>
    %284 = arith.extf %283 : vector<10x256xbf16> to vector<10x256xf32>
    %c35_174 = arith.constant 35 : index
    %c0_175 = arith.constant 0 : index
    %c0_176 = arith.constant 0 : index
    %285 = vector.load %arg3[%c35_174, %c0_175, %c0_176] : memref<49x1x256xf32, #tpu.memory_space<vmem>>, vector<1x1x256xf32>
    %286 = vector.shape_cast %285 : vector<1x1x256xf32> to vector<1x256xf32>
    %287 = vector.broadcast %286 : vector<1x256xf32> to vector<10x256xf32>
    %288 = arith.mulf %284, %287 : vector<10x256xf32>
    %289 = arith.addf %281, %288 : vector<10x256xf32>
    %c0_177 = arith.constant 0 : index
    %c41 = arith.constant 41 : index
    %c0_178 = arith.constant 0 : index
    %290 = vector.load %arg2[%c0_177, %c41, %c0_178] : memref<1x64x256xbf16, #tpu.memory_space<vmem>>, vector<1x10x256xbf16>
    %291 = vector.shape_cast %290 : vector<1x10x256xbf16> to vector<10x256xbf16>
    %292 = arith.extf %291 : vector<10x256xbf16> to vector<10x256xf32>
    %c36_179 = arith.constant 36 : index
    %c0_180 = arith.constant 0 : index
    %c0_181 = arith.constant 0 : index
    %293 = vector.load %arg3[%c36_179, %c0_180, %c0_181] : memref<49x1x256xf32, #tpu.memory_space<vmem>>, vector<1x1x256xf32>
    %294 = vector.shape_cast %293 : vector<1x1x256xf32> to vector<1x256xf32>
    %295 = vector.broadcast %294 : vector<1x256xf32> to vector<10x256xf32>
    %296 = arith.mulf %292, %295 : vector<10x256xf32>
    %297 = arith.addf %289, %296 : vector<10x256xf32>
    %c0_182 = arith.constant 0 : index
    %c42 = arith.constant 42 : index
    %c0_183 = arith.constant 0 : index
    %298 = vector.load %arg2[%c0_182, %c42, %c0_183] : memref<1x64x256xbf16, #tpu.memory_space<vmem>>, vector<1x10x256xbf16>
    %299 = vector.shape_cast %298 : vector<1x10x256xbf16> to vector<10x256xbf16>
    %300 = arith.extf %299 : vector<10x256xbf16> to vector<10x256xf32>
    %c37_184 = arith.constant 37 : index
    %c0_185 = arith.constant 0 : index
    %c0_186 = arith.constant 0 : index
    %301 = vector.load %arg3[%c37_184, %c0_185, %c0_186] : memref<49x1x256xf32, #tpu.memory_space<vmem>>, vector<1x1x256xf32>
    %302 = vector.shape_cast %301 : vector<1x1x256xf32> to vector<1x256xf32>
    %303 = vector.broadcast %302 : vector<1x256xf32> to vector<10x256xf32>
    %304 = arith.mulf %300, %303 : vector<10x256xf32>
    %305 = arith.addf %297, %304 : vector<10x256xf32>
    %c0_187 = arith.constant 0 : index
    %c43 = arith.constant 43 : index
    %c0_188 = arith.constant 0 : index
    %306 = vector.load %arg2[%c0_187, %c43, %c0_188] : memref<1x64x256xbf16, #tpu.memory_space<vmem>>, vector<1x10x256xbf16>
    %307 = vector.shape_cast %306 : vector<1x10x256xbf16> to vector<10x256xbf16>
    %308 = arith.extf %307 : vector<10x256xbf16> to vector<10x256xf32>
    %c38_189 = arith.constant 38 : index
    %c0_190 = arith.constant 0 : index
    %c0_191 = arith.constant 0 : index
    %309 = vector.load %arg3[%c38_189, %c0_190, %c0_191] : memref<49x1x256xf32, #tpu.memory_space<vmem>>, vector<1x1x256xf32>
    %310 = vector.shape_cast %309 : vector<1x1x256xf32> to vector<1x256xf32>
    %311 = vector.broadcast %310 : vector<1x256xf32> to vector<10x256xf32>
    %312 = arith.mulf %308, %311 : vector<10x256xf32>
    %313 = arith.addf %305, %312 : vector<10x256xf32>
    %c0_192 = arith.constant 0 : index
    %c44 = arith.constant 44 : index
    %c0_193 = arith.constant 0 : index
    %314 = vector.load %arg2[%c0_192, %c44, %c0_193] : memref<1x64x256xbf16, #tpu.memory_space<vmem>>, vector<1x10x256xbf16>
    %315 = vector.shape_cast %314 : vector<1x10x256xbf16> to vector<10x256xbf16>
    %316 = arith.extf %315 : vector<10x256xbf16> to vector<10x256xf32>
    %c39 = arith.constant 39 : index
    %c0_194 = arith.constant 0 : index
    %c0_195 = arith.constant 0 : index
    %317 = vector.load %arg3[%c39, %c0_194, %c0_195] : memref<49x1x256xf32, #tpu.memory_space<vmem>>, vector<1x1x256xf32>
    %318 = vector.shape_cast %317 : vector<1x1x256xf32> to vector<1x256xf32>
    %319 = vector.broadcast %318 : vector<1x256xf32> to vector<10x256xf32>
    %320 = arith.mulf %316, %319 : vector<10x256xf32>
    %321 = arith.addf %313, %320 : vector<10x256xf32>
    %c0_196 = arith.constant 0 : index
    %c45 = arith.constant 45 : index
    %c0_197 = arith.constant 0 : index
    %322 = vector.load %arg2[%c0_196, %c45, %c0_197] : memref<1x64x256xbf16, #tpu.memory_space<vmem>>, vector<1x10x256xbf16>
    %323 = vector.shape_cast %322 : vector<1x10x256xbf16> to vector<10x256xbf16>
    %324 = arith.extf %323 : vector<10x256xbf16> to vector<10x256xf32>
    %c40_198 = arith.constant 40 : index
    %c0_199 = arith.constant 0 : index
    %c0_200 = arith.constant 0 : index
    %325 = vector.load %arg3[%c40_198, %c0_199, %c0_200] : memref<49x1x256xf32, #tpu.memory_space<vmem>>, vector<1x1x256xf32>
    %326 = vector.shape_cast %325 : vector<1x1x256xf32> to vector<1x256xf32>
    %327 = vector.broadcast %326 : vector<1x256xf32> to vector<10x256xf32>
    %328 = arith.mulf %324, %327 : vector<10x256xf32>
    %329 = arith.addf %321, %328 : vector<10x256xf32>
    %c0_201 = arith.constant 0 : index
    %c46 = arith.constant 46 : index
    %c0_202 = arith.constant 0 : index
    %330 = vector.load %arg2[%c0_201, %c46, %c0_202] : memref<1x64x256xbf16, #tpu.memory_space<vmem>>, vector<1x10x256xbf16>
    %331 = vector.shape_cast %330 : vector<1x10x256xbf16> to vector<10x256xbf16>
    %332 = arith.extf %331 : vector<10x256xbf16> to vector<10x256xf32>
    %c41_203 = arith.constant 41 : index
    %c0_204 = arith.constant 0 : index
    %c0_205 = arith.constant 0 : index
    %333 = vector.load %arg3[%c41_203, %c0_204, %c0_205] : memref<49x1x256xf32, #tpu.memory_space<vmem>>, vector<1x1x256xf32>
    %334 = vector.shape_cast %333 : vector<1x1x256xf32> to vector<1x256xf32>
    %335 = vector.broadcast %334 : vector<1x256xf32> to vector<10x256xf32>
    %336 = arith.mulf %332, %335 : vector<10x256xf32>
    %337 = arith.addf %329, %336 : vector<10x256xf32>
    %c0_206 = arith.constant 0 : index
    %c48 = arith.constant 48 : index
    %c0_207 = arith.constant 0 : index
    %338 = vector.load %arg2[%c0_206, %c48, %c0_207] : memref<1x64x256xbf16, #tpu.memory_space<vmem>>, vector<1x10x256xbf16>
    %339 = vector.shape_cast %338 : vector<1x10x256xbf16> to vector<10x256xbf16>
    %340 = arith.extf %339 : vector<10x256xbf16> to vector<10x256xf32>
    %c42_208 = arith.constant 42 : index
    %c0_209 = arith.constant 0 : index
    %c0_210 = arith.constant 0 : index
    %341 = vector.load %arg3[%c42_208, %c0_209, %c0_210] : memref<49x1x256xf32, #tpu.memory_space<vmem>>, vector<1x1x256xf32>
    %342 = vector.shape_cast %341 : vector<1x1x256xf32> to vector<1x256xf32>
    %343 = vector.broadcast %342 : vector<1x256xf32> to vector<10x256xf32>
    %344 = arith.mulf %340, %343 : vector<10x256xf32>
    %345 = arith.addf %337, %344 : vector<10x256xf32>
    %c0_211 = arith.constant 0 : index
    %c49 = arith.constant 49 : index
    %c0_212 = arith.constant 0 : index
    %346 = vector.load %arg2[%c0_211, %c49, %c0_212] : memref<1x64x256xbf16, #tpu.memory_space<vmem>>, vector<1x10x256xbf16>
    %347 = vector.shape_cast %346 : vector<1x10x256xbf16> to vector<10x256xbf16>
    %348 = arith.extf %347 : vector<10x256xbf16> to vector<10x256xf32>
    %c43_213 = arith.constant 43 : index
    %c0_214 = arith.constant 0 : index
    %c0_215 = arith.constant 0 : index
    %349 = vector.load %arg3[%c43_213, %c0_214, %c0_215] : memref<49x1x256xf32, #tpu.memory_space<vmem>>, vector<1x1x256xf32>
    %350 = vector.shape_cast %349 : vector<1x1x256xf32> to vector<1x256xf32>
    %351 = vector.broadcast %350 : vector<1x256xf32> to vector<10x256xf32>
    %352 = arith.mulf %348, %351 : vector<10x256xf32>
    %353 = arith.addf %345, %352 : vector<10x256xf32>
    %c0_216 = arith.constant 0 : index
    %c50 = arith.constant 50 : index
    %c0_217 = arith.constant 0 : index
    %354 = vector.load %arg2[%c0_216, %c50, %c0_217] : memref<1x64x256xbf16, #tpu.memory_space<vmem>>, vector<1x10x256xbf16>
    %355 = vector.shape_cast %354 : vector<1x10x256xbf16> to vector<10x256xbf16>
    %356 = arith.extf %355 : vector<10x256xbf16> to vector<10x256xf32>
    %c44_218 = arith.constant 44 : index
    %c0_219 = arith.constant 0 : index
    %c0_220 = arith.constant 0 : index
    %357 = vector.load %arg3[%c44_218, %c0_219, %c0_220] : memref<49x1x256xf32, #tpu.memory_space<vmem>>, vector<1x1x256xf32>
    %358 = vector.shape_cast %357 : vector<1x1x256xf32> to vector<1x256xf32>
    %359 = vector.broadcast %358 : vector<1x256xf32> to vector<10x256xf32>
    %360 = arith.mulf %356, %359 : vector<10x256xf32>
    %361 = arith.addf %353, %360 : vector<10x256xf32>
    %c0_221 = arith.constant 0 : index
    %c51 = arith.constant 51 : index
    %c0_222 = arith.constant 0 : index
    %362 = vector.load %arg2[%c0_221, %c51, %c0_222] : memref<1x64x256xbf16, #tpu.memory_space<vmem>>, vector<1x10x256xbf16>
    %363 = vector.shape_cast %362 : vector<1x10x256xbf16> to vector<10x256xbf16>
    %364 = arith.extf %363 : vector<10x256xbf16> to vector<10x256xf32>
    %c45_223 = arith.constant 45 : index
    %c0_224 = arith.constant 0 : index
    %c0_225 = arith.constant 0 : index
    %365 = vector.load %arg3[%c45_223, %c0_224, %c0_225] : memref<49x1x256xf32, #tpu.memory_space<vmem>>, vector<1x1x256xf32>
    %366 = vector.shape_cast %365 : vector<1x1x256xf32> to vector<1x256xf32>
    %367 = vector.broadcast %366 : vector<1x256xf32> to vector<10x256xf32>
    %368 = arith.mulf %364, %367 : vector<10x256xf32>
    %369 = arith.addf %361, %368 : vector<10x256xf32>
    %c0_226 = arith.constant 0 : index
    %c52 = arith.constant 52 : index
    %c0_227 = arith.constant 0 : index
    %370 = vector.load %arg2[%c0_226, %c52, %c0_227] : memref<1x64x256xbf16, #tpu.memory_space<vmem>>, vector<1x10x256xbf16>
    %371 = vector.shape_cast %370 : vector<1x10x256xbf16> to vector<10x256xbf16>
    %372 = arith.extf %371 : vector<10x256xbf16> to vector<10x256xf32>
    %c46_228 = arith.constant 46 : index
    %c0_229 = arith.constant 0 : index
    %c0_230 = arith.constant 0 : index
    %373 = vector.load %arg3[%c46_228, %c0_229, %c0_230] : memref<49x1x256xf32, #tpu.memory_space<vmem>>, vector<1x1x256xf32>
    %374 = vector.shape_cast %373 : vector<1x1x256xf32> to vector<1x256xf32>
    %375 = vector.broadcast %374 : vector<1x256xf32> to vector<10x256xf32>
    %376 = arith.mulf %372, %375 : vector<10x256xf32>
    %377 = arith.addf %369, %376 : vector<10x256xf32>
    %c0_231 = arith.constant 0 : index
    %c53 = arith.constant 53 : index
    %c0_232 = arith.constant 0 : index
    %378 = vector.load %arg2[%c0_231, %c53, %c0_232] : memref<1x64x256xbf16, #tpu.memory_space<vmem>>, vector<1x10x256xbf16>
    %379 = vector.shape_cast %378 : vector<1x10x256xbf16> to vector<10x256xbf16>
    %380 = arith.extf %379 : vector<10x256xbf16> to vector<10x256xf32>
    %c47 = arith.constant 47 : index
    %c0_233 = arith.constant 0 : index
    %c0_234 = arith.constant 0 : index
    %381 = vector.load %arg3[%c47, %c0_233, %c0_234] : memref<49x1x256xf32, #tpu.memory_space<vmem>>, vector<1x1x256xf32>
    %382 = vector.shape_cast %381 : vector<1x1x256xf32> to vector<1x256xf32>
    %383 = vector.broadcast %382 : vector<1x256xf32> to vector<10x256xf32>
    %384 = arith.mulf %380, %383 : vector<10x256xf32>
    %385 = arith.addf %377, %384 : vector<10x256xf32>
    %c0_235 = arith.constant 0 : index
    %c54 = arith.constant 54 : index
    %c0_236 = arith.constant 0 : index
    %386 = vector.load %arg2[%c0_235, %c54, %c0_236] : memref<1x64x256xbf16, #tpu.memory_space<vmem>>, vector<1x10x256xbf16>
    %387 = vector.shape_cast %386 : vector<1x10x256xbf16> to vector<10x256xbf16>
    %388 = arith.extf %387 : vector<10x256xbf16> to vector<10x256xf32>
    %c48_237 = arith.constant 48 : index
    %c0_238 = arith.constant 0 : index
    %c0_239 = arith.constant 0 : index
    %389 = vector.load %arg3[%c48_237, %c0_238, %c0_239] : memref<49x1x256xf32, #tpu.memory_space<vmem>>, vector<1x1x256xf32>
    %390 = vector.shape_cast %389 : vector<1x1x256xf32> to vector<1x256xf32>
    %391 = vector.broadcast %390 : vector<1x256xf32> to vector<10x256xf32>
    %392 = arith.mulf %388, %391 : vector<10x256xf32>
    %393 = arith.addf %385, %392 : vector<10x256xf32>
    %c0_240 = arith.constant 0 : index
    %c0_241 = arith.constant 0 : index
    %394 = vector.load %arg4[%c0_240, %c0_241] : memref<1x256xf32, #tpu.memory_space<vmem>>, vector<1x256xf32>
    %395 = vector.broadcast %394 : vector<1x256xf32> to vector<10x256xf32>
    %396 = arith.mulf %393, %395 : vector<10x256xf32>
    %c0_242 = arith.constant 0 : index
    %c0_243 = arith.constant 0 : index
    %397 = vector.load %arg5[%c0_242, %c0_243] : memref<1x256xf32, #tpu.memory_space<vmem>>, vector<1x256xf32>
    %398 = vector.broadcast %397 : vector<1x256xf32> to vector<10x256xf32>
    %399 = arith.addf %396, %398 : vector<10x256xf32>
    %cst = arith.constant 0.000000e+00 : f32
    %400 = vector.broadcast %cst : f32 to vector<10x256xf32>
    %401 = arith.maximumf %399, %400 : vector<10x256xf32>
    %c0_244 = arith.constant 0 : index
    %c0_245 = arith.constant 0 : index
    %402 = vector.load %arg10[%c0_244, %c0_245] : memref<10x128xf32, #tpu.memory_space<vmem>>, vector<10x128xf32>
    %403 = arith.truncf %401 : vector<10x256xf32> to vector<10x256xbf16>
    %c0_246 = arith.constant 0 : index
    %c0_247 = arith.constant 0 : index
    %404 = vector.load %arg6[%c0_246, %c0_247] : memref<256x128xbf16, #tpu.memory_space<vmem>>, vector<256x128xbf16>
    %cst_248 = arith.constant dense<0.000000e+00> : vector<10x128xf32>
    %405 = tpu.matmul %403, %404, %cst_248 {dimension_numbers = #tpu.dot_dimension_numbers<[1], [0], [0], [1], [0, 0, 1, 1], [], []>} : vector<10x256xbf16>, vector<256x128xbf16>, vector<10x128xf32> -> vector<10x128xf32>
    %406 = arith.addf %402, %405 : vector<10x128xf32>
    %c0_249 = arith.constant 0 : index
    %c0_250 = arith.constant 0 : index
    %407 = vector.load %arg10[%c0_249, %c0_250] : memref<10x128xf32, #tpu.memory_space<vmem>>, vector<10x128xf32>
    tpu.vector_store %arg10[%c0_249, %c0_250], %406 {strides = array<i32>} : memref<10x128xf32, #tpu.memory_space<vmem>>, vector<10x128xf32>,
    %c0_i32_251 = arith.constant 0 : i32
    %408 = arith.cmpi eq, %arg1, %c0_i32_251 : i32
    %409 = arith.extui %408 : i1 to i32
    %c0_i32_252 = arith.constant 0 : i32
    %410 = arith.cmpi ne, %409, %c0_i32_252 : i32
    scf.if %410 {
      %c0_253 = arith.constant 0 : index
      %c0_254 = arith.constant 0 : index
      %411 = vector.load %arg10[%c0_253, %c0_254] : memref<10x128xf32, #tpu.memory_space<vmem>>, vector<10x128xf32>
      %c0_255 = arith.constant 0 : index
      %c0_256 = arith.constant 0 : index
      %412 = vector.load %arg7[%c0_255, %c0_256] : memref<1x128xf32, #tpu.memory_space<vmem>>, vector<1x128xf32>
      %413 = vector.broadcast %412 : vector<1x128xf32> to vector<10x128xf32>
      %414 = arith.mulf %411, %413 : vector<10x128xf32>
      %c0_257 = arith.constant 0 : index
      %c0_258 = arith.constant 0 : index
      %415 = vector.load %arg8[%c0_257, %c0_258] : memref<1x128xf32, #tpu.memory_space<vmem>>, vector<1x128xf32>
      %416 = vector.broadcast %415 : vector<1x128xf32> to vector<10x128xf32>
      %417 = arith.addf %414, %416 : vector<10x128xf32>
      %cst_259 = arith.constant 0.000000e+00 : f32
      %418 = vector.broadcast %cst_259 : f32 to vector<10x128xf32>
      %419 = arith.maximumf %417, %418 : vector<10x128xf32>
      %420 = arith.truncf %419 : vector<10x128xf32> to vector<10x128xbf16>
      %c0_260 = arith.constant 0 : index
      %c0_261 = arith.constant 0 : index
      %c0_262 = arith.constant 0 : index
      %421 = vector.load %arg9[%c0_260, %c0_261, %c0_262] : memref<1x10x128xbf16, #tpu.memory_space<vmem>>, vector<1x10x128xbf16>
      %422 = vector.shape_cast %421 : vector<1x10x128xbf16> to vector<10x128xbf16>
      %423 = vector.shape_cast %420 : vector<10x128xbf16> to vector<1x10x128xbf16>
      tpu.vector_store %arg9[%c0_260, %c0_261, %c0_262], %423 {strides = array<i32>} : memref<1x10x128xbf16, #tpu.memory_space<vmem>>, vector<1x10x128xbf16>,
    } else {
    }
    return
  }
  func.func @transform_0(%arg0: i32, %arg1: i32) -> (i32, i32, i32) {
    %c0_i32 = arith.constant 0 : i32
    %c0_i32_0 = arith.constant 0 : i32
    return %arg0, %c0_i32, %arg1 : i32, i32, i32
  }
  func.func @transform_1(%arg0: i32, %arg1: i32) -> (i32, i32, i32) {
    %c0_i32 = arith.constant 0 : i32
    %c0_i32_0 = arith.constant 0 : i32
    %c0_i32_1 = arith.constant 0 : i32
    return %c0_i32, %c0_i32_0, %arg1 : i32, i32, i32
  }
  func.func @transform_2(%arg0: i32, %arg1: i32) -> (i32, i32) {
    %c0_i32 = arith.constant 0 : i32
    %c0_i32_0 = arith.constant 0 : i32
    return %c0_i32, %arg1 : i32, i32
  }
  func.func @transform_3(%arg0: i32, %arg1: i32) -> (i32, i32) {
    %c0_i32 = arith.constant 0 : i32
    %c0_i32_0 = arith.constant 0 : i32
    return %c0_i32, %arg1 : i32, i32
  }
  func.func @transform_4(%arg0: i32, %arg1: i32) -> (i32, i32) {
    %c0_i32 = arith.constant 0 : i32
    %c0_i32_0 = arith.constant 0 : i32
    return %arg1, %c0_i32 : i32, i32
  }
  func.func @transform_5(%arg0: i32, %arg1: i32) -> (i32, i32) {
    %c0_i32 = arith.constant 0 : i32
    %c0_i32_0 = arith.constant 0 : i32
    %c0_i32_1 = arith.constant 0 : i32
    return %c0_i32, %c0_i32_0 : i32, i32
  }
  func.func @transform_6(%arg0: i32, %arg1: i32) -> (i32, i32) {
    %c0_i32 = arith.constant 0 : i32
    %c0_i32_0 = arith.constant 0 : i32
    %c0_i32_1 = arith.constant 0 : i32
    return %c0_i32, %c0_i32_0 : i32, i32
  }
  func.func @transform_7(%arg0: i32, %arg1: i32) -> (i32, i32, i32) {
    %c0_i32 = arith.constant 0 : i32
    %c0_i32_0 = arith.constant 0 : i32
    %c0_i32_1 = arith.constant 0 : i32
    return %arg0, %c0_i32, %c0_i32_0 : i32, i32, i32
  }
}

module attributes {stable_mosaic.version = 11 : i64} {
  func.func @_conv_dw_kernel(%arg0: i32, %arg1: i32, %arg2: memref<1x64x128xbf16, #tpu.memory_space<vmem>>, %arg3: memref<49x1x128xf32, #tpu.memory_space<vmem>>, %arg4: memref<1x128xf32, #tpu.memory_space<vmem>>, %arg5: memref<1x128xf32, #tpu.memory_space<vmem>>, %arg6: memref<128x128xbf16, #tpu.memory_space<vmem>>, %arg7: memref<1x128xf32, #tpu.memory_space<vmem>>, %arg8: memref<1x128xf32, #tpu.memory_space<vmem>>, %arg9: memref<1x10x128xbf16, #tpu.memory_space<vmem>>, %arg10: memref<10x128xf32, #tpu.memory_space<vmem>>) attributes {dimension_semantics = [#tpu.dimension_semantics<parallel>, #tpu.dimension_semantics<arbitrary>], iteration_bounds = array<i64: 2, 1>, scalar_prefetch = 0 : i64, scratch_operands = 1 : i64, tpu.core_type = #tpu.core_type<tc>, window_params = [{transform_indices = @transform_0, window_bounds = array<i64: 1, 64, 128>}, {transform_indices = @transform_1, window_bounds = array<i64: 49, 1, 128>}, {transform_indices = @transform_2, window_bounds = array<i64: 1, 128>}, {transform_indices = @transform_3, window_bounds = array<i64: 1, 128>}, {transform_indices = @transform_4, window_bounds = array<i64: 128, 128>}, {pipeline_mode = #tpu.pipeline_mode<synchronous>, transform_indices = @transform_5, window_bounds = array<i64: 1, 128>}, {pipeline_mode = #tpu.pipeline_mode<synchronous>, transform_indices = @transform_6, window_bounds = array<i64: 1, 128>}, {transform_indices = @transform_7, window_bounds = array<i64: 1, 10, 128>}]} {
    %c0_i32 = arith.constant 0 : i32
    %0 = arith.cmpi eq, %arg1, %c0_i32 : i32
    %1 = arith.extui %0 : i1 to i32
    %c0_i32_0 = arith.constant 0 : i32
    %2 = arith.cmpi ne, %1, %c0_i32_0 : i32
    scf.if %2 {
      %cst_253 = arith.constant 0.000000e+00 : f32
      %411 = vector.broadcast %cst_253 : f32 to vector<10x128xf32>
      %c0_254 = arith.constant 0 : index
      %c0_255 = arith.constant 0 : index
      %412 = vector.load %arg10[%c0_254, %c0_255] : memref<10x128xf32, #tpu.memory_space<vmem>>, vector<10x128xf32>
      tpu.vector_store %arg10[%c0_254, %c0_255], %411 {strides = array<i32>} : memref<10x128xf32, #tpu.memory_space<vmem>>, vector<10x128xf32>,
    } else {
    }
    %c0 = arith.constant 0 : index
    %c0_1 = arith.constant 0 : index
    %c0_2 = arith.constant 0 : index
    %3 = vector.load %arg2[%c0, %c0_1, %c0_2] : memref<1x64x128xbf16, #tpu.memory_space<vmem>>, vector<1x10x128xbf16>
    %4 = vector.shape_cast %3 : vector<1x10x128xbf16> to vector<10x128xbf16>
    %5 = arith.extf %4 : vector<10x128xbf16> to vector<10x128xf32>
    %c0_3 = arith.constant 0 : index
    %c0_4 = arith.constant 0 : index
    %c0_5 = arith.constant 0 : index
    %6 = vector.load %arg3[%c0_3, %c0_4, %c0_5] : memref<49x1x128xf32, #tpu.memory_space<vmem>>, vector<1x1x128xf32>
    %7 = vector.shape_cast %6 : vector<1x1x128xf32> to vector<1x128xf32>
    %8 = vector.broadcast %7 : vector<1x128xf32> to vector<10x128xf32>
    %9 = arith.mulf %5, %8 : vector<10x128xf32>
    %c0_6 = arith.constant 0 : index
    %c1 = arith.constant 1 : index
    %c0_7 = arith.constant 0 : index
    %10 = vector.load %arg2[%c0_6, %c1, %c0_7] : memref<1x64x128xbf16, #tpu.memory_space<vmem>>, vector<1x10x128xbf16>
    %11 = vector.shape_cast %10 : vector<1x10x128xbf16> to vector<10x128xbf16>
    %12 = arith.extf %11 : vector<10x128xbf16> to vector<10x128xf32>
    %c1_8 = arith.constant 1 : index
    %c0_9 = arith.constant 0 : index
    %c0_10 = arith.constant 0 : index
    %13 = vector.load %arg3[%c1_8, %c0_9, %c0_10] : memref<49x1x128xf32, #tpu.memory_space<vmem>>, vector<1x1x128xf32>
    %14 = vector.shape_cast %13 : vector<1x1x128xf32> to vector<1x128xf32>
    %15 = vector.broadcast %14 : vector<1x128xf32> to vector<10x128xf32>
    %16 = arith.mulf %12, %15 : vector<10x128xf32>
    %17 = arith.addf %9, %16 : vector<10x128xf32>
    %c0_11 = arith.constant 0 : index
    %c2 = arith.constant 2 : index
    %c0_12 = arith.constant 0 : index
    %18 = vector.load %arg2[%c0_11, %c2, %c0_12] : memref<1x64x128xbf16, #tpu.memory_space<vmem>>, vector<1x10x128xbf16>
    %19 = vector.shape_cast %18 : vector<1x10x128xbf16> to vector<10x128xbf16>
    %20 = arith.extf %19 : vector<10x128xbf16> to vector<10x128xf32>
    %c2_13 = arith.constant 2 : index
    %c0_14 = arith.constant 0 : index
    %c0_15 = arith.constant 0 : index
    %21 = vector.load %arg3[%c2_13, %c0_14, %c0_15] : memref<49x1x128xf32, #tpu.memory_space<vmem>>, vector<1x1x128xf32>
    %22 = vector.shape_cast %21 : vector<1x1x128xf32> to vector<1x128xf32>
    %23 = vector.broadcast %22 : vector<1x128xf32> to vector<10x128xf32>
    %24 = arith.mulf %20, %23 : vector<10x128xf32>
    %25 = arith.addf %17, %24 : vector<10x128xf32>
    %c0_16 = arith.constant 0 : index
    %c3 = arith.constant 3 : index
    %c0_17 = arith.constant 0 : index
    %26 = vector.load %arg2[%c0_16, %c3, %c0_17] : memref<1x64x128xbf16, #tpu.memory_space<vmem>>, vector<1x10x128xbf16>
    %27 = vector.shape_cast %26 : vector<1x10x128xbf16> to vector<10x128xbf16>
    %28 = arith.extf %27 : vector<10x128xbf16> to vector<10x128xf32>
    %c3_18 = arith.constant 3 : index
    %c0_19 = arith.constant 0 : index
    %c0_20 = arith.constant 0 : index
    %29 = vector.load %arg3[%c3_18, %c0_19, %c0_20] : memref<49x1x128xf32, #tpu.memory_space<vmem>>, vector<1x1x128xf32>
    %30 = vector.shape_cast %29 : vector<1x1x128xf32> to vector<1x128xf32>
    %31 = vector.broadcast %30 : vector<1x128xf32> to vector<10x128xf32>
    %32 = arith.mulf %28, %31 : vector<10x128xf32>
    %33 = arith.addf %25, %32 : vector<10x128xf32>
    %c0_21 = arith.constant 0 : index
    %c4 = arith.constant 4 : index
    %c0_22 = arith.constant 0 : index
    %34 = vector.load %arg2[%c0_21, %c4, %c0_22] : memref<1x64x128xbf16, #tpu.memory_space<vmem>>, vector<1x10x128xbf16>
    %35 = vector.shape_cast %34 : vector<1x10x128xbf16> to vector<10x128xbf16>
    %36 = arith.extf %35 : vector<10x128xbf16> to vector<10x128xf32>
    %c4_23 = arith.constant 4 : index
    %c0_24 = arith.constant 0 : index
    %c0_25 = arith.constant 0 : index
    %37 = vector.load %arg3[%c4_23, %c0_24, %c0_25] : memref<49x1x128xf32, #tpu.memory_space<vmem>>, vector<1x1x128xf32>
    %38 = vector.shape_cast %37 : vector<1x1x128xf32> to vector<1x128xf32>
    %39 = vector.broadcast %38 : vector<1x128xf32> to vector<10x128xf32>
    %40 = arith.mulf %36, %39 : vector<10x128xf32>
    %41 = arith.addf %33, %40 : vector<10x128xf32>
    %c0_26 = arith.constant 0 : index
    %c5 = arith.constant 5 : index
    %c0_27 = arith.constant 0 : index
    %42 = vector.load %arg2[%c0_26, %c5, %c0_27] : memref<1x64x128xbf16, #tpu.memory_space<vmem>>, vector<1x10x128xbf16>
    %43 = vector.shape_cast %42 : vector<1x10x128xbf16> to vector<10x128xbf16>
    %44 = arith.extf %43 : vector<10x128xbf16> to vector<10x128xf32>
    %c5_28 = arith.constant 5 : index
    %c0_29 = arith.constant 0 : index
    %c0_30 = arith.constant 0 : index
    %45 = vector.load %arg3[%c5_28, %c0_29, %c0_30] : memref<49x1x128xf32, #tpu.memory_space<vmem>>, vector<1x1x128xf32>
    %46 = vector.shape_cast %45 : vector<1x1x128xf32> to vector<1x128xf32>
    %47 = vector.broadcast %46 : vector<1x128xf32> to vector<10x128xf32>
    %48 = arith.mulf %44, %47 : vector<10x128xf32>
    %49 = arith.addf %41, %48 : vector<10x128xf32>
    %c0_31 = arith.constant 0 : index
    %c6 = arith.constant 6 : index
    %c0_32 = arith.constant 0 : index
    %50 = vector.load %arg2[%c0_31, %c6, %c0_32] : memref<1x64x128xbf16, #tpu.memory_space<vmem>>, vector<1x10x128xbf16>
    %51 = vector.shape_cast %50 : vector<1x10x128xbf16> to vector<10x128xbf16>
    %52 = arith.extf %51 : vector<10x128xbf16> to vector<10x128xf32>
    %c6_33 = arith.constant 6 : index
    %c0_34 = arith.constant 0 : index
    %c0_35 = arith.constant 0 : index
    %53 = vector.load %arg3[%c6_33, %c0_34, %c0_35] : memref<49x1x128xf32, #tpu.memory_space<vmem>>, vector<1x1x128xf32>
    %54 = vector.shape_cast %53 : vector<1x1x128xf32> to vector<1x128xf32>
    %55 = vector.broadcast %54 : vector<1x128xf32> to vector<10x128xf32>
    %56 = arith.mulf %52, %55 : vector<10x128xf32>
    %57 = arith.addf %49, %56 : vector<10x128xf32>
    %c0_36 = arith.constant 0 : index
    %c8 = arith.constant 8 : index
    %c0_37 = arith.constant 0 : index
    %58 = vector.load %arg2[%c0_36, %c8, %c0_37] : memref<1x64x128xbf16, #tpu.memory_space<vmem>>, vector<1x10x128xbf16>
    %59 = vector.shape_cast %58 : vector<1x10x128xbf16> to vector<10x128xbf16>
    %60 = arith.extf %59 : vector<10x128xbf16> to vector<10x128xf32>
    %c7 = arith.constant 7 : index
    %c0_38 = arith.constant 0 : index
    %c0_39 = arith.constant 0 : index
    %61 = vector.load %arg3[%c7, %c0_38, %c0_39] : memref<49x1x128xf32, #tpu.memory_space<vmem>>, vector<1x1x128xf32>
    %62 = vector.shape_cast %61 : vector<1x1x128xf32> to vector<1x128xf32>
    %63 = vector.broadcast %62 : vector<1x128xf32> to vector<10x128xf32>
    %64 = arith.mulf %60, %63 : vector<10x128xf32>
    %65 = arith.addf %57, %64 : vector<10x128xf32>
    %c0_40 = arith.constant 0 : index
    %c9 = arith.constant 9 : index
    %c0_41 = arith.constant 0 : index
    %66 = vector.load %arg2[%c0_40, %c9, %c0_41] : memref<1x64x128xbf16, #tpu.memory_space<vmem>>, vector<1x10x128xbf16>
    %67 = vector.shape_cast %66 : vector<1x10x128xbf16> to vector<10x128xbf16>
    %68 = arith.extf %67 : vector<10x128xbf16> to vector<10x128xf32>
    %c8_42 = arith.constant 8 : index
    %c0_43 = arith.constant 0 : index
    %c0_44 = arith.constant 0 : index
    %69 = vector.load %arg3[%c8_42, %c0_43, %c0_44] : memref<49x1x128xf32, #tpu.memory_space<vmem>>, vector<1x1x128xf32>
    %70 = vector.shape_cast %69 : vector<1x1x128xf32> to vector<1x128xf32>
    %71 = vector.broadcast %70 : vector<1x128xf32> to vector<10x128xf32>
    %72 = arith.mulf %68, %71 : vector<10x128xf32>
    %73 = arith.addf %65, %72 : vector<10x128xf32>
    %c0_45 = arith.constant 0 : index
    %c10 = arith.constant 10 : index
    %c0_46 = arith.constant 0 : index
    %74 = vector.load %arg2[%c0_45, %c10, %c0_46] : memref<1x64x128xbf16, #tpu.memory_space<vmem>>, vector<1x10x128xbf16>
    %75 = vector.shape_cast %74 : vector<1x10x128xbf16> to vector<10x128xbf16>
    %76 = arith.extf %75 : vector<10x128xbf16> to vector<10x128xf32>
    %c9_47 = arith.constant 9 : index
    %c0_48 = arith.constant 0 : index
    %c0_49 = arith.constant 0 : index
    %77 = vector.load %arg3[%c9_47, %c0_48, %c0_49] : memref<49x1x128xf32, #tpu.memory_space<vmem>>, vector<1x1x128xf32>
    %78 = vector.shape_cast %77 : vector<1x1x128xf32> to vector<1x128xf32>
    %79 = vector.broadcast %78 : vector<1x128xf32> to vector<10x128xf32>
    %80 = arith.mulf %76, %79 : vector<10x128xf32>
    %81 = arith.addf %73, %80 : vector<10x128xf32>
    %c0_50 = arith.constant 0 : index
    %c11 = arith.constant 11 : index
    %c0_51 = arith.constant 0 : index
    %82 = vector.load %arg2[%c0_50, %c11, %c0_51] : memref<1x64x128xbf16, #tpu.memory_space<vmem>>, vector<1x10x128xbf16>
    %83 = vector.shape_cast %82 : vector<1x10x128xbf16> to vector<10x128xbf16>
    %84 = arith.extf %83 : vector<10x128xbf16> to vector<10x128xf32>
    %c10_52 = arith.constant 10 : index
    %c0_53 = arith.constant 0 : index
    %c0_54 = arith.constant 0 : index
    %85 = vector.load %arg3[%c10_52, %c0_53, %c0_54] : memref<49x1x128xf32, #tpu.memory_space<vmem>>, vector<1x1x128xf32>
    %86 = vector.shape_cast %85 : vector<1x1x128xf32> to vector<1x128xf32>
    %87 = vector.broadcast %86 : vector<1x128xf32> to vector<10x128xf32>
    %88 = arith.mulf %84, %87 : vector<10x128xf32>
    %89 = arith.addf %81, %88 : vector<10x128xf32>
    %c0_55 = arith.constant 0 : index
    %c12 = arith.constant 12 : index
    %c0_56 = arith.constant 0 : index
    %90 = vector.load %arg2[%c0_55, %c12, %c0_56] : memref<1x64x128xbf16, #tpu.memory_space<vmem>>, vector<1x10x128xbf16>
    %91 = vector.shape_cast %90 : vector<1x10x128xbf16> to vector<10x128xbf16>
    %92 = arith.extf %91 : vector<10x128xbf16> to vector<10x128xf32>
    %c11_57 = arith.constant 11 : index
    %c0_58 = arith.constant 0 : index
    %c0_59 = arith.constant 0 : index
    %93 = vector.load %arg3[%c11_57, %c0_58, %c0_59] : memref<49x1x128xf32, #tpu.memory_space<vmem>>, vector<1x1x128xf32>
    %94 = vector.shape_cast %93 : vector<1x1x128xf32> to vector<1x128xf32>
    %95 = vector.broadcast %94 : vector<1x128xf32> to vector<10x128xf32>
    %96 = arith.mulf %92, %95 : vector<10x128xf32>
    %97 = arith.addf %89, %96 : vector<10x128xf32>
    %c0_60 = arith.constant 0 : index
    %c13 = arith.constant 13 : index
    %c0_61 = arith.constant 0 : index
    %98 = vector.load %arg2[%c0_60, %c13, %c0_61] : memref<1x64x128xbf16, #tpu.memory_space<vmem>>, vector<1x10x128xbf16>
    %99 = vector.shape_cast %98 : vector<1x10x128xbf16> to vector<10x128xbf16>
    %100 = arith.extf %99 : vector<10x128xbf16> to vector<10x128xf32>
    %c12_62 = arith.constant 12 : index
    %c0_63 = arith.constant 0 : index
    %c0_64 = arith.constant 0 : index
    %101 = vector.load %arg3[%c12_62, %c0_63, %c0_64] : memref<49x1x128xf32, #tpu.memory_space<vmem>>, vector<1x1x128xf32>
    %102 = vector.shape_cast %101 : vector<1x1x128xf32> to vector<1x128xf32>
    %103 = vector.broadcast %102 : vector<1x128xf32> to vector<10x128xf32>
    %104 = arith.mulf %100, %103 : vector<10x128xf32>
    %105 = arith.addf %97, %104 : vector<10x128xf32>
    %c0_65 = arith.constant 0 : index
    %c14 = arith.constant 14 : index
    %c0_66 = arith.constant 0 : index
    %106 = vector.load %arg2[%c0_65, %c14, %c0_66] : memref<1x64x128xbf16, #tpu.memory_space<vmem>>, vector<1x10x128xbf16>
    %107 = vector.shape_cast %106 : vector<1x10x128xbf16> to vector<10x128xbf16>
    %108 = arith.extf %107 : vector<10x128xbf16> to vector<10x128xf32>
    %c13_67 = arith.constant 13 : index
    %c0_68 = arith.constant 0 : index
    %c0_69 = arith.constant 0 : index
    %109 = vector.load %arg3[%c13_67, %c0_68, %c0_69] : memref<49x1x128xf32, #tpu.memory_space<vmem>>, vector<1x1x128xf32>
    %110 = vector.shape_cast %109 : vector<1x1x128xf32> to vector<1x128xf32>
    %111 = vector.broadcast %110 : vector<1x128xf32> to vector<10x128xf32>
    %112 = arith.mulf %108, %111 : vector<10x128xf32>
    %113 = arith.addf %105, %112 : vector<10x128xf32>
    %c0_70 = arith.constant 0 : index
    %c16 = arith.constant 16 : index
    %c0_71 = arith.constant 0 : index
    %114 = vector.load %arg2[%c0_70, %c16, %c0_71] : memref<1x64x128xbf16, #tpu.memory_space<vmem>>, vector<1x10x128xbf16>
    %115 = vector.shape_cast %114 : vector<1x10x128xbf16> to vector<10x128xbf16>
    %116 = arith.extf %115 : vector<10x128xbf16> to vector<10x128xf32>
    %c14_72 = arith.constant 14 : index
    %c0_73 = arith.constant 0 : index
    %c0_74 = arith.constant 0 : index
    %117 = vector.load %arg3[%c14_72, %c0_73, %c0_74] : memref<49x1x128xf32, #tpu.memory_space<vmem>>, vector<1x1x128xf32>
    %118 = vector.shape_cast %117 : vector<1x1x128xf32> to vector<1x128xf32>
    %119 = vector.broadcast %118 : vector<1x128xf32> to vector<10x128xf32>
    %120 = arith.mulf %116, %119 : vector<10x128xf32>
    %121 = arith.addf %113, %120 : vector<10x128xf32>
    %c0_75 = arith.constant 0 : index
    %c17 = arith.constant 17 : index
    %c0_76 = arith.constant 0 : index
    %122 = vector.load %arg2[%c0_75, %c17, %c0_76] : memref<1x64x128xbf16, #tpu.memory_space<vmem>>, vector<1x10x128xbf16>
    %123 = vector.shape_cast %122 : vector<1x10x128xbf16> to vector<10x128xbf16>
    %124 = arith.extf %123 : vector<10x128xbf16> to vector<10x128xf32>
    %c15 = arith.constant 15 : index
    %c0_77 = arith.constant 0 : index
    %c0_78 = arith.constant 0 : index
    %125 = vector.load %arg3[%c15, %c0_77, %c0_78] : memref<49x1x128xf32, #tpu.memory_space<vmem>>, vector<1x1x128xf32>
    %126 = vector.shape_cast %125 : vector<1x1x128xf32> to vector<1x128xf32>
    %127 = vector.broadcast %126 : vector<1x128xf32> to vector<10x128xf32>
    %128 = arith.mulf %124, %127 : vector<10x128xf32>
    %129 = arith.addf %121, %128 : vector<10x128xf32>
    %c0_79 = arith.constant 0 : index
    %c18 = arith.constant 18 : index
    %c0_80 = arith.constant 0 : index
    %130 = vector.load %arg2[%c0_79, %c18, %c0_80] : memref<1x64x128xbf16, #tpu.memory_space<vmem>>, vector<1x10x128xbf16>
    %131 = vector.shape_cast %130 : vector<1x10x128xbf16> to vector<10x128xbf16>
    %132 = arith.extf %131 : vector<10x128xbf16> to vector<10x128xf32>
    %c16_81 = arith.constant 16 : index
    %c0_82 = arith.constant 0 : index
    %c0_83 = arith.constant 0 : index
    %133 = vector.load %arg3[%c16_81, %c0_82, %c0_83] : memref<49x1x128xf32, #tpu.memory_space<vmem>>, vector<1x1x128xf32>
    %134 = vector.shape_cast %133 : vector<1x1x128xf32> to vector<1x128xf32>
    %135 = vector.broadcast %134 : vector<1x128xf32> to vector<10x128xf32>
    %136 = arith.mulf %132, %135 : vector<10x128xf32>
    %137 = arith.addf %129, %136 : vector<10x128xf32>
    %c0_84 = arith.constant 0 : index
    %c19 = arith.constant 19 : index
    %c0_85 = arith.constant 0 : index
    %138 = vector.load %arg2[%c0_84, %c19, %c0_85] : memref<1x64x128xbf16, #tpu.memory_space<vmem>>, vector<1x10x128xbf16>
    %139 = vector.shape_cast %138 : vector<1x10x128xbf16> to vector<10x128xbf16>
    %140 = arith.extf %139 : vector<10x128xbf16> to vector<10x128xf32>
    %c17_86 = arith.constant 17 : index
    %c0_87 = arith.constant 0 : index
    %c0_88 = arith.constant 0 : index
    %141 = vector.load %arg3[%c17_86, %c0_87, %c0_88] : memref<49x1x128xf32, #tpu.memory_space<vmem>>, vector<1x1x128xf32>
    %142 = vector.shape_cast %141 : vector<1x1x128xf32> to vector<1x128xf32>
    %143 = vector.broadcast %142 : vector<1x128xf32> to vector<10x128xf32>
    %144 = arith.mulf %140, %143 : vector<10x128xf32>
    %145 = arith.addf %137, %144 : vector<10x128xf32>
    %c0_89 = arith.constant 0 : index
    %c20 = arith.constant 20 : index
    %c0_90 = arith.constant 0 : index
    %146 = vector.load %arg2[%c0_89, %c20, %c0_90] : memref<1x64x128xbf16, #tpu.memory_space<vmem>>, vector<1x10x128xbf16>
    %147 = vector.shape_cast %146 : vector<1x10x128xbf16> to vector<10x128xbf16>
    %148 = arith.extf %147 : vector<10x128xbf16> to vector<10x128xf32>
    %c18_91 = arith.constant 18 : index
    %c0_92 = arith.constant 0 : index
    %c0_93 = arith.constant 0 : index
    %149 = vector.load %arg3[%c18_91, %c0_92, %c0_93] : memref<49x1x128xf32, #tpu.memory_space<vmem>>, vector<1x1x128xf32>
    %150 = vector.shape_cast %149 : vector<1x1x128xf32> to vector<1x128xf32>
    %151 = vector.broadcast %150 : vector<1x128xf32> to vector<10x128xf32>
    %152 = arith.mulf %148, %151 : vector<10x128xf32>
    %153 = arith.addf %145, %152 : vector<10x128xf32>
    %c0_94 = arith.constant 0 : index
    %c21 = arith.constant 21 : index
    %c0_95 = arith.constant 0 : index
    %154 = vector.load %arg2[%c0_94, %c21, %c0_95] : memref<1x64x128xbf16, #tpu.memory_space<vmem>>, vector<1x10x128xbf16>
    %155 = vector.shape_cast %154 : vector<1x10x128xbf16> to vector<10x128xbf16>
    %156 = arith.extf %155 : vector<10x128xbf16> to vector<10x128xf32>
    %c19_96 = arith.constant 19 : index
    %c0_97 = arith.constant 0 : index
    %c0_98 = arith.constant 0 : index
    %157 = vector.load %arg3[%c19_96, %c0_97, %c0_98] : memref<49x1x128xf32, #tpu.memory_space<vmem>>, vector<1x1x128xf32>
    %158 = vector.shape_cast %157 : vector<1x1x128xf32> to vector<1x128xf32>
    %159 = vector.broadcast %158 : vector<1x128xf32> to vector<10x128xf32>
    %160 = arith.mulf %156, %159 : vector<10x128xf32>
    %161 = arith.addf %153, %160 : vector<10x128xf32>
    %c0_99 = arith.constant 0 : index
    %c22 = arith.constant 22 : index
    %c0_100 = arith.constant 0 : index
    %162 = vector.load %arg2[%c0_99, %c22, %c0_100] : memref<1x64x128xbf16, #tpu.memory_space<vmem>>, vector<1x10x128xbf16>
    %163 = vector.shape_cast %162 : vector<1x10x128xbf16> to vector<10x128xbf16>
    %164 = arith.extf %163 : vector<10x128xbf16> to vector<10x128xf32>
    %c20_101 = arith.constant 20 : index
    %c0_102 = arith.constant 0 : index
    %c0_103 = arith.constant 0 : index
    %165 = vector.load %arg3[%c20_101, %c0_102, %c0_103] : memref<49x1x128xf32, #tpu.memory_space<vmem>>, vector<1x1x128xf32>
    %166 = vector.shape_cast %165 : vector<1x1x128xf32> to vector<1x128xf32>
    %167 = vector.broadcast %166 : vector<1x128xf32> to vector<10x128xf32>
    %168 = arith.mulf %164, %167 : vector<10x128xf32>
    %169 = arith.addf %161, %168 : vector<10x128xf32>
    %c0_104 = arith.constant 0 : index
    %c24 = arith.constant 24 : index
    %c0_105 = arith.constant 0 : index
    %170 = vector.load %arg2[%c0_104, %c24, %c0_105] : memref<1x64x128xbf16, #tpu.memory_space<vmem>>, vector<1x10x128xbf16>
    %171 = vector.shape_cast %170 : vector<1x10x128xbf16> to vector<10x128xbf16>
    %172 = arith.extf %171 : vector<10x128xbf16> to vector<10x128xf32>
    %c21_106 = arith.constant 21 : index
    %c0_107 = arith.constant 0 : index
    %c0_108 = arith.constant 0 : index
    %173 = vector.load %arg3[%c21_106, %c0_107, %c0_108] : memref<49x1x128xf32, #tpu.memory_space<vmem>>, vector<1x1x128xf32>
    %174 = vector.shape_cast %173 : vector<1x1x128xf32> to vector<1x128xf32>
    %175 = vector.broadcast %174 : vector<1x128xf32> to vector<10x128xf32>
    %176 = arith.mulf %172, %175 : vector<10x128xf32>
    %177 = arith.addf %169, %176 : vector<10x128xf32>
    %c0_109 = arith.constant 0 : index
    %c25 = arith.constant 25 : index
    %c0_110 = arith.constant 0 : index
    %178 = vector.load %arg2[%c0_109, %c25, %c0_110] : memref<1x64x128xbf16, #tpu.memory_space<vmem>>, vector<1x10x128xbf16>
    %179 = vector.shape_cast %178 : vector<1x10x128xbf16> to vector<10x128xbf16>
    %180 = arith.extf %179 : vector<10x128xbf16> to vector<10x128xf32>
    %c22_111 = arith.constant 22 : index
    %c0_112 = arith.constant 0 : index
    %c0_113 = arith.constant 0 : index
    %181 = vector.load %arg3[%c22_111, %c0_112, %c0_113] : memref<49x1x128xf32, #tpu.memory_space<vmem>>, vector<1x1x128xf32>
    %182 = vector.shape_cast %181 : vector<1x1x128xf32> to vector<1x128xf32>
    %183 = vector.broadcast %182 : vector<1x128xf32> to vector<10x128xf32>
    %184 = arith.mulf %180, %183 : vector<10x128xf32>
    %185 = arith.addf %177, %184 : vector<10x128xf32>
    %c0_114 = arith.constant 0 : index
    %c26 = arith.constant 26 : index
    %c0_115 = arith.constant 0 : index
    %186 = vector.load %arg2[%c0_114, %c26, %c0_115] : memref<1x64x128xbf16, #tpu.memory_space<vmem>>, vector<1x10x128xbf16>
    %187 = vector.shape_cast %186 : vector<1x10x128xbf16> to vector<10x128xbf16>
    %188 = arith.extf %187 : vector<10x128xbf16> to vector<10x128xf32>
    %c23 = arith.constant 23 : index
    %c0_116 = arith.constant 0 : index
    %c0_117 = arith.constant 0 : index
    %189 = vector.load %arg3[%c23, %c0_116, %c0_117] : memref<49x1x128xf32, #tpu.memory_space<vmem>>, vector<1x1x128xf32>
    %190 = vector.shape_cast %189 : vector<1x1x128xf32> to vector<1x128xf32>
    %191 = vector.broadcast %190 : vector<1x128xf32> to vector<10x128xf32>
    %192 = arith.mulf %188, %191 : vector<10x128xf32>
    %193 = arith.addf %185, %192 : vector<10x128xf32>
    %c0_118 = arith.constant 0 : index
    %c27 = arith.constant 27 : index
    %c0_119 = arith.constant 0 : index
    %194 = vector.load %arg2[%c0_118, %c27, %c0_119] : memref<1x64x128xbf16, #tpu.memory_space<vmem>>, vector<1x10x128xbf16>
    %195 = vector.shape_cast %194 : vector<1x10x128xbf16> to vector<10x128xbf16>
    %196 = arith.extf %195 : vector<10x128xbf16> to vector<10x128xf32>
    %c24_120 = arith.constant 24 : index
    %c0_121 = arith.constant 0 : index
    %c0_122 = arith.constant 0 : index
    %197 = vector.load %arg3[%c24_120, %c0_121, %c0_122] : memref<49x1x128xf32, #tpu.memory_space<vmem>>, vector<1x1x128xf32>
    %198 = vector.shape_cast %197 : vector<1x1x128xf32> to vector<1x128xf32>
    %199 = vector.broadcast %198 : vector<1x128xf32> to vector<10x128xf32>
    %200 = arith.mulf %196, %199 : vector<10x128xf32>
    %201 = arith.addf %193, %200 : vector<10x128xf32>
    %c0_123 = arith.constant 0 : index
    %c28 = arith.constant 28 : index
    %c0_124 = arith.constant 0 : index
    %202 = vector.load %arg2[%c0_123, %c28, %c0_124] : memref<1x64x128xbf16, #tpu.memory_space<vmem>>, vector<1x10x128xbf16>
    %203 = vector.shape_cast %202 : vector<1x10x128xbf16> to vector<10x128xbf16>
    %204 = arith.extf %203 : vector<10x128xbf16> to vector<10x128xf32>
    %c25_125 = arith.constant 25 : index
    %c0_126 = arith.constant 0 : index
    %c0_127 = arith.constant 0 : index
    %205 = vector.load %arg3[%c25_125, %c0_126, %c0_127] : memref<49x1x128xf32, #tpu.memory_space<vmem>>, vector<1x1x128xf32>
    %206 = vector.shape_cast %205 : vector<1x1x128xf32> to vector<1x128xf32>
    %207 = vector.broadcast %206 : vector<1x128xf32> to vector<10x128xf32>
    %208 = arith.mulf %204, %207 : vector<10x128xf32>
    %209 = arith.addf %201, %208 : vector<10x128xf32>
    %c0_128 = arith.constant 0 : index
    %c29 = arith.constant 29 : index
    %c0_129 = arith.constant 0 : index
    %210 = vector.load %arg2[%c0_128, %c29, %c0_129] : memref<1x64x128xbf16, #tpu.memory_space<vmem>>, vector<1x10x128xbf16>
    %211 = vector.shape_cast %210 : vector<1x10x128xbf16> to vector<10x128xbf16>
    %212 = arith.extf %211 : vector<10x128xbf16> to vector<10x128xf32>
    %c26_130 = arith.constant 26 : index
    %c0_131 = arith.constant 0 : index
    %c0_132 = arith.constant 0 : index
    %213 = vector.load %arg3[%c26_130, %c0_131, %c0_132] : memref<49x1x128xf32, #tpu.memory_space<vmem>>, vector<1x1x128xf32>
    %214 = vector.shape_cast %213 : vector<1x1x128xf32> to vector<1x128xf32>
    %215 = vector.broadcast %214 : vector<1x128xf32> to vector<10x128xf32>
    %216 = arith.mulf %212, %215 : vector<10x128xf32>
    %217 = arith.addf %209, %216 : vector<10x128xf32>
    %c0_133 = arith.constant 0 : index
    %c30 = arith.constant 30 : index
    %c0_134 = arith.constant 0 : index
    %218 = vector.load %arg2[%c0_133, %c30, %c0_134] : memref<1x64x128xbf16, #tpu.memory_space<vmem>>, vector<1x10x128xbf16>
    %219 = vector.shape_cast %218 : vector<1x10x128xbf16> to vector<10x128xbf16>
    %220 = arith.extf %219 : vector<10x128xbf16> to vector<10x128xf32>
    %c27_135 = arith.constant 27 : index
    %c0_136 = arith.constant 0 : index
    %c0_137 = arith.constant 0 : index
    %221 = vector.load %arg3[%c27_135, %c0_136, %c0_137] : memref<49x1x128xf32, #tpu.memory_space<vmem>>, vector<1x1x128xf32>
    %222 = vector.shape_cast %221 : vector<1x1x128xf32> to vector<1x128xf32>
    %223 = vector.broadcast %222 : vector<1x128xf32> to vector<10x128xf32>
    %224 = arith.mulf %220, %223 : vector<10x128xf32>
    %225 = arith.addf %217, %224 : vector<10x128xf32>
    %c0_138 = arith.constant 0 : index
    %c32 = arith.constant 32 : index
    %c0_139 = arith.constant 0 : index
    %226 = vector.load %arg2[%c0_138, %c32, %c0_139] : memref<1x64x128xbf16, #tpu.memory_space<vmem>>, vector<1x10x128xbf16>
    %227 = vector.shape_cast %226 : vector<1x10x128xbf16> to vector<10x128xbf16>
    %228 = arith.extf %227 : vector<10x128xbf16> to vector<10x128xf32>
    %c28_140 = arith.constant 28 : index
    %c0_141 = arith.constant 0 : index
    %c0_142 = arith.constant 0 : index
    %229 = vector.load %arg3[%c28_140, %c0_141, %c0_142] : memref<49x1x128xf32, #tpu.memory_space<vmem>>, vector<1x1x128xf32>
    %230 = vector.shape_cast %229 : vector<1x1x128xf32> to vector<1x128xf32>
    %231 = vector.broadcast %230 : vector<1x128xf32> to vector<10x128xf32>
    %232 = arith.mulf %228, %231 : vector<10x128xf32>
    %233 = arith.addf %225, %232 : vector<10x128xf32>
    %c0_143 = arith.constant 0 : index
    %c33 = arith.constant 33 : index
    %c0_144 = arith.constant 0 : index
    %234 = vector.load %arg2[%c0_143, %c33, %c0_144] : memref<1x64x128xbf16, #tpu.memory_space<vmem>>, vector<1x10x128xbf16>
    %235 = vector.shape_cast %234 : vector<1x10x128xbf16> to vector<10x128xbf16>
    %236 = arith.extf %235 : vector<10x128xbf16> to vector<10x128xf32>
    %c29_145 = arith.constant 29 : index
    %c0_146 = arith.constant 0 : index
    %c0_147 = arith.constant 0 : index
    %237 = vector.load %arg3[%c29_145, %c0_146, %c0_147] : memref<49x1x128xf32, #tpu.memory_space<vmem>>, vector<1x1x128xf32>
    %238 = vector.shape_cast %237 : vector<1x1x128xf32> to vector<1x128xf32>
    %239 = vector.broadcast %238 : vector<1x128xf32> to vector<10x128xf32>
    %240 = arith.mulf %236, %239 : vector<10x128xf32>
    %241 = arith.addf %233, %240 : vector<10x128xf32>
    %c0_148 = arith.constant 0 : index
    %c34 = arith.constant 34 : index
    %c0_149 = arith.constant 0 : index
    %242 = vector.load %arg2[%c0_148, %c34, %c0_149] : memref<1x64x128xbf16, #tpu.memory_space<vmem>>, vector<1x10x128xbf16>
    %243 = vector.shape_cast %242 : vector<1x10x128xbf16> to vector<10x128xbf16>
    %244 = arith.extf %243 : vector<10x128xbf16> to vector<10x128xf32>
    %c30_150 = arith.constant 30 : index
    %c0_151 = arith.constant 0 : index
    %c0_152 = arith.constant 0 : index
    %245 = vector.load %arg3[%c30_150, %c0_151, %c0_152] : memref<49x1x128xf32, #tpu.memory_space<vmem>>, vector<1x1x128xf32>
    %246 = vector.shape_cast %245 : vector<1x1x128xf32> to vector<1x128xf32>
    %247 = vector.broadcast %246 : vector<1x128xf32> to vector<10x128xf32>
    %248 = arith.mulf %244, %247 : vector<10x128xf32>
    %249 = arith.addf %241, %248 : vector<10x128xf32>
    %c0_153 = arith.constant 0 : index
    %c35 = arith.constant 35 : index
    %c0_154 = arith.constant 0 : index
    %250 = vector.load %arg2[%c0_153, %c35, %c0_154] : memref<1x64x128xbf16, #tpu.memory_space<vmem>>, vector<1x10x128xbf16>
    %251 = vector.shape_cast %250 : vector<1x10x128xbf16> to vector<10x128xbf16>
    %252 = arith.extf %251 : vector<10x128xbf16> to vector<10x128xf32>
    %c31 = arith.constant 31 : index
    %c0_155 = arith.constant 0 : index
    %c0_156 = arith.constant 0 : index
    %253 = vector.load %arg3[%c31, %c0_155, %c0_156] : memref<49x1x128xf32, #tpu.memory_space<vmem>>, vector<1x1x128xf32>
    %254 = vector.shape_cast %253 : vector<1x1x128xf32> to vector<1x128xf32>
    %255 = vector.broadcast %254 : vector<1x128xf32> to vector<10x128xf32>
    %256 = arith.mulf %252, %255 : vector<10x128xf32>
    %257 = arith.addf %249, %256 : vector<10x128xf32>
    %c0_157 = arith.constant 0 : index
    %c36 = arith.constant 36 : index
    %c0_158 = arith.constant 0 : index
    %258 = vector.load %arg2[%c0_157, %c36, %c0_158] : memref<1x64x128xbf16, #tpu.memory_space<vmem>>, vector<1x10x128xbf16>
    %259 = vector.shape_cast %258 : vector<1x10x128xbf16> to vector<10x128xbf16>
    %260 = arith.extf %259 : vector<10x128xbf16> to vector<10x128xf32>
    %c32_159 = arith.constant 32 : index
    %c0_160 = arith.constant 0 : index
    %c0_161 = arith.constant 0 : index
    %261 = vector.load %arg3[%c32_159, %c0_160, %c0_161] : memref<49x1x128xf32, #tpu.memory_space<vmem>>, vector<1x1x128xf32>
    %262 = vector.shape_cast %261 : vector<1x1x128xf32> to vector<1x128xf32>
    %263 = vector.broadcast %262 : vector<1x128xf32> to vector<10x128xf32>
    %264 = arith.mulf %260, %263 : vector<10x128xf32>
    %265 = arith.addf %257, %264 : vector<10x128xf32>
    %c0_162 = arith.constant 0 : index
    %c37 = arith.constant 37 : index
    %c0_163 = arith.constant 0 : index
    %266 = vector.load %arg2[%c0_162, %c37, %c0_163] : memref<1x64x128xbf16, #tpu.memory_space<vmem>>, vector<1x10x128xbf16>
    %267 = vector.shape_cast %266 : vector<1x10x128xbf16> to vector<10x128xbf16>
    %268 = arith.extf %267 : vector<10x128xbf16> to vector<10x128xf32>
    %c33_164 = arith.constant 33 : index
    %c0_165 = arith.constant 0 : index
    %c0_166 = arith.constant 0 : index
    %269 = vector.load %arg3[%c33_164, %c0_165, %c0_166] : memref<49x1x128xf32, #tpu.memory_space<vmem>>, vector<1x1x128xf32>
    %270 = vector.shape_cast %269 : vector<1x1x128xf32> to vector<1x128xf32>
    %271 = vector.broadcast %270 : vector<1x128xf32> to vector<10x128xf32>
    %272 = arith.mulf %268, %271 : vector<10x128xf32>
    %273 = arith.addf %265, %272 : vector<10x128xf32>
    %c0_167 = arith.constant 0 : index
    %c38 = arith.constant 38 : index
    %c0_168 = arith.constant 0 : index
    %274 = vector.load %arg2[%c0_167, %c38, %c0_168] : memref<1x64x128xbf16, #tpu.memory_space<vmem>>, vector<1x10x128xbf16>
    %275 = vector.shape_cast %274 : vector<1x10x128xbf16> to vector<10x128xbf16>
    %276 = arith.extf %275 : vector<10x128xbf16> to vector<10x128xf32>
    %c34_169 = arith.constant 34 : index
    %c0_170 = arith.constant 0 : index
    %c0_171 = arith.constant 0 : index
    %277 = vector.load %arg3[%c34_169, %c0_170, %c0_171] : memref<49x1x128xf32, #tpu.memory_space<vmem>>, vector<1x1x128xf32>
    %278 = vector.shape_cast %277 : vector<1x1x128xf32> to vector<1x128xf32>
    %279 = vector.broadcast %278 : vector<1x128xf32> to vector<10x128xf32>
    %280 = arith.mulf %276, %279 : vector<10x128xf32>
    %281 = arith.addf %273, %280 : vector<10x128xf32>
    %c0_172 = arith.constant 0 : index
    %c40 = arith.constant 40 : index
    %c0_173 = arith.constant 0 : index
    %282 = vector.load %arg2[%c0_172, %c40, %c0_173] : memref<1x64x128xbf16, #tpu.memory_space<vmem>>, vector<1x10x128xbf16>
    %283 = vector.shape_cast %282 : vector<1x10x128xbf16> to vector<10x128xbf16>
    %284 = arith.extf %283 : vector<10x128xbf16> to vector<10x128xf32>
    %c35_174 = arith.constant 35 : index
    %c0_175 = arith.constant 0 : index
    %c0_176 = arith.constant 0 : index
    %285 = vector.load %arg3[%c35_174, %c0_175, %c0_176] : memref<49x1x128xf32, #tpu.memory_space<vmem>>, vector<1x1x128xf32>
    %286 = vector.shape_cast %285 : vector<1x1x128xf32> to vector<1x128xf32>
    %287 = vector.broadcast %286 : vector<1x128xf32> to vector<10x128xf32>
    %288 = arith.mulf %284, %287 : vector<10x128xf32>
    %289 = arith.addf %281, %288 : vector<10x128xf32>
    %c0_177 = arith.constant 0 : index
    %c41 = arith.constant 41 : index
    %c0_178 = arith.constant 0 : index
    %290 = vector.load %arg2[%c0_177, %c41, %c0_178] : memref<1x64x128xbf16, #tpu.memory_space<vmem>>, vector<1x10x128xbf16>
    %291 = vector.shape_cast %290 : vector<1x10x128xbf16> to vector<10x128xbf16>
    %292 = arith.extf %291 : vector<10x128xbf16> to vector<10x128xf32>
    %c36_179 = arith.constant 36 : index
    %c0_180 = arith.constant 0 : index
    %c0_181 = arith.constant 0 : index
    %293 = vector.load %arg3[%c36_179, %c0_180, %c0_181] : memref<49x1x128xf32, #tpu.memory_space<vmem>>, vector<1x1x128xf32>
    %294 = vector.shape_cast %293 : vector<1x1x128xf32> to vector<1x128xf32>
    %295 = vector.broadcast %294 : vector<1x128xf32> to vector<10x128xf32>
    %296 = arith.mulf %292, %295 : vector<10x128xf32>
    %297 = arith.addf %289, %296 : vector<10x128xf32>
    %c0_182 = arith.constant 0 : index
    %c42 = arith.constant 42 : index
    %c0_183 = arith.constant 0 : index
    %298 = vector.load %arg2[%c0_182, %c42, %c0_183] : memref<1x64x128xbf16, #tpu.memory_space<vmem>>, vector<1x10x128xbf16>
    %299 = vector.shape_cast %298 : vector<1x10x128xbf16> to vector<10x128xbf16>
    %300 = arith.extf %299 : vector<10x128xbf16> to vector<10x128xf32>
    %c37_184 = arith.constant 37 : index
    %c0_185 = arith.constant 0 : index
    %c0_186 = arith.constant 0 : index
    %301 = vector.load %arg3[%c37_184, %c0_185, %c0_186] : memref<49x1x128xf32, #tpu.memory_space<vmem>>, vector<1x1x128xf32>
    %302 = vector.shape_cast %301 : vector<1x1x128xf32> to vector<1x128xf32>
    %303 = vector.broadcast %302 : vector<1x128xf32> to vector<10x128xf32>
    %304 = arith.mulf %300, %303 : vector<10x128xf32>
    %305 = arith.addf %297, %304 : vector<10x128xf32>
    %c0_187 = arith.constant 0 : index
    %c43 = arith.constant 43 : index
    %c0_188 = arith.constant 0 : index
    %306 = vector.load %arg2[%c0_187, %c43, %c0_188] : memref<1x64x128xbf16, #tpu.memory_space<vmem>>, vector<1x10x128xbf16>
    %307 = vector.shape_cast %306 : vector<1x10x128xbf16> to vector<10x128xbf16>
    %308 = arith.extf %307 : vector<10x128xbf16> to vector<10x128xf32>
    %c38_189 = arith.constant 38 : index
    %c0_190 = arith.constant 0 : index
    %c0_191 = arith.constant 0 : index
    %309 = vector.load %arg3[%c38_189, %c0_190, %c0_191] : memref<49x1x128xf32, #tpu.memory_space<vmem>>, vector<1x1x128xf32>
    %310 = vector.shape_cast %309 : vector<1x1x128xf32> to vector<1x128xf32>
    %311 = vector.broadcast %310 : vector<1x128xf32> to vector<10x128xf32>
    %312 = arith.mulf %308, %311 : vector<10x128xf32>
    %313 = arith.addf %305, %312 : vector<10x128xf32>
    %c0_192 = arith.constant 0 : index
    %c44 = arith.constant 44 : index
    %c0_193 = arith.constant 0 : index
    %314 = vector.load %arg2[%c0_192, %c44, %c0_193] : memref<1x64x128xbf16, #tpu.memory_space<vmem>>, vector<1x10x128xbf16>
    %315 = vector.shape_cast %314 : vector<1x10x128xbf16> to vector<10x128xbf16>
    %316 = arith.extf %315 : vector<10x128xbf16> to vector<10x128xf32>
    %c39 = arith.constant 39 : index
    %c0_194 = arith.constant 0 : index
    %c0_195 = arith.constant 0 : index
    %317 = vector.load %arg3[%c39, %c0_194, %c0_195] : memref<49x1x128xf32, #tpu.memory_space<vmem>>, vector<1x1x128xf32>
    %318 = vector.shape_cast %317 : vector<1x1x128xf32> to vector<1x128xf32>
    %319 = vector.broadcast %318 : vector<1x128xf32> to vector<10x128xf32>
    %320 = arith.mulf %316, %319 : vector<10x128xf32>
    %321 = arith.addf %313, %320 : vector<10x128xf32>
    %c0_196 = arith.constant 0 : index
    %c45 = arith.constant 45 : index
    %c0_197 = arith.constant 0 : index
    %322 = vector.load %arg2[%c0_196, %c45, %c0_197] : memref<1x64x128xbf16, #tpu.memory_space<vmem>>, vector<1x10x128xbf16>
    %323 = vector.shape_cast %322 : vector<1x10x128xbf16> to vector<10x128xbf16>
    %324 = arith.extf %323 : vector<10x128xbf16> to vector<10x128xf32>
    %c40_198 = arith.constant 40 : index
    %c0_199 = arith.constant 0 : index
    %c0_200 = arith.constant 0 : index
    %325 = vector.load %arg3[%c40_198, %c0_199, %c0_200] : memref<49x1x128xf32, #tpu.memory_space<vmem>>, vector<1x1x128xf32>
    %326 = vector.shape_cast %325 : vector<1x1x128xf32> to vector<1x128xf32>
    %327 = vector.broadcast %326 : vector<1x128xf32> to vector<10x128xf32>
    %328 = arith.mulf %324, %327 : vector<10x128xf32>
    %329 = arith.addf %321, %328 : vector<10x128xf32>
    %c0_201 = arith.constant 0 : index
    %c46 = arith.constant 46 : index
    %c0_202 = arith.constant 0 : index
    %330 = vector.load %arg2[%c0_201, %c46, %c0_202] : memref<1x64x128xbf16, #tpu.memory_space<vmem>>, vector<1x10x128xbf16>
    %331 = vector.shape_cast %330 : vector<1x10x128xbf16> to vector<10x128xbf16>
    %332 = arith.extf %331 : vector<10x128xbf16> to vector<10x128xf32>
    %c41_203 = arith.constant 41 : index
    %c0_204 = arith.constant 0 : index
    %c0_205 = arith.constant 0 : index
    %333 = vector.load %arg3[%c41_203, %c0_204, %c0_205] : memref<49x1x128xf32, #tpu.memory_space<vmem>>, vector<1x1x128xf32>
    %334 = vector.shape_cast %333 : vector<1x1x128xf32> to vector<1x128xf32>
    %335 = vector.broadcast %334 : vector<1x128xf32> to vector<10x128xf32>
    %336 = arith.mulf %332, %335 : vector<10x128xf32>
    %337 = arith.addf %329, %336 : vector<10x128xf32>
    %c0_206 = arith.constant 0 : index
    %c48 = arith.constant 48 : index
    %c0_207 = arith.constant 0 : index
    %338 = vector.load %arg2[%c0_206, %c48, %c0_207] : memref<1x64x128xbf16, #tpu.memory_space<vmem>>, vector<1x10x128xbf16>
    %339 = vector.shape_cast %338 : vector<1x10x128xbf16> to vector<10x128xbf16>
    %340 = arith.extf %339 : vector<10x128xbf16> to vector<10x128xf32>
    %c42_208 = arith.constant 42 : index
    %c0_209 = arith.constant 0 : index
    %c0_210 = arith.constant 0 : index
    %341 = vector.load %arg3[%c42_208, %c0_209, %c0_210] : memref<49x1x128xf32, #tpu.memory_space<vmem>>, vector<1x1x128xf32>
    %342 = vector.shape_cast %341 : vector<1x1x128xf32> to vector<1x128xf32>
    %343 = vector.broadcast %342 : vector<1x128xf32> to vector<10x128xf32>
    %344 = arith.mulf %340, %343 : vector<10x128xf32>
    %345 = arith.addf %337, %344 : vector<10x128xf32>
    %c0_211 = arith.constant 0 : index
    %c49 = arith.constant 49 : index
    %c0_212 = arith.constant 0 : index
    %346 = vector.load %arg2[%c0_211, %c49, %c0_212] : memref<1x64x128xbf16, #tpu.memory_space<vmem>>, vector<1x10x128xbf16>
    %347 = vector.shape_cast %346 : vector<1x10x128xbf16> to vector<10x128xbf16>
    %348 = arith.extf %347 : vector<10x128xbf16> to vector<10x128xf32>
    %c43_213 = arith.constant 43 : index
    %c0_214 = arith.constant 0 : index
    %c0_215 = arith.constant 0 : index
    %349 = vector.load %arg3[%c43_213, %c0_214, %c0_215] : memref<49x1x128xf32, #tpu.memory_space<vmem>>, vector<1x1x128xf32>
    %350 = vector.shape_cast %349 : vector<1x1x128xf32> to vector<1x128xf32>
    %351 = vector.broadcast %350 : vector<1x128xf32> to vector<10x128xf32>
    %352 = arith.mulf %348, %351 : vector<10x128xf32>
    %353 = arith.addf %345, %352 : vector<10x128xf32>
    %c0_216 = arith.constant 0 : index
    %c50 = arith.constant 50 : index
    %c0_217 = arith.constant 0 : index
    %354 = vector.load %arg2[%c0_216, %c50, %c0_217] : memref<1x64x128xbf16, #tpu.memory_space<vmem>>, vector<1x10x128xbf16>
    %355 = vector.shape_cast %354 : vector<1x10x128xbf16> to vector<10x128xbf16>
    %356 = arith.extf %355 : vector<10x128xbf16> to vector<10x128xf32>
    %c44_218 = arith.constant 44 : index
    %c0_219 = arith.constant 0 : index
    %c0_220 = arith.constant 0 : index
    %357 = vector.load %arg3[%c44_218, %c0_219, %c0_220] : memref<49x1x128xf32, #tpu.memory_space<vmem>>, vector<1x1x128xf32>
    %358 = vector.shape_cast %357 : vector<1x1x128xf32> to vector<1x128xf32>
    %359 = vector.broadcast %358 : vector<1x128xf32> to vector<10x128xf32>
    %360 = arith.mulf %356, %359 : vector<10x128xf32>
    %361 = arith.addf %353, %360 : vector<10x128xf32>
    %c0_221 = arith.constant 0 : index
    %c51 = arith.constant 51 : index
    %c0_222 = arith.constant 0 : index
    %362 = vector.load %arg2[%c0_221, %c51, %c0_222] : memref<1x64x128xbf16, #tpu.memory_space<vmem>>, vector<1x10x128xbf16>
    %363 = vector.shape_cast %362 : vector<1x10x128xbf16> to vector<10x128xbf16>
    %364 = arith.extf %363 : vector<10x128xbf16> to vector<10x128xf32>
    %c45_223 = arith.constant 45 : index
    %c0_224 = arith.constant 0 : index
    %c0_225 = arith.constant 0 : index
    %365 = vector.load %arg3[%c45_223, %c0_224, %c0_225] : memref<49x1x128xf32, #tpu.memory_space<vmem>>, vector<1x1x128xf32>
    %366 = vector.shape_cast %365 : vector<1x1x128xf32> to vector<1x128xf32>
    %367 = vector.broadcast %366 : vector<1x128xf32> to vector<10x128xf32>
    %368 = arith.mulf %364, %367 : vector<10x128xf32>
    %369 = arith.addf %361, %368 : vector<10x128xf32>
    %c0_226 = arith.constant 0 : index
    %c52 = arith.constant 52 : index
    %c0_227 = arith.constant 0 : index
    %370 = vector.load %arg2[%c0_226, %c52, %c0_227] : memref<1x64x128xbf16, #tpu.memory_space<vmem>>, vector<1x10x128xbf16>
    %371 = vector.shape_cast %370 : vector<1x10x128xbf16> to vector<10x128xbf16>
    %372 = arith.extf %371 : vector<10x128xbf16> to vector<10x128xf32>
    %c46_228 = arith.constant 46 : index
    %c0_229 = arith.constant 0 : index
    %c0_230 = arith.constant 0 : index
    %373 = vector.load %arg3[%c46_228, %c0_229, %c0_230] : memref<49x1x128xf32, #tpu.memory_space<vmem>>, vector<1x1x128xf32>
    %374 = vector.shape_cast %373 : vector<1x1x128xf32> to vector<1x128xf32>
    %375 = vector.broadcast %374 : vector<1x128xf32> to vector<10x128xf32>
    %376 = arith.mulf %372, %375 : vector<10x128xf32>
    %377 = arith.addf %369, %376 : vector<10x128xf32>
    %c0_231 = arith.constant 0 : index
    %c53 = arith.constant 53 : index
    %c0_232 = arith.constant 0 : index
    %378 = vector.load %arg2[%c0_231, %c53, %c0_232] : memref<1x64x128xbf16, #tpu.memory_space<vmem>>, vector<1x10x128xbf16>
    %379 = vector.shape_cast %378 : vector<1x10x128xbf16> to vector<10x128xbf16>
    %380 = arith.extf %379 : vector<10x128xbf16> to vector<10x128xf32>
    %c47 = arith.constant 47 : index
    %c0_233 = arith.constant 0 : index
    %c0_234 = arith.constant 0 : index
    %381 = vector.load %arg3[%c47, %c0_233, %c0_234] : memref<49x1x128xf32, #tpu.memory_space<vmem>>, vector<1x1x128xf32>
    %382 = vector.shape_cast %381 : vector<1x1x128xf32> to vector<1x128xf32>
    %383 = vector.broadcast %382 : vector<1x128xf32> to vector<10x128xf32>
    %384 = arith.mulf %380, %383 : vector<10x128xf32>
    %385 = arith.addf %377, %384 : vector<10x128xf32>
    %c0_235 = arith.constant 0 : index
    %c54 = arith.constant 54 : index
    %c0_236 = arith.constant 0 : index
    %386 = vector.load %arg2[%c0_235, %c54, %c0_236] : memref<1x64x128xbf16, #tpu.memory_space<vmem>>, vector<1x10x128xbf16>
    %387 = vector.shape_cast %386 : vector<1x10x128xbf16> to vector<10x128xbf16>
    %388 = arith.extf %387 : vector<10x128xbf16> to vector<10x128xf32>
    %c48_237 = arith.constant 48 : index
    %c0_238 = arith.constant 0 : index
    %c0_239 = arith.constant 0 : index
    %389 = vector.load %arg3[%c48_237, %c0_238, %c0_239] : memref<49x1x128xf32, #tpu.memory_space<vmem>>, vector<1x1x128xf32>
    %390 = vector.shape_cast %389 : vector<1x1x128xf32> to vector<1x128xf32>
    %391 = vector.broadcast %390 : vector<1x128xf32> to vector<10x128xf32>
    %392 = arith.mulf %388, %391 : vector<10x128xf32>
    %393 = arith.addf %385, %392 : vector<10x128xf32>
    %c0_240 = arith.constant 0 : index
    %c0_241 = arith.constant 0 : index
    %394 = vector.load %arg4[%c0_240, %c0_241] : memref<1x128xf32, #tpu.memory_space<vmem>>, vector<1x128xf32>
    %395 = vector.broadcast %394 : vector<1x128xf32> to vector<10x128xf32>
    %396 = arith.mulf %393, %395 : vector<10x128xf32>
    %c0_242 = arith.constant 0 : index
    %c0_243 = arith.constant 0 : index
    %397 = vector.load %arg5[%c0_242, %c0_243] : memref<1x128xf32, #tpu.memory_space<vmem>>, vector<1x128xf32>
    %398 = vector.broadcast %397 : vector<1x128xf32> to vector<10x128xf32>
    %399 = arith.addf %396, %398 : vector<10x128xf32>
    %cst = arith.constant 0.000000e+00 : f32
    %400 = vector.broadcast %cst : f32 to vector<10x128xf32>
    %401 = arith.maximumf %399, %400 : vector<10x128xf32>
    %c0_244 = arith.constant 0 : index
    %c0_245 = arith.constant 0 : index
    %402 = vector.load %arg10[%c0_244, %c0_245] : memref<10x128xf32, #tpu.memory_space<vmem>>, vector<10x128xf32>
    %403 = arith.truncf %401 : vector<10x128xf32> to vector<10x128xbf16>
    %c0_246 = arith.constant 0 : index
    %c0_247 = arith.constant 0 : index
    %404 = vector.load %arg6[%c0_246, %c0_247] : memref<128x128xbf16, #tpu.memory_space<vmem>>, vector<128x128xbf16>
    %cst_248 = arith.constant dense<0.000000e+00> : vector<10x128xf32>
    %405 = tpu.matmul %403, %404, %cst_248 {dimension_numbers = #tpu.dot_dimension_numbers<[1], [0], [0], [1], [0, 0, 1, 1], [], []>} : vector<10x128xbf16>, vector<128x128xbf16>, vector<10x128xf32> -> vector<10x128xf32>
    %406 = arith.addf %402, %405 : vector<10x128xf32>
    %c0_249 = arith.constant 0 : index
    %c0_250 = arith.constant 0 : index
    %407 = vector.load %arg10[%c0_249, %c0_250] : memref<10x128xf32, #tpu.memory_space<vmem>>, vector<10x128xf32>
    tpu.vector_store %arg10[%c0_249, %c0_250], %406 {strides = array<i32>} : memref<10x128xf32, #tpu.memory_space<vmem>>, vector<10x128xf32>,
    %c0_i32_251 = arith.constant 0 : i32
    %408 = arith.cmpi eq, %arg1, %c0_i32_251 : i32
    %409 = arith.extui %408 : i1 to i32
    %c0_i32_252 = arith.constant 0 : i32
    %410 = arith.cmpi ne, %409, %c0_i32_252 : i32
    scf.if %410 {
      %c0_253 = arith.constant 0 : index
      %c0_254 = arith.constant 0 : index
      %411 = vector.load %arg10[%c0_253, %c0_254] : memref<10x128xf32, #tpu.memory_space<vmem>>, vector<10x128xf32>
      %c0_255 = arith.constant 0 : index
      %c0_256 = arith.constant 0 : index
      %412 = vector.load %arg7[%c0_255, %c0_256] : memref<1x128xf32, #tpu.memory_space<vmem>>, vector<1x128xf32>
      %413 = vector.broadcast %412 : vector<1x128xf32> to vector<10x128xf32>
      %414 = arith.mulf %411, %413 : vector<10x128xf32>
      %c0_257 = arith.constant 0 : index
      %c0_258 = arith.constant 0 : index
      %415 = vector.load %arg8[%c0_257, %c0_258] : memref<1x128xf32, #tpu.memory_space<vmem>>, vector<1x128xf32>
      %416 = vector.broadcast %415 : vector<1x128xf32> to vector<10x128xf32>
      %417 = arith.addf %414, %416 : vector<10x128xf32>
      %cst_259 = arith.constant 0.000000e+00 : f32
      %418 = vector.broadcast %cst_259 : f32 to vector<10x128xf32>
      %419 = arith.maximumf %417, %418 : vector<10x128xf32>
      %420 = arith.truncf %419 : vector<10x128xf32> to vector<10x128xbf16>
      %c0_260 = arith.constant 0 : index
      %c0_261 = arith.constant 0 : index
      %c0_262 = arith.constant 0 : index
      %421 = vector.load %arg9[%c0_260, %c0_261, %c0_262] : memref<1x10x128xbf16, #tpu.memory_space<vmem>>, vector<1x10x128xbf16>
      %422 = vector.shape_cast %421 : vector<1x10x128xbf16> to vector<10x128xbf16>
      %423 = vector.shape_cast %420 : vector<10x128xbf16> to vector<1x10x128xbf16>
      tpu.vector_store %arg9[%c0_260, %c0_261, %c0_262], %423 {strides = array<i32>} : memref<1x10x128xbf16, #tpu.memory_space<vmem>>, vector<1x10x128xbf16>,
    } else {
    }
    return
  }
  func.func @transform_0(%arg0: i32, %arg1: i32) -> (i32, i32, i32) {
    %c0_i32 = arith.constant 0 : i32
    %c0_i32_0 = arith.constant 0 : i32
    return %arg0, %c0_i32, %arg1 : i32, i32, i32
  }
  func.func @transform_1(%arg0: i32, %arg1: i32) -> (i32, i32, i32) {
    %c0_i32 = arith.constant 0 : i32
    %c0_i32_0 = arith.constant 0 : i32
    %c0_i32_1 = arith.constant 0 : i32
    return %c0_i32, %c0_i32_0, %arg1 : i32, i32, i32
  }
  func.func @transform_2(%arg0: i32, %arg1: i32) -> (i32, i32) {
    %c0_i32 = arith.constant 0 : i32
    %c0_i32_0 = arith.constant 0 : i32
    return %c0_i32, %arg1 : i32, i32
  }
  func.func @transform_3(%arg0: i32, %arg1: i32) -> (i32, i32) {
    %c0_i32 = arith.constant 0 : i32
    %c0_i32_0 = arith.constant 0 : i32
    return %c0_i32, %arg1 : i32, i32
  }
  func.func @transform_4(%arg0: i32, %arg1: i32) -> (i32, i32) {
    %c0_i32 = arith.constant 0 : i32
    %c0_i32_0 = arith.constant 0 : i32
    return %arg1, %c0_i32 : i32, i32
  }
  func.func @transform_5(%arg0: i32, %arg1: i32) -> (i32, i32) {
    %c0_i32 = arith.constant 0 : i32
    %c0_i32_0 = arith.constant 0 : i32
    %c0_i32_1 = arith.constant 0 : i32
    return %c0_i32, %c0_i32_0 : i32, i32
  }
  func.func @transform_6(%arg0: i32, %arg1: i32) -> (i32, i32) {
    %c0_i32 = arith.constant 0 : i32
    %c0_i32_0 = arith.constant 0 : i32
    %c0_i32_1 = arith.constant 0 : i32
    return %c0_i32, %c0_i32_0 : i32, i32
  }
  func.func @transform_7(%arg0: i32, %arg1: i32) -> (i32, i32, i32) {
    %c0_i32 = arith.constant 0 : i32
    %c0_i32_0 = arith.constant 0 : i32
    %c0_i32_1 = arith.constant 0 : i32
    return %arg0, %c0_i32, %c0_i32_0 : i32, i32, i32
  }
}

module attributes {stable_mosaic.version = 11 : i64} {
  func.func @_conv_dw_kernel(%arg0: i32, %arg1: i32, %arg2: memref<1x4x128xbf16, #tpu.memory_space<vmem>>, %arg3: memref<1x1x128xf32, #tpu.memory_space<vmem>>, %arg4: memref<1x128xf32, #tpu.memory_space<vmem>>, %arg5: memref<1x128xf32, #tpu.memory_space<vmem>>, %arg6: memref<128x128xbf16, #tpu.memory_space<vmem>>, %arg7: memref<1x128xf32, #tpu.memory_space<vmem>>, %arg8: memref<1x128xf32, #tpu.memory_space<vmem>>, %arg9: memref<128x8xbf16, #tpu.memory_space<vmem>>, %arg10: memref<1x8xf32, #tpu.memory_space<vmem>>, %arg11: memref<1x4x8xf32, #tpu.memory_space<vmem>>, %arg12: memref<4x128xf32, #tpu.memory_space<vmem>>) attributes {dimension_semantics = [#tpu.dimension_semantics<parallel>, #tpu.dimension_semantics<arbitrary>], iteration_bounds = array<i64: 2, 1>, scalar_prefetch = 0 : i64, scratch_operands = 1 : i64, tpu.core_type = #tpu.core_type<tc>, window_params = [{transform_indices = @transform_0, window_bounds = array<i64: 1, 4, 128>}, {transform_indices = @transform_1, window_bounds = array<i64: 1, 1, 128>}, {transform_indices = @transform_2, window_bounds = array<i64: 1, 128>}, {transform_indices = @transform_3, window_bounds = array<i64: 1, 128>}, {transform_indices = @transform_4, window_bounds = array<i64: 128, 128>}, {pipeline_mode = #tpu.pipeline_mode<synchronous>, transform_indices = @transform_5, window_bounds = array<i64: 1, 128>}, {pipeline_mode = #tpu.pipeline_mode<synchronous>, transform_indices = @transform_6, window_bounds = array<i64: 1, 128>}, {pipeline_mode = #tpu.pipeline_mode<synchronous>, transform_indices = @transform_7, window_bounds = array<i64: 128, 8>}, {pipeline_mode = #tpu.pipeline_mode<synchronous>, transform_indices = @transform_8, window_bounds = array<i64: 1, 8>}, {transform_indices = @transform_9, window_bounds = array<i64: 1, 4, 8>}]} {
    %c0_i32 = arith.constant 0 : i32
    %0 = arith.cmpi eq, %arg1, %c0_i32 : i32
    %1 = arith.extui %0 : i1 to i32
    %c0_i32_0 = arith.constant 0 : i32
    %2 = arith.cmpi ne, %1, %c0_i32_0 : i32
    scf.if %2 {
      %cst_19 = arith.constant 0.000000e+00 : f32
      %27 = vector.broadcast %cst_19 : f32 to vector<4x128xf32>
      %c0_20 = arith.constant 0 : index
      %c0_21 = arith.constant 0 : index
      %28 = vector.load %arg12[%c0_20, %c0_21] : memref<4x128xf32, #tpu.memory_space<vmem>>, vector<4x128xf32>
      tpu.vector_store %arg12[%c0_20, %c0_21], %27 {strides = array<i32>} : memref<4x128xf32, #tpu.memory_space<vmem>>, vector<4x128xf32>,
    } else {
    }
    %c0 = arith.constant 0 : index
    %c0_1 = arith.constant 0 : index
    %c0_2 = arith.constant 0 : index
    %3 = vector.load %arg2[%c0, %c0_1, %c0_2] : memref<1x4x128xbf16, #tpu.memory_space<vmem>>, vector<1x4x128xbf16>
    %4 = vector.shape_cast %3 : vector<1x4x128xbf16> to vector<4x128xbf16>
    %5 = arith.extf %4 : vector<4x128xbf16> to vector<4x128xf32>
    %c0_3 = arith.constant 0 : index
    %c0_4 = arith.constant 0 : index
    %c0_5 = arith.constant 0 : index
    %6 = vector.load %arg3[%c0_3, %c0_4, %c0_5] : memref<1x1x128xf32, #tpu.memory_space<vmem>>, vector<1x1x128xf32>
    %7 = vector.shape_cast %6 : vector<1x1x128xf32> to vector<1x128xf32>
    %8 = vector.broadcast %7 : vector<1x128xf32> to vector<4x128xf32>
    %9 = arith.mulf %5, %8 : vector<4x128xf32>
    %c0_6 = arith.constant 0 : index
    %c0_7 = arith.constant 0 : index
    %10 = vector.load %arg4[%c0_6, %c0_7] : memref<1x128xf32, #tpu.memory_space<vmem>>, vector<1x128xf32>
    %11 = vector.broadcast %10 : vector<1x128xf32> to vector<4x128xf32>
    %12 = arith.mulf %9, %11 : vector<4x128xf32>
    %c0_8 = arith.constant 0 : index
    %c0_9 = arith.constant 0 : index
    %13 = vector.load %arg5[%c0_8, %c0_9] : memref<1x128xf32, #tpu.memory_space<vmem>>, vector<1x128xf32>
    %14 = vector.broadcast %13 : vector<1x128xf32> to vector<4x128xf32>
    %15 = arith.addf %12, %14 : vector<4x128xf32>
    %cst = arith.constant 0.000000e+00 : f32
    %16 = vector.broadcast %cst : f32 to vector<4x128xf32>
    %17 = arith.maximumf %15, %16 : vector<4x128xf32>
    %c0_10 = arith.constant 0 : index
    %c0_11 = arith.constant 0 : index
    %18 = vector.load %arg12[%c0_10, %c0_11] : memref<4x128xf32, #tpu.memory_space<vmem>>, vector<4x128xf32>
    %19 = arith.truncf %17 : vector<4x128xf32> to vector<4x128xbf16>
    %c0_12 = arith.constant 0 : index
    %c0_13 = arith.constant 0 : index
    %20 = vector.load %arg6[%c0_12, %c0_13] : memref<128x128xbf16, #tpu.memory_space<vmem>>, vector<128x128xbf16>
    %cst_14 = arith.constant dense<0.000000e+00> : vector<4x128xf32>
    %21 = tpu.matmul %19, %20, %cst_14 {dimension_numbers = #tpu.dot_dimension_numbers<[1], [0], [0], [1], [0, 0, 1, 1], [], []>} : vector<4x128xbf16>, vector<128x128xbf16>, vector<4x128xf32> -> vector<4x128xf32>
    %22 = arith.addf %18, %21 : vector<4x128xf32>
    %c0_15 = arith.constant 0 : index
    %c0_16 = arith.constant 0 : index
    %23 = vector.load %arg12[%c0_15, %c0_16] : memref<4x128xf32, #tpu.memory_space<vmem>>, vector<4x128xf32>
    tpu.vector_store %arg12[%c0_15, %c0_16], %22 {strides = array<i32>} : memref<4x128xf32, #tpu.memory_space<vmem>>, vector<4x128xf32>,
    %c0_i32_17 = arith.constant 0 : i32
    %24 = arith.cmpi eq, %arg1, %c0_i32_17 : i32
    %25 = arith.extui %24 : i1 to i32
    %c0_i32_18 = arith.constant 0 : i32
    %26 = arith.cmpi ne, %25, %c0_i32_18 : i32
    scf.if %26 {
      %c0_19 = arith.constant 0 : index
      %c0_20 = arith.constant 0 : index
      %27 = vector.load %arg12[%c0_19, %c0_20] : memref<4x128xf32, #tpu.memory_space<vmem>>, vector<4x128xf32>
      %c0_21 = arith.constant 0 : index
      %c0_22 = arith.constant 0 : index
      %28 = vector.load %arg7[%c0_21, %c0_22] : memref<1x128xf32, #tpu.memory_space<vmem>>, vector<1x128xf32>
      %29 = vector.broadcast %28 : vector<1x128xf32> to vector<4x128xf32>
      %30 = arith.mulf %27, %29 : vector<4x128xf32>
      %c0_23 = arith.constant 0 : index
      %c0_24 = arith.constant 0 : index
      %31 = vector.load %arg8[%c0_23, %c0_24] : memref<1x128xf32, #tpu.memory_space<vmem>>, vector<1x128xf32>
      %32 = vector.broadcast %31 : vector<1x128xf32> to vector<4x128xf32>
      %33 = arith.addf %30, %32 : vector<4x128xf32>
      %cst_25 = arith.constant 0.000000e+00 : f32
      %34 = vector.broadcast %cst_25 : f32 to vector<4x128xf32>
      %35 = arith.maximumf %33, %34 : vector<4x128xf32>
      %36 = arith.truncf %35 : vector<4x128xf32> to vector<4x128xbf16>
      %c0_26 = arith.constant 0 : index
      %c0_27 = arith.constant 0 : index
      %37 = vector.load %arg9[%c0_26, %c0_27] : memref<128x8xbf16, #tpu.memory_space<vmem>>, vector<128x8xbf16>
      %cst_28 = arith.constant dense<0.000000e+00> : vector<4x8xf32>
      %38 = tpu.matmul %36, %37, %cst_28 {dimension_numbers = #tpu.dot_dimension_numbers<[1], [0], [0], [1], [0, 0, 1, 1], [], []>} : vector<4x128xbf16>, vector<128x8xbf16>, vector<4x8xf32> -> vector<4x8xf32>
      %c0_29 = arith.constant 0 : index
      %c0_30 = arith.constant 0 : index
      %39 = vector.load %arg10[%c0_29, %c0_30] : memref<1x8xf32, #tpu.memory_space<vmem>>, vector<1x8xf32>
      %40 = vector.broadcast %39 : vector<1x8xf32> to vector<4x8xf32>
      %41 = arith.addf %38, %40 : vector<4x8xf32>
      %c0_31 = arith.constant 0 : index
      %c0_32 = arith.constant 0 : index
      %c0_33 = arith.constant 0 : index
      %42 = vector.load %arg11[%c0_31, %c0_32, %c0_33] : memref<1x4x8xf32, #tpu.memory_space<vmem>>, vector<1x4x8xf32>
      %43 = vector.shape_cast %42 : vector<1x4x8xf32> to vector<4x8xf32>
      %44 = vector.shape_cast %41 : vector<4x8xf32> to vector<1x4x8xf32>
      tpu.vector_store %arg11[%c0_31, %c0_32, %c0_33], %44 {strides = array<i32>} : memref<1x4x8xf32, #tpu.memory_space<vmem>>, vector<1x4x8xf32>,
    } else {
    }
    return
  }
  func.func @transform_0(%arg0: i32, %arg1: i32) -> (i32, i32, i32) {
    %c0_i32 = arith.constant 0 : i32
    %c0_i32_0 = arith.constant 0 : i32
    return %arg0, %c0_i32, %arg1 : i32, i32, i32
  }
  func.func @transform_1(%arg0: i32, %arg1: i32) -> (i32, i32, i32) {
    %c0_i32 = arith.constant 0 : i32
    %c0_i32_0 = arith.constant 0 : i32
    %c0_i32_1 = arith.constant 0 : i32
    return %c0_i32, %c0_i32_0, %arg1 : i32, i32, i32
  }
  func.func @transform_2(%arg0: i32, %arg1: i32) -> (i32, i32) {
    %c0_i32 = arith.constant 0 : i32
    %c0_i32_0 = arith.constant 0 : i32
    return %c0_i32, %arg1 : i32, i32
  }
  func.func @transform_3(%arg0: i32, %arg1: i32) -> (i32, i32) {
    %c0_i32 = arith.constant 0 : i32
    %c0_i32_0 = arith.constant 0 : i32
    return %c0_i32, %arg1 : i32, i32
  }
  func.func @transform_4(%arg0: i32, %arg1: i32) -> (i32, i32) {
    %c0_i32 = arith.constant 0 : i32
    %c0_i32_0 = arith.constant 0 : i32
    return %arg1, %c0_i32 : i32, i32
  }
  func.func @transform_5(%arg0: i32, %arg1: i32) -> (i32, i32) {
    %c0_i32 = arith.constant 0 : i32
    %c0_i32_0 = arith.constant 0 : i32
    %c0_i32_1 = arith.constant 0 : i32
    return %c0_i32, %c0_i32_0 : i32, i32
  }
  func.func @transform_6(%arg0: i32, %arg1: i32) -> (i32, i32) {
    %c0_i32 = arith.constant 0 : i32
    %c0_i32_0 = arith.constant 0 : i32
    %c0_i32_1 = arith.constant 0 : i32
    return %c0_i32, %c0_i32_0 : i32, i32
  }
  func.func @transform_7(%arg0: i32, %arg1: i32) -> (i32, i32) {
    %c0_i32 = arith.constant 0 : i32
    %c0_i32_0 = arith.constant 0 : i32
    %c0_i32_1 = arith.constant 0 : i32
    return %c0_i32, %c0_i32_0 : i32, i32
  }
  func.func @transform_8(%arg0: i32, %arg1: i32) -> (i32, i32) {
    %c0_i32 = arith.constant 0 : i32
    %c0_i32_0 = arith.constant 0 : i32
    %c0_i32_1 = arith.constant 0 : i32
    return %c0_i32, %c0_i32_0 : i32, i32
  }
  func.func @transform_9(%arg0: i32, %arg1: i32) -> (i32, i32, i32) {
    %c0_i32 = arith.constant 0 : i32
    %c0_i32_0 = arith.constant 0 : i32
    %c0_i32_1 = arith.constant 0 : i32
    return %arg0, %c0_i32, %c0_i32_0 : i32, i32, i32
  }
}

module attributes {stable_mosaic.version = 11 : i64} {
  func.func @_conv_dw_kernel(%arg0: i32, %arg1: i32, %arg2: memref<1x4x128xbf16, #tpu.memory_space<vmem>>, %arg3: memref<1x1x128xf32, #tpu.memory_space<vmem>>, %arg4: memref<1x128xf32, #tpu.memory_space<vmem>>, %arg5: memref<1x128xf32, #tpu.memory_space<vmem>>, %arg6: memref<128x128xbf16, #tpu.memory_space<vmem>>, %arg7: memref<1x128xf32, #tpu.memory_space<vmem>>, %arg8: memref<1x128xf32, #tpu.memory_space<vmem>>, %arg9: memref<128x8xbf16, #tpu.memory_space<vmem>>, %arg10: memref<1x8xf32, #tpu.memory_space<vmem>>, %arg11: memref<1x4x8xf32, #tpu.memory_space<vmem>>, %arg12: memref<4x128xf32, #tpu.memory_space<vmem>>) attributes {dimension_semantics = [#tpu.dimension_semantics<parallel>, #tpu.dimension_semantics<arbitrary>], iteration_bounds = array<i64: 2, 1>, scalar_prefetch = 0 : i64, scratch_operands = 1 : i64, tpu.core_type = #tpu.core_type<tc>, window_params = [{transform_indices = @transform_0, window_bounds = array<i64: 1, 4, 128>}, {transform_indices = @transform_1, window_bounds = array<i64: 1, 1, 128>}, {transform_indices = @transform_2, window_bounds = array<i64: 1, 128>}, {transform_indices = @transform_3, window_bounds = array<i64: 1, 128>}, {transform_indices = @transform_4, window_bounds = array<i64: 128, 128>}, {pipeline_mode = #tpu.pipeline_mode<synchronous>, transform_indices = @transform_5, window_bounds = array<i64: 1, 128>}, {pipeline_mode = #tpu.pipeline_mode<synchronous>, transform_indices = @transform_6, window_bounds = array<i64: 1, 128>}, {pipeline_mode = #tpu.pipeline_mode<synchronous>, transform_indices = @transform_7, window_bounds = array<i64: 128, 8>}, {pipeline_mode = #tpu.pipeline_mode<synchronous>, transform_indices = @transform_8, window_bounds = array<i64: 1, 8>}, {transform_indices = @transform_9, window_bounds = array<i64: 1, 4, 8>}]} {
    %c0_i32 = arith.constant 0 : i32
    %0 = arith.cmpi eq, %arg1, %c0_i32 : i32
    %1 = arith.extui %0 : i1 to i32
    %c0_i32_0 = arith.constant 0 : i32
    %2 = arith.cmpi ne, %1, %c0_i32_0 : i32
    scf.if %2 {
      %cst_19 = arith.constant 0.000000e+00 : f32
      %27 = vector.broadcast %cst_19 : f32 to vector<4x128xf32>
      %c0_20 = arith.constant 0 : index
      %c0_21 = arith.constant 0 : index
      %28 = vector.load %arg12[%c0_20, %c0_21] : memref<4x128xf32, #tpu.memory_space<vmem>>, vector<4x128xf32>
      tpu.vector_store %arg12[%c0_20, %c0_21], %27 {strides = array<i32>} : memref<4x128xf32, #tpu.memory_space<vmem>>, vector<4x128xf32>,
    } else {
    }
    %c0 = arith.constant 0 : index
    %c0_1 = arith.constant 0 : index
    %c0_2 = arith.constant 0 : index
    %3 = vector.load %arg2[%c0, %c0_1, %c0_2] : memref<1x4x128xbf16, #tpu.memory_space<vmem>>, vector<1x4x128xbf16>
    %4 = vector.shape_cast %3 : vector<1x4x128xbf16> to vector<4x128xbf16>
    %5 = arith.extf %4 : vector<4x128xbf16> to vector<4x128xf32>
    %c0_3 = arith.constant 0 : index
    %c0_4 = arith.constant 0 : index
    %c0_5 = arith.constant 0 : index
    %6 = vector.load %arg3[%c0_3, %c0_4, %c0_5] : memref<1x1x128xf32, #tpu.memory_space<vmem>>, vector<1x1x128xf32>
    %7 = vector.shape_cast %6 : vector<1x1x128xf32> to vector<1x128xf32>
    %8 = vector.broadcast %7 : vector<1x128xf32> to vector<4x128xf32>
    %9 = arith.mulf %5, %8 : vector<4x128xf32>
    %c0_6 = arith.constant 0 : index
    %c0_7 = arith.constant 0 : index
    %10 = vector.load %arg4[%c0_6, %c0_7] : memref<1x128xf32, #tpu.memory_space<vmem>>, vector<1x128xf32>
    %11 = vector.broadcast %10 : vector<1x128xf32> to vector<4x128xf32>
    %12 = arith.mulf %9, %11 : vector<4x128xf32>
    %c0_8 = arith.constant 0 : index
    %c0_9 = arith.constant 0 : index
    %13 = vector.load %arg5[%c0_8, %c0_9] : memref<1x128xf32, #tpu.memory_space<vmem>>, vector<1x128xf32>
    %14 = vector.broadcast %13 : vector<1x128xf32> to vector<4x128xf32>
    %15 = arith.addf %12, %14 : vector<4x128xf32>
    %cst = arith.constant 0.000000e+00 : f32
    %16 = vector.broadcast %cst : f32 to vector<4x128xf32>
    %17 = arith.maximumf %15, %16 : vector<4x128xf32>
    %c0_10 = arith.constant 0 : index
    %c0_11 = arith.constant 0 : index
    %18 = vector.load %arg12[%c0_10, %c0_11] : memref<4x128xf32, #tpu.memory_space<vmem>>, vector<4x128xf32>
    %19 = arith.truncf %17 : vector<4x128xf32> to vector<4x128xbf16>
    %c0_12 = arith.constant 0 : index
    %c0_13 = arith.constant 0 : index
    %20 = vector.load %arg6[%c0_12, %c0_13] : memref<128x128xbf16, #tpu.memory_space<vmem>>, vector<128x128xbf16>
    %cst_14 = arith.constant dense<0.000000e+00> : vector<4x128xf32>
    %21 = tpu.matmul %19, %20, %cst_14 {dimension_numbers = #tpu.dot_dimension_numbers<[1], [0], [0], [1], [0, 0, 1, 1], [], []>} : vector<4x128xbf16>, vector<128x128xbf16>, vector<4x128xf32> -> vector<4x128xf32>
    %22 = arith.addf %18, %21 : vector<4x128xf32>
    %c0_15 = arith.constant 0 : index
    %c0_16 = arith.constant 0 : index
    %23 = vector.load %arg12[%c0_15, %c0_16] : memref<4x128xf32, #tpu.memory_space<vmem>>, vector<4x128xf32>
    tpu.vector_store %arg12[%c0_15, %c0_16], %22 {strides = array<i32>} : memref<4x128xf32, #tpu.memory_space<vmem>>, vector<4x128xf32>,
    %c0_i32_17 = arith.constant 0 : i32
    %24 = arith.cmpi eq, %arg1, %c0_i32_17 : i32
    %25 = arith.extui %24 : i1 to i32
    %c0_i32_18 = arith.constant 0 : i32
    %26 = arith.cmpi ne, %25, %c0_i32_18 : i32
    scf.if %26 {
      %c0_19 = arith.constant 0 : index
      %c0_20 = arith.constant 0 : index
      %27 = vector.load %arg12[%c0_19, %c0_20] : memref<4x128xf32, #tpu.memory_space<vmem>>, vector<4x128xf32>
      %c0_21 = arith.constant 0 : index
      %c0_22 = arith.constant 0 : index
      %28 = vector.load %arg7[%c0_21, %c0_22] : memref<1x128xf32, #tpu.memory_space<vmem>>, vector<1x128xf32>
      %29 = vector.broadcast %28 : vector<1x128xf32> to vector<4x128xf32>
      %30 = arith.mulf %27, %29 : vector<4x128xf32>
      %c0_23 = arith.constant 0 : index
      %c0_24 = arith.constant 0 : index
      %31 = vector.load %arg8[%c0_23, %c0_24] : memref<1x128xf32, #tpu.memory_space<vmem>>, vector<1x128xf32>
      %32 = vector.broadcast %31 : vector<1x128xf32> to vector<4x128xf32>
      %33 = arith.addf %30, %32 : vector<4x128xf32>
      %cst_25 = arith.constant 0.000000e+00 : f32
      %34 = vector.broadcast %cst_25 : f32 to vector<4x128xf32>
      %35 = arith.maximumf %33, %34 : vector<4x128xf32>
      %36 = arith.truncf %35 : vector<4x128xf32> to vector<4x128xbf16>
      %c0_26 = arith.constant 0 : index
      %c0_27 = arith.constant 0 : index
      %37 = vector.load %arg9[%c0_26, %c0_27] : memref<128x8xbf16, #tpu.memory_space<vmem>>, vector<128x8xbf16>
      %cst_28 = arith.constant dense<0.000000e+00> : vector<4x8xf32>
      %38 = tpu.matmul %36, %37, %cst_28 {dimension_numbers = #tpu.dot_dimension_numbers<[1], [0], [0], [1], [0, 0, 1, 1], [], []>} : vector<4x128xbf16>, vector<128x8xbf16>, vector<4x8xf32> -> vector<4x8xf32>
      %c0_29 = arith.constant 0 : index
      %c0_30 = arith.constant 0 : index
      %39 = vector.load %arg10[%c0_29, %c0_30] : memref<1x8xf32, #tpu.memory_space<vmem>>, vector<1x8xf32>
      %40 = vector.broadcast %39 : vector<1x8xf32> to vector<4x8xf32>
      %41 = arith.addf %38, %40 : vector<4x8xf32>
      %c0_31 = arith.constant 0 : index
      %c0_32 = arith.constant 0 : index
      %c0_33 = arith.constant 0 : index
      %42 = vector.load %arg11[%c0_31, %c0_32, %c0_33] : memref<1x4x8xf32, #tpu.memory_space<vmem>>, vector<1x4x8xf32>
      %43 = vector.shape_cast %42 : vector<1x4x8xf32> to vector<4x8xf32>
      %44 = vector.shape_cast %41 : vector<4x8xf32> to vector<1x4x8xf32>
      tpu.vector_store %arg11[%c0_31, %c0_32, %c0_33], %44 {strides = array<i32>} : memref<1x4x8xf32, #tpu.memory_space<vmem>>, vector<1x4x8xf32>,
    } else {
    }
    return
  }
  func.func @transform_0(%arg0: i32, %arg1: i32) -> (i32, i32, i32) {
    %c0_i32 = arith.constant 0 : i32
    %c0_i32_0 = arith.constant 0 : i32
    return %arg0, %c0_i32, %arg1 : i32, i32, i32
  }
  func.func @transform_1(%arg0: i32, %arg1: i32) -> (i32, i32, i32) {
    %c0_i32 = arith.constant 0 : i32
    %c0_i32_0 = arith.constant 0 : i32
    %c0_i32_1 = arith.constant 0 : i32
    return %c0_i32, %c0_i32_0, %arg1 : i32, i32, i32
  }
  func.func @transform_2(%arg0: i32, %arg1: i32) -> (i32, i32) {
    %c0_i32 = arith.constant 0 : i32
    %c0_i32_0 = arith.constant 0 : i32
    return %c0_i32, %arg1 : i32, i32
  }
  func.func @transform_3(%arg0: i32, %arg1: i32) -> (i32, i32) {
    %c0_i32 = arith.constant 0 : i32
    %c0_i32_0 = arith.constant 0 : i32
    return %c0_i32, %arg1 : i32, i32
  }
  func.func @transform_4(%arg0: i32, %arg1: i32) -> (i32, i32) {
    %c0_i32 = arith.constant 0 : i32
    %c0_i32_0 = arith.constant 0 : i32
    return %arg1, %c0_i32 : i32, i32
  }
  func.func @transform_5(%arg0: i32, %arg1: i32) -> (i32, i32) {
    %c0_i32 = arith.constant 0 : i32
    %c0_i32_0 = arith.constant 0 : i32
    %c0_i32_1 = arith.constant 0 : i32
    return %c0_i32, %c0_i32_0 : i32, i32
  }
  func.func @transform_6(%arg0: i32, %arg1: i32) -> (i32, i32) {
    %c0_i32 = arith.constant 0 : i32
    %c0_i32_0 = arith.constant 0 : i32
    %c0_i32_1 = arith.constant 0 : i32
    return %c0_i32, %c0_i32_0 : i32, i32
  }
  func.func @transform_7(%arg0: i32, %arg1: i32) -> (i32, i32) {
    %c0_i32 = arith.constant 0 : i32
    %c0_i32_0 = arith.constant 0 : i32
    %c0_i32_1 = arith.constant 0 : i32
    return %c0_i32, %c0_i32_0 : i32, i32
  }
  func.func @transform_8(%arg0: i32, %arg1: i32) -> (i32, i32) {
    %c0_i32 = arith.constant 0 : i32
    %c0_i32_0 = arith.constant 0 : i32
    %c0_i32_1 = arith.constant 0 : i32
    return %c0_i32, %c0_i32_0 : i32, i32
  }
  func.func @transform_9(%arg0: i32, %arg1: i32) -> (i32, i32, i32) {
    %c0_i32 = arith.constant 0 : i32
    %c0_i32_0 = arith.constant 0 : i32
    %c0_i32_1 = arith.constant 0 : i32
    return %arg0, %c0_i32, %c0_i32_0 : i32, i32, i32
  }
}

</mosaic_0001>

<bundles_post_ra>
// kernel: cpm_forward.21
= control target key start
LH: loop header
LB: loop body
LE: loop exit
PB: predicated region body
PF: predicated region fallthrough
CT: control target
= control target key end

     0   :  { %s721_s1 = inlined_call_operand.vmem [shape: bf16[128,128], index: 1, kind: input, shape index: {}]   ;;  %s722_s0 = inlined_call_operand.vmem [shape: bf16[128,128], index: 0, kind: input, shape index: {}]   ;;  %s723_s2 = inlined_call_operand.vmem [shape: f32[1,128], index: 2, kind: input, shape index: {}]   ;;  %s724_s3 = inlined_call_operand.vmem [shape: bf16[128,128], index: 3, kind: output, shape index: {}]  }
   0x1   :  { %v610_v0 = vld [vmem:[%s721_s1] sm:$0xff]   ;;  %v611_v1 = vld [vmem:[%s721_s1 + $0x8] sm:$0xff]   ;;  %v612_v2 = vld [vmem:[%s721_s1 + $0x10] sm:$0xff]  }
   0x2   :  { %562 = vmatprep.subr.bf16.mxu0 %v610_v0  ;;  %594 = vmatprep.subr.bf16.mxu1 %v610_v0  ;;  %v613_v3 = vld [vmem:[%s721_s1 + $0x18] sm:$0xff]   ;;  %v618_v4 = vld [vmem:[%s722_s0] sm:$0xff]   ;;  %v615_v7 = vld [vmem:[%s721_s1 + $0x28] sm:$0xff]  }
   0x3   :  { %563 = vmatpush3.bf16.msra.mxu0 %v610_v0  ;;  %602 = vmatpush3.bf16.msra.mxu1 %v610_v0  ;;  %v619_v5 = vld [vmem:[%s722_s0 + $0x20] sm:$0xff]   ;;  %v616_v8 = vld [vmem:[%s721_s1 + $0x30] sm:$0xff]   ;;  %v617_v9 = vld [vmem:[%s721_s1 + $0x38] sm:$0xff]  }
   0x4   :  { %564 = vmatprep.subr.bf16.mxu0 %v611_v1  ;;  %595 = vmatprep.subr.bf16.mxu1 %v611_v1  ;;  %v614_v6 = vld [vmem:[%s721_s1 + $0x20] sm:$0xff]   ;;  %v620_v10 = vld [vmem:[%s722_s0 + $0x8] sm:$0xff]   ;;  %v622_v12 = vld [vmem:[%s722_s0 + $0x10] sm:$0xff]  }
   0x5   :  { %578 = vmatprep.mubr.bf16.mxu0 %v618_v4  ;;  %586 = vmatprep.mubr.bf16.mxu1 %v619_v5  ;;  %v621_v11 = vld [vmem:[%s722_s0 + $0x28] sm:$0xff]   ;;  %v623_v13 = vld [vmem:[%s722_s0 + $0x30] sm:$0xff]   ;;  %v624_v14 = vld [vmem:[%s722_s0 + $0x18] sm:$0xff]  }
   0x6   :  { %v625_v15 = vld [vmem:[%s722_s0 + $0x38] sm:$0xff]   ;;  %v466_v16 = vld [vmem:[%s723_s2] ss:$0 sm:$0xff] }
   0x7   :  { %565 = vmatpush3.bf16.msra.mxu0 %v611_v1  ;;  %603 = vmatpush3.bf16.msra.mxu1 %v611_v1 }
   0x8   :  { %566 = vmatprep.subr.bf16.mxu0 %v612_v2  ;;  %596 = vmatprep.subr.bf16.mxu1 %v612_v2 }
   0xb   :  { %567 = vmatpush3.bf16.msra.mxu0 %v612_v2  ;;  %604 = vmatpush3.bf16.msra.mxu1 %v612_v2 }
   0xc   :  { %568 = vmatprep.subr.bf16.mxu0 %v613_v3  ;;  %597 = vmatprep.subr.bf16.mxu1 %v613_v3 }
   0xf   :  { %569 = vmatpush3.bf16.msra.mxu0 %v613_v3  ;;  %605 = vmatpush3.bf16.msra.mxu1 %v613_v3 }
  0x10   :  { %570 = vmatprep.subr.bf16.mxu0 %v614_v6  ;;  %598 = vmatprep.subr.bf16.mxu1 %v614_v6 }
  0x13   :  { %571 = vmatpush3.bf16.msra.mxu0 %v614_v6  ;;  %606 = vmatpush3.bf16.msra.mxu1 %v614_v6 }
  0x14   :  { %572 = vmatprep.subr.bf16.mxu0 %v615_v7  ;;  %599 = vmatprep.subr.bf16.mxu1 %v615_v7 }
  0x17   :  { %573 = vmatpush3.bf16.msra.mxu0 %v615_v7  ;;  %607 = vmatpush3.bf16.msra.mxu1 %v615_v7 }
  0x18   :  { %574 = vmatprep.subr.bf16.mxu0 %v616_v8  ;;  %600 = vmatprep.subr.bf16.mxu1 %v616_v8 }
  0x1b   :  { %575 = vmatpush3.bf16.msra.mxu0 %v616_v8  ;;  %608 = vmatpush3.bf16.msra.mxu1 %v616_v8 }
  0x1c   :  { %576 = vmatprep.subr.bf16.mxu0 %v617_v9  ;;  %601 = vmatprep.subr.bf16.mxu1 %v617_v9 }
  0x1f   :  { %577 = vmatpush3.bf16.msra.mxu0 %v617_v9  ;;  %609 = vmatpush3.bf16.msra.mxu1 %v617_v9 }
  0x22   :  { %579 = vmatmul.mubr.bf16.vlgmr.msra.gmra.mrb[0].mxu0 %v620_v10  ;;  %587 = vmatmul.mubr.bf16.vlgmr.msra.gmra.mrb[0].mxu1 %v621_v11 }
  0x23   :  { %582 = vmatprep.mubr.bf16.mxu0 %v622_v12  ;;  %590 = vmatprep.mubr.bf16.mxu1 %v623_v13 }
  0x2a   :  { %583 = vmatmul.mubr.bf16.gmra.mrb[4].mxu0 %v624_v14  ;;  %591 = vmatmul.mubr.bf16.gmra.mrb[4].mxu1 %v625_v15 }
  0xf5   :  { %v580_v17 = vpop.f32.mrb[0].mxu0  ;;  %v588_v18 = vpop.f32.mrb[0].mxu1 }
  0xf6   :  { %v336_v19 = vadd.f32 %v580_v17, %v466_v16  ;;  %v344_v20 = vadd.f32 %v588_v18, %v466_v16  ;;  %v213_v21 = vpop.f32.mrb[1].mxu0  ;;  %v245_v22 = vpop.f32.mrb[1].mxu1 }
  0xf7   :  { %v334_v23 = vadd.f32 %v466_v16, %v213_v21  ;;  %v342_v24 = vadd.f32 %v466_v16, %v245_v22  ;;  %v581_v25 = vpop.f32.mrb[2].mxu0  ;;  %v589_v26 = vpop.f32.mrb[2].mxu1 }
  0xf8   :  { %v337_v27 = vadd.f32 %v581_v25, %v466_v16  ;;  %v345_v28 = vadd.f32 %v589_v26, %v466_v16  ;;  %v216_v29 = vpop.f32.mrb[3].mxu0  ;;  %v248_v30 = vpop.f32.mrb[3].mxu1  ;;  %v352_v33 = vmax.f32 %v336_v19, 0.0  ;;  %v360_v34 = vmax.f32 %v344_v20, 0.0 }
  0xf9   :  { %v335_v31 = vadd.f32 %v466_v16, %v216_v29  ;;  %v343_v32 = vadd.f32 %v466_v16, %v248_v30  ;;  %v350_v37 = vmax.f32 %v334_v23, 0.0  ;;  %v358_v38 = vmax.f32 %v342_v24, 0.0 }
  0xfa   :  { %v353_v35 = vmax.f32 %v337_v27, 0.0  ;;  %v361_v36 = vmax.f32 %v345_v28, 0.0 }
  0xfb   :  { %v351_v39 = vmax.f32 %v335_v31, 0.0  ;;  %v359_v40 = vmax.f32 %v343_v32, 0.0 }
  0xfc   :  { %v507_v41 = vpack.c.bf16 %v353_v35, %v352_v33  ;;  %v527_v42 = vpack.c.bf16 %v361_v36, %v360_v34 }
  0xfd   :  { %v502_v43 = vpack.c.bf16 %v351_v39, %v350_v37  ;;  %v522_v44 = vpack.c.bf16 %v359_v40, %v358_v38  ;;  %v584_v45 = vpop.f32.mrb[4].mxu0  ;;  %v592_v46 = vpop.f32.mrb[4].mxu1 }
  0xfe   :  { %539 = vst [vmem:[%s724_s3 + $0x8] sm:$0xff] %v507_v41   ;;  %543 = vst [vmem:[%s724_s3 + $0x28] sm:$0xff] %v527_v42   ;;  %v340_v47 = vadd.f32 %v584_v45, %v466_v16  ;;  %v348_v48 = vadd.f32 %v592_v46, %v466_v16  ;;  %v229_v49 = vpop.f32.mrb[5].mxu0  ;;  %v261_v50 = vpop.f32.mrb[5].mxu1 }
  0xff   :  { %503 = vst [vmem:[%s724_s3] sm:$0xff] %v502_v43   ;;  %542 = vst [vmem:[%s724_s3 + $0x20] sm:$0xff] %v522_v44   ;;  %v338_v51 = vadd.f32 %v466_v16, %v229_v49  ;;  %v346_v52 = vadd.f32 %v466_v16, %v261_v50  ;;  %v585_v53 = vpop.f32.mrb[6].mxu0  ;;  %v593_v54 = vpop.f32.mrb[6].mxu1 }
 0x100   :  { %v341_v55 = vadd.f32 %v585_v53, %v466_v16  ;;  %v349_v56 = vadd.f32 %v593_v54, %v466_v16  ;;  %v232_v57 = vpop.f32.mrb[7].mxu0  ;;  %v264_v58 = vpop.f32.mrb[7].mxu1  ;;  %v356_v61 = vmax.f32 %v340_v47, 0.0  ;;  %v364_v62 = vmax.f32 %v348_v48, 0.0 }
 0x101   :  { %v339_v59 = vadd.f32 %v466_v16, %v232_v57  ;;  %v347_v60 = vadd.f32 %v466_v16, %v264_v58  ;;  %v354_v1 = vmax.f32 %v338_v51, 0.0  ;;  %v362_v2 = vmax.f32 %v346_v52, 0.0 }
 0x102   :  { %v357_v63 = vmax.f32 %v341_v55, 0.0  ;;  %v365_v0 = vmax.f32 %v349_v56, 0.0 }
 0x103   :  { %v355_v3 = vmax.f32 %v339_v59, 0.0  ;;  %v363_v4 = vmax.f32 %v347_v60, 0.0 }
 0x104   :  { %v517_v5 = vpack.c.bf16 %v357_v63, %v356_v61  ;;  %v537_v6 = vpack.c.bf16 %v365_v0, %v364_v62 }
 0x105   :  { %v512_v7 = vpack.c.bf16 %v355_v3, %v354_v1  ;;  %v532_v8 = vpack.c.bf16 %v363_v4, %v362_v2 }
 0x106   :  { %541 = vst [vmem:[%s724_s3 + $0x18] sm:$0xff] %v517_v5   ;;  %545 = vst [vmem:[%s724_s3 + $0x38] sm:$0xff] %v537_v6  }
 0x107   :  { %540 = vst [vmem:[%s724_s3 + $0x10] sm:$0xff] %v512_v7   ;;  %544 = vst [vmem:[%s724_s3 + $0x30] sm:$0xff] %v532_v8  }

// kernel: cpm_forward.22
= control target key start
LH: loop header
LB: loop body
LE: loop exit
PB: predicated region body
PF: predicated region fallthrough
CT: control target
= control target key end

     0   :  { %s905_s12 = smov 0   ;;  %s907_s13 = smov 0   ;;  %s1012_s0 = inlined_call_operand.vmem [shape: bf16[32,640], index: 0, kind: input, shape index: {}]   ;;  %s1013_s1 = inlined_call_operand.vmem [shape: bf16[640,256], index: 1, kind: input, shape index: {}]   ;;  %s1014_s2 = inlined_call_operand.vmem [shape: f32[1,256], index: 2, kind: input, shape index: {}]   ;;  %s1015_s3 = inlined_call_operand.vmem [shape: bf16[32,256], index: 3, kind: output, shape index: {}]  }
   0x1   :  { %s909_s14 = smov 0   ;;  %s911_s15 = smov 0  }
   0x2   :  { %s913_s16 = smov 0  }
   0x3 LB: > { %s25_s17 = sadd.s32 1, %s877_s15  ;;  %p48_p1 = scmp.ne.s32.totalorder %s869_s13, %s865_s12  ;;  %s881_s16 = sphi %s913_s16, %s13_s16   ;;  %s877_s15 = sphi %s911_s15, %s1019_s15   ;;  %s873_s14 = sphi %s909_s14, %s1018_s14   ;;  %s869_s13 = sphi %s907_s13, %s1017_s13   ;;  %s865_s12 = sphi %s905_s12, %s1016_s12  }
   0x4   : > { %p26_p0 = scmp.ge.s32.totalorder %s25_s17, 5  ;;  %p49_p2 = scmp.eq.s32.totalorder %s881_s16, 0 }
   0x5   : > { %s41_s19 = sadd.s32 1, %s869_s13  ;;  %p718_p5 = scmp.ge.s32.totalorder %s881_s16, 5 }
   0x6   : > { %s1021_s17 = smov (%p26_p0, %s25_s17), 0  ;;  %p50_p3 = por %p49_p2, %p48_p1 }
   0x7   : > { %s37_s18 = ssub.s32 %s877_s15, %s1021_s17  ;;  %164 = sbr.rel (%p718_p5) target bundleno = 21 (0x15), region = 20 }
   0x8   : > { %p39_p4 = scmp.eq.s32.totalorder %s37_s18, 0 }
   0xa   : > { %s940_s20 = scalar_select %p39_p4, %s869_s13, %s41_s19  }
   0xe   : > { %167 = sbr.rel (!%p50_p3) target bundleno = 21 (0x15), region = 24  ;;  %s169_s21 = sand.u32 (%p50_p3), 1, %s869_s13  }
   0xf   : > { %s720_s22 = sshll.u32 (%p50_p3), %s877_s15, 2  ;;  %s719_s23 = sshll.u32 (%p50_p3), %s169_s21, 4 }
  0x10   : > { %s176_s26 = scalar_lea.vmem (%p50_p3), %s1012_s0, %s720_s22  ;;  %s171_s27 = scalar_lea.vmem (%p50_p3), [#allocation3], %s719_s23 }
  0x11   : > { %v192_v0 = vld [vmem:[%s176_s26] sm:$0xf] (%p50_p3)  ;;  %v194_v1 = vld [vmem:[%s176_s26 + $0x14] sm:$0xf] (%p50_p3)  ;;  %v196_v2 = vld [vmem:[%s176_s26 + $0x28] sm:$0xf] (%p50_p3) }
  0x12   : > { %193 = vst [vmem:[%s171_s27] sm:$0xf] (%p50_p3), %v192_v0  ;;  %195 = vst [vmem:[%s171_s27 + $0x4] sm:$0xf] (%p50_p3), %v194_v1  ;;  %v198_v3 = vld [vmem:[%s176_s26 + $0x3c] sm:$0xf] (%p50_p3) }
  0x13   : > { %197 = vst [vmem:[%s171_s27 + $0x8] sm:$0xf] (%p50_p3), %v196_v2  ;;  %199 = vst [vmem:[%s171_s27 + $0xc] sm:$0xf] (%p50_p3), %v198_v3 }
  0x15 PF: > { %p721_p6 = scmp.ge.s32.totalorder %s881_s16, 1  ;;  %p244_p7 = scmp.lt.s32.totalorder %s881_s16, 6 }
  0x17   : > { %p245_p8 = pnand %p721_p6, %p244_p7 }
  0x18   : > { %s251_s28 = sand.u32 (!%p245_p8), 1, %s865_s12   ;;  %s723_s29 = sshll.u32 (!%p245_p8), %s873_s14, 4 }
  0x19   : > { %248 = sbr.rel (%p245_p8) target bundleno = 306 (0x132), region = 69  ;;  %s952_s30 = sshll.u32 (!%p245_p8), %s251_s28, 4 }
  0x1a   : > { %p296_p9 = scmp.lt.s32.totalorder (!%p245_p8), %s723_s29, 79  ;;  %s253_s8 = scalar_lea.vmem (!%p245_p8), [#allocation3], %s952_s30 }
  0x1b   : > { %p726_p10 = scmp.ne.s32.totalorder (!%p245_p8), %s873_s14, 0 }
  0x20   : > { %s1023_s29 = smov (!%p296_p9, %s723_s29), 79  ;;  %327 = sbr.rel (%p726_p10) target bundleno = 39 (0x27), region = 77 }
  0x21   : > { %s754_s4 = sshll.u32 %s1023_s29, 3  ;;  %v883_v4 = vmov (!%p726_p10), 0.0  }
  0x22   : > { %s957_s7 = scalar_lea.vmem %s1013_s1, %s754_s4  ;;  %328 = vst [vmem:[#allocation2] sm:$0xff] (!%p726_p10), %v883_v4  ;;  %329 = vst [vmem:[#allocation2 + $0x8] sm:$0xff] (!%p726_p10), %v883_v4 }
  0x23   : > { %330 = vst [vmem:[#allocation2 + $0x10] sm:$0xff] (!%p726_p10), %v883_v4  ;;  %331 = vst [vmem:[#allocation2 + $0x18] sm:$0xff] (!%p726_p10), %v883_v4 }
  0x24   : > { %332 = vst [vmem:[#allocation2 + $0x20] sm:$0xff] (!%p726_p10), %v883_v4  ;;  %333 = vst [vmem:[#allocation2 + $0x28] sm:$0xff] (!%p726_p10), %v883_v4 }
  0x25   : > { %334 = vst [vmem:[#allocation2 + $0x30] sm:$0xff] (!%p726_p10), %v883_v4  ;;  %335 = vst [vmem:[#allocation2 + $0x38] sm:$0xff] (!%p726_p10), %v883_v4 }
  0x27 PF: > { %v817_v5 = vld [vmem:[%s957_s7 + $0x4] ss:$8 sps:$4 sm:$0xff]   ;;  %v819_v6 = vld [vmem:[%s957_s7] ss:$8 sps:$4 sm:$0xff]   ;;  %v884_v7 = vmov 0   ;;  %p745_p11 = scmp.ne.s32.totalorder %s873_s14, 4 }
  0x28   : > { %488 = vmatprep.mubr.bf16.mxu0 %v884_v7  ;;  %498 = vmatprep.mubr.bf16.mxu1 %v884_v7  ;;  %v820_v8 = vld [vmem:[%s957_s7 + $0x14] ss:$8 sps:$4 sm:$0xff]   ;;  %v822_v9 = vld [vmem:[%s957_s7 + $0x10] ss:$8 sps:$4 sm:$0xff]   ;;  %v823_v10 = vld [vmem:[%s957_s7 + $0x24] ss:$8 sps:$4 sm:$0xff]   ;;  %v539_v48 = vlaneseq (!%p745_p11) }
  0x29   : > { %456 = vmatprep.subr.bf16.mxu0 %v817_v5  ;;  %759 = vmatprep.subr.bf16.mxu1 %v817_v5  ;;  %v825_v11 = vld [vmem:[%s957_s7 + $0x20] ss:$8 sps:$4 sm:$0xff]   ;;  %v826_v12 = vld [vmem:[%s957_s7 + $0x34] ss:$8 sps:$4 sm:$0xff]   ;;  %v828_v13 = vld [vmem:[%s957_s7 + $0x30] ss:$8 sps:$4 sm:$0xff]  }
  0x2a   : > { %457 = vmatpush1.bf16.msra.mxu0 %v819_v6  ;;  %767 = vmatpush1.bf16.msra.mxu1 %v819_v6  ;;  %v829_v14 = vld [vmem:[%s957_s7 + $0x44] ss:$8 sps:$4 sm:$0xff]   ;;  %v831_v15 = vld [vmem:[%s957_s7 + $0x40] ss:$8 sps:$4 sm:$0xff]   ;;  %v832_v16 = vld [vmem:[%s957_s7 + $0x54] ss:$8 sps:$4 sm:$0xff]  }
  0x2b   : > { %458 = vmatprep.subr.bf16.mxu0 %v820_v8  ;;  %760 = vmatprep.subr.bf16.mxu1 %v820_v8  ;;  %v834_v17 = vld [vmem:[%s957_s7 + $0x50] ss:$8 sps:$4 sm:$0xff]   ;;  %v835_v18 = vld [vmem:[%s957_s7 + $0x64] ss:$8 sps:$4 sm:$0xff]   ;;  %v837_v19 = vld [vmem:[%s957_s7 + $0x60] ss:$8 sps:$4 sm:$0xff]  }
  0x2c   : > { %v838_v20 = vld [vmem:[%s957_s7 + $0x74] ss:$8 sps:$4 sm:$0xff]   ;;  %v840_v21 = vld [vmem:[%s957_s7 + $0x70] ss:$8 sps:$4 sm:$0xff]   ;;  %v336_v24 = vld [vmem:[#allocation2] sm:$0xff]  ;;  %v540_v49 = vshrl.u32 (!%p745_p11), %v539_v48, 7 }
  0x2d   : > { %v841_v22 = vld [vmem:[%s253_s8] sm:$0xff]   ;;  %v842_v23 = vld [vmem:[%s253_s8 + $0x8] sm:$0xff]  }
  0x2e   : > { %459 = vmatpush1.bf16.msra.mxu0 %v822_v9  ;;  %768 = vmatpush1.bf16.msra.mxu1 %v822_v9  ;;  %v340_v25 = vld [vmem:[#allocation2 + $0x20] sm:$0xff]  ;;  %v337_v26 = vld [vmem:[#allocation2 + $0x8] sm:$0xff]  ;;  %v338_v30 = vld [vmem:[#allocation2 + $0x10] sm:$0xff]  ;;  %v541_v53 = vsub.s32 (!%p745_p11), 0, %v540_v49  ;;  %v545_v54 = vsub.s32 (!%p745_p11), 1, %v540_v49 }
  0x2f   : > { %460 = vmatprep.subr.bf16.mxu0 %v823_v10  ;;  %761 = vmatprep.subr.bf16.mxu1 %v823_v10  ;;  %v341_v27 = vld [vmem:[#allocation2 + $0x28] sm:$0xff]  ;;  %v342_v31 = vld [vmem:[#allocation2 + $0x30] sm:$0xff]  ;;  %v339_v36 = vld [vmem:[#allocation2 + $0x18] sm:$0xff] }
  0x30   : > { %v343_v37 = vld [vmem:[#allocation2 + $0x38] sm:$0xff]  ;;  %v537_v50 = vld [vmem:[%s1014_s2] sm:$0x3] (!%p745_p11) }
  0x31   : > { %v542_v58 = vrot.slane (!%p745_p11), %v537_v50, %v541_v53  ;;  %v546_v59 = vrot.slane (!%p745_p11), %v537_v50, %v545_v54 }
  0x32   : > { %461 = vmatpush1.bf16.msra.mxu0 %v825_v11  ;;  %769 = vmatpush1.bf16.msra.mxu1 %v825_v11 }
  0x33   : > { %462 = vmatprep.subr.bf16.mxu0 %v826_v12  ;;  %762 = vmatprep.subr.bf16.mxu1 %v826_v12 }
  0x36   : > { %463 = vmatpush1.bf16.msra.mxu0 %v828_v13  ;;  %770 = vmatpush1.bf16.msra.mxu1 %v828_v13 }
  0x37   : > { %464 = vmatprep.subr.bf16.mxu0 %v829_v14  ;;  %763 = vmatprep.subr.bf16.mxu1 %v829_v14 }
  0x3a   : > { %465 = vmatpush1.bf16.msra.mxu0 %v831_v15  ;;  %771 = vmatpush1.bf16.msra.mxu1 %v831_v15 }
  0x3b   : > { %466 = vmatprep.subr.bf16.mxu0 %v832_v16  ;;  %764 = vmatprep.subr.bf16.mxu1 %v832_v16 }
  0x3e   : > { %467 = vmatpush1.bf16.msra.mxu0 %v834_v17  ;;  %772 = vmatpush1.bf16.msra.mxu1 %v834_v17 }
  0x3f   : > { %468 = vmatprep.subr.bf16.mxu0 %v835_v18  ;;  %765 = vmatprep.subr.bf16.mxu1 %v835_v18 }
  0x42   : > { %469 = vmatpush1.bf16.msra.mxu0 %v837_v19  ;;  %773 = vmatpush1.bf16.msra.mxu1 %v837_v19 }
  0x43   : > { %470 = vmatprep.subr.bf16.mxu0 %v838_v20  ;;  %766 = vmatprep.subr.bf16.mxu1 %v838_v20 }
  0x46   : > { %471 = vmatpush1.bf16.msra.mxu0 %v840_v21  ;;  %774 = vmatpush1.bf16.msra.mxu1 %v840_v21 }
  0x49   : > { %489 = vmatmul.mubr.bf16.vlgmr.msra.gmra.mrb[0].mxu0 %v841_v22  ;;  %499 = vmatmul.mubr.bf16.vlgmr.msra.gmra.mrb[0].mxu1 %v842_v23 }
 0x11c   : > { %v490_v28 = vpop.f32.mrb[0].mxu0  ;;  %v500_v29 = vpop.f32.mrb[0].mxu1  ;;  %528 = sbr.rel (%p745_p11) target bundleno = 306 (0x132), region = 81 }
 0x11d   : > { %v509_v32 = vadd.f32 %v490_v28, %v336_v24  ;;  %v513_v33 = vadd.f32 %v500_v29, %v340_v25  ;;  %v492_v34 = vpop.f32.mrb[1].mxu0  ;;  %v502_v35 = vpop.f32.mrb[1].mxu1 }
 0x11e   : > { %v510_v38 = vadd.f32 %v492_v34, %v337_v26  ;;  %v514_v39 = vadd.f32 %v502_v35, %v341_v27  ;;  %v494_v40 = vpop.f32.mrb[2].mxu0  ;;  %v504_v41 = vpop.f32.mrb[2].mxu1 }
 0x11f   : > { %517 = vst [vmem:[#allocation2] sm:$0xff] %v509_v32  ;;  %521 = vst [vmem:[#allocation2 + $0x20] sm:$0xff] %v513_v33  ;;  %v511_v42 = vadd.f32 %v494_v40, %v338_v30  ;;  %v515_v43 = vadd.f32 %v504_v41, %v342_v31  ;;  %v496_v44 = vpop.f32.mrb[3].mxu0  ;;  %v506_v45 = vpop.f32.mrb[3].mxu1 }
 0x120   : > { %518 = vst [vmem:[#allocation2 + $0x8] sm:$0xff] %v510_v38  ;;  %522 = vst [vmem:[#allocation2 + $0x28] sm:$0xff] %v514_v39  ;;  %v512_v46 = vadd.f32 %v496_v44, %v339_v36  ;;  %v516_v47 = vadd.f32 %v506_v45, %v343_v37 }
 0x121   : > { %519 = vst [vmem:[#allocation2 + $0x10] sm:$0xff] %v511_v42  ;;  %523 = vst [vmem:[#allocation2 + $0x30] sm:$0xff] %v515_v43 }
 0x122   : > { %520 = vst [vmem:[#allocation2 + $0x18] sm:$0xff] %v512_v46  ;;  %524 = vst [vmem:[#allocation2 + $0x38] sm:$0xff] %v516_v47 }
 0x126   : > { %v529_v51 = vld [vmem:[#allocation2] sm:$0xff] }
 0x127   : > { %v530_v52 = vld [vmem:[#allocation2 + $0x8] sm:$0xff]  ;;  %v533_v57 = vld [vmem:[#allocation2 + $0x20] sm:$0xff]  ;;  %v549_v63 = vadd.f32 %v542_v58, %v529_v51 }
 0x128   : > { %v531_v55 = vld [vmem:[#allocation2 + $0x10] sm:$0xff]  ;;  %v534_v60 = vld [vmem:[#allocation2 + $0x28] sm:$0xff]  ;;  %v550_v0 = vadd.f32 %v546_v59, %v530_v52  ;;  %v553_v3 = vadd.f32 %v542_v58, %v533_v57 }
 0x129   : > { %v532_v56 = vld [vmem:[#allocation2 + $0x18] sm:$0xff]  ;;  %v535_v61 = vld [vmem:[#allocation2 + $0x30] sm:$0xff]  ;;  %v551_v1 = vadd.f32 %v542_v58, %v531_v55  ;;  %v554_v4 = vadd.f32 %v546_v59, %v534_v60  ;;  %v557_v7 = vmax.f32 %v549_v63, 0.0 }
 0x12a   : > { %v536_v62 = vld [vmem:[#allocation2 + $0x38] sm:$0xff]  ;;  %v552_v2 = vadd.f32 %v546_v59, %v532_v56  ;;  %v555_v5 = vadd.f32 %v542_v58, %v535_v61  ;;  %v558_v8 = vmax.f32 %v550_v0, 0.0  ;;  %v561_v11 = vmax.f32 %v553_v3, 0.0 }
 0x12b   : > { %v556_v6 = vadd.f32 %v546_v59, %v536_v62  ;;  %v559_v9 = vmax.f32 %v551_v1, 0.0  ;;  %v562_v12 = vmax.f32 %v554_v4, 0.0 }
 0x12c   : > { %v560_v10 = vmax.f32 %v552_v2, 0.0  ;;  %v563_v13 = vmax.f32 %v555_v5, 0.0  ;;  %v755_v15 = vpack.c.bf16 %v558_v8, %v557_v7 }
 0x12d   : > { %v564_v14 = vmax.f32 %v556_v6, 0.0  ;;  %v757_v17 = vpack.c.bf16 %v562_v12, %v561_v11 }
 0x12e   : > { %v756_v16 = vpack.c.bf16 %v560_v10, %v559_v9  ;;  %589 = vst [vmem:[%s1015_s3] sm:$0xff] %v755_v15 }
 0x12f   : > { %v758_v18 = vpack.c.bf16 %v564_v14, %v563_v13  ;;  %591 = vst [vmem:[%s1015_s3 + $0x10] sm:$0xff] %v757_v17 }
 0x130   : > { %590 = vst [vmem:[%s1015_s3 + $0x8] sm:$0xff] %v756_v16 }
 0x131   : > { %592 = vst [vmem:[%s1015_s3 + $0x18] sm:$0xff] %v758_v18 }
 0x132 PF: > { %s13_s16 = sadd.s32 1, %s881_s16   ;;  %s1016_s12 = smov %s869_s13 }
 0x133   : > { %p10_p12 = scmp.ge.s32.totalorder %s13_s16, 7   ;;  %s1017_s13 = smov %s940_s20 }
 0x134   : > { %s1018_s14 = smov %s877_s15  ;;  %s1019_s15 = smov %s1021_s17 }
 0x135   :  { %12 = sbr.rel (!%p10_p12) target bundleno = 3 (0x3), region = 122 }

// kernel: cpm_forward.23
= control target key start
LH: loop header
LB: loop body
LE: loop exit
PB: predicated region body
PF: predicated region fallthrough
CT: control target
= control target key end

     0   :  { %s1218_s12 = smov 0   ;;  %s1220_s13 = smov 0   ;;  %s1505_s0 = inlined_call_operand.vmem [shape: bf16[16,1792], index: 0, kind: input, shape index: {}]   ;;  %s1506_s1 = inlined_call_operand.vmem [shape: bf16[1792,512], index: 1, kind: input, shape index: {}]   ;;  %s1507_s2 = inlined_call_operand.vmem [shape: f32[1,512], index: 2, kind: input, shape index: {}]   ;;  %s1508_s3 = inlined_call_operand.vmem [shape: bf16[16,512], index: 3, kind: output, shape index: {}]  }
   0x1   :  { %s1222_s14 = smov 0   ;;  %s1224_s15 = smov 0  }
   0x2   :  { %s1226_s16 = smov 0   ;;  %s1228_s17 = smov 0  }
   0x3   :  { %s1230_s18 = smov 0   ;;  %s1232_s19 = smov 0  }
   0x4   :  { %s1234_s20 = smov 0   ;;  %s1236_s21 = smov 0  }
   0x5   :  { %s1238_s22 = smov 0  }
   0x6 LB: > { %s904_s23 = sadd.s32 4294967295, %s1195_s22   ;;  %s25_s24 = sadd.s32 1, %s1187_s20  ;;  %s1195_s22 = sphi %s1238_s22, %s13_s22   ;;  %s1191_s21 = sphi %s1236_s21, %s1529_s21   ;;  %s1187_s20 = sphi %s1234_s20, %s1528_s20   ;;  %s1183_s19 = sphi %s1232_s19, %s1527_s19   ;;  %s1179_s18 = sphi %s1230_s18, %s1526_s18   ;;  %s1175_s17 = sphi %s1228_s17, %s1525_s17   ;;  %s1171_s16 = sphi %s1226_s16, %s1524_s16   ;;  %s1167_s15 = sphi %s1224_s15, %s1523_s15   ;;  %s1163_s14 = sphi %s1222_s14, %s1522_s14   ;;  %s1159_s13 = sphi %s1220_s13, %s1521_s13   ;;  %s1155_s12 = sphi %s1218_s12, %s1520_s12  }
   0x7   : > { %p26_p0 = scmp.ge.s32.totalorder %s25_s24, 7  ;;  %s28_s25 = sadd.s32 1, %s1191_s21 }
   0x8   : > { %s41_s26 = sadd.s32 1, %s1175_s17  ;;  %p48_p1 = scmp.ne.s32.totalorder %s1175_s17, %s1171_s16 }
   0x9   : > { %s1531_s24 = smov (%p26_p0, %s25_s24), 0  ;;  %s1533_s25 = smov (!%p26_p0, %s28_s25), %s1191_s21 }
   0xa   : > { %1511 = sst [smem:[#allocation6_spill]] %s1531_s24  ;;  %s37_s27 = ssub.s32 %s1187_s20, %s1531_s24 }
   0xb   : > { %p49_p2 = scmp.eq.s32.totalorder %s1195_s22, 0  ;;  %p30_p3 = scmp.ge.s32.totalorder %s1533_s25, 2 }
   0xc   : > { %p39_p4 = scmp.eq.s32.totalorder %s37_s27, 0  ;;  %s69_s29 = sadd.s32 1, %s1167_s15 }
   0xd   : > { %p1285_p5 = por %p49_p2, %p48_p1  ;;  %s1535_s25 = smov (%p30_p3, %s1533_s25), 0 }
   0xe   : > { %1513 = sst [smem:[#allocation7_spill]] %s1535_s25  ;;  %s65_s4 = ssub.s32 %s1191_s21, %s1535_s25 }
   0xf   : > { %s1293_s30 = scalar_select %p39_p4, %s1175_s17, %s41_s26  }
  0x10   : > { %p76_p6 = scmp.ne.s32.totalorder %s1167_s15, %s1163_s14  ;;  %s66_s5 = sor.u32 %s65_s4, %s37_s27 }
  0x11   : > { %1514 = sst [smem:[#allocation8_spill]] %s1293_s30  ;;  %p121_p7 = scmp.eq.s32.totalorder %s65_s4, 0 }
  0x12   : > { %p67_p8 = scmp.eq.s32.totalorder %s66_s5, 0  ;;  %p1299_p9 = por %p76_p6, %p49_p2 }
  0x13   : > { %s123_s7 = sadd.s32 1, %s1159_s13  ;;  %p133_p10 = scmp.ne.s32.totalorder %s1159_s13, %s1155_s12 }
  0x14   : > { %s1307_s8 = scalar_select %p67_p8, %s1167_s15, %s69_s29  }
  0x15   : > { %s1310_s9 = scalar_select %p121_p7, %s1159_s13, %s123_s7  }
  0x16   : > { %p134_p11 = scmp.eq.s32.totalorder %s904_s23, 13  ;;  %p907_p13 = scmp.ge.s32.totalorder %s1195_s22, 14 }
  0x18   : > { %p1312_p12 = por %p134_p11, %p133_p10  ;;  %156 = sbr.rel (%p907_p13) target bundleno = 61 (0x3d), region = 16 }
  0x1f   : > { %159 = sbr.rel (!%p1285_p5) target bundleno = 38 (0x26), region = 20  ;;  %s161_s11 = sand.u32 (%p1285_p5), 1, %s1175_s17  }
  0x20   : > { %s964_s26 = sshll.u32 (%p1285_p5), %s1187_s20, 3  ;;  %s908_s27 = sshll.u32 (%p1285_p5), %s161_s11, 4 }
  0x21   : > { %s169_s5 = scalar_lea.vmem (%p1285_p5), %s1505_s0, %s964_s26  ;;  %s163_s23 = scalar_lea.vmem (%p1285_p5), [#allocation3], %s908_s27 }
  0x22   : > { %v199_v0 = vld [vmem:[%s169_s5] sm:$0xff] (%p1285_p5)  ;;  %v201_v1 = vld [vmem:[%s169_s5 + $0x38] sm:$0xff] (%p1285_p5) }
  0x23   : > { %200 = vst [vmem:[%s163_s23] sm:$0xff] (%p1285_p5), %v199_v0  ;;  %202 = vst [vmem:[%s163_s23 + $0x8] sm:$0xff] (%p1285_p5), %v201_v1 }
  0x26 PF: > { %208 = sbr.rel (!%p1299_p9) target bundleno = 61 (0x3d), region = 58  ;;  %s210_s28 = sand.u32 (%p1299_p9), 1, %s1167_s15  }
  0x27   : > { %s913_s7 = sshll.u32 (%p1299_p9), %s1191_s21, 1  ;;  %s911_s25 = sshll.u32 (%p1299_p9), %s210_s28, 8 }
  0x28   : > { %s965_s11 = sshll.u32 (%p1299_p9), %s1187_s20, 7  ;;  %s1337_s6 = scalar_lea.vmem (%p1299_p9), [#allocation4], %s911_s25 }
  0x29   : > { %s216_s24 = sadd.s32 (%p1299_p9), %s965_s11, %s913_s7 }
  0x2a   : > { %s915_s30 = sshll.u32 (%p1299_p9), %s216_s24, 2 }
  0x2b   : > { %s1332_s4 = scalar_lea.vmem (%p1299_p9), %s1506_s1, %s915_s30 }
  0x2c   : > { %v308_v2 = vld [vmem:[%s1332_s4] sm:$0xff] (%p1299_p9)  ;;  %v310_v3 = vld [vmem:[%s1332_s4 + $0x10] sm:$0xff] (%p1299_p9) }
  0x2d   : > { %v312_v4 = vld [vmem:[%s1332_s4 + $0x20] sm:$0xff]  ;;  %309 = vst [vmem:[%s1337_s6] sm:$0xff] %v308_v2  ;;  %311 = vst [vmem:[%s1337_s6 + $0x8] sm:$0xff] %v310_v3  ;;  %v314_v5 = vld [vmem:[%s1332_s4 + $0x30] sm:$0xff] }
  0x2e   : > { %313 = vst [vmem:[%s1337_s6 + $0x10] sm:$0xff] %v312_v4  ;;  %v316_v6 = vld [vmem:[%s1332_s4 + $0x40] sm:$0xff]  ;;  %v318_v7 = vld [vmem:[%s1332_s4 + $0x50] sm:$0xff]  ;;  %315 = vst [vmem:[%s1337_s6 + $0x18] sm:$0xff] %v314_v5 }
  0x2f   : > { %317 = vst [vmem:[%s1337_s6 + $0x20] sm:$0xff] %v316_v6  ;;  %319 = vst [vmem:[%s1337_s6 + $0x28] sm:$0xff] %v318_v7  ;;  %v320_v8 = vld [vmem:[%s1332_s4 + $0x60] sm:$0xff]  ;;  %v322_v9 = vld [vmem:[%s1332_s4 + $0x70] sm:$0xff] }
  0x30   : > { %v324_v10 = vld [vmem:[%s1332_s4 + $0x80] sm:$0xff]  ;;  %321 = vst [vmem:[%s1337_s6 + $0x30] sm:$0xff] %v320_v8  ;;  %323 = vst [vmem:[%s1337_s6 + $0x38] sm:$0xff] %v322_v9  ;;  %v326_v11 = vld [vmem:[%s1332_s4 + $0x90] sm:$0xff] }
  0x31   : > { %325 = vst [vmem:[%s1337_s6 + $0x40] sm:$0xff] %v324_v10  ;;  %v328_v12 = vld [vmem:[%s1332_s4 + $0xa0] sm:$0xff]  ;;  %v330_v13 = vld [vmem:[%s1332_s4 + $0xb0] sm:$0xff]  ;;  %327 = vst [vmem:[%s1337_s6 + $0x48] sm:$0xff] %v326_v11 }
  0x32   : > { %329 = vst [vmem:[%s1337_s6 + $0x50] sm:$0xff] %v328_v12  ;;  %331 = vst [vmem:[%s1337_s6 + $0x58] sm:$0xff] %v330_v13  ;;  %v332_v14 = vld [vmem:[%s1332_s4 + $0xc0] sm:$0xff]  ;;  %v334_v15 = vld [vmem:[%s1332_s4 + $0xd0] sm:$0xff] }
  0x33   : > { %v336_v16 = vld [vmem:[%s1332_s4 + $0xe0] sm:$0xff]  ;;  %333 = vst [vmem:[%s1337_s6 + $0x60] sm:$0xff] %v332_v14  ;;  %335 = vst [vmem:[%s1337_s6 + $0x68] sm:$0xff] %v334_v15  ;;  %v338_v17 = vld [vmem:[%s1332_s4 + $0xf0] sm:$0xff] }
  0x34   : > { %337 = vst [vmem:[%s1337_s6 + $0x70] sm:$0xff] %v336_v16  ;;  %v340_v18 = vld [vmem:[%s1332_s4 + $0x100] sm:$0xff]  ;;  %v342_v19 = vld [vmem:[%s1332_s4 + $0x110] sm:$0xff]  ;;  %339 = vst [vmem:[%s1337_s6 + $0x78] sm:$0xff] %v338_v17 }
  0x35   : > { %341 = vst [vmem:[%s1337_s6 + $0x80] sm:$0xff] %v340_v18  ;;  %343 = vst [vmem:[%s1337_s6 + $0x88] sm:$0xff] %v342_v19  ;;  %v344_v20 = vld [vmem:[%s1332_s4 + $0x120] sm:$0xff]  ;;  %v346_v21 = vld [vmem:[%s1332_s4 + $0x130] sm:$0xff] }
  0x36   : > { %v348_v22 = vld [vmem:[%s1332_s4 + $0x140] sm:$0xff]  ;;  %345 = vst [vmem:[%s1337_s6 + $0x90] sm:$0xff] %v344_v20  ;;  %347 = vst [vmem:[%s1337_s6 + $0x98] sm:$0xff] %v346_v21  ;;  %v350_v23 = vld [vmem:[%s1332_s4 + $0x150] sm:$0xff] }
  0x37   : > { %349 = vst [vmem:[%s1337_s6 + $0xa0] sm:$0xff] %v348_v22  ;;  %v352_v24 = vld [vmem:[%s1332_s4 + $0x160] sm:$0xff]  ;;  %v354_v25 = vld [vmem:[%s1332_s4 + $0x170] sm:$0xff]  ;;  %351 = vst [vmem:[%s1337_s6 + $0xa8] sm:$0xff] %v350_v23 }
  0x38   : > { %353 = vst [vmem:[%s1337_s6 + $0xb0] sm:$0xff] %v352_v24  ;;  %355 = vst [vmem:[%s1337_s6 + $0xb8] sm:$0xff] %v354_v25  ;;  %v356_v26 = vld [vmem:[%s1332_s4 + $0x180] sm:$0xff]  ;;  %v358_v27 = vld [vmem:[%s1332_s4 + $0x190] sm:$0xff] }
  0x39   : > { %v360_v28 = vld [vmem:[%s1332_s4 + $0x1a0] sm:$0xff]  ;;  %357 = vst [vmem:[%s1337_s6 + $0xc0] sm:$0xff] %v356_v26  ;;  %359 = vst [vmem:[%s1337_s6 + $0xc8] sm:$0xff] %v358_v27  ;;  %v362_v29 = vld [vmem:[%s1332_s4 + $0x1b0] sm:$0xff] }
  0x3a   : > { %361 = vst [vmem:[%s1337_s6 + $0xd0] sm:$0xff] %v360_v28  ;;  %v364_v30 = vld [vmem:[%s1332_s4 + $0x1c0] sm:$0xff]  ;;  %v366_v31 = vld [vmem:[%s1332_s4 + $0x1d0] sm:$0xff]  ;;  %363 = vst [vmem:[%s1337_s6 + $0xd8] sm:$0xff] %v362_v29 }
  0x3b   : > { %365 = vst [vmem:[%s1337_s6 + $0xe0] sm:$0xff] %v364_v30  ;;  %367 = vst [vmem:[%s1337_s6 + $0xe8] sm:$0xff] %v366_v31  ;;  %v368_v32 = vld [vmem:[%s1332_s4 + $0x1e0] sm:$0xff]  ;;  %v370_v33 = vld [vmem:[%s1332_s4 + $0x1f0] sm:$0xff] }
  0x3c   : > { %369 = vst [vmem:[%s1337_s6 + $0xf0] sm:$0xff] %v368_v32  ;;  %371 = vst [vmem:[%s1337_s6 + $0xf8] sm:$0xff] %v370_v33 }
  0x3d PF: > { %p916_p0 = scmp.ge.s32.totalorder %s1195_s22, 1  ;;  %p384_p1 = scmp.lt.s32.totalorder %s1195_s22, 15 }
  0x3f   : > { %p385_p2 = pnand %p916_p0, %p384_p1 }
  0x40   : > { %s391_s24 = sand.u32 (!%p385_p2), 1, %s1171_s16   ;;  %s398_s25 = sand.u32 (!%p385_p2), 1, %s1163_s14  }
  0x41   : > { %388 = sbr.rel (%p385_p2) target bundleno = 384 (0x180), region = 100  ;;  %s1404_s30 = sshll.u32 (!%p385_p2), %s391_s24, 4 }
  0x42   : > { %s918_s27 = sshll.u32 (!%p385_p2), %s398_s25, 8  ;;  %s425_s5 = sand.u32 (!%p385_p2), 1, %s1155_s12  }
  0x43   : > { %s920_s23 = sshll.u32 (!%p385_p2), %s1183_s19, 1  ;;  %s919_s28 = sshll.u32 (!%p385_p2), %s425_s5, 4 }
  0x44   : > { %p433_p3 = scmp.lt.s32.totalorder (!%p385_p2), %s920_s23, 3  ;;  %s393_s26 = scalar_lea.vmem (!%p385_p2), [#allocation3], %s1404_s30 }
  0x45   : > { %s1415_s4 = scalar_lea.vmem (!%p385_p2), [#allocation4], %s918_s27  ;;  %s1417_s16 = scalar_lea.vmem (!%p385_p2), [#allocation5], %s919_s28 }
  0x46   : > { %p921_p4 = scmp.ne.s32.totalorder (!%p385_p2), %s1179_s18, 0 }
  0x48   : > { %s1537_s23 = smov (!%p433_p3, %s920_s23), 3  ;;  %442 = sbr.rel (%p921_p4) target bundleno = 79 (0x4f), region = 112 }
  0x49   : > { %s435_s29 = scalar_lea.vmem %s1507_s2, %s1537_s23  ;;  %v1197_v34 = vmov (!%p921_p4), 0.0  }
  0x4a   : > { %443 = vst [vmem:[#allocation2] sm:$0xff] (!%p921_p4), %v1197_v34  ;;  %444 = vst [vmem:[#allocation2 + $0x8] sm:$0xff] (!%p921_p4), %v1197_v34 }
  0x4b   : > { %445 = vst [vmem:[#allocation2 + $0x10] sm:$0xff] (!%p921_p4), %v1197_v34  ;;  %446 = vst [vmem:[#allocation2 + $0x18] sm:$0xff] (!%p921_p4), %v1197_v34 }
  0x4f PF: > { %v1058_v35 = vld [vmem:[%s1415_s4 + $0x4] ss:$8 sps:$4 sm:$0xff]   ;;  %v1060_v36 = vld [vmem:[%s1415_s4] ss:$8 sps:$4 sm:$0xff]   ;;  %v1061_v37 = vld [vmem:[%s1415_s4 + $0x14] ss:$8 sps:$4 sm:$0xff]  }
  0x50   : > { %655 = vmatprep.subr.bf16.mxu0 %v1058_v35  ;;  %v1063_v38 = vld [vmem:[%s1415_s4 + $0x10] ss:$8 sps:$4 sm:$0xff]   ;;  %v1064_v39 = vld [vmem:[%s1415_s4 + $0x24] ss:$8 sps:$4 sm:$0xff]   ;;  %v1066_v40 = vld [vmem:[%s1415_s4 + $0x20] ss:$8 sps:$4 sm:$0xff]  }
  0x51   : > { %656 = vmatpush1.bf16.msra.mxu0 %v1060_v36  ;;  %v1067_v41 = vld [vmem:[%s1415_s4 + $0x34] ss:$8 sps:$4 sm:$0xff]   ;;  %v1069_v42 = vld [vmem:[%s1415_s4 + $0x30] ss:$8 sps:$4 sm:$0xff]   ;;  %v1070_v43 = vld [vmem:[%s1415_s4 + $0x44] ss:$8 sps:$4 sm:$0xff]  }
  0x52   : > { %657 = vmatprep.subr.bf16.mxu0 %v1061_v37  ;;  %v1072_v44 = vld [vmem:[%s1415_s4 + $0x40] ss:$8 sps:$4 sm:$0xff]   ;;  %v1073_v45 = vld [vmem:[%s1415_s4 + $0x54] ss:$8 sps:$4 sm:$0xff]   ;;  %v1075_v46 = vld [vmem:[%s1415_s4 + $0x50] ss:$8 sps:$4 sm:$0xff]  }
  0x53   : > { %v1076_v47 = vld [vmem:[%s1415_s4 + $0x64] ss:$8 sps:$4 sm:$0xff]   ;;  %v1078_v49 = vld [vmem:[%s1415_s4 + $0x60] ss:$8 sps:$4 sm:$0xff]   ;;  %v1079_v50 = vld [vmem:[%s1415_s4 + $0x74] ss:$8 sps:$4 sm:$0xff]  }
  0x54   : > { %v1108_v48 = vld [vmem:[%s393_s26 + $0x4] ss:$8 sps:$4 sm:$0xff]   ;;  %v1081_v51 = vld [vmem:[%s1415_s4 + $0x70] ss:$8 sps:$4 sm:$0xff]   ;;  %v1084_v53 = vld [vmem:[%s1415_s4 + $0x80] ss:$8 sps:$4 sm:$0xff]  }
  0x55   : > { %658 = vmatpush1.bf16.msra.mxu0 %v1063_v38  ;;  %687 = vmatprep.mubr.bf16.mxu0 %v1108_v48  ;;  %v1082_v52 = vld [vmem:[%s1415_s4 + $0x84] ss:$8 sps:$4 sm:$0xff]   ;;  %v1085_v54 = vld [vmem:[%s1415_s4 + $0x94] ss:$8 sps:$4 sm:$0xff]   ;;  %v1087_v55 = vld [vmem:[%s1415_s4 + $0x90] ss:$8 sps:$4 sm:$0xff]  }
  0x56   : > { %659 = vmatprep.subr.bf16.mxu0 %v1064_v39  ;;  %v1088_v56 = vld [vmem:[%s1415_s4 + $0xa4] ss:$8 sps:$4 sm:$0xff]   ;;  %v1090_v57 = vld [vmem:[%s1415_s4 + $0xa0] ss:$8 sps:$4 sm:$0xff]   ;;  %v1091_v58 = vld [vmem:[%s1415_s4 + $0xb4] ss:$8 sps:$4 sm:$0xff]  }
  0x57   : > { %v1093_v59 = vld [vmem:[%s1415_s4 + $0xb0] ss:$8 sps:$4 sm:$0xff]   ;;  %v1094_v60 = vld [vmem:[%s1415_s4 + $0xc4] ss:$8 sps:$4 sm:$0xff]   ;;  %v1096_v61 = vld [vmem:[%s1415_s4 + $0xc0] ss:$8 sps:$4 sm:$0xff]  }
  0x58   : > { %v1097_v62 = vld [vmem:[%s1415_s4 + $0xd4] ss:$8 sps:$4 sm:$0xff]   ;;  %v1099_v63 = vld [vmem:[%s1415_s4 + $0xd0] ss:$8 sps:$4 sm:$0xff]   ;;  %v1100_v0 = vld [vmem:[%s1415_s4 + $0xe4] ss:$8 sps:$4 sm:$0xff]  }
  0x59   : > { %660 = vmatpush1.bf16.msra.mxu0 %v1066_v40  ;;  %v1102_v1 = vld [vmem:[%s1415_s4 + $0xe0] ss:$8 sps:$4 sm:$0xff]   ;;  %v1103_v2 = vld [vmem:[%s1415_s4 + $0xf4] ss:$8 sps:$4 sm:$0xff]   ;;  %v1105_v3 = vld [vmem:[%s1415_s4 + $0xf0] ss:$8 sps:$4 sm:$0xff]  }
  0x5a   : > { %661 = vmatprep.subr.bf16.mxu0 %v1067_v41  ;;  %v1106_v4 = vld [vmem:[%s393_s26] ss:$8 sps:$4 sm:$0xff]   ;;  %p956_p5 = scmp.ne.s32.totalorder %s1179_s18, 6 }
  0x5b   : > { %v447_v5 = vld [vmem:[#allocation2] sm:$0xff]  ;;  %v448_v6 = vld [vmem:[#allocation2 + $0x8] sm:$0xff]  ;;  %v449_v8 = vld [vmem:[#allocation2 + $0x10] sm:$0xff]  ;;  %v716_v17 = vlaneseq (!%p956_p5) }
  0x5c   : > { %v450_v11 = vld [vmem:[#allocation2 + $0x18] sm:$0xff]  ;;  %v714_v19 = vld [vmem:[%s435_s29] sm:$0x3] (!%p956_p5) }
  0x5d   : > { %662 = vmatpush1.bf16.msra.mxu0 %v1069_v42  ;;  %v717_v18 = vshrl.u32 (!%p956_p5), %v716_v17, 7 }
  0x5e   : > { %663 = vmatprep.subr.bf16.mxu0 %v1070_v43 }
  0x5f   : > { %v718_v21 = vsub.s32 (!%p956_p5), 0, %v717_v18  ;;  %v722_v22 = vsub.s32 (!%p956_p5), 1, %v717_v18 }
  0x61   : > { %664 = vmatpush1.bf16.msra.mxu0 %v1072_v44  ;;  %v719_v26 = vrot.slane (!%p956_p5), %v714_v19, %v718_v21  ;;  %v723_v27 = vrot.slane (!%p956_p5), %v714_v19, %v722_v22 }
  0x62   : > { %665 = vmatprep.subr.bf16.mxu0 %v1073_v45 }
  0x65   : > { %666 = vmatpush1.bf16.msra.mxu0 %v1075_v46 }
  0x66   : > { %667 = vmatprep.subr.bf16.mxu0 %v1076_v47 }
  0x69   : > { %668 = vmatpush1.bf16.msra.mxu0 %v1078_v49 }
  0x6a   : > { %669 = vmatprep.subr.bf16.mxu0 %v1079_v50 }
  0x6d   : > { %670 = vmatpush1.bf16.msra.mxu0 %v1081_v51 }
  0x6e   : > { %671 = vmatprep.subr.bf16.mxu0 %v1082_v52 }
  0x71   : > { %672 = vmatpush1.bf16.msra.mxu0 %v1084_v53 }
  0x72   : > { %673 = vmatprep.subr.bf16.mxu0 %v1085_v54 }
  0x75   : > { %674 = vmatpush1.bf16.msra.mxu0 %v1087_v55 }
  0x76   : > { %675 = vmatprep.subr.bf16.mxu0 %v1088_v56 }
  0x79   : > { %676 = vmatpush1.bf16.msra.mxu0 %v1090_v57 }
  0x7a   : > { %677 = vmatprep.subr.bf16.mxu0 %v1091_v58 }
  0x7d   : > { %678 = vmatpush1.bf16.msra.mxu0 %v1093_v59 }
  0x7e   : > { %679 = vmatprep.subr.bf16.mxu0 %v1094_v60 }
  0x81   : > { %680 = vmatpush1.bf16.msra.mxu0 %v1096_v61 }
  0x82   : > { %681 = vmatprep.subr.bf16.mxu0 %v1097_v62 }
  0x85   : > { %682 = vmatpush1.bf16.msra.mxu0 %v1099_v63 }
  0x86   : > { %683 = vmatprep.subr.bf16.mxu0 %v1100_v0 }
  0x89   : > { %684 = vmatpush1.bf16.msra.mxu0 %v1102_v1 }
  0x8a   : > { %685 = vmatprep.subr.bf16.mxu0 %v1103_v2 }
  0x8d   : > { %686 = vmatpush1.bf16.msra.mxu0 %v1105_v3 }
  0x90   : > { %688 = vmatmul.mubr.bf16.vlgmr.msra.gmra.mrb[0].mxu0 %v1106_v4 }
 0x163   : > { %v689_v7 = vpop.f32.mrb[0].mxu0  ;;  %709 = sbr.rel (%p956_p5) target bundleno = 376 (0x178), region = 116 }
 0x164   : > { %v698_v9 = vadd.f32 %v689_v7, %v447_v5  ;;  %v691_v10 = vpop.f32.mrb[1].mxu0 }
 0x165   : > { %v699_v12 = vadd.f32 %v691_v10, %v448_v6  ;;  %v693_v13 = vpop.f32.mrb[2].mxu0 }
 0x166   : > { %702 = vst [vmem:[#allocation2] sm:$0xff] %v698_v9  ;;  %v700_v14 = vadd.f32 %v693_v13, %v449_v8  ;;  %v695_v15 = vpop.f32.mrb[3].mxu0 }
 0x167   : > { %703 = vst [vmem:[#allocation2 + $0x8] sm:$0xff] %v699_v12  ;;  %v701_v16 = vadd.f32 %v695_v15, %v450_v11 }
 0x168   : > { %704 = vst [vmem:[#allocation2 + $0x10] sm:$0xff] %v700_v14 }
 0x169   : > { %705 = vst [vmem:[#allocation2 + $0x18] sm:$0xff] %v701_v16 }
 0x16d   : > { %v710_v20 = vld [vmem:[#allocation2] sm:$0xff] }
 0x16e   : > { %v711_v23 = vld [vmem:[#allocation2 + $0x8] sm:$0xff]  ;;  %v726_v28 = vadd.f32 %v719_v26, %v710_v20 }
 0x16f   : > { %v712_v24 = vld [vmem:[#allocation2 + $0x10] sm:$0xff]  ;;  %v727_v29 = vadd.f32 %v723_v27, %v711_v23 }
 0x170   : > { %v713_v25 = vld [vmem:[#allocation2 + $0x18] sm:$0xff]  ;;  %v728_v30 = vadd.f32 %v719_v26, %v712_v24  ;;  %v730_v32 = vmax.f32 %v726_v28, 0.0 }
 0x171   : > { %v729_v31 = vadd.f32 %v723_v27, %v713_v25  ;;  %v731_v33 = vmax.f32 %v727_v29, 0.0 }
 0x172   : > { %v732_v34 = vmax.f32 %v728_v30, 0.0 }
 0x173   : > { %v733_v35 = vmax.f32 %v729_v31, 0.0  ;;  %v966_v36 = vpack.c.bf16 %v731_v33, %v730_v32 }
 0x175   : > { %v967_v37 = vpack.c.bf16 %v733_v35, %v732_v34  ;;  %746 = vst [vmem:[%s1417_s16] sm:$0xff] %v966_v36 }
 0x177   : > { %747 = vst [vmem:[%s1417_s16 + $0x8] sm:$0xff] %v967_v37 }
 0x178 PF: > { %754 = sbr.rel (!%p1312_p12) target bundleno = 384 (0x180), region = 120  ;;  %s968_s18 = sshll.u32 (%p1312_p12), %s1183_s19, 3 }
 0x179   : > { %s760_s25 = scalar_lea.vmem (%p1312_p12), %s1508_s3, %s968_s18 }
 0x17c   : > { %v790_v38 = vld [vmem:[%s1417_s16] sm:$0xff] (%p1312_p12) }
 0x17d   : > { %791 = vst [vmem:[%s760_s25] sm:$0xff] (%p1312_p12), %v790_v38 }
 0x17e   : > { %v792_v39 = vld [vmem:[%s1417_s16 + $0x8] sm:$0xff] (%p1312_p12) }
 0x17f   : > { %793 = vst [vmem:[%s760_s25 + $0x10] sm:$0xff] %v792_v39 }
 0x180 PF: > { %s13_s22 = sadd.s32 1, %s1195_s22   ;;  %s1517_s10 = sld [smem:[#allocation8_spill]] }
 0x181   : > { %p10_p6 = scmp.ge.s32.totalorder %s13_s22, 16   ;;  %s1518_s30 = sld [smem:[#allocation6_spill]] }
 0x182   : > { %s1519_s27 = sld [smem:[#allocation7_spill]]  ;;  %s1520_s12 = smov %s1159_s13 }
 0x183   : > { %s1521_s13 = smov %s1310_s9  ;;  %s1522_s14 = smov %s1167_s15 }
 0x184   : > { %s1523_s15 = smov %s1307_s8  ;;  %s1524_s16 = smov %s1175_s17 }
 0x185   : > { %s1526_s18 = smov %s1187_s20  ;;  %s1527_s19 = smov %s1191_s21 }
 0x186   : > { %s1525_s17 = smov %s1517_s10  ;;  %12 = sbr.rel (!%p10_p6) target bundleno = 6 (0x6), region = 200 }
 0x187   : > { %s1528_s20 = smov %s1518_s30 }
 0x188   : > { %s1529_s21 = smov %s1519_s27 }

// kernel: cpm_forward.24
= control target key start
LH: loop header
LB: loop body
LE: loop exit
PB: predicated region body
PF: predicated region fallthrough
CT: control target
= control target key end

     0   :  { %s1839_s0 = inlined_call_operand.vmem [shape: bf16[2,16,512], index: 0, kind: input, shape index: {}]   ;;  %s1840_s1 = inlined_call_operand.vmem [shape: f32[9,1,512], index: 1, kind: input, shape index: {}]   ;;  %s1841_s2 = inlined_call_operand.vmem [shape: f32[1,512], index: 2, kind: input, shape index: {}]   ;;  %s1842_s3 = inlined_call_operand.vmem [shape: f32[1,512], index: 3, kind: input, shape index: {}]   ;;  %s1843_s4 = inlined_call_operand.vmem [shape: bf16[512,256], index: 4, kind: input, shape index: {}]   ;;  %s1844_s5 = inlined_call_operand.vmem [shape: f32[1,256], index: 5, kind: input, shape index: {}]   ;;  %s1845_s6 = inlined_call_operand.vmem [shape: f32[1,256], index: 6, kind: input, shape index: {}]   ;;  %s1846_s7 = inlined_call_operand.vmem [shape: bf16[2,6,256], index: 7, kind: output, shape index: {}]  }
   0x1   :  { %1851 = sst [smem:[#allocation9_spill]] %s1839_s0 }
   0x2   :  { %1852 = sst [smem:[#allocation10_spill]] %s1840_s1 }
   0x3   :  { %s1488_s24 = smov 0   ;;  %s1490_s25 = smov 0  }
   0x4   :  { %s1492_s26 = smov 0   ;;  %s1494_s27 = smov 0  }
   0x5   :  { %s1496_s28 = smov 0   ;;  %s1498_s29 = smov 0  }
   0x6   :  { %s1500_s30 = smov 0   ;;  %s1502_s8 = smov 0  }
   0x7   :  { %s1504_s9 = smov 0  }
   0x8 LB: > { %1853 = sst [smem:[#allocation5_spill]] %s1437_s30  ;;  %s26_s10 = sadd.s32 1, %s1437_s30  ;;  %s1445_s9 = sphi %s1504_s9, %s17_s9   ;;  %s1441_s8 = sphi %s1502_s8, %s1864_s8   ;;  %s1437_s30 = sphi %s1500_s30, %s1863_s30   ;;  %s1433_s29 = sphi %s1498_s29, %s1862_s29   ;;  %s1429_s28 = sphi %s1496_s28, %s1861_s28   ;;  %s1425_s27 = sphi %s1494_s27, %s1868_s27   ;;  %s1421_s26 = sphi %s1492_s26, %s1867_s26   ;;  %s1417_s25 = sphi %s1490_s25, %s1866_s25   ;;  %s1413_s24 = sphi %s1488_s24, %s1865_s24  }
   0x9   : > { %1854 = sst [smem:[#allocation6_spill]] %s1441_s8  ;;  %p27_p0 = scmp.ge.s32.totalorder %s26_s10, 2 }
   0xa   : > { %s29_s11 = sadd.s32 1, %s1441_s8  ;;  %p45_p1 = scmp.ne.s32.totalorder %s1425_s27, %s1421_s26 }
   0xb   : > { %p46_p2 = scmp.eq.s32.totalorder %s1445_s9, 0  ;;  %s1870_s10 = smov (%p27_p0, %s26_s10), 0 }
   0xc   : > { %1855 = sst [smem:[#allocation7_spill]] %s1870_s10  ;;  %s1872_s11 = smov (!%p27_p0, %s29_s11), %s1441_s8 }
   0xd   : > { %s34_s12 = ssub.s32 %s1437_s30, %s1870_s10  ;;  %p1543_p3 = por %p46_p2, %p45_p1 }
   0xe   : > { %p31_p4 = scmp.ge.s32.totalorder %s1872_s11, 2  ;;  %p62_p5 = scmp.eq.s32.totalorder %s34_s12, 0 }
   0xf   : > { %s64_s14 = sadd.s32 1, %s1417_s25  ;;  %p71_p6 = scmp.ne.s32.totalorder %s1417_s25, %s1413_s24 }
  0x10   : > { %s1874_s11 = smov (%p31_p4, %s1872_s11), 0  ;;  %s38_s19 = sadd.s32 1, %s1425_s27 }
  0x11   : > { %1857 = sst [smem:[#allocation8_spill]] %s1874_s11  ;;  %s33_s16 = ssub.s32 %s1441_s8, %s1874_s11 }
  0x12   : > { %s1553_s15 = scalar_select %p62_p5, %s1417_s25, %s64_s14  }
  0x13   : > { %p1557_p7 = por %p71_p6, %p46_p2  ;;  %s35_s18 = sor.u32 %s34_s12, %s33_s16 }
  0x14   : > { %p36_p8 = scmp.eq.s32.totalorder %s35_s18, 0  ;;  %p1189_p9 = scmp.ge.s32.totalorder %s1445_s9, 4 }
  0x16   : > { %s1563_s20 = scalar_select %p36_p8, %s1425_s27, %s38_s19  }
  0x17   : > { %249 = sbr.rel (%p1189_p9) target bundleno = 57 (0x39), region = 24 }
  0x1e   : > { %252 = sbr.rel (!%p1543_p3) target bundleno = 41 (0x29), region = 28  ;;  %s254_s21 = sand.u32 (%p1543_p3), 1, %s1425_s27  }
  0x1f   : > { %s1191_s22 = sshll.u32 (%p1543_p3), %s1437_s30, 1  ;;  %s1190_s23 = sshll.u32 (%p1543_p3), %s254_s21, 4 }
  0x20   : > { %s1192_s14 = sshll.u32 (%p1543_p3), %s1441_s8, 3  ;;  %s1859_s0 = sld [smem:[#allocation9_spill]] (%p1543_p3) }
  0x21   : > { %s259_s11 = sadd.s32 (%p1543_p3), %s1192_s14, %s1191_s22  ;;  %s256_s19 = scalar_lea.vmem (%p1543_p3), [#allocation3], %s1190_s23 }
  0x22   : > { %s1193_s10 = sshll.u32 (%p1543_p3), %s259_s11, 2 }
  0x26   : > { %s261_s18 = scalar_lea.vmem %s1859_s0, %s1193_s10 }
  0x27   : > { %v291_v0 = vld [vmem:[%s261_s18] sm:$0xff]  ;;  %v293_v1 = vld [vmem:[%s261_s18 + $0x10] sm:$0xff] }
  0x28   : > { %292 = vst [vmem:[%s256_s19] sm:$0xff] %v291_v0  ;;  %294 = vst [vmem:[%s256_s19 + $0x8] sm:$0xff] %v293_v1 }
  0x29 PF: > { %300 = sbr.rel (!%p1557_p7) target bundleno = 57 (0x39), region = 66  ;;  %s302_s13 = sand.u32 (%p1557_p7), 1, %s1417_s25  }
  0x2a   : > { %s1194_s21 = sshll.u32 (%p1557_p7), %s1437_s30, 1  ;;  %s1252_s8 = smul.u32 (%p1557_p7), 18, %s302_s13 }
  0x2b   : > { %s1860_s1 = sld [smem:[#allocation10_spill]] (%p1557_p7) }
  0x2c   : > { %s304_s10 = scalar_lea.vmem (%p1557_p7), [#allocation4], %s1252_s8 }
  0x31   : > { %s306_s14 = scalar_lea.vmem %s1860_s1, %s1194_s21 }
  0x32   : > { %v322_v2 = vld [vmem:[%s306_s14] sm:$0x3]  ;;  %v324_v3 = vld [vmem:[%s306_s14 + $0x4] sm:$0x3]  ;;  %v326_v4 = vld [vmem:[%s306_s14 + $0x8] sm:$0x3] }
  0x33   : > { %v328_v5 = vld [vmem:[%s306_s14 + $0xc] sm:$0x3]  ;;  %v330_v6 = vld [vmem:[%s306_s14 + $0x10] sm:$0x3]  ;;  %323 = vst [vmem:[%s304_s10] sm:$0x3] %v322_v2 }
  0x34   : > { %325 = vst [vmem:[%s304_s10 + $0x2] sm:$0x3] %v324_v3  ;;  %327 = vst [vmem:[%s304_s10 + $0x4] sm:$0x3] %v326_v4  ;;  %v332_v7 = vld [vmem:[%s306_s14 + $0x14] sm:$0x3] }
  0x35   : > { %329 = vst [vmem:[%s304_s10 + $0x6] sm:$0x3] %v328_v5  ;;  %331 = vst [vmem:[%s304_s10 + $0x8] sm:$0x3] %v330_v6  ;;  %v334_v8 = vld [vmem:[%s306_s14 + $0x18] sm:$0x3] }
  0x36   : > { %v336_v9 = vld [vmem:[%s306_s14 + $0x1c] sm:$0x3]  ;;  %333 = vst [vmem:[%s304_s10 + $0xa] sm:$0x3] %v332_v7  ;;  %335 = vst [vmem:[%s304_s10 + $0xc] sm:$0x3] %v334_v8 }
  0x37   : > { %337 = vst [vmem:[%s304_s10 + $0xe] sm:$0x3] %v336_v9  ;;  %v338_v10 = vld [vmem:[%s306_s14 + $0x20] sm:$0x3] }
  0x38   : > { %339 = vst [vmem:[%s304_s10 + $0x10] sm:$0x3] %v338_v10 }
  0x39 PF: > { %p1195_p10 = scmp.ge.s32.totalorder %s1445_s9, 1  ;;  %p405_p11 = scmp.lt.s32.totalorder %s1445_s9, 5 }
  0x3b   : > { %p406_p12 = pnand %p1195_p10, %p405_p11 }
  0x3c   : > { %s412_s8 = sand.u32 (!%p406_p12), 1, %s1421_s26   ;;  %s419_s17 = sand.u32 (!%p406_p12), 1, %s1413_s24  }
  0x3d   : > { %409 = sbr.rel (%p406_p12) target bundleno = 376 (0x178), region = 119  ;;  %s1196_s23 = sshll.u32 (!%p406_p12), %s412_s8, 4 }
  0x3e   : > { %s1253_s12 = smul.u32 (!%p406_p12), 18, %s419_s17  ;;  %s1197_s16 = sshll.u32 (!%p406_p12), %s1429_s28, 1 }
  0x3f   : > { %p471_p13 = scmp.lt.s32.totalorder (!%p406_p12), %s1197_s16, 3  ;;  %s1199_s18 = sshll.u32 (!%p406_p12), %s1429_s28, 5 }
  0x40   : > { %p487_p0 = scmp.lt.s32.totalorder (!%p406_p12), %s1433_s29, 1  ;;  %p481_p1 = scmp.lt.s32.totalorder (!%p406_p12), %s1199_s18, 63 }
  0x41   : > { %s1609_s19 = scalar_lea.vmem (!%p406_p12), [#allocation3], %s1196_s23  ;;  %s1611_s13 = scalar_lea.vmem (!%p406_p12), [#allocation4], %s1253_s12 }
  0x42   : > { %p1204_p2 = scmp.ne.s32.totalorder (!%p406_p12), %s1429_s28, 0 }
  0x44   : > { %s1876_s16 = smov (!%p471_p13, %s1197_s16), 3  ;;  %s1878_s18 = smov (!%p481_p1, %s1199_s18), 63 }
  0x45   : > { %s473_s21 = scalar_lea.vmem %s1841_s2, %s1876_s16  ;;  %s478_s26 = scalar_lea.vmem %s1842_s3, %s1876_s16  ;;  %v1447_v11 = vmov (!%p1204_p2), 0.0  }
  0x46   : > { %s1880_s29 = smov (!%p487_p0, %s1433_s29), 1  ;;  %s1249_s24 = sshll.u32 %s1878_s18, 3  ;;  %496 = vst [vmem:[#allocation2] sm:$0x3f] (!%p1204_p2), %v1447_v11  ;;  %497 = vst [vmem:[#allocation2 + $0x8] sm:$0x3f] (!%p1204_p2), %v1447_v11 }
  0x47   : > { %s1602_s8 = scalar_lea.vmem %s1843_s4, %s1249_s24  ;;  %s1250_s17 = sshll.u32 %s1880_s29, 3 }
  0x48   : > { %s1607_s30 = scalar_lea.vmem %s1846_s7, %s1250_s17  ;;  %495 = sbr.rel (%p1204_p2) target bundleno = 79 (0x4f), region = 131 }
  0x4f PF: > { %v1327_v12 = vld [vmem:[%s1602_s8 + $0x4] ss:$8 sps:$4 sm:$0xff]   ;;  %v1329_v13 = vld [vmem:[%s1602_s8] ss:$8 sps:$4 sm:$0xff]   ;;  %v1330_v14 = vld [vmem:[%s1602_s8 + $0x14] ss:$8 sps:$4 sm:$0xff]   ;;  %v503_v20 = vlaneseq }
  0x50   : > { %973 = vmatprep.subr.bf16.mxu0 %v1327_v12  ;;  %v1332_v15 = vld [vmem:[%s1602_s8 + $0x10] ss:$8 sps:$4 sm:$0xff]   ;;  %v1333_v16 = vld [vmem:[%s1602_s8 + $0x24] ss:$8 sps:$4 sm:$0xff]   ;;  %v1335_v17 = vld [vmem:[%s1602_s8 + $0x20] ss:$8 sps:$4 sm:$0xff]  }
  0x51   : > { %974 = vmatpush1.bf16.msra.mxu0 %v1329_v13  ;;  %v1336_v18 = vld [vmem:[%s1602_s8 + $0x34] ss:$8 sps:$4 sm:$0xff]   ;;  %v1338_v19 = vld [vmem:[%s1602_s8 + $0x30] ss:$8 sps:$4 sm:$0xff]   ;;  %v1339_v21 = vld [vmem:[%s1602_s8 + $0x44] ss:$8 sps:$4 sm:$0xff]  }
  0x52   : > { %975 = vmatprep.subr.bf16.mxu0 %v1330_v14  ;;  %v1341_v22 = vld [vmem:[%s1602_s8 + $0x40] ss:$8 sps:$4 sm:$0xff]   ;;  %v504_v23 = vshrl.u32 %v503_v20, 7  ;;  %v1342_v24 = vld [vmem:[%s1602_s8 + $0x54] ss:$8 sps:$4 sm:$0xff]   ;;  %vm594_vm0 = vcmask 1043456  }
  0x53   : > { %v1344_v25 = vld [vmem:[%s1602_s8 + $0x50] ss:$8 sps:$4 sm:$0xff]   ;;  %v1345_v27 = vld [vmem:[%s1602_s8 + $0x64] ss:$8 sps:$4 sm:$0xff]   ;;  %v1347_v28 = vld [vmem:[%s1602_s8 + $0x60] ss:$8 sps:$4 sm:$0xff]  }
  0x54   : > { %v1626_v26 = vsub.s32 1, %v504_v23  ;;  %v1631_v29 = vld [vmem:[%s1609_s19] sm:$0x77]  ;;  %v1637_v32 = vsub.s32 0, %v504_v23  ;;  %v1660_v41 = vld [vmem:[%s1609_s19 + $0x8] sm:$0x11] }
  0x55   : > { %976 = vmatpush1.bf16.msra.mxu0 %v1332_v15  ;;  %v1634_v30 = vld [vmem:[%s1611_s13] sm:$0x3]  ;;  %v500_v31 = vunpack.c.h.bf16 %v1631_v29  ;;  %v1645_v35 = vld [vmem:[%s1611_s13 + $0x2] sm:$0x3]  ;;  %v1654_v39 = vld [vmem:[%s1611_s13 + $0x4] sm:$0x3]  ;;  %v499_v43 = vunpack.c.l.bf16 %v1631_v29  ;;  %v572_v56 = vunpack.c.h.bf16 %v1660_v41  ;;  %v571_v8 = vunpack.c.l.bf16 %v1660_v41 }
  0x56   : > { %977 = vmatprep.subr.bf16.mxu0 %v1333_v16  ;;  %v510_v33 = vrot.slane %v1634_v30, %v1626_v26  ;;  %v1642_v34 = vld [vmem:[%s1609_s19] sm:$0xff]  ;;  %v528_v38 = vrot.slane %v1645_v35, %v1626_v26  ;;  %vm629_vm1 = vcmask 1042432   ;;  %v506_v44 = vrot.slane %v1634_v30, %v1637_v32  ;;  %v1670_v48 = vld [vmem:[%s1609_s19 + $0x8] sm:$0x33]  ;;  %p1245_p3 = scmp.ne.s32.totalorder %s1429_s28, 1 }
  0x57   : > { %v1648_v36 = vld [vmem:[%s1609_s19] sm:$0xee]  ;;  %v517_v37 = vunpack.c.h.bf16 %v1642_v34  ;;  %v516_v45 = vunpack.c.l.bf16 %v1642_v34  ;;  %v554_v51 = vrot.slane %v1654_v39, %v1626_v26  ;;  %v1208_v53 = vld [vmem:[%s1611_s13 + $0x8] sm:$0x3]  ;;  %v524_v54 = vrot.slane %v1645_v35, %v1637_v32  ;;  %v1209_v5 = vld [vmem:[%s1611_s13 + $0xa] sm:$0x3] }
  0x58   : > { %v1657_v40 = vld [vmem:[%s1609_s19] sm:$0xcc]  ;;  %v543_v46 = vunpack.c.h.bf16 %v1648_v36  ;;  %v514_v49 = vmul.f32 %v510_v33, %v500_v31  ;;  %v542_v55 = vunpack.c.l.bf16 %v1648_v36  ;;  %vm664_vm2 = vcmask 1041408   ;;  %v1695_v10 = vld [vmem:[%s1609_s19 + $0x8] sm:$0x77] }
  0x59   : > { %978 = vmatpush1.bf16.msra.mxu0 %v1335_v17  ;;  %v1348_v42 = vld [vmem:[%s1602_s8 + $0x74] ss:$8 sps:$4 sm:$0xff]   ;;  %v532_v50 = vmul.f32 %v528_v38, %v517_v37  ;;  %v570_v52 = vunpack.c.h.bf16 %v1657_v40  ;;  %v1350_v59 = vld [vmem:[%s1602_s8 + $0x70] ss:$8 sps:$4 sm:$0xff]   ;;  %v550_v61 = vrot.slane %v1654_v39, %v1637_v32  ;;  %v607_v63 = vunpack.c.h.bf16 %v1670_v48  ;;  %v1351_v0 = vld [vmem:[%s1602_s8 + $0x84] ss:$8 sps:$4 sm:$0xff]  }
  0x5a   : > { %979 = vmatprep.subr.bf16.mxu0 %v1336_v18  ;;  %v1207_v47 = vld [vmem:[%s1611_s13 + $0x6] sm:$0x3]  ;;  %v558_v62 = vmul.f32 %v554_v51, %v543_v46  ;;  %v569_v1 = vunpack.c.l.bf16 %v1657_v40  ;;  %v618_v4 = vrot.slane %v1208_v53, %v1626_v26  ;;  %v606_v18 = vunpack.c.l.bf16 %v1670_v48  ;;  %v1702_v20 = vld [vmem:[%s1611_s13 + $0xc] sm:$0x3]  ;;  %v1712_v38 = vld [vmem:[%s1611_s13 + $0xe] sm:$0x3] }
  0x5b   : > { %v583_v57 = vrot.slane %v1207_v47, %v1626_v26  ;;  %v1682_v58 = vld [vmem:[%s1609_s19] sm:$0x88]  ;;  %v536_v60 = vrot.slane %v532_v50, 1  ;;  %v579_v17 = vrot.slane %v1207_v47, %v1637_v32  ;;  %v614_v31 = vrot.slane %v1208_v53, %v1637_v32  ;;  %v1723_v51 = vld [vmem:[%s1611_s13 + $0x10] sm:$0x3] }
  0x5c   : > { %v562_v7 = vrot.slane %v558_v62, 2  ;;  %v642_v9 = vunpack.c.h.bf16 %v1682_v58  ;;  %v622_v13 = vmul.f32 %v618_v4, %v570_v52  ;;  %v624_v14 = vmul.f32 %v618_v4, %v607_v63  ;;  %v1353_v15 = vld [vmem:[%s1602_s8 + $0x80] ss:$8 sps:$4 sm:$0xff]   ;;  %v1366_v48 = vld [vmem:[%s1602_s8 + $0xd4] ss:$8 sps:$4 sm:$0xff]  }
  0x5d   : > { %980 = vmatpush1.bf16.msra.mxu0 %v1338_v19  ;;  %v587_v2 = vmul.f32 %v583_v57, %v570_v52  ;;  %v589_v3 = vmul.f32 %v583_v57, %v572_v56  ;;  %v540_v6 = vadd.f32 %v536_v60, %v514_v49  ;;  %v653_v19 = vrot.slane %v1209_v5, %v1626_v26  ;;  %v1356_v52 = vld [vmem:[%s1602_s8 + $0x90] ss:$8 sps:$4 sm:$0xff]   ;;  %v1357_v60 = vld [vmem:[%s1602_s8 + $0xa4] ss:$8 sps:$4 sm:$0xff]   ;;  %v761_v34 = vld [vmem:[%s478_s26] sm:$0x3] }
  0x5e   : > { %981 = vmatprep.subr.bf16.mxu0 %v1339_v21  ;;  %v1705_v21 = vld [vmem:[%s1609_s19 + $0x8] sm:$0xff]  ;;  %v641_v47 = vunpack.c.l.bf16 %v1682_v58  ;;  %v688_v49 = vrot.slane %v1702_v20, %v1626_v26  ;;  %v649_v56 = vrot.slane %v1209_v5, %v1637_v32  ;;  %v676_v58 = vunpack.c.l.bf16 %v1695_v10 }
  0x5f   : > { %v598_v11 = vrot.slane %v587_v2, 4  ;;  %v599_v12 = vrot.slane %v589_v3, 4  ;;  %v566_v16 = vadd.f32 %v562_v7, %v540_v6  ;;  %v657_v33 = vmul.f32 %v653_v19, %v642_v9  ;;  %v1737_v2 = vld [vmem:[%s473_s21] sm:$0x3] }
  0x60   : > { %v659_v37 = vmul.f32 %v653_v19, %v607_v63  ;;  %v697_v50 = vunpack.c.h.bf16 %v1705_v21  ;;  %v708_v63 = vrot.slane %v1712_v38, %v1626_v26  ;;  %v684_v4 = vrot.slane %v1702_v20, %v1637_v32  ;;  %v1360_v19 = vld [vmem:[%s1602_s8 + $0xb4] ss:$8 sps:$4 sm:$0xff]  }
  0x61   : > { %982 = vmatpush1.bf16.msra.mxu0 %v1341_v22  ;;  %v1354_v22 = vld [vmem:[%s1602_s8 + $0x94] ss:$8 sps:$4 sm:$0xff]   ;;  %v600_v23 = vsel %vm594_vm0, %v598_v11, %v599_v12  ;;  %v668_v57 = vrot.slane %v657_v33, 6  ;;  %v696_v5 = vunpack.c.l.bf16 %v1705_v21  ;;  %v734_v6 = vrot.slane %v1723_v51, %v1626_v26  ;;  %v1359_v12 = vld [vmem:[%s1602_s8 + $0xa0] ss:$8 sps:$4 sm:$0xff]  }
  0x62   : > { %983 = vmatprep.subr.bf16.mxu0 %v1342_v24  ;;  %v633_v24 = vrot.slane %v622_v13, 5  ;;  %v704_v9 = vrot.slane %v1712_v38, %v1637_v32  ;;  %v557_v29 = vmul.f32 %v550_v61, %v542_v55  ;;  %v586_v30 = vmul.f32 %v579_v17, %v569_v1  ;;  %v1362_v61 = vld [vmem:[%s1602_s8 + $0xb0] ss:$8 sps:$4 sm:$0xff]  }
  0x63   : > { %v621_v36 = vmul.f32 %v614_v31, %v569_v1  ;;  %v623_v55 = vmul.f32 %v614_v31, %v606_v18  ;;  %v770_v40 = vrot.slane %v761_v34, %v1626_v26 }
  0x64   : > { %v561_v39 = vrot.slane %v557_v29, 2 }
  0x65   : > { %984 = vmatpush1.bf16.msra.mxu0 %v1344_v25  ;;  %v634_v25 = vrot.slane %v624_v14, 5  ;;  %v756_v14 = vrot.slane %v1737_v2, %v1626_v26  ;;  %v631_v1 = vrot.slane %v623_v55, 5 }
  0x66   : > { %985 = vmatprep.subr.bf16.mxu0 %v1345_v27  ;;  %v677_v27 = vunpack.c.h.bf16 %v1695_v10  ;;  %v712_v10 = vmul.f32 %v708_v63, %v697_v50 }
  0x67   : > { %v635_v46 = vsel %vm629_vm1, %v633_v24, %v634_v25  ;;  %v630_v24 = vrot.slane %v621_v36, 5  ;;  %v656_v25 = vmul.f32 %v649_v56, %v641_v47 }
  0x68   : > { %v692_v62 = vmul.f32 %v688_v49, %v677_v27  ;;  %v716_v21 = vrot.slane %v712_v10, 1  ;;  %v1363_v27 = vld [vmem:[%s1602_s8 + $0xc4] ss:$8 sps:$4 sm:$0xff]   ;;  %v711_v49 = vmul.f32 %v704_v9, %v696_v5  ;;  %v1371_v5 = vld [vmem:[%s1602_s8 + $0xe0] ss:$8 sps:$4 sm:$0xff]  }
  0x69   : > { %986 = vmatpush1.bf16.msra.mxu0 %v1347_v28  ;;  %v604_v28 = vadd.f32 %v600_v23, %v566_v16  ;;  %v531_v16 = vmul.f32 %v524_v54, %v516_v45  ;;  %v595_v54 = vrot.slane %v586_v30, 4  ;;  %v665_v33 = vrot.slane %v656_v25, 6  ;;  %v1374_v10 = vld [vmem:[%s1602_s8 + $0xf0] ss:$8 sps:$4 sm:$0xff]  }
  0x6a   : > { %987 = vmatprep.subr.bf16.mxu0 %v1348_v42  ;;  %v1715_v42 = vld [vmem:[%s1609_s19 + $0x8] sm:$0xee]  ;;  %v632_v38 = vsel %vm629_vm1, %v630_v24, %v631_v1 }
  0x6b   : > { %v639_v53 = vadd.f32 %v635_v46, %v604_v28  ;;  %v722_v11 = vunpack.c.l.bf16 %v1715_v42  ;;  %v535_v35 = vrot.slane %v531_v16, 1  ;;  %v1365_v46 = vld [vmem:[%s1602_s8 + $0xc0] ss:$8 sps:$4 sm:$0xff]  }
  0x6c   : > { %v778_v16 = vld [vmem:[#allocation2 + $0x8] sm:$0x3f] }
  0x6d   : > { %988 = vmatpush1.bf16.msra.mxu0 %v1350_v59  ;;  %v669_v59 = vrot.slane %v659_v37, 6 }
  0x6e   : > { %989 = vmatprep.subr.bf16.mxu0 %v1351_v0  ;;  %v723_v0 = vunpack.c.h.bf16 %v1715_v42 }
  0x6f   : > { %v670_v3 = vsel %vm664_vm2, %v668_v57, %v669_v59  ;;  %v1368_v57 = vld [vmem:[%s1602_s8 + $0xd0] ss:$8 sps:$4 sm:$0xff]  }
  0x70   : > { %v674_v7 = vadd.f32 %v670_v3, %v639_v53  ;;  %v738_v13 = vmul.f32 %v734_v6, %v723_v0  ;;  %v752_v6 = vrot.slane %v1737_v2, %v1637_v32 }
  0x71   : > { %990 = vmatpush1.bf16.msra.mxu0 %v1353_v15  ;;  %v513_v15 = vmul.f32 %v506_v44, %v499_v43  ;;  %v588_v44 = vmul.f32 %v579_v17, %v571_v8  ;;  %v658_v8 = vmul.f32 %v649_v56, %v606_v18  ;;  %v730_v17 = vrot.slane %v1723_v51, %v1637_v32 }
  0x72   : > { %991 = vmatprep.subr.bf16.mxu0 %v1354_v22  ;;  %v694_v20 = vadd.f32 %v692_v62, %v674_v7  ;;  %v742_v43 = vrot.slane %v738_v13, 2  ;;  %v1369_v62 = vld [vmem:[%s1602_s8 + $0xe4] ss:$8 sps:$4 sm:$0xff]   ;;  %v766_v7 = vrot.slane %v761_v34, %v1637_v32 }
  0x73   : > { %v539_v22 = vadd.f32 %v535_v35, %v513_v15  ;;  %v596_v23 = vrot.slane %v588_v44, 4  ;;  %v666_v42 = vrot.slane %v658_v8, 6  ;;  %v737_v53 = vmul.f32 %v730_v17, %v722_v11  ;;  %v777_v15 = vld [vmem:[#allocation2] sm:$0x3f] }
  0x74   : > { %v720_v45 = vadd.f32 %v716_v21, %v694_v20  ;;  %v1024_v35 = vld [vmem:[%s1844_s5] sm:$0x3] (!%p1245_p3) }
  0x75   : > { %992 = vmatpush1.bf16.msra.mxu0 %v1356_v52  ;;  %v565_v28 = vadd.f32 %v561_v39, %v539_v22  ;;  %v597_v31 = vsel %vm594_vm0, %v595_v54, %v596_v23  ;;  %v667_v50 = vsel %vm664_vm2, %v665_v33, %v666_v42  ;;  %v691_v52 = vmul.f32 %v684_v4, %v676_v58  ;;  %v1372_v4 = vld [vmem:[%s1602_s8 + $0xf4] ss:$8 sps:$4 sm:$0xff]  }
  0x76   : > { %993 = vmatprep.subr.bf16.mxu0 %v1357_v60  ;;  %v746_v41 = vadd.f32 %v742_v43, %v720_v45  ;;  %v715_v60 = vrot.slane %v711_v49, 1  ;;  %v741_v3 = vrot.slane %v737_v53, 2  ;;  %v1029_v44 = vrot.slane (!%p1245_p3), %v1024_v35, %v1637_v32  ;;  %v1038_v45 = vld [vmem:[%s1845_s6] sm:$0x3] (!%p1245_p3) }
  0x77   : > { %v603_v47 = vadd.f32 %v597_v31, %v565_v28  ;;  %v1033_v36 = vrot.slane (!%p1245_p3), %v1024_v35, %v1626_v26  ;;  %v1043_v39 = vrot.slane (!%p1245_p3), %v1038_v45, %v1637_v32  ;;  %v1047_v54 = vrot.slane (!%p1245_p3), %v1038_v45, %v1626_v26 }
  0x78   : > { %v760_v37 = vmul.f32 %v756_v14, %v746_v41 }
  0x79   : > { %994 = vmatpush1.bf16.msra.mxu0 %v1359_v12  ;;  %v638_v51 = vadd.f32 %v632_v38, %v603_v47 }
  0x7a   : > { %995 = vmatprep.subr.bf16.mxu0 %v1360_v19  ;;  %v774_v18 = vadd.f32 %v770_v40, %v760_v37 }
  0x7b   : > { %v673_v59 = vadd.f32 %v667_v50, %v638_v51 }
  0x7c   : > { %v776_v56 = vmax.f32 %v774_v18, 0.0 }
  0x7d   : > { %996 = vmatpush1.bf16.msra.mxu0 %v1362_v61  ;;  %v693_v0 = vadd.f32 %v691_v52, %v673_v59 }
  0x7e   : > { %997 = vmatprep.subr.bf16.mxu0 %v1363_v27  ;;  %v780_v63 = vpack.c.bf16 %v776_v56, %v776_v56 }
  0x7f   : > { %v719_v58 = vadd.f32 %v715_v60, %v693_v0 }
  0x80   : > { %1005 = vmatprep.mubr.bf16.mxu0 %v780_v63 }
  0x81   : > { %998 = vmatpush1.bf16.msra.mxu0 %v1365_v46  ;;  %v745_v9 = vadd.f32 %v741_v3, %v719_v58 }
  0x82   : > { %999 = vmatprep.subr.bf16.mxu0 %v1366_v48 }
  0x83   : > { %v759_v11 = vmul.f32 %v752_v6, %v745_v9 }
  0x85   : > { %1000 = vmatpush1.bf16.msra.mxu0 %v1368_v57  ;;  %v773_v12 = vadd.f32 %v766_v7, %v759_v11 }
  0x86   : > { %1001 = vmatprep.subr.bf16.mxu0 %v1369_v62 }
  0x87   : > { %v775_v13 = vmax.f32 %v773_v12, 0.0 }
  0x89   : > { %1002 = vmatpush1.bf16.msra.mxu0 %v1371_v5  ;;  %v779_v14 = vpack.c.bf16 %v775_v13, %v775_v13 }
  0x8a   : > { %1003 = vmatprep.subr.bf16.mxu0 %v1372_v4 }
  0x8d   : > { %1004 = vmatpush1.bf16.msra.mxu0 %v1374_v10 }
  0x90   : > { %1006 = vmatmul.mubr.bf16.vlgmr.msra.gmra.mrb[0].mxu0 %v779_v14 }
 0x161   : > { %1021 = sbr.rel (%p1245_p3) target bundleno = 376 (0x178), region = 135 }
 0x163   : > { %v1007_v19 = vpop.f32.mrb[0].mxu0 }
 0x164   : > { %v1014_v20 = vadd.f32 %v1007_v19, %v777_v15  ;;  %v1009_v2 = vpop.f32.mrb[1].mxu0 }
 0x165   : > { %v1015_v21 = vadd.f32 %v1009_v2, %v778_v16  ;;  %v1011_v29 = vpop.f32.mrb[2].mxu0 }
 0x166   : > { %1016 = vst [vmem:[#allocation2] sm:$0x3f] %v1014_v20  ;;  %v1012_v30 = vpop.f32.mrb[3].mxu0 }
 0x167   : > { %1017 = vst [vmem:[#allocation2 + $0x8] sm:$0x3f] %v1015_v21 }
 0x16d   : > { %v1022_v43 = vld [vmem:[#allocation2] sm:$0x3f] }
 0x16e   : > { %v1023_v34 = vld [vmem:[#allocation2 + $0x8] sm:$0x3f]  ;;  %v1036_v55 = vmul.f32 %v1029_v44, %v1022_v43 }
 0x16f   : > { %v1037_v61 = vmul.f32 %v1033_v36, %v1023_v34 }
 0x170   : > { %v1050_v22 = vadd.f32 %v1043_v39, %v1036_v55 }
 0x171   : > { %v1051_v23 = vadd.f32 %v1047_v54, %v1037_v61 }
 0x172   : > { %v1052_v24 = vmax.f32 %v1050_v22, 0.0 }
 0x173   : > { %v1053_v25 = vmax.f32 %v1051_v23, 0.0 }
 0x175   : > { %v1251_v27 = vpack.c.bf16 %v1053_v25, %v1052_v24 }
 0x177   : > { %1062 = vst [vmem:[%s1607_s30] sm:$0x77] %v1251_v27 }
 0x178 PF: > { %s17_s9 = sadd.s32 1, %s1445_s9   ;;  %s1861_s28 = sld [smem:[#allocation5_spill]] }
 0x179   : > { %p14_p4 = scmp.ge.s32.totalorder %s17_s9, 6   ;;  %s1862_s29 = sld [smem:[#allocation6_spill]] }
 0x17a   : > { %s1863_s30 = sld [smem:[#allocation7_spill]]  ;;  %s1864_s8 = sld [smem:[#allocation8_spill]] }
 0x17b   : > { %s1865_s24 = smov %s1417_s25  ;;  %s1866_s25 = smov %s1553_s15 }
 0x17c   : > { %s1867_s26 = smov %s1425_s27  ;;  %s1868_s27 = smov %s1563_s20 }
 0x17d   :  { %16 = sbr.rel (!%p14_p4) target bundleno = 8 (0x8), region = 195 }

// kernel: cpm_forward.25
= control target key start
LH: loop header
LB: loop body
LE: loop exit
PB: predicated region body
PF: predicated region fallthrough
CT: control target
= control target key end

     0   :  { %s1277_s24 = smov 0   ;;  %s1279_s25 = smov 0   ;;  %s1594_s0 = inlined_call_operand.vmem [shape: bf16[2,16,256], index: 0, kind: input, shape index: {}]   ;;  %s1595_s1 = inlined_call_operand.vmem [shape: f32[9,1,256], index: 1, kind: input, shape index: {}]   ;;  %s1596_s2 = inlined_call_operand.vmem [shape: f32[1,256], index: 2, kind: input, shape index: {}]   ;;  %s1597_s3 = inlined_call_operand.vmem [shape: f32[1,256], index: 3, kind: input, shape index: {}]   ;;  %s1598_s4 = inlined_call_operand.vmem [shape: bf16[256,256], index: 4, kind: input, shape index: {}]   ;;  %s1599_s5 = inlined_call_operand.vmem [shape: f32[1,256], index: 5, kind: input, shape index: {}]   ;;  %s1600_s6 = inlined_call_operand.vmem [shape: f32[1,256], index: 6, kind: input, shape index: {}]   ;;  %s1601_s7 = inlined_call_operand.vmem [shape: bf16[2,6,256], index: 7, kind: output, shape index: {}]  }
   0x1   :  { %s1281_s26 = smov 0  }
   0x2 LB: > { %s29_s27 = sadd.s32 1, %s1230_s25  ;;  %p1088_p0 = scmp.ge.s32.totalorder %s1234_s26, 1  ;;  %s1234_s26 = sphi %s1281_s26, %s17_s26   ;;  %s1230_s25 = sphi %s1279_s25, %s1603_s25   ;;  %s1226_s24 = sphi %s1277_s24, %s1602_s24  }
   0x3   : > { %p31_p1 = scmp.ge.s32.totalorder %s29_s27, 2  ;;  %p298_p2 = scmp.lt.s32.totalorder %s1234_s26, 3 }
   0x5   : > { %s1605_s27 = smov (%p31_p1, %s29_s27), 0  ;;  %p299_p3 = pnand %p1088_p0, %p298_p2 }
   0x6   : > { %v1164_v0 = vld [vmem:[%s1598_s4 + $0x4] ss:$8 sps:$4 sm:$0xff] (!%p299_p3)   ;;  %v1166_v1 = vld [vmem:[%s1598_s4] ss:$8 sps:$4 sm:$0xff] (!%p299_p3)   ;;  %v1167_v2 = vld [vmem:[%s1598_s4 + $0x14] ss:$8 sps:$4 sm:$0xff] (!%p299_p3)   ;;  %v400_v9 = vlaneseq (!%p299_p3) }
   0x7   : > { %302 = sbr.rel (%p299_p3) target bundleno = 303 (0x12f), region = 48  ;;  %870 = vmatprep.subr.bf16.mxu0 (!%p299_p3), %v1164_v0  ;;  %v1169_v3 = vld [vmem:[%s1598_s4 + $0x10] ss:$8 sps:$4 sm:$0xff] (!%p299_p3)   ;;  %v1170_v4 = vld [vmem:[%s1598_s4 + $0x24] ss:$8 sps:$4 sm:$0xff] (!%p299_p3)   ;;  %v1236_v6 = vmov (!%p299_p3), 0.0  }
   0x8   : > { %871 = vmatpush1.bf16.msra.mxu0 (!%p299_p3), %v1166_v1  ;;  %v1172_v5 = vld [vmem:[%s1598_s4 + $0x20] ss:$8 sps:$4 sm:$0xff] (!%p299_p3)   ;;  %393 = vst [vmem:[#allocation2] sm:$0x3f] (!%p299_p3), %v1236_v6  ;;  %394 = vst [vmem:[#allocation2 + $0x8] sm:$0x3f] (!%p299_p3), %v1236_v6 }
   0x9   : > { %872 = vmatprep.subr.bf16.mxu0 (!%p299_p3), %v1167_v2  ;;  %v1173_v7 = vld [vmem:[%s1598_s4 + $0x34] ss:$8 sps:$4 sm:$0xff] (!%p299_p3)   ;;  %p353_p4 = scmp.lt.s32.totalorder (!%p299_p3), %s1226_s24, 1  ;;  %v1175_v8 = vld [vmem:[%s1598_s4 + $0x30] ss:$8 sps:$4 sm:$0xff] (!%p299_p3)   ;;  %v401_v12 = vshrl.u32 (!%p299_p3), %v400_v9, 7 }
   0xa   : > { %v1176_v10 = vld [vmem:[%s1598_s4 + $0x44] ss:$8 sps:$4 sm:$0xff] (!%p299_p3)   ;;  %v1178_v11 = vld [vmem:[%s1598_s4 + $0x40] ss:$8 sps:$4 sm:$0xff] (!%p299_p3)   ;;  %v1179_v13 = vld [vmem:[%s1598_s4 + $0x54] ss:$8 sps:$4 sm:$0xff] (!%p299_p3)  }
   0xb   : > { %v1181_v14 = vld [vmem:[%s1598_s4 + $0x50] ss:$8 sps:$4 sm:$0xff] (!%p299_p3)   ;;  %v1343_v15 = vsub.s32 (!%p299_p3), 1, %v401_v12  ;;  %v1182_v16 = vld [vmem:[%s1598_s4 + $0x64] ss:$8 sps:$4 sm:$0xff] (!%p299_p3)   ;;  %vm491_vm0 = vcmask (!%p299_p3), 1043456  }
   0xc   : > { %873 = vmatpush1.bf16.msra.mxu0 (!%p299_p3), %v1169_v3  ;;  %v1184_v17 = vld [vmem:[%s1598_s4 + $0x60] ss:$8 sps:$4 sm:$0xff] (!%p299_p3)   ;;  %v1360_v21 = vsub.s32 (!%p299_p3), 0, %v401_v12  ;;  %v1381_v28 = vld [vmem:[%s1595_s1 + $0x4] sm:$0x3] (!%p299_p3)  ;;  %vm526_vm1 = vcmask (!%p299_p3), 1042432  }
   0xd   : > { %874 = vmatprep.subr.bf16.mxu0 (!%p299_p3), %v1170_v4  ;;  %v1357_v19 = vld [vmem:[%s1595_s1] sm:$0x3] (!%p299_p3)  ;;  %v1370_v24 = vld [vmem:[%s1595_s1 + $0x2] sm:$0x3] (!%p299_p3)  ;;  %v1185_v31 = vld [vmem:[%s1598_s4 + $0x74] ss:$8 sps:$4 sm:$0xff] (!%p299_p3)   ;;  %v451_v40 = vrot.slane (!%p299_p3), %v1381_v28, %v1343_v15 }
   0xe   : > { %s1607_s24 = smov (!%p353_p4, %s1226_s24), 1  ;;  %v407_v22 = vrot.slane %v1357_v19, %v1343_v15  ;;  %v425_v27 = vrot.slane %v1370_v24, %v1343_v15  ;;  %v403_v33 = vrot.slane %v1357_v19, %v1360_v21  ;;  %v1095_v36 = vld [vmem:[%s1595_s1 + $0x6] sm:$0x3]  ;;  %v1096_v42 = vld [vmem:[%s1595_s1 + $0x8] sm:$0x3]  ;;  %v421_v43 = vrot.slane %v1370_v24, %v1360_v21 }
   0xf   : > { %s1136_s8 = sshll.u32 %s1607_s24, 4  ;;  %v480_v46 = vrot.slane %v1095_v36, %v1343_v15  ;;  %vm561_vm2 = vcmask 1041408   ;;  %v1187_v48 = vld [vmem:[%s1598_s4 + $0x70] ss:$8 sps:$4 sm:$0xff]   ;;  %v447_v50 = vrot.slane %v1381_v28, %v1360_v21  ;;  %v1188_v53 = vld [vmem:[%s1598_s4 + $0x84] ss:$8 sps:$4 sm:$0xff]   ;;  %v515_v57 = vrot.slane %v1096_v42, %v1343_v15 }
  0x10   : > { %875 = vmatpush1.bf16.msra.mxu0 %v1172_v5  ;;  %s1341_s13 = scalar_lea.vmem %s1594_s0, %s1136_s8  ;;  %v1097_v58 = vld [vmem:[%s1595_s1 + $0xa] sm:$0x3]  ;;  %v476_v6 = vrot.slane %v1095_v36, %v1360_v21  ;;  %v1445_v9 = vld [vmem:[%s1595_s1 + $0xc] sm:$0x3]  ;;  %v658_v24 = vld [vmem:[%s1597_s3] sm:$0x3] }
  0x11   : > { %876 = vmatprep.subr.bf16.mxu0 %v1173_v7  ;;  %v1352_v18 = vld [vmem:[%s1341_s13] sm:$0x77]  ;;  %v1387_v30 = vld [vmem:[%s1341_s13 + $0x8] sm:$0x11]  ;;  %v1415_v47 = vld [vmem:[%s1341_s13] sm:$0x88] }
  0x12   : > { %v397_v20 = vunpack.c.h.bf16 %v1352_v18  ;;  %v1365_v23 = vld [vmem:[%s1341_s13] sm:$0xff]  ;;  %v396_v32 = vunpack.c.l.bf16 %v1352_v18  ;;  %v1401_v37 = vld [vmem:[%s1341_s13 + $0x8] sm:$0x33]  ;;  %v469_v45 = vunpack.c.h.bf16 %v1387_v30  ;;  %v468_v61 = vunpack.c.l.bf16 %v1387_v30  ;;  %s1137_s28 = sshll.u32 %s1607_s24, 3 }
  0x13   : > { %v1373_v25 = vld [vmem:[%s1341_s13] sm:$0xee]  ;;  %v414_v26 = vunpack.c.h.bf16 %v1365_v23  ;;  %v413_v34 = vunpack.c.l.bf16 %v1365_v23  ;;  %v504_v52 = vunpack.c.h.bf16 %v1401_v37  ;;  %v539_v62 = vunpack.c.h.bf16 %v1415_v47  ;;  %v1434_v63 = vld [vmem:[%s1341_s13 + $0x8] sm:$0x77]  ;;  %s388_s8 = scalar_lea.vmem %s1601_s7, %s1137_s28 }
  0x14   : > { %877 = vmatpush1.bf16.msra.mxu0 %v1175_v8  ;;  %v1384_v29 = vld [vmem:[%s1341_s13] sm:$0xcc]  ;;  %v440_v35 = vunpack.c.h.bf16 %v1373_v25  ;;  %v411_v38 = vmul.f32 %v407_v22, %v397_v20  ;;  %v439_v44 = vunpack.c.l.bf16 %v1373_v25  ;;  %v486_v56 = vmul.f32 %v480_v46, %v469_v45 }
  0x15   : > { %878 = vmatprep.subr.bf16.mxu0 %v1176_v10  ;;  %v429_v39 = vmul.f32 %v425_v27, %v414_v26  ;;  %v467_v41 = vunpack.c.h.bf16 %v1384_v29  ;;  %v466_v54 = vunpack.c.l.bf16 %v1384_v29  ;;  %v521_v3 = vmul.f32 %v515_v57, %v504_v52  ;;  %v1190_v4 = vld [vmem:[%s1598_s4 + $0x80] ss:$8 sps:$4 sm:$0xff]   ;;  %v1459_v27 = vld [vmem:[%s1595_s1 + $0xe] sm:$0x3] }
  0x16   : > { %v455_v51 = vmul.f32 %v451_v40, %v440_v35  ;;  %v496_v1 = vrot.slane %v486_v56, 4  ;;  %v503_v7 = vunpack.c.l.bf16 %v1401_v37  ;;  %v550_v8 = vrot.slane %v1097_v58, %v1343_v15  ;;  %v1448_v10 = vld [vmem:[%s1341_s13 + $0x8] sm:$0xff]  ;;  %v1472_v40 = vld [vmem:[%s1595_s1 + $0x10] sm:$0x3]  ;;  %v1203_v37 = vld [vmem:[%s1598_s4 + $0xd4] ss:$8 sps:$4 sm:$0xff]  }
  0x17   : > { %v433_v49 = vrot.slane %v429_v39, 1  ;;  %v484_v55 = vmul.f32 %v480_v46, %v467_v41  ;;  %v519_v2 = vmul.f32 %v515_v57, %v467_v41  ;;  %v511_v20 = vrot.slane %v1096_v42, %v1360_v21  ;;  %v1193_v41 = vld [vmem:[%s1598_s4 + $0x90] ss:$8 sps:$4 sm:$0xff]   ;;  %v1200_v29 = vld [vmem:[%s1598_s4 + $0xc4] ss:$8 sps:$4 sm:$0xff]  }
  0x18   : > { %879 = vmatpush1.bf16.msra.mxu0 %v1178_v11  ;;  %v459_v60 = vrot.slane %v455_v51, 2  ;;  %v1191_v11 = vld [vmem:[%s1598_s4 + $0x94] ss:$8 sps:$4 sm:$0xff]   ;;  %v554_v22 = vmul.f32 %v550_v8, %v539_v62  ;;  %v556_v26 = vmul.f32 %v550_v8, %v504_v52  ;;  %v538_v36 = vunpack.c.l.bf16 %v1415_v47 }
  0x19   : > { %880 = vmatprep.subr.bf16.mxu0 %v1179_v13  ;;  %v437_v59 = vadd.f32 %v433_v49, %v411_v38  ;;  %v495_v0 = vrot.slane %v484_v55, 4  ;;  %v530_v13 = vrot.slane %v519_v2, 5  ;;  %v585_v38 = vrot.slane %v1445_v9, %v1343_v15  ;;  %v1488_v55 = vld [vmem:[%s1596_s2] sm:$0x3]  ;;  %v1197_v8 = vld [vmem:[%s1598_s4 + $0xb4] ss:$8 sps:$4 sm:$0xff]  }
  0x1a   : > { %v594_v39 = vunpack.c.h.bf16 %v1448_v10  ;;  %v546_v45 = vrot.slane %v1097_v58, %v1360_v21  ;;  %v565_v46 = vrot.slane %v554_v22, 6  ;;  %v566_v47 = vrot.slane %v556_v26, 6 }
  0x1b   : > { %v463_v5 = vadd.f32 %v459_v60, %v437_v59  ;;  %v497_v12 = vsel %vm491_vm0, %v495_v0, %v496_v1  ;;  %v573_v49 = vunpack.c.l.bf16 %v1434_v63  ;;  %v605_v52 = vrot.slane %v1459_v27, %v1343_v15  ;;  %v1196_v1 = vld [vmem:[%s1598_s4 + $0xa0] ss:$8 sps:$4 sm:$0xff]  }
  0x1c   : > { %881 = vmatpush1.bf16.msra.mxu0 %v1181_v14  ;;  %v531_v14 = vrot.slane %v521_v3, 5  ;;  %v567_v56 = vsel %vm561_vm2, %v565_v46, %v566_v47  ;;  %v581_v57 = vrot.slane %v1445_v9, %v1360_v21  ;;  %v593_v58 = vunpack.c.l.bf16 %v1448_v10  ;;  %v1205_v46 = vld [vmem:[%s1598_s4 + $0xd0] ss:$8 sps:$4 sm:$0xff]  }
  0x1d   : > { %882 = vmatprep.subr.bf16.mxu0 %v1182_v16  ;;  %v574_v16 = vunpack.c.h.bf16 %v1434_v63  ;;  %v631_v59 = vrot.slane %v1472_v40, %v1343_v15  ;;  %v601_v62 = vrot.slane %v1459_v27, %v1360_v21  ;;  %v609_v63 = vmul.f32 %v605_v52, %v594_v39 }
  0x1e   : > { %v532_v35 = vsel %vm526_vm1, %v530_v13, %v531_v14  ;;  %v653_v3 = vrot.slane %v1488_v55, %v1343_v15  ;;  %v454_v18 = vmul.f32 %v447_v50, %v439_v44  ;;  %v483_v19 = vmul.f32 %v476_v6, %v466_v54  ;;  %v1199_v44 = vld [vmem:[%s1598_s4 + $0xb0] ss:$8 sps:$4 sm:$0xff]  }
  0x1f   : > { %v589_v51 = vmul.f32 %v585_v38, %v574_v16  ;;  %v613_v10 = vrot.slane %v609_v63, 1  ;;  %v520_v28 = vmul.f32 %v511_v20, %v503_v7  ;;  %v553_v14 = vmul.f32 %v546_v45, %v538_v36  ;;  %v1211_v63 = vld [vmem:[%s1598_s4 + $0xf0] ss:$8 sps:$4 sm:$0xff]  }
  0x20   : > { %883 = vmatpush1.bf16.msra.mxu0 %v1184_v17  ;;  %v501_v17 = vadd.f32 %v497_v12, %v463_v5  ;;  %v428_v5 = vmul.f32 %v421_v43, %v413_v34  ;;  %v518_v34 = vmul.f32 %v511_v20, %v466_v54  ;;  %v458_v43 = vrot.slane %v454_v18, 2 }
  0x21   : > { %884 = vmatprep.subr.bf16.mxu0 %v1185_v31  ;;  %v1462_v31 = vld [vmem:[%s1341_s13 + $0x8] sm:$0xee]  ;;  %v667_v54 = vrot.slane %v658_v24, %v1343_v15  ;;  %v627_v16 = vrot.slane %v1472_v40, %v1360_v21  ;;  %v562_v22 = vrot.slane %v553_v14, 6  ;;  %v608_v38 = vmul.f32 %v601_v62, %v593_v58 }
  0x22   : > { %v536_v42 = vadd.f32 %v532_v35, %v501_v17  ;;  %v619_v0 = vunpack.c.l.bf16 %v1462_v31  ;;  %v527_v13 = vrot.slane %v518_v34, 5  ;;  %v1202_v35 = vld [vmem:[%s1598_s4 + $0xc0] ss:$8 sps:$4 sm:$0xff]  }
  0x24   : > { %885 = vmatpush1.bf16.msra.mxu0 %v1187_v48  ;;  %v1194_v48 = vld [vmem:[%s1598_s4 + $0xa4] ss:$8 sps:$4 sm:$0xff]   ;;  %v571_v60 = vadd.f32 %v567_v56, %v536_v42  ;;  %v634_v42 = vmul.f32 %v627_v16, %v619_v0 }
  0x25   : > { %886 = vmatprep.subr.bf16.mxu0 %v1188_v53  ;;  %v620_v53 = vunpack.c.h.bf16 %v1462_v31 }
  0x26   : > { %v591_v9 = vadd.f32 %v589_v51, %v571_v60  ;;  %v1206_v51 = vld [vmem:[%s1598_s4 + $0xe4] ss:$8 sps:$4 sm:$0xff]   ;;  %v638_v56 = vrot.slane %v634_v42, 2  ;;  %v663_v60 = vrot.slane %v658_v24, %v1360_v21  ;;  %v934_v24 = vld [vmem:[%s1600_s6] sm:$0x3] }
  0x27   : > { %v635_v2 = vmul.f32 %v631_v59, %v620_v53  ;;  %v1209_v59 = vld [vmem:[%s1598_s4 + $0xf4] ss:$8 sps:$4 sm:$0xff]   ;;  %v939_v34 = vrot.slane %v934_v24, %v1360_v21 }
  0x28   : > { %887 = vmatpush1.bf16.msra.mxu0 %v1190_v4  ;;  %v410_v4 = vmul.f32 %v403_v33, %v396_v32  ;;  %v432_v32 = vrot.slane %v428_v5, 1  ;;  %v485_v33 = vmul.f32 %v476_v6, %v468_v61  ;;  %v617_v25 = vadd.f32 %v613_v10, %v591_v9 }
  0x29   : > { %888 = vmatprep.subr.bf16.mxu0 %v1191_v11  ;;  %v639_v23 = vrot.slane %v635_v2, 2  ;;  %v492_v11 = vrot.slane %v483_v19, 4  ;;  %v528_v61 = vrot.slane %v520_v28, 5  ;;  %v555_v6 = vmul.f32 %v546_v45, %v503_v7 }
  0x2a   : > { %v436_v50 = vadd.f32 %v432_v32, %v410_v4  ;;  %v493_v12 = vrot.slane %v485_v33, 4  ;;  %v675_v4 = vld [vmem:[#allocation2 + $0x8] sm:$0x3f] }
  0x2b   : > { %v643_v30 = vadd.f32 %v639_v23, %v617_v25  ;;  %v529_v27 = vsel %vm526_vm1, %v527_v13, %v528_v61  ;;  %v563_v31 = vrot.slane %v555_v6, 6  ;;  %v920_v23 = vld [vmem:[%s1599_s5] sm:$0x3] }
  0x2c   : > { %889 = vmatpush1.bf16.msra.mxu0 %v1193_v41  ;;  %v462_v17 = vadd.f32 %v458_v43, %v436_v50  ;;  %v494_v20 = vsel %vm491_vm0, %v492_v11, %v493_v12  ;;  %v588_v41 = vmul.f32 %v581_v57, %v573_v49  ;;  %v1208_v49 = vld [vmem:[%s1598_s4 + $0xe0] ss:$8 sps:$4 sm:$0xff]   ;;  %v649_v57 = vrot.slane %v1488_v55, %v1360_v21 }
  0x2d   : > { %890 = vmatprep.subr.bf16.mxu0 %v1194_v48  ;;  %v657_v26 = vmul.f32 %v653_v3, %v643_v30  ;;  %v564_v39 = vsel %vm561_vm2, %v562_v22, %v563_v31  ;;  %v612_v48 = vrot.slane %v608_v38, 1  ;;  %v674_v3 = vld [vmem:[#allocation2] sm:$0x3f]  ;;  %v925_v32 = vrot.slane %v920_v23, %v1360_v21 }
  0x2e   : > { %v500_v36 = vadd.f32 %v494_v20, %v462_v17  ;;  %v929_v33 = vrot.slane %v920_v23, %v1343_v15  ;;  %v943_v43 = vrot.slane %v934_v24, %v1343_v15 }
  0x2f   : > { %v671_v7 = vadd.f32 %v667_v54, %v657_v26 }
  0x30   : > { %891 = vmatpush1.bf16.msra.mxu0 %v1196_v1  ;;  %v535_v40 = vadd.f32 %v529_v27, %v500_v36 }
  0x31   : > { %892 = vmatprep.subr.bf16.mxu0 %v1197_v8  ;;  %v673_v45 = vmax.f32 %v671_v7, 0.0 }
  0x32   : > { %v570_v47 = vadd.f32 %v564_v39, %v535_v40 }
  0x33   : > { %v677_v52 = vpack.c.bf16 %v673_v45, %v673_v45 }
  0x34   : > { %893 = vmatpush1.bf16.msra.mxu0 %v1199_v44  ;;  %v590_v53 = vadd.f32 %v588_v41, %v570_v47 }
  0x35   : > { %894 = vmatprep.subr.bf16.mxu0 %v1200_v29  ;;  %902 = vmatprep.mubr.bf16.mxu0 %v677_v52 }
  0x36   : > { %v616_v58 = vadd.f32 %v612_v48, %v590_v53 }
  0x38   : > { %895 = vmatpush1.bf16.msra.mxu0 %v1202_v35  ;;  %v642_v62 = vadd.f32 %v638_v56, %v616_v58 }
  0x39   : > { %896 = vmatprep.subr.bf16.mxu0 %v1203_v37 }
  0x3a   : > { %v656_v0 = vmul.f32 %v649_v57, %v642_v62 }
  0x3c   : > { %897 = vmatpush1.bf16.msra.mxu0 %v1205_v46  ;;  %v670_v1 = vadd.f32 %v663_v60, %v656_v0 }
  0x3d   : > { %898 = vmatprep.subr.bf16.mxu0 %v1206_v51 }
  0x3e   : > { %v672_v2 = vmax.f32 %v670_v1, 0.0 }
  0x40   : > { %899 = vmatpush1.bf16.msra.mxu0 %v1208_v49  ;;  %v676_v55 = vpack.c.bf16 %v672_v2, %v672_v2 }
  0x41   : > { %900 = vmatprep.subr.bf16.mxu0 %v1209_v59 }
  0x44   : > { %901 = vmatpush1.bf16.msra.mxu0 %v1211_v63 }
  0x47   : > { %903 = vmatmul.mubr.bf16.vlgmr.msra.gmra.mrb[0].mxu0 %v676_v55 }
 0x11a   : > { %v904_v5 = vpop.f32.mrb[0].mxu0 }
 0x11b   : > { %v911_v8 = vadd.f32 %v904_v5, %v674_v3  ;;  %v906_v9 = vpop.f32.mrb[1].mxu0 }
 0x11c   : > { %v912_v10 = vadd.f32 %v906_v9, %v675_v4  ;;  %v908_v18 = vpop.f32.mrb[2].mxu0 }
 0x11d   : > { %913 = vst [vmem:[#allocation2] sm:$0x3f] %v911_v8  ;;  %v909_v19 = vpop.f32.mrb[3].mxu0 }
 0x11e   : > { %914 = vst [vmem:[#allocation2 + $0x8] sm:$0x3f] %v912_v10 }
 0x124   : > { %v918_v25 = vld [vmem:[#allocation2] sm:$0x3f] }
 0x125   : > { %v932_v11 = vmul.f32 %v925_v32, %v918_v25  ;;  %v919_v28 = vld [vmem:[#allocation2 + $0x8] sm:$0x3f] }
 0x126   : > { %v933_v44 = vmul.f32 %v929_v33, %v919_v28 }
 0x127   : > { %v946_v50 = vadd.f32 %v939_v34, %v932_v11 }
 0x128   : > { %v947_v12 = vadd.f32 %v943_v43, %v933_v44 }
 0x129   : > { %v948_v13 = vmax.f32 %v946_v50, 0.0 }
 0x12a   : > { %v949_v14 = vmax.f32 %v947_v12, 0.0 }
 0x12c   : > { %v1138_v29 = vpack.c.bf16 %v949_v14, %v948_v13 }
 0x12e   : > { %958 = vst [vmem:[%s388_s8] sm:$0x77] %v1138_v29 }
 0x12f PF: > { %s17_s26 = sadd.s32 1, %s1234_s26   ;;  %s1602_s24 = smov %s1230_s25 }
 0x130   : > { %p14_p5 = scmp.ge.s32.totalorder %s17_s26, 4   ;;  %s1603_s25 = smov %s1605_s27 }
 0x132   :  { %16 = sbr.rel (!%p14_p5) target bundleno = 2 (0x2), region = 106 }

// kernel: cpm_forward.29
= control target key start
LH: loop header
LB: loop body
LE: loop exit
PB: predicated region body
PF: predicated region fallthrough
CT: control target
= control target key end

     0   :  { %14 = vsyncpa [#allocation4], 0  ;;  %s2149_s0 = inlined_call_operand.vmem [shape: bf16[2,4,128], index: 0, kind: input, shape index: {}]   ;;  %s2150_s1 = inlined_call_operand.hbm [shape: f32[1,1,128], index: 1, kind: input, shape index: {}]   ;;  %s2151_s2 = inlined_call_operand.hbm [shape: f32[1,128], index: 2, kind: input, shape index: {}]   ;;  %s2152_s3 = inlined_call_operand.hbm [shape: f32[1,128], index: 3, kind: input, shape index: {}]   ;;  %s2153_s4 = inlined_call_operand.vmem [shape: bf16[128,512], index: 4, kind: input, shape index: {}]   ;;  %s2154_s5 = inlined_call_operand.vmem [shape: f32[1,512], index: 5, kind: input, shape index: {}]   ;;  %s2155_s6 = inlined_call_operand.vmem [shape: f32[1,512], index: 6, kind: input, shape index: {}]   ;;  %s2156_s7 = inlined_call_operand.vmem [shape: bf16[512,8], index: 7, kind: input, shape index: {}]   ;;  %s2157_s8 = inlined_call_operand.hbm [shape: f32[1,8], index: 8, kind: input, shape index: {}]   ;;  %s2158_s9 = inlined_call_operand.vmem [shape: f32[2,4,8], index: 9, kind: output, shape index: {}]  }
   0x1   :  { %15 = vsyncpa [#allocation6], 0 }
   0x2   :  { %16 = vsyncpa [#allocation9], 0  ;;  %s1787_s30 = smov 0   ;;  %s1789_s10 = smov 0  }
   0x3   :  { %s1791_s11 = smov 0  }
   0x4 LB: > { %s1732_s12 = smov [#allocation5]   ;;  %s1308_s14 = sadd.s32 4294967295, %s1730_s11   ;;  %s1730_s11 = sphi %s1791_s11, %s22_s11   ;;  %s1726_s10 = sphi %s1789_s10, %s2171_s10   ;;  %s1722_s30 = sphi %s1787_s30, %s2170_s30  }
   0x5   : > { %s309_s13 = sshll.u32 %s1732_s12, 4  ;;  %p1310_p0 = scmp.ge.s32.totalorder %s1730_s11, 1  ;;  %s310_s13 = int_to_ptr.vmem [resolvable:$true] %s309_s13 }
   0x6   : > { %p281_p1 = scmp.lt.s32.totalorder %s1730_s11, 3  ;;  %p1805_p2 = scmp.eq.s32.totalorder %s1308_s14, 0 }
   0x7   : > { %s34_s17 = sadd.s32 1, %s1726_s10  ;;  %s1733_s20 = smov [#allocation3]  }
   0x8   : > { %s2162_s15 = scalar_select %p1805_p2, 1, 0 }
   0x9   : > { %p1809_p3 = pnand %p1310_p0, %p281_p1  ;;  %p1822_p6 = scmp.ge.s32.totalorder %s34_s17, 2 }
   0xa   : > { %s296_s21 = sshll.u32 %s1733_s20, 4  ;;  %s1584_s24 = scalar_lea.hbm %s2151_s2, 16  ;;  %s1826_s21 = int_to_ptr.vmem [resolvable:$true] %s296_s21 }
   0xb   : > { %s2163_s16 = scalar_select %p1809_p3, 1, 0 }
   0xc   : > { %p1454_p4 = pneg %p1809_p3  ;;  %p1585_p7 = scmp.ne.s32.totalorder %s2151_s2, %s1584_s24 }
   0xd   : > { %s2165_s19 = scalar_select %p1822_p6, 1, 0 }
   0xe   : > { %p1818_p5 = pnand %p1805_p2, %p1454_p4  ;;  %p1591_p11 = scmp.lt.u32.totalorder %s1584_s24, %s2151_s2 }
  0x10   : > { %p1836_p8 = pneg %p1818_p5 }
  0x12   : > { %p1587_p9 = pnand %p1836_p8, %p1585_p7 }
  0x14   : > { %p1588_p10 = pneg %p1587_p9 }
  0x16   : > { %p1593_p12 = pnand %p1591_p11, %p1588_p10 }
  0x18   : > { %1596 = shalt.err (!%p1593_p12)
}
  0x19   : > { %s1597_s12 = scalar_lea.vmem %s310_s13, 16  ;;  %s1604_s14 = scalar_lea.vmem %s310_s13, 32 }
  0x1a   : > { %p1598_p13 = scmp.ne.s32.totalorder %s310_s13, %s1597_s12  ;;  %p1605_p4 = scmp.lt.s32.totalorder %s310_s13, %s310_s13 }
  0x1b   : > { %p1606_p2 = scmp.lt.s32.totalorder %s1604_s14, %s1597_s12 }
  0x1c   : > { %p1600_p0 = pnand %p1598_p13, %p1836_p8 }
  0x1d   : > { %p1607_p3 = por %p1606_p2, %p1605_p4 }
  0x1e   : > { %p1601_p1 = pneg %p1600_p0 }
  0x20   : > { %p1608_p6 = pnand %p1607_p3, %p1601_p1 }
  0x22   : > { %1611 = shalt.err (!%p1608_p6)
}
  0x23   : > { %1460 = dma.hbm_to_vmem [thread:$0]  (!%p1818_p5), %s2151_s2, 16, %s310_s13, [#allocation6]  }
  0x24   : > { %p2167_p7 = scmp.ne.s32.totalorder %s2165_s19, 0  ;;  %s1612_s25 = scalar_lea.hbm %s2150_s1, 16 }
  0x25   : > { %p1613_p2 = scmp.ne.s32.totalorder %s2150_s1, %s1612_s25  ;;  %p1619_p9 = scmp.lt.u32.totalorder %s1612_s25, %s2150_s1 }
  0x26   : > { %s2173_s17 = smov (%p2167_p7, %s34_s17), 0 }
  0x27   : > { %p1615_p3 = pnand %p1613_p2, %p1836_p8 }
  0x29   : > { %p1616_p6 = pneg %p1615_p3 }
  0x2b   : > { %p1621_p10 = pnand %p1619_p9, %p1616_p6 }
  0x2d   : > { %1624 = shalt.err (!%p1621_p10)
}
  0x2e   : > { %s1625_s13 = scalar_lea.vmem %s1826_s21, 16  ;;  %s1632_s19 = scalar_lea.vmem %s1826_s21, 32 }
  0x2f   : > { %p1626_p11 = scmp.ne.s32.totalorder %s1826_s21, %s1625_s13  ;;  %p1633_p0 = scmp.lt.s32.totalorder %s1826_s21, %s1826_s21 }
  0x30   : > { %p1634_p1 = scmp.lt.s32.totalorder %s1632_s19, %s1625_s13 }
  0x31   : > { %p1628_p12 = pnand %p1626_p11, %p1836_p8 }
  0x32   : > { %p1635_p4 = por %p1634_p1, %p1633_p0 }
  0x33   : > { %p1629_p13 = pneg %p1628_p12 }
  0x35   : > { %p1636_p7 = pnand %p1635_p4, %p1629_p13 }
  0x37   : > { %1639 = shalt.err (!%p1636_p7)
}
  0x38   : > { %1457 = dma.hbm_to_vmem [thread:$0]  (!%p1818_p5), %s2150_s1, 16, %s1826_s21, [#allocation4]  }
  0x39   : > { %s1734_s22 = smov [#allocation7]   ;;  %s1735_s24 = smov [#allocation8]  }
  0x3a   : > { %s322_s23 = sshll.u32 %s1734_s22, 4  ;;  %s352_s25 = sshll.u32 %s1735_s24, 4  ;;  %s323_s23 = int_to_ptr.vmem [resolvable:$true] %s322_s23  ;;  %s353_s25 = int_to_ptr.vmem [resolvable:$true] %s352_s25 }
  0x3b   : > { %s1640_s29 = scalar_lea.hbm %s2152_s3, 16 }
  0x3c   : > { %p1641_p2 = scmp.ne.s32.totalorder %s2152_s3, %s1640_s29  ;;  %p1647_p9 = scmp.lt.u32.totalorder %s1640_s29, %s2152_s3 }
  0x3e   : > { %p1643_p3 = pnand %p1641_p2, %p1836_p8 }
  0x40   : > { %p1644_p6 = pneg %p1643_p3 }
  0x42   : > { %p1649_p10 = pnand %p1647_p9, %p1644_p6 }
  0x44   : > { %1652 = shalt.err (!%p1649_p10)
}
  0x45   : > { %s1653_s21 = scalar_lea.vmem %s323_s23, 16  ;;  %s1660_s20 = scalar_lea.vmem %s323_s23, 32 }
  0x46   : > { %p1654_p11 = scmp.ne.s32.totalorder %s323_s23, %s1653_s21  ;;  %p1661_p0 = scmp.lt.s32.totalorder %s323_s23, %s323_s23 }
  0x47   : > { %p1662_p1 = scmp.lt.s32.totalorder %s1660_s20, %s1653_s21 }
  0x48   : > { %p1656_p12 = pnand %p1654_p11, %p1836_p8 }
  0x49   : > { %p1663_p4 = por %p1662_p1, %p1661_p0 }
  0x4a   : > { %p1657_p13 = pneg %p1656_p12 }
  0x4c   : > { %p1664_p7 = pnand %p1663_p4, %p1657_p13 }
  0x4e   : > { %1667 = shalt.err (!%p1664_p7)
}
  0x4f   : > { %1463 = dma.hbm_to_vmem [thread:$0]  (!%p1818_p5), %s2152_s3, 16, %s323_s23, [#allocation6]  }
  0x50   : > { %s1668_s29 = scalar_lea.hbm %s2157_s8, 16 }
  0x51   : > { %p1669_p2 = scmp.ne.s32.totalorder %s2157_s8, %s1668_s29  ;;  %p1675_p9 = scmp.lt.u32.totalorder %s1668_s29, %s2157_s8 }
  0x53   : > { %p1671_p3 = pnand %p1669_p2, %p1836_p8 }
  0x55   : > { %p1672_p6 = pneg %p1671_p3 }
  0x57   : > { %p1677_p10 = pnand %p1675_p9, %p1672_p6 }
  0x59   : > { %1680 = shalt.err (!%p1677_p10)
}
  0x5a   : > { %s1681_s21 = scalar_lea.vmem %s353_s25, 16  ;;  %s1688_s23 = scalar_lea.vmem %s353_s25, 32 }
  0x5b   : > { %p1682_p11 = scmp.ne.s32.totalorder %s353_s25, %s1681_s21  ;;  %p1689_p0 = scmp.lt.s32.totalorder %s353_s25, %s353_s25 }
  0x5c   : > { %p1690_p1 = scmp.lt.s32.totalorder %s1688_s23, %s1681_s21 }
  0x5d   : > { %p1684_p12 = pnand %p1682_p11, %p1836_p8 }
  0x5e   : > { %p1691_p4 = por %p1690_p1, %p1689_p0 }
  0x5f   : > { %p1685_p13 = pneg %p1684_p12 }
  0x61   : > { %p1692_p7 = pnand %p1691_p4, %p1685_p13 }
  0x63   : > { %1695 = shalt.err (!%p1692_p7)
}
  0x64   : > { %1466 = dma.hbm_to_vmem [thread:$0]  (!%p1818_p5), %s2157_s8, 16, %s353_s25, [#allocation9]  }
  0x65   : > { %p2168_p2 = scmp.ne.s32.totalorder %s2163_s16, 0 }
  0x66   : > { %p2169_p3 = scmp.ne.s32.totalorder (!%p2168_p2), %s2162_s15, 0 }
  0x67   : > { %375 = sbr.rel (%p2168_p2) target bundleno = 595 (0x253), region = 56 }
  0x6e   : > { %1709 = dma.done.wait (%p2169_p3), [#allocation4], 16  }
  0x6f   : > { %1711 = vsyncadd (%p2169_p3), [#allocation4], 4294967280 }
  0x70   : > { %1713 = dma.done.wait (%p2169_p3), [#allocation6], 32  }
  0x71   : > { %1715 = vsyncadd (%p2169_p3), [#allocation6], 4294967264 }
  0x72   : > { %1717 = dma.done.wait (%p2169_p3), [#allocation9], 16  }
  0x73   : > { %1719 = vsyncadd (%p2169_p3), [#allocation9], 4294967280  ;;  %v1736_v0 = vmov 0   ;;  %v1504_v1 = vld [vmem:[%s2153_s4 + $0x4] ss:$16 sps:$4 sm:$0xff]   ;;  %p430_p5 = scmp.lt.s32.totalorder %s1722_s30, 1 }
  0x74   : > { %709 = vmatprep.mubr.bf16.mxu0 %v1736_v0  ;;  %750 = vmatprep.mubr.bf16.mxu1 %v1736_v0  ;;  %v1506_v2 = vld [vmem:[%s2153_s4 + $0xc] ss:$16 sps:$4 sm:$0xff]   ;;  %v1508_v3 = vld [vmem:[%s2153_s4] ss:$16 sps:$4 sm:$0xff]   ;;  %v1509_v4 = vld [vmem:[%s2153_s4 + $0x8] ss:$16 sps:$4 sm:$0xff]  }
  0x75   : > { %677 = vmatprep.subr.bf16.mxu0 %v1504_v1  ;;  %718 = vmatprep.subr.bf16.mxu1 %v1506_v2  ;;  %v1510_v5 = vld [vmem:[%s2153_s4 + $0x24] ss:$16 sps:$4 sm:$0xff]   ;;  %v1512_v6 = vld [vmem:[%s2153_s4 + $0x2c] ss:$16 sps:$4 sm:$0xff]   ;;  %v1514_v7 = vld [vmem:[%s2153_s4 + $0x20] ss:$16 sps:$4 sm:$0xff]  }
  0x76   : > { %678 = vmatpush1.bf16.msra.mxu0 %v1508_v3  ;;  %719 = vmatpush1.bf16.msra.mxu1 %v1509_v4  ;;  %v1515_v8 = vld [vmem:[%s2153_s4 + $0x28] ss:$16 sps:$4 sm:$0xff]   ;;  %v1516_v9 = vld [vmem:[%s2153_s4 + $0x44] ss:$16 sps:$4 sm:$0xff]   ;;  %v1518_v10 = vld [vmem:[%s2153_s4 + $0x4c] ss:$16 sps:$4 sm:$0xff]  }
  0x77   : > { %679 = vmatprep.subr.bf16.mxu0 %v1510_v5  ;;  %720 = vmatprep.subr.bf16.mxu1 %v1512_v6  ;;  %v1520_v11 = vld [vmem:[%s2153_s4 + $0x40] ss:$16 sps:$4 sm:$0xff]   ;;  %v1521_v12 = vld [vmem:[%s2153_s4 + $0x48] ss:$16 sps:$4 sm:$0xff]   ;;  %v1522_v13 = vld [vmem:[%s2153_s4 + $0x64] ss:$16 sps:$4 sm:$0xff]  }
  0x78   : > { %v1524_v14 = vld [vmem:[%s2153_s4 + $0x6c] ss:$16 sps:$4 sm:$0xff]   ;;  %v1526_v15 = vld [vmem:[%s2153_s4 + $0x60] ss:$16 sps:$4 sm:$0xff]   ;;  %s2175_s30 = smov (!%p430_p5, %s1722_s30), 1  ;;  %vm1179_vm0 = vcmask 60416  }
  0x79   : > { %v1527_v16 = vld [vmem:[%s2153_s4 + $0x68] ss:$16 sps:$4 sm:$0xff]   ;;  %v1528_v17 = vld [vmem:[%s2153_s4 + $0x84] ss:$16 sps:$4 sm:$0xff]   ;;  %v1530_v18 = vld [vmem:[%s2153_s4 + $0x8c] ss:$16 sps:$4 sm:$0xff]  }
  0x7a   : > { %680 = vmatpush1.bf16.msra.mxu0 %v1514_v7  ;;  %721 = vmatpush1.bf16.msra.mxu1 %v1515_v8  ;;  %v1532_v19 = vld [vmem:[%s2153_s4 + $0x80] ss:$16 sps:$4 sm:$0xff]   ;;  %v1533_v20 = vld [vmem:[%s2153_s4 + $0x88] ss:$16 sps:$4 sm:$0xff]   ;;  %s1322_s28 = sshll.u32 %s2175_s30, 1  ;;  %s1323_s16 = sshll.u32 %s2175_s30, 2 }
  0x7b   : > { %681 = vmatprep.subr.bf16.mxu0 %v1516_v9  ;;  %722 = vmatprep.subr.bf16.mxu1 %v1518_v10  ;;  %v1534_v21 = vld [vmem:[%s2153_s4 + $0xa4] ss:$16 sps:$4 sm:$0xff]   ;;  %v1536_v22 = vld [vmem:[%s2153_s4 + $0xac] ss:$16 sps:$4 sm:$0xff]   ;;  %s436_s21 = scalar_lea.vmem %s2149_s0, %s1322_s28  ;;  %v1538_v23 = vld [vmem:[%s2153_s4 + $0xa0] ss:$16 sps:$4 sm:$0xff]   ;;  %s447_s25 = scalar_lea.vmem %s2158_s9, %s1323_s16 }
  0x7c   : > { %v1539_v24 = vld [vmem:[%s2153_s4 + $0xa8] ss:$16 sps:$4 sm:$0xff]   ;;  %v1540_v25 = vld [vmem:[%s2153_s4 + $0xc4] ss:$16 sps:$4 sm:$0xff]   ;;  %v1542_v26 = vld [vmem:[%s2153_s4 + $0xcc] ss:$16 sps:$4 sm:$0xff]  }
  0x7d   : > { %v455_v27 = vld [vmem:[%s436_s21] sm:$0x3]  ;;  %v1545_v30 = vld [vmem:[%s2153_s4 + $0xc8] ss:$16 sps:$4 sm:$0xff]   ;;  %v1546_v32 = vld [vmem:[%s2153_s4 + $0xe4] ss:$16 sps:$4 sm:$0xff]  }
  0x7e   : > { %682 = vmatpush1.bf16.msra.mxu0 %v1520_v11  ;;  %723 = vmatpush1.bf16.msra.mxu1 %v1521_v12  ;;  %v1324_v28 = vld [vmem:[#allocation3] ss:$0 sm:$0xff]  ;;  %v456_v31 = vunpack.c.l.bf16 %v455_v27  ;;  %v1325_v33 = vld [vmem:[#allocation5] ss:$0 sm:$0xff]  ;;  %v1548_v34 = vld [vmem:[%s2153_s4 + $0xec] ss:$16 sps:$4 sm:$0xff]   ;;  %v778_v11 = vlaneseq }
  0x7f   : > { %683 = vmatprep.subr.bf16.mxu0 %v1522_v13  ;;  %724 = vmatprep.subr.bf16.mxu1 %v1524_v14  ;;  %v1544_v29 = vld [vmem:[%s2153_s4 + $0xc0] ss:$16 sps:$4 sm:$0xff]   ;;  %v1326_v36 = vld [vmem:[#allocation7] ss:$0 sm:$0xff]  ;;  %v1551_v39 = vld [vmem:[%s2153_s4 + $0xe8] ss:$16 sps:$4 sm:$0xff]  }
  0x80   : > { %v464_v35 = vmul.f32 %v1324_v28, %v456_v31  ;;  %v1550_v37 = vld [vmem:[%s2153_s4 + $0xe0] ss:$16 sps:$4 sm:$0xff]   ;;  %v1556_v47 = vld [vmem:[%s2156_s7 + $0x48] sm:$0xff]   ;;  %v1564_v55 = vld [vmem:[%s2156_s7 + $0x58] sm:$0xff]   ;;  %v779_v12 = vshrl.u32 %v778_v11, 7 }
  0x81   : > { %v1552_v41 = vld [vmem:[%s2156_s7 + $0x40] sm:$0xff]   ;;  %v1557_v48 = vld [vmem:[%s2156_s7 + $0xc8] sm:$0xff]   ;;  %v1560_v51 = vld [vmem:[%s2156_s7 + $0x50] sm:$0xff]  }
  0x82   : > { %684 = vmatpush1.bf16.msra.mxu0 %v1526_v15  ;;  %725 = vmatpush1.bf16.msra.mxu1 %v1527_v16  ;;  %v472_v38 = vmul.f32 %v1325_v33, %v464_v35  ;;  %v1553_v42 = vld [vmem:[%s2156_s7 + $0xc0] sm:$0xff]   ;;  %v1558_v49 = vld [vmem:[%s2156_s7 + $0x8] sm:$0xff]   ;;  %v1561_v52 = vld [vmem:[%s2156_s7 + $0xd0] sm:$0xff]   ;;  %v780_v13 = vsub.s32 0, %v779_v12  ;;  %v784_v14 = vsub.s32 1, %v779_v12  ;;  %v788_v15 = vsub.s32 2, %v779_v12 }
  0x83   : > { %685 = vmatprep.subr.bf16.mxu0 %v1528_v17  ;;  %726 = vmatprep.subr.bf16.mxu1 %v1530_v18  ;;  %v1554_v44 = vld [vmem:[%s2156_s7] sm:$0xff]   ;;  %v1559_v50 = vld [vmem:[%s2156_s7 + $0x88] sm:$0xff]   ;;  %v1562_v53 = vld [vmem:[%s2156_s7 + $0x10] sm:$0xff]   ;;  %v792_v16 = vsub.s32 3, %v779_v12 }
  0x84   : > { %v480_v40 = vadd.f32 %v1326_v36, %v472_v38  ;;  %v1555_v45 = vld [vmem:[%s2156_s7 + $0x80] sm:$0xff]   ;;  %v1563_v54 = vld [vmem:[%s2156_s7 + $0x90] sm:$0xff]   ;;  %v1565_v56 = vld [vmem:[%s2156_s7 + $0xd8] sm:$0xff]  }
  0x85   : > { %v1566_v57 = vld [vmem:[%s2156_s7 + $0x18] sm:$0xff]   ;;  %v1568_v59 = vld [vmem:[%s2156_s7 + $0x60] sm:$0xff]   ;;  %v1572_v63 = vld [vmem:[%s2156_s7 + $0x68] sm:$0xff]  }
  0x86   : > { %686 = vmatpush1.bf16.msra.mxu0 %v1532_v19  ;;  %727 = vmatpush1.bf16.msra.mxu1 %v1533_v20  ;;  %v481_v43 = vmax.f32 %v480_v40, 0.0  ;;  %v1567_v58 = vld [vmem:[%s2156_s7 + $0x98] sm:$0xff]   ;;  %v1569_v60 = vld [vmem:[%s2156_s7 + $0xe0] sm:$0xff]   ;;  %v1573_v0 = vld [vmem:[%s2156_s7 + $0xe8] sm:$0xff]  }
  0x87   : > { %687 = vmatprep.subr.bf16.mxu0 %v1534_v21  ;;  %728 = vmatprep.subr.bf16.mxu1 %v1536_v22  ;;  %v1570_v61 = vld [vmem:[%s2156_s7 + $0x20] sm:$0xff]   ;;  %v1574_v1 = vld [vmem:[%s2156_s7 + $0x28] sm:$0xff]   ;;  %v1576_v3 = vld [vmem:[%s2156_s7 + $0x70] sm:$0xff]  }
  0x88   : > { %v484_v46 = vpack.c.bf16 %v481_v43, %v481_v43  ;;  %v1571_v62 = vld [vmem:[%s2156_s7 + $0xa0] sm:$0xff]   ;;  %v1575_v2 = vld [vmem:[%s2156_s7 + $0xa8] sm:$0xff]   ;;  %v1577_v4 = vld [vmem:[%s2156_s7 + $0xf0] sm:$0xff]  }
  0x89   : > { %v1578_v5 = vld [vmem:[%s2156_s7 + $0x30] sm:$0xff]   ;;  %v1580_v7 = vld [vmem:[%s2156_s7 + $0x78] sm:$0xff]   ;;  %v776_v17 = vld [vmem:[%s2154_s5] sm:$0xf] }
  0x8a   : > { %688 = vmatpush1.bf16.msra.mxu0 %v1538_v23  ;;  %729 = vmatpush1.bf16.msra.mxu1 %v1539_v24  ;;  %v1579_v6 = vld [vmem:[%s2156_s7 + $0xb0] sm:$0xff]   ;;  %v1581_v8 = vld [vmem:[%s2156_s7 + $0xf8] sm:$0xff]   ;;  %v800_v18 = vld [vmem:[%s2155_s6] sm:$0xf]  ;;  %v781_v19 = vrot.slane %v776_v17, %v780_v13  ;;  %v785_v20 = vrot.slane %v776_v17, %v784_v14  ;;  %v789_v21 = vrot.slane %v776_v17, %v788_v15 }
  0x8b   : > { %689 = vmatprep.subr.bf16.mxu0 %v1540_v25  ;;  %730 = vmatprep.subr.bf16.mxu1 %v1542_v26  ;;  %v1582_v9 = vld [vmem:[%s2156_s7 + $0x38] sm:$0xff]   ;;  %v793_v22 = vrot.slane %v776_v17, %v792_v16  ;;  %v805_v23 = vrot.slane %v800_v18, %v780_v13  ;;  %v809_v24 = vrot.slane %v800_v18, %v784_v14 }
  0x8c   : > { %v1583_v10 = vld [vmem:[%s2156_s7 + $0xb8] sm:$0xff]   ;;  %v813_v25 = vrot.slane %v800_v18, %v788_v15  ;;  %v817_v26 = vrot.slane %v800_v18, %v792_v16 }
  0x8e   : > { %690 = vmatpush1.bf16.msra.mxu0 %v1544_v29  ;;  %731 = vmatpush1.bf16.msra.mxu1 %v1545_v30  ;;  %v794_v29 = vcombine.low %v781_v19, %v785_v20  ;;  %v795_v30 = vcombine.low %v789_v21, %v793_v22  ;;  %v819_v36 = vcombine.low %v813_v25, %v817_v26 }
  0x8f   : > { %691 = vmatprep.subr.bf16.mxu0 %v1546_v32  ;;  %732 = vmatprep.subr.bf16.mxu1 %v1548_v34  ;;  %v818_v34 = vcombine.low %v805_v23, %v809_v24 }
  0x92   : > { %692 = vmatpush1.bf16.msra.mxu0 %v1550_v37  ;;  %733 = vmatpush1.bf16.msra.mxu1 %v1551_v39 }
  0x93   : > { %1394 = vmatprep.subr.bf16.mxu0 %v1552_v41  ;;  %1416 = vmatprep.subr.bf16.mxu1 %v1553_v42 }
  0x95   : > { %710 = vmatmul.mubr.bf16.vlgmr.msra.gmra.mrb[0].mxu0 %v484_v46  ;;  %751 = vmatmul.mubr.bf16.vlgmr.msra.gmra.mrb[0].mxu1 %v484_v46 }
  0x96   : > { %1395 = vmatpush3.bf16.msra.mxu0 %v1554_v44  ;;  %1417 = vmatpush3.bf16.msra.mxu1 %v1555_v45 }
  0x97   : > { %1396 = vmatprep.subr.bf16.mxu0 %v1556_v47  ;;  %1418 = vmatprep.subr.bf16.mxu1 %v1557_v48 }
  0x9a   : > { %1397 = vmatpush3.bf16.msra.mxu0 %v1558_v49  ;;  %1419 = vmatpush3.bf16.msra.mxu1 %v1559_v50 }
  0x9b   : > { %1398 = vmatprep.subr.bf16.mxu0 %v1560_v51  ;;  %1420 = vmatprep.subr.bf16.mxu1 %v1561_v52 }
  0x9e   : > { %1399 = vmatpush3.bf16.msra.mxu0 %v1562_v53  ;;  %1421 = vmatpush3.bf16.msra.mxu1 %v1563_v54 }
  0x9f   : > { %1400 = vmatprep.subr.bf16.mxu0 %v1564_v55  ;;  %1422 = vmatprep.subr.bf16.mxu1 %v1565_v56  ;;  %v1359_v55 = vld [vmem:[#allocation8] ss:$0 sm:$0xff] }
  0xa2   : > { %1401 = vmatpush3.bf16.msra.mxu0 %v1566_v57  ;;  %1423 = vmatpush3.bf16.msra.mxu1 %v1567_v58 }
  0xa3   : > { %1402 = vmatprep.subr.bf16.mxu0 %v1568_v59  ;;  %1424 = vmatprep.subr.bf16.mxu1 %v1569_v60 }
  0xa6   : > { %1403 = vmatpush3.bf16.msra.mxu0 %v1570_v61  ;;  %1425 = vmatpush3.bf16.msra.mxu1 %v1571_v62 }
  0xa7   : > { %1404 = vmatprep.subr.bf16.mxu0 %v1572_v63  ;;  %1426 = vmatprep.subr.bf16.mxu1 %v1573_v0 }
  0xaa   : > { %1405 = vmatpush3.bf16.msra.mxu0 %v1574_v1  ;;  %1427 = vmatpush3.bf16.msra.mxu1 %v1575_v2 }
  0xab   : > { %1406 = vmatprep.subr.bf16.mxu0 %v1576_v3  ;;  %1428 = vmatprep.subr.bf16.mxu1 %v1577_v4 }
  0xae   : > { %1407 = vmatpush3.bf16.msra.mxu0 %v1578_v5  ;;  %1429 = vmatpush3.bf16.msra.mxu1 %v1579_v6 }
  0xaf   : > { %1408 = vmatprep.subr.bf16.mxu0 %v1580_v7  ;;  %1430 = vmatprep.subr.bf16.mxu1 %v1581_v8 }
  0xb2   : > { %1409 = vmatpush3.bf16.msra.mxu0 %v1582_v9  ;;  %1431 = vmatpush3.bf16.msra.mxu1 %v1583_v10 }
 0x168   : > { %v711_v27 = vpop.f32.mrb[0].mxu0  ;;  %v752_v28 = vpop.f32.mrb[0].mxu1 }
 0x169   : > { %v713_v31 = vpop.f32.mrb[1].mxu0  ;;  %v754_v32 = vpop.f32.mrb[1].mxu1 }
 0x16a   : > { %v763_v33 = vcombine.low %v711_v27, %v713_v31  ;;  %v764_v35 = vcombine.low %v752_v28, %v754_v32  ;;  %v715_v37 = vpop.f32.mrb[2].mxu0  ;;  %v756_v38 = vpop.f32.mrb[2].mxu1 }
 0x16b   : > { %v716_v39 = vpop.f32.mrb[3].mxu0  ;;  %v757_v40 = vpop.f32.mrb[3].mxu1 }
 0x16c   : > { %v798_v41 = vmul.f32 %v794_v29, %v763_v33  ;;  %v799_v42 = vmul.f32 %v795_v30, %v764_v35 }
 0x16e   : > { %v822_v43 = vadd.f32 %v818_v34, %v798_v41  ;;  %v823_v44 = vadd.f32 %v819_v36, %v799_v42 }
 0x170   : > { %v824_v45 = vmax.f32 %v822_v43, 0.0  ;;  %v825_v46 = vmax.f32 %v823_v44, 0.0 }
 0x172   : > { %v828_v47 = vcombine.high %v824_v45, %v824_v45  ;;  %v829_v48 = vcombine.high %v825_v46, %v825_v46  ;;  %v832_v51 = vpack.c.bf16 %v824_v45, %v824_v45  ;;  %v834_v52 = vpack.c.bf16 %v825_v46, %v825_v46 }
 0x174   : > { %v833_v49 = vpack.c.bf16 %v828_v47, %v828_v47  ;;  %v835_v50 = vpack.c.bf16 %v829_v48, %v829_v48 }
 0x176   : > { %1131 = vmatprep.mubr.bf16.mxu0 %v833_v49  ;;  %1171 = vmatprep.mubr.bf16.mxu1 %v835_v50 }
 0x177   : > { %1132 = vmatmul.mubr.bf16.vlgmr.msra.gmra.mrb[4].mxu0 %v832_v51  ;;  %1172 = vmatmul.mubr.bf16.vlgmr.msra.gmra.mrb[4].mxu1 %v834_v52 }
 0x24a   : > { %v1410_v53 = vpop.f32.mrb[4].mxu0  ;;  %v1432_v54 = vpop.f32.mrb[4].mxu1 }
 0x24b   : > { %v1411_v56 = vpop.f32.mrb[5].mxu0  ;;  %v1433_v57 = vpop.f32.mrb[5].mxu1 }
 0x24c   : > { %v1412_v58 = vadd.f32 %v1411_v56, %v1410_v53  ;;  %v1434_v59 = vadd.f32 %v1433_v57, %v1432_v54  ;;  %v1413_v60 = vpop.f32.mrb[6].mxu0  ;;  %v1435_v61 = vpop.f32.mrb[6].mxu1 }
 0x24d   : > { %v1414_v62 = vpop.f32.mrb[7].mxu0  ;;  %v1436_v63 = vpop.f32.mrb[7].mxu1 }
 0x24e   : > { %v1134_v0 = vadd.f32 %v1412_v58, %v1359_v55 }
 0x250   : > { %v1174_v1 = vadd.f32 %v1434_v59, %v1134_v0 }
 0x252   : > { %1180 = vst.msk [vmem:[%s447_s25] sm:$0xf] %vm1179_vm0, %v1174_v1 }
 0x253 PF: > { %s22_s11 = sadd.s32 1, %s1730_s11   ;;  %s2170_s30 = smov %s1726_s10 }
 0x254   : > { %p19_p8 = scmp.ge.s32.totalorder %s22_s11, 4   ;;  %s2171_s10 = smov %s2173_s17 }
 0x256   :  { %21 = sbr.rel (!%p19_p8) target bundleno = 4 (0x4), region = 117 }
 0x25d   :  { %1200 = vsyncpa [#allocation4], 1 }
 0x25e   :  { %1202 = vsyncpa [#allocation4 + $0x1], 1 }
 0x25f   :  { %1203 = vsyncpa [#allocation6], 1 }
 0x260   :  { %1204 = vsyncpa [#allocation9], 1 }

// kernel: cpm_forward.28
= control target key start
LH: loop header
LB: loop body
LE: loop exit
PB: predicated region body
PF: predicated region fallthrough
CT: control target
= control target key end

     0   :  { %8 = vsyncpa [#allocation4], 0  ;;  %s2912_s12 = smov 0   ;;  %s2914_s13 = smov 0   ;;  %s3442_s0 = inlined_call_operand.vmem [shape: bf16[2,16,256], index: 0, kind: input, shape index: {}]   ;;  %s3443_s1 = inlined_call_operand.vmem [shape: bf16[9,256,128], index: 1, kind: input, shape index: {}]   ;;  %s3444_s2 = inlined_call_operand.hbm [shape: f32[1,128], index: 2, kind: input, shape index: {}]   ;;  %s3445_s3 = inlined_call_operand.vmem [shape: bf16[2,6,128], index: 3, kind: output, shape index: {}]  }
   0x1   :  { %s2916_s14 = smov 0  }
   0x2 LB: > { %s2005_s15 = sadd.s32 4294967295, %s2888_s14   ;;  %s26_s16 = sadd.s32 1, %s2884_s13  ;;  %s2888_s14 = sphi %s2916_s14, %s14_s14   ;;  %s2884_s13 = sphi %s2914_s13, %s3455_s13   ;;  %s2880_s12 = sphi %s2912_s12, %s3454_s12  }
   0x3   : > { %p28_p0 = scmp.ge.s32.totalorder %s26_s16, 2  ;;  %p2007_p1 = scmp.ge.s32.totalorder %s2888_s14, 1 }
   0x4   : > { %p132_p2 = scmp.lt.s32.totalorder %s2888_s14, 3  ;;  %p2937_p4 = scmp.eq.s32.totalorder %s2005_s15, 0 }
   0x5   : > { %s3457_s16 = smov (%p28_p0, %s26_s16), 0  ;;  %s2890_s19 = smov [#allocation3]  }
   0x6   : > { %p2933_p3 = pnand %p2007_p1, %p132_p2  ;;  %s154_s20 = sshll.u32 %s2890_s19, 4  ;;  %s155_s20 = int_to_ptr.vmem [resolvable:$true] %s154_s20 }
   0x7   : > { %s3450_s18 = scalar_select %p2937_p4, 1, 0 }
   0x8   : > { %s3449_s17 = scalar_select %p2933_p3, 1, 0 }
   0x9   : > { %p2640_p5 = pneg %p2933_p3  ;;  %s2834_s24 = scalar_lea.hbm %s3444_s2, 16 }
   0xa   : > { %p2835_p7 = scmp.ne.s32.totalorder %s3444_s2, %s2834_s24  ;;  %p2841_p11 = scmp.lt.u32.totalorder %s2834_s24, %s3444_s2 }
   0xb   : > { %p2945_p6 = pnand %p2937_p4, %p2640_p5 }
   0xd   : > { %p2836_p8 = pneg %p2945_p6 }
   0xf   : > { %p2837_p9 = pnand %p2836_p8, %p2835_p7 }
  0x11   : > { %p2838_p10 = pneg %p2837_p9 }
  0x13   : > { %p2843_p12 = pnand %p2841_p11, %p2838_p10 }
  0x15   : > { %2846 = shalt.err (!%p2843_p12)
}
  0x16   : > { %s2847_s29 = scalar_lea.vmem %s155_s20, 16  ;;  %s2854_s30 = scalar_lea.vmem %s155_s20, 32 }
  0x17   : > { %p2848_p13 = scmp.ne.s32.totalorder %s155_s20, %s2847_s29  ;;  %p2855_p2 = scmp.lt.s32.totalorder %s155_s20, %s155_s20 }
  0x18   : > { %p2856_p5 = scmp.lt.s32.totalorder %s2854_s30, %s2847_s29 }
  0x19   : > { %p2850_p0 = pnand %p2848_p13, %p2836_p8 }
  0x1a   : > { %p2857_p4 = por %p2856_p5, %p2855_p2 }
  0x1b   : > { %p2851_p1 = pneg %p2850_p0 }
  0x1d   : > { %p2858_p3 = pnand %p2857_p4, %p2851_p1 }
  0x1f   : > { %2861 = shalt.err (!%p2858_p3)
}
  0x20   : > { %2643 = dma.hbm_to_vmem [thread:$0]  (!%p2945_p6), %s3444_s2, 16, %s155_s20, [#allocation4]  }
  0x21   : > { %p3452_p7 = scmp.ne.s32.totalorder %s3449_s17, 0 }
  0x22   : > { %p3453_p9 = scmp.ne.s32.totalorder (!%p3452_p7), %s3450_s18, 0 }
  0x23   : > { %180 = sbr.rel (%p3452_p7) target bundleno = 437 (0x1b5), region = 32 }
  0x2a   : > { %2875 = dma.done.wait (%p3453_p9), [#allocation4], 16  }
  0x2b   : > { %2877 = vsyncadd (%p3453_p9), [#allocation4], 4294967280  ;;  %v2672_v0 = vld [vmem:[%s3443_s1 + $0xc0] sm:$0xff]   ;;  %v2676_v4 = vld [vmem:[%s3443_s1 + $0xc8] sm:$0xff]   ;;  %p213_p3 = scmp.lt.s32.totalorder %s2880_s12, 1 }
  0x2c   : > { %v2673_v1 = vld [vmem:[%s3443_s1 + $0x40] sm:$0xff]   ;;  %2438 = vmatprep.subr.bf16.mxu0 %v2672_v0  ;;  %v2677_v5 = vld [vmem:[%s3443_s1 + $0x48] sm:$0xff]   ;;  %v2680_v8 = vld [vmem:[%s3443_s1 + $0xd0] sm:$0xff]  }
  0x2d   : > { %v2674_v2 = vld [vmem:[%s3443_s1 + $0x80] sm:$0xff]   ;;  %2460 = vmatprep.subr.bf16.mxu1 %v2673_v1  ;;  %v2678_v6 = vld [vmem:[%s3443_s1 + $0x88] sm:$0xff]   ;;  %v2681_v9 = vld [vmem:[%s3443_s1 + $0x50] sm:$0xff]   ;;  %s3459_s12 = smov (!%p213_p3, %s2880_s12), 1 }
  0x2e   : > { %v2675_v3 = vld [vmem:[%s3443_s1] sm:$0xff]   ;;  %2439 = vmatpush3.bf16.msra.mxu0 %v2674_v2  ;;  %v2679_v7 = vld [vmem:[%s3443_s1 + $0x8] sm:$0xff]   ;;  %v2682_v10 = vld [vmem:[%s3443_s1 + $0x90] sm:$0xff]   ;;  %s2437_s18 = sshll.u32 %s3459_s12, 4  ;;  %s2015_s8 = sshll.u32 %s3459_s12, 2 }
  0x2f   : > { %2461 = vmatpush3.bf16.msra.mxu1 %v2675_v3  ;;  %2440 = vmatprep.subr.bf16.mxu0 %v2676_v4  ;;  %v2683_v11 = vld [vmem:[%s3443_s1 + $0x10] sm:$0xff]   ;;  %v2684_v12 = vld [vmem:[%s3443_s1 + $0xd8] sm:$0xff]   ;;  %v2688_v16 = vld [vmem:[%s3443_s1 + $0xe0] sm:$0xff]   ;;  %s3069_s27 = scalar_lea.vmem %s3442_s0, %s2437_s18  ;;  %s231_s11 = scalar_lea.vmem %s3445_s3, %s2015_s8 }
  0x30   : > { %2462 = vmatprep.subr.bf16.mxu1 %v2677_v5  ;;  %v2685_v13 = vld [vmem:[%s3443_s1 + $0x58] sm:$0xff]   ;;  %v2689_v17 = vld [vmem:[%s3443_s1 + $0x60] sm:$0xff]   ;;  %v2692_v20 = vld [vmem:[%s3443_s1 + $0xe8] sm:$0xff]  }
  0x31   : > { %v2686_v14 = vld [vmem:[%s3443_s1 + $0x98] sm:$0xff]   ;;  %v2690_v18 = vld [vmem:[%s3443_s1 + $0xa0] sm:$0xff]   ;;  %v2693_v21 = vld [vmem:[%s3443_s1 + $0x68] sm:$0xff]  }
  0x32   : > { %2441 = vmatpush3.bf16.msra.mxu0 %v2678_v6  ;;  %v2687_v15 = vld [vmem:[%s3443_s1 + $0x18] sm:$0xff]   ;;  %v2691_v19 = vld [vmem:[%s3443_s1 + $0x20] sm:$0xff]   ;;  %v2694_v22 = vld [vmem:[%s3443_s1 + $0xa8] sm:$0xff]  }
  0x33   : > { %2463 = vmatpush3.bf16.msra.mxu1 %v2679_v7  ;;  %2442 = vmatprep.subr.bf16.mxu0 %v2680_v8  ;;  %v2695_v23 = vld [vmem:[%s3443_s1 + $0x28] sm:$0xff]   ;;  %v2696_v24 = vld [vmem:[%s3443_s1 + $0xf0] sm:$0xff]   ;;  %v2700_v28 = vld [vmem:[%s3443_s1 + $0xf8] sm:$0xff]  }
  0x34   : > { %2464 = vmatprep.subr.bf16.mxu1 %v2681_v9  ;;  %v2697_v25 = vld [vmem:[%s3443_s1 + $0x70] sm:$0xff]   ;;  %v2701_v29 = vld [vmem:[%s3443_s1 + $0x78] sm:$0xff]   ;;  %v271_v32 = vld [vmem:[%s3069_s27] sm:$0xff] }
  0x35   : > { %v2698_v26 = vld [vmem:[%s3443_s1 + $0xb0] sm:$0xff]   ;;  %v2702_v30 = vld [vmem:[%s3443_s1 + $0xb8] sm:$0xff]   ;;  %v238_v33 = vld [vmem:[%s3069_s27] sm:$0x77]  ;;  %v2048_v34 = vcombine.low %v271_v32, %v271_v32  ;;  %v2049_v35 = vcombine.high %v271_v32, %v271_v32 }
  0x36   : > { %2443 = vmatpush3.bf16.msra.mxu0 %v2682_v10  ;;  %v2699_v27 = vld [vmem:[%s3443_s1 + $0x30] sm:$0xff]   ;;  %v2703_v31 = vld [vmem:[%s3443_s1 + $0x38] sm:$0xff]   ;;  %v2066_v36 = vcombine.low %v238_v33, %v238_v33  ;;  %v2067_v37 = vcombine.high %v238_v33, %v238_v33  ;;  %v2708_v38 = vld [vmem:[%s3443_s1 + $0x140] sm:$0xff]  }
  0x37   : > { %2465 = vmatpush3.bf16.msra.mxu1 %v2683_v11  ;;  %2444 = vmatprep.subr.bf16.mxu0 %v2684_v12  ;;  %v318_v39 = vshrl.u32 %v2049_v35, 16  ;;  %v320_v40 = vshll.u32 %v2049_v35, 16  ;;  %v311_v41 = vshrl.u32 %v2048_v34, 16  ;;  %v313_v42 = vshll.u32 %v2048_v34, 16  ;;  %v2710_v43 = vld [vmem:[%s3443_s1 + $0x1c0] sm:$0xff]   ;;  %v2712_v50 = vld [vmem:[%s3443_s1 + $0x148] sm:$0xff]  }
  0x38   : > { %2466 = vmatprep.subr.bf16.mxu1 %v2685_v13  ;;  %597 = vmatprep.mubr.bf16.mxu1 %v2067_v37  ;;  %v2709_v46 = vld [vmem:[%s3443_s1 + $0x100] sm:$0xff]   ;;  %v2714_v51 = vld [vmem:[%s3443_s1 + $0x1c8] sm:$0xff]   ;;  %v2716_v54 = vld [vmem:[%s3443_s1 + $0x150] sm:$0xff]  }
  0x39   : > { %v322_v44 = vrot.slane %v320_v40, 1  ;;  %v315_v45 = vrot.slane %v313_v42, 1  ;;  %v2711_v47 = vld [vmem:[%s3443_s1 + $0x180] sm:$0xff]   ;;  %v2715_v52 = vld [vmem:[%s3443_s1 + $0x188] sm:$0xff]   ;;  %v2718_v55 = vld [vmem:[%s3443_s1 + $0x1d0] sm:$0xff]  }
  0x3a   : > { %2445 = vmatpush3.bf16.msra.mxu0 %v2686_v14  ;;  %v2713_v53 = vld [vmem:[%s3443_s1 + $0x108] sm:$0xff]   ;;  %v2719_v56 = vld [vmem:[%s3443_s1 + $0x190] sm:$0xff]   ;;  %v2720_v58 = vld [vmem:[%s3443_s1 + $0x158] sm:$0xff]  }
  0x3b   : > { %2467 = vmatpush3.bf16.msra.mxu1 %v2687_v15  ;;  %2446 = vmatprep.subr.bf16.mxu0 %v2688_v16  ;;  %v323_v48 = vor.u32 %v322_v44, %v318_v39  ;;  %v316_v49 = vor.u32 %v315_v45, %v311_v41  ;;  %v2717_v57 = vld [vmem:[%s3443_s1 + $0x110] sm:$0xff]   ;;  %v2722_v59 = vld [vmem:[%s3443_s1 + $0x1d8] sm:$0xff]   ;;  %v2724_v62 = vld [vmem:[%s3443_s1 + $0x160] sm:$0xff]  }
  0x3c   : > { %2468 = vmatprep.subr.bf16.mxu1 %v2689_v17  ;;  %v2723_v60 = vld [vmem:[%s3443_s1 + $0x198] sm:$0xff]   ;;  %v2726_v63 = vld [vmem:[%s3443_s1 + $0x1e0] sm:$0xff]   ;;  %v2728_v2 = vld [vmem:[%s3443_s1 + $0x168] sm:$0xff]  }
  0x3d   : > { %454 = vmatprep.mubr.bf16.mxu0 %v323_v48  ;;  %v2721_v61 = vld [vmem:[%s3443_s1 + $0x118] sm:$0xff]   ;;  %v2727_v0 = vld [vmem:[%s3443_s1 + $0x1a0] sm:$0xff]   ;;  %v2730_v3 = vld [vmem:[%s3443_s1 + $0x1e8] sm:$0xff]  }
  0x3e   : > { %2447 = vmatpush3.bf16.msra.mxu0 %v2690_v18  ;;  %v2725_v1 = vld [vmem:[%s3443_s1 + $0x120] sm:$0xff]   ;;  %v2731_v4 = vld [vmem:[%s3443_s1 + $0x1a8] sm:$0xff]   ;;  %v2732_v6 = vld [vmem:[%s3443_s1 + $0x170] sm:$0xff]  }
  0x3f   : > { %2469 = vmatpush3.bf16.msra.mxu1 %v2691_v19  ;;  %2448 = vmatprep.subr.bf16.mxu0 %v2692_v20  ;;  %v2729_v5 = vld [vmem:[%s3443_s1 + $0x128] sm:$0xff]   ;;  %v2734_v7 = vld [vmem:[%s3443_s1 + $0x1f0] sm:$0xff]   ;;  %v2736_v10 = vld [vmem:[%s3443_s1 + $0x178] sm:$0xff]  }
  0x40   : > { %2470 = vmatprep.subr.bf16.mxu1 %v2693_v21  ;;  %v2735_v8 = vld [vmem:[%s3443_s1 + $0x1b0] sm:$0xff]   ;;  %v2738_v11 = vld [vmem:[%s3443_s1 + $0x1f8] sm:$0xff]   ;;  %v605_v12 = vld [vmem:[%s3069_s27] sm:$0xee] }
  0x41   : > { %v2733_v9 = vld [vmem:[%s3443_s1 + $0x130] sm:$0xff]   ;;  %v2116_v13 = vcombine.low %v605_v12, %v605_v12  ;;  %v2117_v14 = vcombine.high %v605_v12, %v605_v12  ;;  %v2741_v15 = vld [vmem:[%s3443_s1 + $0x1b8] sm:$0xff]   ;;  %v3174_v16 = vld [vmem:[%s3069_s27] sm:$0xcc] }
  0x42   : > { %2449 = vmatpush3.bf16.msra.mxu0 %v2694_v22  ;;  %v2737_v17 = vld [vmem:[%s3443_s1 + $0x138] sm:$0xff]   ;;  %v786_v19 = vld [vmem:[%s3069_s27 + $0x8] sm:$0x11]  ;;  %v2742_v20 = vld [vmem:[%s3443_s1 + $0x240] sm:$0xff]  }
  0x43   : > { %2471 = vmatpush3.bf16.msra.mxu1 %v2695_v23  ;;  %2450 = vmatprep.subr.bf16.mxu0 %v2696_v24  ;;  %v645_v18 = vrot.slane %v2117_v14, 1  ;;  %v2166_v21 = vcombine.low %v3174_v16, %v786_v19  ;;  %v2167_v22 = vcombine.high %v3174_v16, %v786_v19  ;;  %v644_v23 = vrot.slane %v2116_v13, 1  ;;  %v2746_v24 = vld [vmem:[%s3443_s1 + $0x2c0] sm:$0xff]   ;;  %v2749_v32 = vld [vmem:[%s3443_s1 + $0x208] sm:$0xff]   ;;  %v2752_v33 = vld [vmem:[%s3443_s1 + $0x250] sm:$0xff]  }
  0x44   : > { %2472 = vmatprep.subr.bf16.mxu1 %v2697_v25  ;;  %v2754_v34 = vld [vmem:[%s3443_s1 + $0x2d0] sm:$0xff]   ;;  %v2756_v37 = vld [vmem:[%s3443_s1 + $0x258] sm:$0xff]   ;;  %v2760_v41 = vld [vmem:[%s3443_s1 + $0x260] sm:$0xff]  }
  0x45   : > { %v828_v25 = vrot.slane %v2166_v21, 2  ;;  %v2755_v35 = vld [vmem:[%s3443_s1 + $0x290] sm:$0xff]   ;;  %v2759_v39 = vld [vmem:[%s3443_s1 + $0x298] sm:$0xff]   ;;  %v2762_v42 = vld [vmem:[%s3443_s1 + $0x2e0] sm:$0xff]  }
  0x46   : > { %2451 = vmatpush3.bf16.msra.mxu0 %v2698_v26  ;;  %v829_v26 = vrot.slane %v2167_v22, 2  ;;  %v2757_v40 = vld [vmem:[%s3443_s1 + $0x218] sm:$0xff]   ;;  %v2761_v44 = vld [vmem:[%s3443_s1 + $0x220] sm:$0xff]   ;;  %v2764_v45 = vld [vmem:[%s3443_s1 + $0x268] sm:$0xff]  }
  0x47   : > { %2473 = vmatpush3.bf16.msra.mxu1 %v2699_v27  ;;  %2452 = vmatprep.subr.bf16.mxu0 %v2700_v28  ;;  %v2745_v27 = vld [vmem:[%s3443_s1 + $0x200] sm:$0xff]   ;;  %v2765_v48 = vld [vmem:[%s3443_s1 + $0x228] sm:$0xff]   ;;  %v2788_v19 = vld [vmem:[%s3443_s1 + $0x350] sm:$0xff]  }
  0x48   : > { %2474 = vmatprep.subr.bf16.mxu1 %v2701_v29  ;;  %v2747_v28 = vld [vmem:[%s3443_s1 + $0x280] sm:$0xff]   ;;  %v2748_v29 = vld [vmem:[%s3443_s1 + $0x248] sm:$0xff]   ;;  %v2790_v21 = vld [vmem:[%s3443_s1 + $0x3d0] sm:$0xff]  }
  0x49   : > { %v2783_v12 = vld [vmem:[%s3443_s1 + $0x380] sm:$0xff]   ;;  %v2791_v22 = vld [vmem:[%s3443_s1 + $0x390] sm:$0xff]  }
  0x4a   : > { %2453 = vmatpush3.bf16.msra.mxu0 %v2702_v30  ;;  %v2750_v30 = vld [vmem:[%s3443_s1 + $0x2c8] sm:$0xff]  }
  0x4b   : > { %2475 = vmatpush3.bf16.msra.mxu1 %v2703_v31  ;;  %2482 = vmatprep.subr.bf16.mxu0 %v2708_v38  ;;  %v2751_v31 = vld [vmem:[%s3443_s1 + $0x288] sm:$0xff]   ;;  %v2758_v38 = vld [vmem:[%s3443_s1 + $0x2d8] sm:$0xff]  }
  0x4c   : > { %2504 = vmatprep.subr.bf16.mxu1 %v2710_v43  ;;  %v2763_v43 = vld [vmem:[%s3443_s1 + $0x2a0] sm:$0xff]  }
  0x4d   : > { %455 = vmatmul.mubr.bf16.vlgmr.msra.gmra.mrb[0].mxu0 %v316_v49  ;;  %v2768_v49 = vld [vmem:[%s3443_s1 + $0x270] sm:$0xff]  }
  0x4e   : > { %598 = vmatmul.mubr.bf16.vlgmr.msra.gmra.mrb[0].mxu1 %v2066_v36  ;;  %2483 = vmatpush3.bf16.msra.mxu0 %v2709_v46  ;;  %v2753_v36 = vld [vmem:[%s3443_s1 + $0x210] sm:$0xff]   ;;  %v2766_v46 = vld [vmem:[%s3443_s1 + $0x2e8] sm:$0xff]  }
  0x4f   : > { %2505 = vmatpush3.bf16.msra.mxu1 %v2711_v47  ;;  %2484 = vmatprep.subr.bf16.mxu0 %v2712_v50  ;;  %v2767_v47 = vld [vmem:[%s3443_s1 + $0x2a8] sm:$0xff]   ;;  %v2770_v50 = vld [vmem:[%s3443_s1 + $0x2f0] sm:$0xff]  }
  0x50   : > { %2506 = vmatprep.subr.bf16.mxu1 %v2714_v51  ;;  %776 = vmatprep.mubr.bf16.mxu0 %v645_v18  ;;  %v2771_v51 = vld [vmem:[%s3443_s1 + $0x2b0] sm:$0xff]   ;;  %v2787_v18 = vld [vmem:[%s3443_s1 + $0x388] sm:$0xff]  }
  0x51   : > { %960 = vmatprep.mubr.bf16.mxu1 %v829_v26  ;;  %v2795_v26 = vld [vmem:[%s3443_s1 + $0x398] sm:$0xff]  }
  0x52   : > { %2485 = vmatpush3.bf16.msra.mxu0 %v2713_v53  ;;  %v2772_v53 = vld [vmem:[%s3443_s1 + $0x278] sm:$0xff]  }
  0x53   : > { %2507 = vmatpush3.bf16.msra.mxu1 %v2715_v52  ;;  %2486 = vmatprep.subr.bf16.mxu0 %v2716_v54  ;;  %v2769_v52 = vld [vmem:[%s3443_s1 + $0x230] sm:$0xff]   ;;  %v2773_v54 = vld [vmem:[%s3443_s1 + $0x238] sm:$0xff]  }
  0x54   : > { %2508 = vmatprep.subr.bf16.mxu1 %v2718_v55  ;;  %v2774_v55 = vld [vmem:[%s3443_s1 + $0x2f8] sm:$0xff]  }
  0x56   : > { %2487 = vmatpush3.bf16.msra.mxu0 %v2717_v57 }
  0x57   : > { %2509 = vmatpush3.bf16.msra.mxu1 %v2719_v56  ;;  %2488 = vmatprep.subr.bf16.mxu0 %v2720_v58  ;;  %v969_v56 = vld [vmem:[%s3069_s27 + $0x8] sm:$0x33]  ;;  %v2776_v58 = vld [vmem:[%s3443_s1 + $0x2b8] sm:$0xff]  }
  0x58   : > { %2510 = vmatprep.subr.bf16.mxu1 %v2722_v59  ;;  %v2217_v57 = vcombine.high %v3174_v16, %v969_v56  ;;  %v2216_v59 = vcombine.low %v3174_v16, %v969_v56  ;;  %v2785_v16 = vld [vmem:[%s3443_s1 + $0x308] sm:$0xff]  }
  0x5a   : > { %2489 = vmatpush3.bf16.msra.mxu0 %v2721_v61  ;;  %v1017_v61 = vshrl.u32 %v2217_v57, 16 }
  0x5b   : > { %2511 = vmatpush3.bf16.msra.mxu1 %v2723_v60  ;;  %2490 = vmatprep.subr.bf16.mxu0 %v2724_v62  ;;  %v2778_v60 = vld [vmem:[%s3443_s1 + $0x340] sm:$0xff]   ;;  %v1020_v62 = vshll.u32 %v2217_v57, 16 }
  0x5c   : > { %2512 = vmatprep.subr.bf16.mxu1 %v2726_v63  ;;  %v1009_v63 = vshrl.u32 %v2216_v59, 16 }
  0x5e   : > { %2491 = vmatpush3.bf16.msra.mxu0 %v2725_v1  ;;  %v1163_v1 = vld [vmem:[%s3069_s27] sm:$0x88] }
  0x5f   : > { %2513 = vmatpush3.bf16.msra.mxu1 %v2727_v0  ;;  %2492 = vmatprep.subr.bf16.mxu0 %v2728_v2  ;;  %v1012_v0 = vshll.u32 %v2216_v59, 16  ;;  %v2266_v2 = vcombine.low %v1163_v1, %v969_v56 }
  0x60   : > { %2514 = vmatprep.subr.bf16.mxu1 %v2730_v3  ;;  %v2267_v3 = vcombine.high %v1163_v1, %v969_v56  ;;  %v2824_v1 = vld [vmem:[%s3443_s1 + $0x460] sm:$0xff]  }
  0x62   : > { %2493 = vmatpush3.bf16.msra.mxu0 %v2729_v5  ;;  %v1022_v5 = vrot.slane %v1020_v62, 3  ;;  %v2821_v62 = vld [vmem:[%s3443_s1 + $0x410] sm:$0xff]  }
  0x63   : > { %2515 = vmatpush3.bf16.msra.mxu1 %v2731_v4  ;;  %2494 = vmatprep.subr.bf16.mxu0 %v2732_v6  ;;  %v1019_v4 = vrot.slane %v1017_v61, 2  ;;  %v1011_v6 = vrot.slane %v1009_v63, 2  ;;  %v2820_v61 = vld [vmem:[%s3443_s1 + $0x450] sm:$0xff]   ;;  %v2822_v63 = vld [vmem:[%s3443_s1 + $0x458] sm:$0xff]  }
  0x64   : > { %2516 = vmatprep.subr.bf16.mxu1 %v2734_v7  ;;  %v1014_v7 = vrot.slane %v1012_v0, 3  ;;  %v2823_v0 = vld [vmem:[%s3443_s1 + $0x418] sm:$0xff]  }
  0x65   : > { %v1023_v13 = vor.u32 %v1022_v5, %v1019_v4  ;;  %v2825_v4 = vld [vmem:[%s3443_s1 + $0x420] sm:$0xff]  }
  0x66   : > { %2495 = vmatpush3.bf16.msra.mxu0 %v2733_v9  ;;  %v1202_v9 = vrot.slane %v2266_v2, 3  ;;  %v1015_v14 = vor.u32 %v1014_v7, %v1011_v6  ;;  %v1713_v2 = vld [vmem:[%s3069_s27 + $0x8] sm:$0xee] }
  0x67   : > { %2517 = vmatpush3.bf16.msra.mxu1 %v2735_v8  ;;  %2496 = vmatprep.subr.bf16.mxu0 %v2736_v10  ;;  %v2781_v8 = vld [vmem:[%s3443_s1 + $0x300] sm:$0xff]   ;;  %v1203_v10 = vrot.slane %v2267_v3, 3  ;;  %v2417_v3 = vcombine.high %v1713_v2, %v1713_v2  ;;  %v2826_v6 = vld [vmem:[%s3443_s1 + $0x468] sm:$0xff]  }
  0x68   : > { %2518 = vmatprep.subr.bf16.mxu1 %v2738_v11  ;;  %v2782_v11 = vld [vmem:[%s3443_s1 + $0x3c0] sm:$0xff]   ;;  %v2827_v7 = vld [vmem:[%s3443_s1 + $0x428] sm:$0xff]  }
  0x69   : > { %v1753_v5 = vrot.slane %v2417_v3, 1 }
  0x6a   : > { %2497 = vmatpush3.bf16.msra.mxu0 %v2737_v17  ;;  %v2786_v17 = vld [vmem:[%s3443_s1 + $0x3c8] sm:$0xff]  }
  0x6b   : > { %2519 = vmatpush3.bf16.msra.mxu1 %v2741_v15  ;;  %2526 = vmatprep.subr.bf16.mxu0 %v2742_v20  ;;  %v2784_v15 = vld [vmem:[%s3443_s1 + $0x348] sm:$0xff]   ;;  %v2789_v20 = vld [vmem:[%s3443_s1 + $0x310] sm:$0xff]  }
  0x6c   : > { %2548 = vmatprep.subr.bf16.mxu1 %v2746_v24  ;;  %v2793_v24 = vld [vmem:[%s3443_s1 + $0x318] sm:$0xff]  }
  0x6d   : > { %777 = vmatmul.mubr.bf16.vlgmr.msra.gmra.mrb[4].mxu0 %v644_v23  ;;  %v2792_v23 = vld [vmem:[%s3443_s1 + $0x358] sm:$0xff]  }
  0x6e   : > { %961 = vmatmul.mubr.bf16.vlgmr.msra.gmra.mrb[4].mxu1 %v828_v25  ;;  %2527 = vmatpush3.bf16.msra.mxu0 %v2745_v27  ;;  %v2794_v25 = vld [vmem:[%s3443_s1 + $0x3d8] sm:$0xff]   ;;  %v2796_v27 = vld [vmem:[%s3443_s1 + $0x360] sm:$0xff]  }
  0x6f   : > { %2549 = vmatpush3.bf16.msra.mxu1 %v2747_v28  ;;  %2528 = vmatprep.subr.bf16.mxu0 %v2748_v29  ;;  %v2797_v28 = vld [vmem:[%s3443_s1 + $0x320] sm:$0xff]  }
  0x70   : > { %2550 = vmatprep.subr.bf16.mxu1 %v2750_v30  ;;  %1334 = vmatprep.mubr.bf16.mxu1 %v1203_v10  ;;  %v2798_v29 = vld [vmem:[%s3443_s1 + $0x3e0] sm:$0xff]   ;;  %v2830_v10 = vld [vmem:[%s3443_s1 + $0x478] sm:$0xff]  }
  0x71   : > { %1154 = vmatprep.mubr.bf16.mxu0 %v1023_v13  ;;  %v2799_v30 = vld [vmem:[%s3443_s1 + $0x3a0] sm:$0xff]  }
  0x72   : > { %2529 = vmatpush3.bf16.msra.mxu0 %v2749_v32  ;;  %v2801_v32 = vld [vmem:[%s3443_s1 + $0x328] sm:$0xff]  }
  0x73   : > { %2551 = vmatpush3.bf16.msra.mxu1 %v2751_v31  ;;  %2530 = vmatprep.subr.bf16.mxu0 %v2752_v33  ;;  %v2800_v31 = vld [vmem:[%s3443_s1 + $0x368] sm:$0xff]  }
  0x74   : > { %2552 = vmatprep.subr.bf16.mxu1 %v2754_v34  ;;  %v2802_v33 = vld [vmem:[%s3443_s1 + $0x3e8] sm:$0xff]  }
  0x75   : > { %v2803_v34 = vld [vmem:[%s3443_s1 + $0x3a8] sm:$0xff]  }
  0x76   : > { %2531 = vmatpush3.bf16.msra.mxu0 %v2753_v36  ;;  %v2805_v36 = vld [vmem:[%s3443_s1 + $0x330] sm:$0xff]  }
  0x77   : > { %2553 = vmatpush3.bf16.msra.mxu1 %v2755_v35  ;;  %2532 = vmatprep.subr.bf16.mxu0 %v2756_v37  ;;  %v2804_v35 = vld [vmem:[%s3443_s1 + $0x370] sm:$0xff]  }
  0x78   : > { %2554 = vmatprep.subr.bf16.mxu1 %v2758_v38  ;;  %v2806_v37 = vld [vmem:[%s3443_s1 + $0x3f0] sm:$0xff]  }
  0x79   : > { %v2807_v38 = vld [vmem:[%s3443_s1 + $0x3b0] sm:$0xff]  }
  0x7a   : > { %2533 = vmatpush3.bf16.msra.mxu0 %v2757_v40  ;;  %v2809_v40 = vld [vmem:[%s3443_s1 + $0x338] sm:$0xff]  }
  0x7b   : > { %2555 = vmatpush3.bf16.msra.mxu1 %v2759_v39  ;;  %2534 = vmatprep.subr.bf16.mxu0 %v2760_v41  ;;  %v2808_v39 = vld [vmem:[%s3443_s1 + $0x378] sm:$0xff]  }
  0x7c   : > { %2556 = vmatprep.subr.bf16.mxu1 %v2762_v42  ;;  %v2810_v41 = vld [vmem:[%s3443_s1 + $0x3f8] sm:$0xff]   ;;  %v1343_v42 = vld [vmem:[%s3069_s27 + $0x8] sm:$0x77] }
  0x7e   : > { %2535 = vmatpush3.bf16.msra.mxu0 %v2761_v44  ;;  %v2813_v44 = vld [vmem:[%s3443_s1 + $0x3b8] sm:$0xff]  }
  0x7f   : > { %2557 = vmatpush3.bf16.msra.mxu1 %v2763_v43  ;;  %2536 = vmatprep.subr.bf16.mxu0 %v2764_v45  ;;  %v2317_v43 = vcombine.high %v1343_v42, %v1343_v42  ;;  %v2814_v45 = vld [vmem:[%s3443_s1 + $0x440] sm:$0xff]  }
  0x80   : > { %2558 = vmatprep.subr.bf16.mxu1 %v2766_v46  ;;  %v1521_v46 = vld [vmem:[%s3069_s27 + $0x8] sm:$0xff] }
  0x82   : > { %2537 = vmatpush3.bf16.msra.mxu0 %v2765_v48  ;;  %v2366_v48 = vcombine.low %v1521_v46, %v1521_v46 }
  0x83   : > { %2559 = vmatpush3.bf16.msra.mxu1 %v2767_v47  ;;  %2538 = vmatprep.subr.bf16.mxu0 %v2768_v49  ;;  %v2316_v47 = vcombine.low %v1343_v42, %v1343_v42  ;;  %v2367_v49 = vcombine.high %v1521_v46, %v1521_v46 }
  0x84   : > { %2560 = vmatprep.subr.bf16.mxu1 %v2770_v50  ;;  %v2817_v50 = vld [vmem:[%s3443_s1 + $0x400] sm:$0xff]  }
  0x86   : > { %2539 = vmatpush3.bf16.msra.mxu0 %v2769_v52  ;;  %v1570_v52 = vshll.u32 %v2367_v49, 16 }
  0x87   : > { %2561 = vmatpush3.bf16.msra.mxu1 %v2771_v51  ;;  %2540 = vmatprep.subr.bf16.mxu0 %v2772_v53  ;;  %v1568_v51 = vshrl.u32 %v2367_v49, 16  ;;  %v1561_v53 = vshrl.u32 %v2366_v48, 16 }
  0x88   : > { %2562 = vmatprep.subr.bf16.mxu1 %v2774_v55  ;;  %v2818_v55 = vld [vmem:[%s3443_s1 + $0x448] sm:$0xff]   ;;  %v1572_v56 = vrot.slane %v1570_v52, 1 }
  0x8a   : > { %2541 = vmatpush3.bf16.msra.mxu0 %v2773_v54  ;;  %v1563_v54 = vshll.u32 %v2366_v48, 16  ;;  %v1573_v59 = vor.u32 %v1572_v56, %v1568_v51 }
  0x8b   : > { %2563 = vmatpush3.bf16.msra.mxu1 %v2776_v58  ;;  %2570 = vmatprep.subr.bf16.mxu0 %v2778_v60  ;;  %v2819_v58 = vld [vmem:[%s3443_s1 + $0x408] sm:$0xff]  }
  0x8c   : > { %2592 = vmatprep.subr.bf16.mxu1 %v2782_v11  ;;  %v1565_v57 = vrot.slane %v1563_v54, 1  ;;  %v2416_v11 = vcombine.low %v1713_v2, %v1713_v2 }
  0x8d   : > { %1155 = vmatmul.mubr.bf16.vlgmr.msra.gmra.mrb[8].mxu0 %v1015_v14 }
  0x8e   : > { %1335 = vmatmul.mubr.bf16.vlgmr.msra.gmra.mrb[8].mxu1 %v1202_v9  ;;  %2571 = vmatpush3.bf16.msra.mxu0 %v2781_v8  ;;  %v1566_v60 = vor.u32 %v1565_v57, %v1561_v53  ;;  %v2828_v8 = vld [vmem:[%s3443_s1 + $0x470] sm:$0xff]   ;;  %v1752_v13 = vrot.slane %v2416_v11, 1 }
  0x8f   : > { %2593 = vmatpush3.bf16.msra.mxu1 %v2783_v12  ;;  %2572 = vmatprep.subr.bf16.mxu0 %v2784_v15  ;;  %v2829_v9 = vld [vmem:[%s3443_s1 + $0x430] sm:$0xff]   ;;  %v2831_v12 = vld [vmem:[%s3443_s1 + $0x438] sm:$0xff]  }
  0x90   : > { %2594 = vmatprep.subr.bf16.mxu1 %v2786_v17  ;;  %1512 = vmatprep.mubr.bf16.mxu0 %v2317_v43 }
  0x91   : > { %1704 = vmatprep.mubr.bf16.mxu1 %v1573_v59 }
  0x92   : > { %2573 = vmatpush3.bf16.msra.mxu0 %v2785_v16 }
  0x93   : > { %2595 = vmatpush3.bf16.msra.mxu1 %v2787_v18  ;;  %2574 = vmatprep.subr.bf16.mxu0 %v2788_v19 }
  0x94   : > { %2596 = vmatprep.subr.bf16.mxu1 %v2790_v21 }
  0x96   : > { %2575 = vmatpush3.bf16.msra.mxu0 %v2789_v20 }
  0x97   : > { %2597 = vmatpush3.bf16.msra.mxu1 %v2791_v22  ;;  %2576 = vmatprep.subr.bf16.mxu0 %v2792_v23  ;;  %v2891_v23 = vmov 0.0  }
  0x98   : > { %2598 = vmatprep.subr.bf16.mxu1 %v2794_v25  ;;  %237 = vst [vmem:[#allocation2] sm:$0x3f] %v2891_v23 }
  0x9a   : > { %2577 = vmatpush3.bf16.msra.mxu0 %v2793_v24 }
  0x9b   : > { %2599 = vmatpush3.bf16.msra.mxu1 %v2795_v26  ;;  %2578 = vmatprep.subr.bf16.mxu0 %v2796_v27 }
  0x9c   : > { %2600 = vmatprep.subr.bf16.mxu1 %v2798_v29 }
  0x9e   : > { %2579 = vmatpush3.bf16.msra.mxu0 %v2797_v28 }
  0x9f   : > { %2601 = vmatpush3.bf16.msra.mxu1 %v2799_v30  ;;  %2580 = vmatprep.subr.bf16.mxu0 %v2800_v31  ;;  %v1893_v2 = vld [vmem:[#allocation2] sm:$0x3f] }
  0xa0   : > { %2602 = vmatprep.subr.bf16.mxu1 %v2802_v33 }
  0xa2   : > { %2581 = vmatpush3.bf16.msra.mxu0 %v2801_v32 }
  0xa3   : > { %2603 = vmatpush3.bf16.msra.mxu1 %v2803_v34  ;;  %2582 = vmatprep.subr.bf16.mxu0 %v2804_v35 }
  0xa4   : > { %2604 = vmatprep.subr.bf16.mxu1 %v2806_v37 }
  0xa6   : > { %2583 = vmatpush3.bf16.msra.mxu0 %v2805_v36 }
  0xa7   : > { %2605 = vmatpush3.bf16.msra.mxu1 %v2807_v38  ;;  %2584 = vmatprep.subr.bf16.mxu0 %v2808_v39 }
  0xa8   : > { %2606 = vmatprep.subr.bf16.mxu1 %v2810_v41 }
  0xaa   : > { %2585 = vmatpush3.bf16.msra.mxu0 %v2809_v40 }
  0xab   : > { %2607 = vmatpush3.bf16.msra.mxu1 %v2813_v44  ;;  %2614 = vmatprep.subr.bf16.mxu0 %v2814_v45 }
  0xad   : > { %1513 = vmatmul.mubr.bf16.vlgmr.msra.gmra.mrb[12].mxu0 %v2316_v47 }
  0xae   : > { %2615 = vmatpush3.bf16.msra.mxu0 %v2817_v50  ;;  %1705 = vmatmul.mubr.bf16.vlgmr.msra.gmra.mrb[12].mxu1 %v1566_v60 }
  0xaf   : > { %2616 = vmatprep.subr.bf16.mxu0 %v2818_v55  ;;  %1884 = vmatprep.mubr.bf16.mxu0 %v1753_v5 }
  0xb2   : > { %2617 = vmatpush3.bf16.msra.mxu0 %v2819_v58 }
  0xb3   : > { %2618 = vmatprep.subr.bf16.mxu0 %v2820_v61 }
  0xb6   : > { %2619 = vmatpush3.bf16.msra.mxu0 %v2821_v62 }
  0xb7   : > { %2620 = vmatprep.subr.bf16.mxu0 %v2822_v63 }
  0xba   : > { %2621 = vmatpush3.bf16.msra.mxu0 %v2823_v0 }
  0xbb   : > { %2622 = vmatprep.subr.bf16.mxu0 %v2824_v1 }
  0xbe   : > { %2623 = vmatpush3.bf16.msra.mxu0 %v2825_v4 }
  0xbf   : > { %2624 = vmatprep.subr.bf16.mxu0 %v2826_v6  ;;  %v2434_v6 = vld [vmem:[#allocation3] ss:$0 sm:$0xff] }
  0xc2   : > { %2625 = vmatpush3.bf16.msra.mxu0 %v2827_v7 }
  0xc3   : > { %2626 = vmatprep.subr.bf16.mxu0 %v2828_v8 }
  0xc6   : > { %2627 = vmatpush3.bf16.msra.mxu0 %v2829_v9 }
  0xc7   : > { %2628 = vmatprep.subr.bf16.mxu0 %v2830_v10 }
  0xca   : > { %2629 = vmatpush3.bf16.msra.mxu0 %v2831_v12 }
  0xcd   : > { %1885 = vmatmul.mubr.bf16.vlgmr.msra.gmra.mrb[16].mxu0 %v1752_v13 }
 0x120   : > { %v2454_v19 = vpop.f32.mrb[0].mxu0 }
 0x121   : > { %v2476_v14 = vpop.f32.mrb[0].mxu1  ;;  %v2455_v20 = vpop.f32.mrb[1].mxu0 }
 0x122   : > { %v2477_v15 = vpop.f32.mrb[1].mxu1  ;;  %v2456_v21 = vadd.f32 %v2455_v20, %v2454_v19  ;;  %v2457_v22 = vpop.f32.mrb[2].mxu0 }
 0x123   : > { %v2478_v16 = vadd.f32 %v2477_v15, %v2476_v14  ;;  %v2479_v17 = vpop.f32.mrb[2].mxu1  ;;  %v2458_v24 = vpop.f32.mrb[3].mxu0 }
 0x124   : > { %v2480_v18 = vpop.f32.mrb[3].mxu1 }
 0x125   : > { %v600_v25 = vadd.f32 %v2478_v16, %v2456_v21 }
 0x140   : > { %v2498_v27 = vpop.f32.mrb[4].mxu0 }
 0x141   : > { %v2520_v26 = vpop.f32.mrb[4].mxu1  ;;  %v2499_v29 = vpop.f32.mrb[5].mxu0 }
 0x142   : > { %v2521_v28 = vpop.f32.mrb[5].mxu1  ;;  %v2500_v32 = vadd.f32 %v2499_v29, %v2498_v27  ;;  %v2501_v33 = vpop.f32.mrb[6].mxu0 }
 0x143   : > { %v2522_v30 = vadd.f32 %v2521_v28, %v2520_v26  ;;  %v2523_v31 = vpop.f32.mrb[6].mxu1  ;;  %v2502_v35 = vpop.f32.mrb[7].mxu0 }
 0x144   : > { %v2524_v34 = vpop.f32.mrb[7].mxu1  ;;  %v784_v36 = vadd.f32 %v2500_v32, %v600_v25 }
 0x146   : > { %v968_v37 = vadd.f32 %v2522_v30, %v784_v36 }
 0x160   : > { %v2542_v39 = vpop.f32.mrb[8].mxu0 }
 0x161   : > { %v2564_v38 = vpop.f32.mrb[8].mxu1  ;;  %v2543_v41 = vpop.f32.mrb[9].mxu0 }
 0x162   : > { %v2565_v40 = vpop.f32.mrb[9].mxu1  ;;  %v2544_v44 = vadd.f32 %v2543_v41, %v2542_v39  ;;  %v2545_v45 = vpop.f32.mrb[10].mxu0 }
 0x163   : > { %v2566_v42 = vadd.f32 %v2565_v40, %v2564_v38  ;;  %v2567_v43 = vpop.f32.mrb[10].mxu1  ;;  %v2546_v47 = vpop.f32.mrb[11].mxu0 }
 0x164   : > { %v2568_v46 = vpop.f32.mrb[11].mxu1  ;;  %v1162_v48 = vadd.f32 %v2544_v44, %v968_v37 }
 0x166   : > { %v1342_v49 = vadd.f32 %v2566_v42, %v1162_v48 }
 0x180   : > { %v2586_v50 = vpop.f32.mrb[12].mxu0 }
 0x181   : > { %v2587_v51 = vpop.f32.mrb[13].mxu0  ;;  %v2608_v56 = vpop.f32.mrb[12].mxu1 }
 0x182   : > { %v2588_v52 = vadd.f32 %v2587_v51, %v2586_v50  ;;  %v2589_v53 = vpop.f32.mrb[14].mxu0  ;;  %v2609_v57 = vpop.f32.mrb[13].mxu1 }
 0x183   : > { %v2590_v54 = vpop.f32.mrb[15].mxu0  ;;  %v2610_v58 = vadd.f32 %v2609_v57, %v2608_v56  ;;  %v2611_v59 = vpop.f32.mrb[14].mxu1 }
 0x184   : > { %v1520_v55 = vadd.f32 %v2588_v52, %v1342_v49  ;;  %v2612_v60 = vpop.f32.mrb[15].mxu1 }
 0x186   : > { %v1712_v61 = vadd.f32 %v2610_v58, %v1520_v55 }
 0x1a0   : > { %v2630_v62 = vpop.f32.mrb[16].mxu0 }
 0x1a1   : > { %v2631_v63 = vpop.f32.mrb[17].mxu0 }
 0x1a2   : > { %v2632_v0 = vadd.f32 %v2631_v63, %v2630_v62  ;;  %v2633_v1 = vpop.f32.mrb[18].mxu0 }
 0x1a3   : > { %v2634_v3 = vpop.f32.mrb[19].mxu0 }
 0x1a4   : > { %v1892_v4 = vadd.f32 %v2632_v0, %v1712_v61 }
 0x1a6   : > { %v1894_v5 = vadd.f32 %v1893_v2, %v1892_v4 }
 0x1a8   : > { %1895 = vst [vmem:[#allocation2] sm:$0x3f] %v1894_v5 }
 0x1af   : > { %v1899_v7 = vld [vmem:[#allocation2] sm:$0x3f] }
 0x1b0   : > { %v1907_v8 = vadd.f32 %v2434_v6, %v1899_v7 }
 0x1b2   : > { %v1908_v9 = vpack.c.bf16 %v1907_v8, %v1907_v8 }
 0x1b4   : > { %1909 = vst [vmem:[%s231_s11] sm:$0x7] %v1908_v9 }
 0x1b5 PF: > { %s14_s14 = sadd.s32 1, %s2888_s14   ;;  %s3454_s12 = smov %s2884_s13 }
 0x1b6   : > { %p11_p4 = scmp.ge.s32.totalorder %s14_s14, 4   ;;  %s3455_s13 = smov %s3457_s16 }
 0x1b8   :  { %13 = sbr.rel (!%p11_p4) target bundleno = 2 (0x2), region = 86 }
 0x1bf   :  { %1929 = vsyncpa [#allocation4], 1 }
 0x1c0   :  { %1931 = vsyncpa [#allocation4 + $0x1], 1 }

// kernel: cpm_forward.35
= control target key start
LH: loop header
LB: loop body
LE: loop exit
PB: predicated region body
PF: predicated region fallthrough
CT: control target
= control target key end

     0   :  { %s1018_s30 = smov 0   ;;  %s1020_s10 = smov 0   ;;  %s1140_s0 = inlined_call_operand.vmem [shape: bf16[2,4,128], index: 0, kind: input, shape index: {}]   ;;  %s1141_s1 = inlined_call_operand.vmem [shape: f32[1,1,128], index: 1, kind: input, shape index: {}]   ;;  %s1142_s2 = inlined_call_operand.vmem [shape: f32[1,128], index: 2, kind: input, shape index: {}]   ;;  %s1143_s3 = inlined_call_operand.vmem [shape: f32[1,128], index: 3, kind: input, shape index: {}]   ;;  %s1144_s4 = inlined_call_operand.vmem [shape: bf16[128,128], index: 4, kind: input, shape index: {}]   ;;  %s1145_s5 = inlined_call_operand.vmem [shape: f32[1,128], index: 5, kind: input, shape index: {}]   ;;  %s1146_s6 = inlined_call_operand.vmem [shape: f32[1,128], index: 6, kind: input, shape index: {}]   ;;  %s1147_s7 = inlined_call_operand.vmem [shape: bf16[128,8], index: 7, kind: input, shape index: {}]   ;;  %s1148_s8 = inlined_call_operand.vmem [shape: f32[1,8], index: 8, kind: input, shape index: {}]   ;;  %s1149_s9 = inlined_call_operand.vmem [shape: f32[2,4,8], index: 9, kind: output, shape index: {}]  }
   0x1   :  { %s1022_s11 = smov 0  }
   0x2 LB: > { %s31_s12 = sadd.s32 1, %s960_s10  ;;  %p815_p0 = scmp.ge.s32.totalorder %s964_s11, 1  ;;  %s964_s11 = sphi %s1022_s11, %s19_s11   ;;  %s960_s10 = sphi %s1020_s10, %s1151_s10   ;;  %s956_s30 = sphi %s1018_s30, %s1150_s30  }
   0x3   : > { %p33_p1 = scmp.ge.s32.totalorder %s31_s12, 2  ;;  %p338_p2 = scmp.lt.s32.totalorder %s964_s11, 3 }
   0x5   : > { %s1153_s12 = smov (%p33_p1, %s31_s12), 0  ;;  %p339_p3 = pnand %p815_p0, %p338_p2 }
   0x6   : > { %v926_v0 = vld [vmem:[%s1144_s4] sm:$0xff] (!%p339_p3)   ;;  %v966_v1 = vmov (!%p339_p3), 0.0   ;;  %v927_v2 = vld [vmem:[%s1144_s4 + $0x8] sm:$0xff] (!%p339_p3)   ;;  %vm967_vm0 = vmmov (!%p339_p3), 0   ;;  %p389_p4 = scmp.lt.s32.totalorder (!%p339_p3), %s956_s30, 1  ;;  %v928_v3 = vld [vmem:[%s1144_s4 + $0x10] sm:$0xff] (!%p339_p3)  }
   0x7   : > { %342 = sbr.rel (%p339_p3) target bundleno = 484 (0x1e4), region = 56  ;;  %860 = vmatprep.subr.bf16.mxu0 (!%p339_p3), %v966_v1  ;;  %420 = vst [vmem:[#allocation2] sm:$0xf] (!%p339_p3), %v966_v1  ;;  %880 = vmatprep.subr.bf16.mxu1 (!%p339_p3), %v966_v1  ;;  %v929_v4 = vld [vmem:[%s1144_s4 + $0x18] sm:$0xff] (!%p339_p3)   ;;  %v818_v7 = vld [vmem:[%s1141_s1] ss:$0 sm:$0xff] (!%p339_p3) }
   0x8   : > { %861 = vmatpush3.bf16.msra.mxu0 (!%p339_p3), %v926_v0  ;;  %876 = vmatprep.mubr.msk.bf16.mxu0 (!%p339_p3), %vm967_vm0, %v966_v1  ;;  %v934_v8 = vld [vmem:[%s1147_s7] sm:$0xff] (!%p339_p3)   ;;  %v935_v11 = vld [vmem:[%s1147_s7 + $0x8] sm:$0xff] (!%p339_p3)   ;;  %v936_v13 = vld [vmem:[%s1147_s7 + $0x10] sm:$0xff] (!%p339_p3)   ;;  %vm689_vm1 = vcmask (!%p339_p3), 60416  }
   0x9   : > { %862 = vmatprep.subr.bf16.mxu0 (!%p339_p3), %v966_v1  ;;  %896 = vmatprep.mubr.msk.bf16.mxu1 (!%p339_p3), %vm967_vm0, %v966_v1  ;;  %v930_v9 = vld [vmem:[%s1144_s4 + $0x20] sm:$0xff] (!%p339_p3)   ;;  %v931_v15 = vld [vmem:[%s1144_s4 + $0x28] sm:$0xff] (!%p339_p3)   ;;  %v932_v18 = vld [vmem:[%s1144_s4 + $0x30] sm:$0xff] (!%p339_p3)  }
   0xa   : > { %v819_v10 = vld [vmem:[%s1142_s2] ss:$0 sm:$0xff] (!%p339_p3)  ;;  %881 = vmatpush3.bf16.msra.mxu1 (!%p339_p3), %v934_v8  ;;  %v933_v20 = vld [vmem:[%s1144_s4 + $0x38] sm:$0xff] (!%p339_p3)   ;;  %v939_v24 = vld [vmem:[%s1147_s7 + $0x28] sm:$0xff] (!%p339_p3)  }
   0xb   : > { %882 = vmatprep.subr.bf16.mxu1 (!%p339_p3), %v966_v1  ;;  %v820_v16 = vld [vmem:[%s1143_s3] ss:$0 sm:$0xff] (!%p339_p3)  ;;  %v937_v22 = vld [vmem:[%s1147_s7 + $0x18] sm:$0xff] (!%p339_p3)   ;;  %v940_v25 = vld [vmem:[%s1147_s7 + $0x30] sm:$0xff] (!%p339_p3)  }
   0xc   : > { %863 = vmatpush3.bf16.msra.mxu0 (!%p339_p3), %v927_v2  ;;  %v938_v23 = vld [vmem:[%s1147_s7 + $0x20] sm:$0xff] (!%p339_p3)   ;;  %v941_v26 = vld [vmem:[%s1147_s7 + $0x38] sm:$0xff] (!%p339_p3)  }
   0xd   : > { %864 = vmatprep.subr.bf16.mxu0 (!%p339_p3), %v966_v1  ;;  %v829_v33 = vld [vmem:[%s1145_s5] ss:$0 sm:$0xff] (!%p339_p3) }
   0xe   : > { %s1155_s30 = smov (!%p389_p4, %s956_s30), 1  ;;  %883 = vmatpush3.bf16.msra.mxu1 %v935_v11  ;;  %v448_v27 = vld [vmem:[#allocation2] sm:$0xf] }
   0xf   : > { %s816_s19 = sshll.u32 %s1155_s30, 1  ;;  %884 = vmatprep.subr.bf16.mxu1 %v966_v1  ;;  %v830_v35 = vld [vmem:[%s1146_s6] ss:$0 sm:$0xff]  ;;  %s817_s25 = sshll.u32 %s1155_s30, 2 }
  0x10   : > { %s395_s22 = scalar_lea.vmem %s1140_s0, %s816_s19  ;;  %865 = vmatpush3.bf16.msra.mxu0 %v928_v3  ;;  %v831_v40 = vld [vmem:[%s1148_s8] ss:$0 sm:$0xff]  ;;  %s414_s13 = scalar_lea.vmem %s1149_s9, %s817_s25 }
  0x11   : > { %v421_v5 = vld [vmem:[%s395_s22] sm:$0x3]  ;;  %866 = vmatprep.subr.bf16.mxu0 %v966_v1 }
  0x12   : > { %v422_v6 = vunpack.c.l.bf16 %v421_v5  ;;  %885 = vmatpush3.bf16.msra.mxu1 %v936_v13 }
  0x13   : > { %886 = vmatprep.subr.bf16.mxu1 %v966_v1 }
  0x14   : > { %v430_v12 = vmul.f32 %v818_v7, %v422_v6  ;;  %867 = vmatpush3.bf16.msra.mxu0 %v929_v4 }
  0x15   : > { %868 = vmatprep.subr.bf16.mxu0 %v966_v1 }
  0x16   : > { %v438_v14 = vmul.f32 %v819_v10, %v430_v12  ;;  %887 = vmatpush3.bf16.msra.mxu1 %v937_v22 }
  0x17   : > { %888 = vmatprep.subr.bf16.mxu1 %v966_v1 }
  0x18   : > { %869 = vmatpush3.bf16.msra.mxu0 %v930_v9  ;;  %v446_v17 = vadd.f32 %v820_v16, %v438_v14 }
  0x19   : > { %870 = vmatprep.subr.bf16.mxu0 %v966_v1 }
  0x1a   : > { %v447_v19 = vmax.f32 %v446_v17, 0.0  ;;  %889 = vmatpush3.bf16.msra.mxu1 %v938_v23 }
  0x1b   : > { %890 = vmatprep.subr.bf16.mxu1 %v966_v1 }
  0x1c   : > { %871 = vmatpush3.bf16.msra.mxu0 %v931_v15  ;;  %v449_v21 = vpack.c.bf16 %v447_v19, %v447_v19 }
  0x1d   : > { %872 = vmatprep.subr.bf16.mxu0 %v966_v1 }
  0x1e   : > { %891 = vmatpush3.bf16.msra.mxu1 %v939_v24 }
  0x1f   : > { %892 = vmatprep.subr.bf16.mxu1 %v966_v1 }
  0x20   : > { %873 = vmatpush3.bf16.msra.mxu0 %v932_v18 }
  0x21   : > { %874 = vmatprep.subr.bf16.mxu0 %v966_v1 }
  0x22   : > { %893 = vmatpush3.bf16.msra.mxu1 %v940_v25 }
  0x23   : > { %894 = vmatprep.subr.bf16.mxu1 %v966_v1 }
  0x24   : > { %875 = vmatpush3.bf16.msra.mxu0 %v933_v20 }
  0x26   : > { %895 = vmatpush3.bf16.msra.mxu1 %v941_v26 }
  0x27   : > { %877 = vmatmul.mubr.bf16.vlgmr.msra.gmra.mrb[0].mxu0 %v449_v21 }
  0xfa   : > { %v548_v28 = vpop.f32.mrb[0].mxu0 }
  0xfb   : > { %v554_v29 = vadd.f32 %v548_v28, %v448_v27  ;;  %v878_v30 = vpop.f32.mrb[1].mxu0 }
  0xfc   : > { %v551_v31 = vpop.f32.mrb[2].mxu0 }
  0xfd   : > { %555 = vst [vmem:[#allocation2] sm:$0xf] %v554_v29  ;;  %v879_v32 = vpop.f32.mrb[3].mxu0 }
 0x104   : > { %v559_v34 = vld [vmem:[#allocation2] sm:$0xf] }
 0x105   : > { %v567_v36 = vmul.f32 %v829_v33, %v559_v34 }
 0x107   : > { %v575_v37 = vadd.f32 %v830_v35, %v567_v36 }
 0x109   : > { %v576_v38 = vmax.f32 %v575_v37, 0.0 }
 0x10b   : > { %v577_v39 = vpack.c.bf16 %v576_v38, %v576_v38 }
 0x10d   : > { %897 = vmatmul.mubr.bf16.vlgmr.msra.gmra.mrb[0].mxu1 %v577_v39 }
 0x1e0   : > { %v683_v41 = vpop.f32.mrb[0].mxu1 }
 0x1e1   : > { %v684_v42 = vadd.f32 %v831_v40, %v683_v41  ;;  %v898_v43 = vpop.f32.mrb[1].mxu1 }
 0x1e2   : > { %v686_v44 = vpop.f32.mrb[2].mxu1 }
 0x1e3   : > { %690 = vst.msk [vmem:[%s414_s13] sm:$0xf] %vm689_vm1, %v684_v42  ;;  %v899_v45 = vpop.f32.mrb[3].mxu1 }
 0x1e4 PF: > { %s19_s11 = sadd.s32 1, %s964_s11   ;;  %s1150_s30 = smov %s960_s10 }
 0x1e5   : > { %p16_p5 = scmp.ge.s32.totalorder %s19_s11, 4   ;;  %s1151_s10 = smov %s1153_s12 }
 0x1e7   :  { %18 = sbr.rel (!%p16_p5) target bundleno = 2 (0x2), region = 106 }

// kernel: cpm_forward.31
= control target key start
LH: loop header
LB: loop body
LE: loop exit
PB: predicated region body
PF: predicated region fallthrough
CT: control target
= control target key end

     0   :  { %s1907_s24 = smov 0   ;;  %s1909_s25 = smov 0   ;;  %s2246_s0 = inlined_call_operand.vmem [shape: bf16[2,64,128], index: 0, kind: input, shape index: {}]   ;;  %s2247_s1 = inlined_call_operand.vmem [shape: f32[49,1,128], index: 1, kind: input, shape index: {}]   ;;  %s2248_s2 = inlined_call_operand.vmem [shape: f32[1,128], index: 2, kind: input, shape index: {}]   ;;  %s2249_s3 = inlined_call_operand.vmem [shape: f32[1,128], index: 3, kind: input, shape index: {}]   ;;  %s2250_s4 = inlined_call_operand.vmem [shape: bf16[128,128], index: 4, kind: input, shape index: {}]   ;;  %s2251_s5 = inlined_call_operand.vmem [shape: f32[1,128], index: 5, kind: input, shape index: {}]   ;;  %s2252_s6 = inlined_call_operand.vmem [shape: f32[1,128], index: 6, kind: input, shape index: {}]   ;;  %s2253_s7 = inlined_call_operand.vmem [shape: bf16[2,10,128], index: 7, kind: output, shape index: {}]  }
   0x1   :  { %s1911_s26 = smov 0  }
   0x2 LB: > { %s29_s27 = sadd.s32 1, %s1859_s25  ;;  %p1656_p0 = scmp.ge.s32.totalorder %s1863_s26, 1  ;;  %s1863_s26 = sphi %s1911_s26, %s17_s26   ;;  %s1859_s25 = sphi %s1909_s25, %s2255_s25   ;;  %s1855_s24 = sphi %s1907_s24, %s2254_s24  }
   0x3   : > { %p31_p1 = scmp.ge.s32.totalorder %s29_s27, 2  ;;  %p289_p2 = scmp.lt.s32.totalorder %s1863_s26, 3 }
   0x5   : > { %s2257_s27 = smov (%p31_p1, %s29_s27), 0  ;;  %p290_p3 = pnand %p1656_p0, %p289_p2 }
   0x6   : > { %v1833_v0 = vld [vmem:[%s2250_s4] sm:$0xff] (!%p290_p3)   ;;  %v1865_v1 = vmov (!%p290_p3), 0.0   ;;  %v1834_v2 = vld [vmem:[%s2250_s4 + $0x8] sm:$0xff] (!%p290_p3)   ;;  %vm1866_vm0 = vmmov (!%p290_p3), 0   ;;  %p338_p4 = scmp.lt.s32.totalorder (!%p290_p3), %s1855_s24, 1  ;;  %v1835_v3 = vld [vmem:[%s2250_s4 + $0x10] sm:$0xff] (!%p290_p3)  }
   0x7   : > { %293 = sbr.rel (%p290_p3) target bundleno = 364 (0x16c), region = 48  ;;  %1787 = vmatprep.subr.bf16.mxu0 (!%p290_p3), %v1865_v1  ;;  %372 = vst [vmem:[#allocation2 + $0x8] sm:$0x3] (!%p290_p3), %v1865_v1  ;;  %1803 = vmatprep.mubr.msk.bf16.mxu0 (!%p290_p3), %vm1866_vm0, %v1865_v1  ;;  %vm400_vm1 = vcmask (!%p290_p3), 1046528   ;;  %vm422_vm2 = vcmask (!%p290_p3), 1045504   ;;  %vm444_vm3 = vcmask (!%p290_p3), 1044480  }
   0x8   : > { %1788 = vmatpush3.bf16.msra.mxu0 (!%p290_p3), %v1833_v0  ;;  %v1836_v4 = vld [vmem:[%s2250_s4 + $0x18] sm:$0xff] (!%p290_p3)   ;;  %v1661_v7 = vld [vmem:[%s2247_s1] ss:$0 sm:$0xff] (!%p290_p3)  ;;  %vm466_vm4 = vcmask (!%p290_p3), 1043456   ;;  %v1663_v11 = vld [vmem:[%s2247_s1 + $0x1] ss:$0 sm:$0xff] (!%p290_p3) }
   0x9   : > { %1789 = vmatprep.subr.bf16.mxu0 (!%p290_p3), %v1865_v1  ;;  %v1665_v15 = vld [vmem:[%s2247_s1 + $0x2] ss:$0 sm:$0xff] (!%p290_p3)  ;;  %v1667_v17 = vld [vmem:[%s2247_s1 + $0x3] ss:$0 sm:$0xff] (!%p290_p3)  ;;  %v1669_v24 = vld [vmem:[%s2247_s1 + $0x4] ss:$0 sm:$0xff] (!%p290_p3) }
   0xa   : > { %v1671_v29 = vld [vmem:[%s2247_s1 + $0x5] ss:$0 sm:$0xff] (!%p290_p3)  ;;  %v1673_v48 = vld [vmem:[%s2247_s1 + $0x6] ss:$0 sm:$0xff] (!%p290_p3)  ;;  %v1838_v49 = vld [vmem:[%s2250_s4 + $0x28] sm:$0xff] (!%p290_p3)   ;;  %vm488_vm5 = vcmask (!%p290_p3), 1042432  }
   0xb   : > { %v1837_v34 = vld [vmem:[%s2250_s4 + $0x20] sm:$0xff] (!%p290_p3)   ;;  %vm510_vm6 = vcmask (!%p290_p3), 1041408   ;;  %v1677_v63 = vld [vmem:[%s2247_s1 + $0x8] ss:$0 sm:$0xff] (!%p290_p3) }
   0xc   : > { %1790 = vmatpush3.bf16.msra.mxu0 (!%p290_p3), %v1834_v2  ;;  %v1675_v58 = vld [vmem:[%s2247_s1 + $0x7] ss:$0 sm:$0xff] (!%p290_p3) }
   0xd   : > { %1791 = vmatprep.subr.bf16.mxu0 (!%p290_p3), %v1865_v1 }
   0xe   : > { %s2259_s24 = smov (!%p338_p4, %s1855_s24), 1 }
   0xf   : > { %s1774_s11 = sshll.u32 %s2259_s24, 5  ;;  %s1775_s22 = sshll.u32 %s2259_s24, 3 }
  0x10   : > { %s1945_s14 = scalar_lea.vmem %s2246_s0, %s1774_s11  ;;  %1792 = vmatpush3.bf16.msra.mxu0 %v1835_v3  ;;  %s365_s29 = scalar_lea.vmem %s2253_s7, %s1775_s22 }
  0x11   : > { %v373_v5 = vld [vmem:[%s1945_s14] sm:$0xff]   ;;  %1793 = vmatprep.subr.bf16.mxu0 %v1865_v1  ;;  %v518_v53 = vld [vmem:[%s1945_s14 + $0x8] sm:$0x1] }
  0x12   : > { %v374_v6 = vld [vmem:[%s1945_s14 + $0x4] sm:$0x1]  ;;  %v375_v8 = vunpack.c.l.bf16 %v373_v5  ;;  %v408_v12 = vld [vmem:[%s1945_s14] sm:$0xe]  ;;  %v1967_v18 = vunpack.c.h.bf16 %v373_v5  ;;  %v532_v59 = vld [vmem:[%s1945_s14 + $0x8] sm:$0x3] }
  0x13   : > { %v376_v9 = vunpack.c.l.bf16 %v374_v6  ;;  %v386_v10 = vld [vmem:[%s1945_s14 + $0x4] sm:$0x3]  ;;  %v409_v14 = vunpack.c.l.bf16 %v408_v12  ;;  %v452_v23 = vld [vmem:[%s1945_s14] sm:$0xc]  ;;  %v1679_v6 = vld [vmem:[%s2247_s1 + $0x9] ss:$0 sm:$0xff] }
  0x14   : > { %v387_v13 = vunpack.c.l.bf16 %v386_v10  ;;  %v430_v16 = vld [vmem:[%s1945_s14 + $0x4] sm:$0x7]  ;;  %v384_v19 = vmul.f32 %v1661_v7, %v375_v8  ;;  %v396_v21 = vmul.f32 %v1663_v11, %v375_v8  ;;  %v453_v32 = vunpack.c.l.bf16 %v452_v23  ;;  %1794 = vmatpush3.bf16.msra.mxu0 %v1836_v4  ;;  %v496_v43 = vld [vmem:[%s1945_s14] sm:$0x8]  ;;  %v1839_v12 = vld [vmem:[%s2250_s4 + $0x30] sm:$0xff]  }
  0x15   : > { %v385_v20 = vmul.f32 %v1661_v7, %v376_v9  ;;  %v431_v22 = vunpack.c.l.bf16 %v430_v16  ;;  %v418_v26 = vmul.f32 %v1665_v15, %v409_v14  ;;  %v440_v28 = vmul.f32 %v1667_v17, %v409_v14  ;;  %1795 = vmatprep.subr.bf16.mxu0 %v1865_v1  ;;  %v553_v5 = vld [vmem:[%s1945_s14 + $0x4] sm:$0xe] }
  0x16   : > { %v397_v25 = vmul.f32 %v1663_v11, %v387_v13  ;;  %v419_v27 = vmul.f32 %v1665_v15, %v387_v13  ;;  %v401_v30 = vrot.slane %v396_v21, 1  ;;  %v462_v40 = vmul.f32 %v1669_v24, %v453_v32  ;;  %v574_v11 = vld [vmem:[%s1945_s14 + $0x8] sm:$0x7]  ;;  %v595_v23 = vld [vmem:[%s1945_s14 + $0x4] sm:$0xc] }
  0x17   : > { %v441_v31 = vmul.f32 %v1667_v17, %v431_v22  ;;  %v463_v33 = vmul.f32 %v1669_v24, %v431_v22  ;;  %v423_v36 = vrot.slane %v418_v26, 2  ;;  %v445_v38 = vrot.slane %v440_v28, 3  ;;  %v1681_v22 = vld [vmem:[%s2247_s1 + $0xa] ss:$0 sm:$0xff] }
  0x18   : > { %v402_v35 = vrot.slane %v397_v25, 1  ;;  %v424_v37 = vrot.slane %v419_v27, 2  ;;  %v484_v42 = vmul.f32 %v1671_v29, %v453_v32  ;;  %v485_v47 = vmul.f32 %v1671_v29, %v1967_v18  ;;  %1796 = vmatpush3.bf16.msra.mxu0 %v1837_v34  ;;  %v1840_v32 = vld [vmem:[%s2250_s4 + $0x38] sm:$0xff]  }
  0x19   : > { %v446_v39 = vrot.slane %v441_v31, 3  ;;  %v468_v41 = vrot.slane %v463_v33, 4  ;;  %v467_v52 = vrot.slane %v462_v40, 4  ;;  %v497_v57 = vunpack.c.l.bf16 %v496_v43  ;;  %1797 = vmatprep.subr.bf16.mxu0 %v1865_v1 }
  0x1a   : > { %v403_v44 = vsel %vm400_vm1, %v401_v30, %v402_v35  ;;  %v407_v45 = vadd.f32 %v402_v35, %v385_v20  ;;  %v425_v46 = vsel %vm422_vm2, %v423_v36, %v424_v37  ;;  %v489_v55 = vrot.slane %v484_v42, 5  ;;  %v1685_v42 = vld [vmem:[%s2247_s1 + $0xc] ss:$0 sm:$0xff] }
  0x1b   : > { %v406_v50 = vadd.f32 %v403_v44, %v384_v19  ;;  %v447_v51 = vsel %vm444_vm3, %v445_v38, %v446_v39  ;;  %v490_v56 = vrot.slane %v485_v47, 5  ;;  %v469_v61 = vsel %vm466_vm4, %v467_v52, %v468_v41  ;;  %v637_v47 = vld [vmem:[%s1945_s14 + $0x4] sm:$0x8]  ;;  %v658_v52 = vld [vmem:[%s1945_s14 + $0xc] sm:$0x1] }
  0x1c   : > { %v429_v54 = vadd.f32 %v424_v37, %v407_v45  ;;  %v507_v62 = vmul.f32 %v1673_v48, %v1967_v18  ;;  %v506_v3 = vmul.f32 %v1673_v48, %v497_v57  ;;  %v519_v4 = vunpack.c.l.bf16 %v518_v53  ;;  %1798 = vmatpush3.bf16.msra.mxu0 %v1838_v49  ;;  %v2027_v37 = vld [vmem:[%s1945_s14 + $0x8] sm:$0xff]  }
  0x1d   : > { %v428_v60 = vadd.f32 %v425_v46, %v406_v50  ;;  %v491_v2 = vsel %vm488_vm5, %v489_v55, %v490_v56  ;;  %v528_v9 = vmul.f32 %v1675_v58, %v1967_v18  ;;  %v533_v10 = vunpack.c.l.bf16 %v532_v59  ;;  %1799 = vmatprep.subr.bf16.mxu0 %v1865_v1  ;;  %v1687_v48 = vld [vmem:[%s2247_s1 + $0xd] ss:$0 sm:$0xff] }
  0x1e   : > { %v451_v0 = vadd.f32 %v446_v39, %v429_v54  ;;  %v512_v8 = vrot.slane %v507_v62, 6  ;;  %v511_v14 = vrot.slane %v506_v3, 6  ;;  %v529_v15 = vmul.f32 %v1675_v58, %v519_v4  ;;  %v672_v62 = vld [vmem:[%s1945_s14 + $0xc] sm:$0x3]  ;;  %v1691_v4 = vld [vmem:[%s2247_s1 + $0xf] ss:$0 sm:$0xff] }
  0x1f   : > { %v450_v7 = vadd.f32 %v447_v51, %v428_v60  ;;  %v542_v16 = vmul.f32 %v1677_v63, %v1967_v18  ;;  %v543_v19 = vmul.f32 %v1677_v63, %v533_v10  ;;  %v554_v20 = vunpack.c.l.bf16 %v553_v5  ;;  %v1683_v18 = vld [vmem:[%s2247_s1 + $0xb] ss:$0 sm:$0xff] }
  0x20   : > { %v473_v13 = vadd.f32 %v468_v41, %v451_v0  ;;  %v564_v21 = vmul.f32 %v1679_v6, %v533_v10  ;;  %v513_v25 = vsel %vm510_vm6, %v511_v14, %v512_v8  ;;  %v575_v27 = vunpack.c.l.bf16 %v574_v11  ;;  %1800 = vmatpush3.bf16.msra.mxu0 %v1839_v12  ;;  %v1693_v10 = vld [vmem:[%s2247_s1 + $0x10] ss:$0 sm:$0xff] }
  0x21   : > { %v472_v17 = vadd.f32 %v469_v61, %v450_v7  ;;  %v546_v26 = vrot.slane %v542_v16, 1  ;;  %v547_v29 = vrot.slane %v543_v19, 1  ;;  %v563_v30 = vmul.f32 %v1679_v6, %v554_v20  ;;  %1801 = vmatprep.subr.bf16.mxu0 %v1865_v1  ;;  %v1689_v61 = vld [vmem:[%s2247_s1 + $0xe] ss:$0 sm:$0xff] }
  0x22   : > { %v495_v24 = vadd.f32 %v490_v56, %v473_v13  ;;  %v568_v31 = vrot.slane %v564_v21, 2  ;;  %v584_v34 = vmul.f32 %v1681_v22, %v554_v20  ;;  %v585_v35 = vmul.f32 %v1681_v22, %v575_v27 }
  0x23   : > { %v494_v28 = vadd.f32 %v491_v2, %v472_v17  ;;  %v596_v36 = vunpack.c.l.bf16 %v595_v23  ;;  %v548_v39 = vsel %vm400_vm1, %v546_v26, %v547_v29  ;;  %v567_v40 = vrot.slane %v563_v30, 2  ;;  %v735_v26 = vld [vmem:[%s1945_s14 + $0x8] sm:$0xc]  ;;  %v1697_v30 = vld [vmem:[%s2247_s1 + $0x12] ss:$0 sm:$0xff] }
  0x24   : > { %v517_v33 = vadd.f32 %v512_v8, %v495_v24  ;;  %v606_v41 = vmul.f32 %v1683_v18, %v575_v27  ;;  %v588_v44 = vrot.slane %v584_v34, 3  ;;  %v589_v45 = vrot.slane %v585_v35, 3  ;;  %1802 = vmatpush3.bf16.msra.mxu0 %v1840_v32 }
  0x25   : > { %v516_v38 = vadd.f32 %v513_v25, %v494_v28  ;;  %v605_v46 = vmul.f32 %v1683_v18, %v596_v36  ;;  %v569_v49 = vsel %vm422_vm2, %v567_v40, %v568_v31  ;;  %v617_v51 = vunpack.c.l.bf16 %v2027_v37  ;;  %v1695_v25 = vld [vmem:[%s2247_s1 + $0x11] ss:$0 sm:$0xff] }
  0x26   : > { %v531_v43 = vadd.f32 %v529_v15, %v517_v33  ;;  %v610_v50 = vrot.slane %v606_v41, 4  ;;  %v590_v54 = vsel %vm444_vm3, %v588_v44, %v589_v45  ;;  %v626_v56 = vmul.f32 %v1685_v42, %v596_v36  ;;  %v714_v15 = vld [vmem:[%s1945_s14 + $0xc] sm:$0x7] }
  0x27   : > { %v530_v1 = vadd.f32 %v528_v9, %v516_v38  ;;  %v609_v55 = vrot.slane %v605_v46, 4  ;;  %v627_v58 = vmul.f32 %v1685_v42, %v617_v51  ;;  %v638_v59 = vunpack.c.l.bf16 %v637_v47  ;;  %v693_v9 = vld [vmem:[%s1945_s14 + $0x8] sm:$0xe] }
  0x28   : > { %v552_v53 = vadd.f32 %v547_v29, %v531_v43  ;;  %v648_v60 = vmul.f32 %v1687_v48, %v617_v51  ;;  %v630_v2 = vrot.slane %v626_v56, 5  ;;  %v659_v3 = vunpack.c.l.bf16 %v658_v52  ;;  %v1699_v43 = vld [vmem:[%s2247_s1 + $0x13] ss:$0 sm:$0xff] }
  0x29   : > { %v551_v57 = vadd.f32 %v548_v39, %v530_v1  ;;  %v611_v0 = vsel %vm466_vm4, %v609_v55, %v610_v50  ;;  %v631_v6 = vrot.slane %v627_v58, 5  ;;  %v647_v7 = vmul.f32 %v1687_v48, %v638_v59  ;;  %v777_v48 = vld [vmem:[%s1945_s14 + $0x8] sm:$0x8]  ;;  %v1701_v1 = vld [vmem:[%s2247_s1 + $0x14] ss:$0 sm:$0xff] }
  0x2a   : > { %v573_v63 = vadd.f32 %v568_v31, %v552_v53  ;;  %v652_v8 = vrot.slane %v648_v60, 6  ;;  %v668_v12 = vmul.f32 %v1689_v61, %v617_v51  ;;  %v669_v13 = vmul.f32 %v1689_v61, %v659_v3  ;;  %v798_v53 = vld [vmem:[%s1945_s14 + $0x10] sm:$0x1] }
  0x2b   : > { %v572_v5 = vadd.f32 %v569_v49, %v551_v57  ;;  %v673_v14 = vunpack.c.l.bf16 %v672_v62  ;;  %v632_v17 = vsel %vm488_vm5, %v630_v2, %v631_v6  ;;  %v651_v19 = vrot.slane %v647_v7, 6  ;;  %v1703_v62 = vld [vmem:[%s2247_s1 + $0x15] ss:$0 sm:$0xff] }
  0x2c   : > { %v594_v11 = vadd.f32 %v589_v45, %v573_v63  ;;  %v682_v20 = vmul.f32 %v1691_v4, %v617_v51  ;;  %v694_v23 = vunpack.c.l.bf16 %v693_v9  ;;  %v715_v29 = vunpack.c.l.bf16 %v714_v15  ;;  %v812_v63 = vld [vmem:[%s1945_s14 + $0x10] sm:$0x3]  ;;  %v833_v9 = vld [vmem:[%s1945_s14 + $0xc] sm:$0xe] }
  0x2d   : > { %v593_v16 = vadd.f32 %v590_v54, %v572_v5  ;;  %v683_v22 = vmul.f32 %v1691_v4, %v673_v14  ;;  %v704_v24 = vmul.f32 %v1693_v10, %v673_v14  ;;  %v653_v18 = vsel %vm510_vm6, %v651_v19, %v652_v8  ;;  %v1705_v4 = vld [vmem:[%s2247_s1 + $0x16] ss:$0 sm:$0xff]  ;;  %v854_v15 = vld [vmem:[%s1945_s14 + $0x10] sm:$0x7] }
  0x2e   : > { %v615_v21 = vadd.f32 %v610_v50, %v594_v11  ;;  %v686_v28 = vrot.slane %v682_v20, 1  ;;  %v703_v33 = vmul.f32 %v1693_v10, %v694_v23  ;;  %v724_v36 = vmul.f32 %v1695_v25, %v694_v23  ;;  %v1707_v10 = vld [vmem:[%s2247_s1 + $0x17] ss:$0 sm:$0xff] }
  0x2f   : > { %v614_v27 = vadd.f32 %v611_v0, %v593_v16  ;;  %v687_v32 = vrot.slane %v683_v22, 1  ;;  %v708_v34 = vrot.slane %v704_v24, 2  ;;  %v725_v38 = vmul.f32 %v1695_v25, %v715_v29  ;;  %v1709_v25 = vld [vmem:[%s2247_s1 + $0x18] ss:$0 sm:$0xff] }
  0x30   : > { %v636_v31 = vadd.f32 %v631_v6, %v615_v21  ;;  %v736_v39 = vunpack.c.l.bf16 %v735_v26  ;;  %v707_v41 = vrot.slane %v703_v33, 2  ;;  %v746_v42 = vmul.f32 %v1697_v30, %v715_v29  ;;  %v875_v26 = vld [vmem:[%s1945_s14 + $0xc] sm:$0xc] }
  0x31   : > { %v635_v35 = vadd.f32 %v632_v17, %v614_v27  ;;  %v728_v45 = vrot.slane %v724_v36, 3  ;;  %v729_v46 = vrot.slane %v725_v38, 3  ;;  %v688_v50 = vsel %vm400_vm1, %v686_v28, %v687_v32 }
  0x32   : > { %v657_v40 = vadd.f32 %v652_v8, %v636_v31  ;;  %v745_v47 = vmul.f32 %v1697_v30, %v736_v39  ;;  %v709_v51 = vsel %vm422_vm2, %v707_v41, %v708_v34  ;;  %v757_v52 = vunpack.c.h.bf16 %v2027_v37  ;;  %v1711_v30 = vld [vmem:[%s2247_s1 + $0x19] ss:$0 sm:$0xff] }
  0x33   : > { %v656_v44 = vadd.f32 %v653_v18, %v635_v35  ;;  %v750_v56 = vrot.slane %v746_v42, 4  ;;  %v766_v57 = vmul.f32 %v1699_v43, %v736_v39  ;;  %v778_v60 = vunpack.c.l.bf16 %v777_v48 }
  0x34   : > { %v671_v49 = vadd.f32 %v669_v13, %v657_v40  ;;  %v749_v55 = vrot.slane %v745_v47, 4  ;;  %v767_v59 = vmul.f32 %v1699_v43, %v757_v52  ;;  %v788_v61 = vmul.f32 %v1701_v1, %v757_v52  ;;  %v2099_v40 = vld [vmem:[%s1945_s14 + $0x10] sm:$0xff]  }
  0x35   : > { %v670_v54 = vadd.f32 %v668_v12, %v656_v44  ;;  %v730_v2 = vsel %vm444_vm3, %v728_v45, %v729_v46  ;;  %v770_v37 = vrot.slane %v766_v57, 5  ;;  %v799_v3 = vunpack.c.l.bf16 %v798_v53  ;;  %v1713_v45 = vld [vmem:[%s2247_s1 + $0x1a] ss:$0 sm:$0xff] }
  0x36   : > { %v692_v58 = vadd.f32 %v687_v32, %v671_v49  ;;  %v771_v6 = vrot.slane %v767_v59, 5  ;;  %v787_v7 = vmul.f32 %v1701_v1, %v778_v60  ;;  %v792_v8 = vrot.slane %v788_v61, 6  ;;  %v917_v49 = vld [vmem:[%s1945_s14 + $0xc] sm:$0x8] }
  0x37   : > { %v691_v0 = vadd.f32 %v688_v50, %v670_v54  ;;  %v751_v12 = vsel %vm466_vm4, %v749_v55, %v750_v56  ;;  %v808_v13 = vmul.f32 %v1703_v62, %v757_v52  ;;  %v813_v14 = vunpack.c.l.bf16 %v812_v63  ;;  %v1715_v50 = vld [vmem:[%s2247_s1 + $0x1b] ss:$0 sm:$0xff]  ;;  %v952_v63 = vld [vmem:[%s1945_s14 + $0x14] sm:$0x3] }
  0x38   : > { %v713_v5 = vadd.f32 %v708_v34, %v692_v58  ;;  %v791_v17 = vrot.slane %v787_v7, 6  ;;  %v809_v19 = vmul.f32 %v1703_v62, %v799_v3  ;;  %v822_v20 = vmul.f32 %v1705_v4, %v757_v52  ;;  %v938_v58 = vld [vmem:[%s1945_s14 + $0x14] sm:$0x1] }
  0x39   : > { %v712_v11 = vadd.f32 %v709_v51, %v691_v0  ;;  %v823_v22 = vmul.f32 %v1705_v4, %v813_v14  ;;  %v834_v23 = vunpack.c.l.bf16 %v833_v9  ;;  %v844_v24 = vmul.f32 %v1707_v10, %v813_v14  ;;  %v1717_v4 = vld [vmem:[%s2247_s1 + $0x1c] ss:$0 sm:$0xff] }
  0x3a   : > { %v734_v16 = vadd.f32 %v729_v46, %v713_v5  ;;  %v772_v18 = vsel %vm488_vm5, %v770_v37, %v771_v6  ;;  %v793_v28 = vsel %vm510_vm6, %v791_v17, %v792_v8  ;;  %v855_v29 = vunpack.c.l.bf16 %v854_v15  ;;  %v1719_v5 = vld [vmem:[%s2247_s1 + $0x1d] ss:$0 sm:$0xff] }
  0x3b   : > { %v733_v21 = vadd.f32 %v730_v2, %v712_v11  ;;  %v826_v32 = vrot.slane %v822_v20, 1  ;;  %v827_v33 = vrot.slane %v823_v22, 1  ;;  %v843_v34 = vmul.f32 %v1707_v10, %v834_v23  ;;  %v973_v10 = vld [vmem:[%s1945_s14 + $0x10] sm:$0xe]  ;;  %v1721_v11 = vld [vmem:[%s2247_s1 + $0x1e] ss:$0 sm:$0xff] }
  0x3c   : > { %v755_v27 = vadd.f32 %v750_v56, %v734_v16  ;;  %v864_v36 = vmul.f32 %v1709_v25, %v834_v23  ;;  %v865_v38 = vmul.f32 %v1709_v25, %v855_v29  ;;  %v876_v39 = vunpack.c.l.bf16 %v875_v26  ;;  %v994_v16 = vld [vmem:[%s1945_s14 + $0x14] sm:$0x7]  ;;  %v1723_v26 = vld [vmem:[%s2247_s1 + $0x1f] ss:$0 sm:$0xff] }
  0x3d   : > { %v754_v31 = vadd.f32 %v751_v12, %v733_v21  ;;  %v847_v42 = vrot.slane %v843_v34, 2  ;;  %v848_v43 = vrot.slane %v844_v24, 2  ;;  %v886_v44 = vmul.f32 %v1711_v30, %v855_v29 }
  0x3e   : > { %v776_v35 = vadd.f32 %v771_v6, %v755_v27  ;;  %v868_v47 = vrot.slane %v864_v36, 3  ;;  %v869_v48 = vrot.slane %v865_v38, 3  ;;  %v885_v1 = vmul.f32 %v1711_v30, %v876_v39  ;;  %v1015_v27 = vld [vmem:[%s1945_s14 + $0x10] sm:$0xc] }
  0x3f   : > { %v775_v41 = vadd.f32 %v772_v18, %v754_v31  ;;  %v890_v52 = vrot.slane %v886_v44, 4  ;;  %v897_v53 = vunpack.c.l.bf16 %v2099_v40  ;;  %v828_v55 = vsel %vm400_vm1, %v826_v32, %v827_v33  ;;  %v1725_v31 = vld [vmem:[%s2247_s1 + $0x20] ss:$0 sm:$0xff] }
  0x40   : > { %v797_v46 = vadd.f32 %v792_v8, %v776_v35  ;;  %v889_v56 = vrot.slane %v885_v1, 4  ;;  %v906_v57 = vmul.f32 %v1713_v45, %v876_v39  ;;  %v918_v61 = vunpack.c.l.bf16 %v917_v49 }
  0x41   : > { %v796_v51 = vadd.f32 %v793_v28, %v775_v41  ;;  %v907_v60 = vmul.f32 %v1713_v45, %v897_v53  ;;  %v928_v62 = vmul.f32 %v1715_v50, %v897_v53  ;;  %v849_v2 = vsel %vm422_vm2, %v847_v42, %v848_v43 }
  0x42   : > { %v811_v54 = vadd.f32 %v809_v19, %v797_v46  ;;  %v870_v37 = vsel %vm444_vm3, %v868_v47, %v869_v48  ;;  %v891_v3 = vsel %vm466_vm4, %v889_v56, %v890_v52  ;;  %v910_v7 = vrot.slane %v906_v57, 5  ;;  %v1727_v46 = vld [vmem:[%s2247_s1 + $0x21] ss:$0 sm:$0xff] }
  0x43   : > { %v810_v59 = vadd.f32 %v808_v13, %v796_v51  ;;  %v927_v8 = vmul.f32 %v1715_v50, %v918_v61  ;;  %v939_v9 = vunpack.c.l.bf16 %v938_v58  ;;  %v911_v13 = vrot.slane %v907_v60, 5  ;;  %v1057_v50 = vld [vmem:[%s1945_s14 + $0x10] sm:$0x8]  ;;  %v1729_v51 = vld [vmem:[%s2247_s1 + $0x22] ss:$0 sm:$0xff] }
  0x44   : > { %v832_v0 = vadd.f32 %v827_v33, %v811_v54  ;;  %v932_v14 = vrot.slane %v928_v62, 6  ;;  %v953_v15 = vunpack.c.l.bf16 %v952_v63  ;;  %v948_v20 = vmul.f32 %v1717_v4, %v897_v53 }
  0x45   : > { %v831_v6 = vadd.f32 %v828_v55, %v810_v59  ;;  %v931_v19 = vrot.slane %v927_v8, 6  ;;  %v962_v21 = vmul.f32 %v1719_v5, %v897_v53  ;;  %v974_v24 = vunpack.c.l.bf16 %v973_v10 }
  0x46   : > { %v853_v12 = vadd.f32 %v848_v43, %v832_v0  ;;  %v963_v23 = vmul.f32 %v1719_v5, %v953_v15  ;;  %v984_v25 = vmul.f32 %v1721_v11, %v953_v15  ;;  %v949_v28 = vmul.f32 %v1717_v4, %v939_v9  ;;  %v1078_v0 = vld [vmem:[%s1945_s14 + $0x18] sm:$0x1] }
  0x47   : > { %v852_v17 = vadd.f32 %v849_v2, %v831_v6  ;;  %v966_v29 = vrot.slane %v962_v21, 1  ;;  %v995_v30 = vunpack.c.l.bf16 %v994_v16  ;;  %v912_v33 = vsel %vm488_vm5, %v910_v7, %v911_v13  ;;  %v1092_v2 = vld [vmem:[%s1945_s14 + $0x18] sm:$0x3]  ;;  %v1113_v7 = vld [vmem:[%s1945_s14 + $0x14] sm:$0xe] }
  0x48   : > { %v874_v22 = vadd.f32 %v869_v48, %v853_v12  ;;  %v967_v34 = vrot.slane %v963_v23, 1  ;;  %v983_v35 = vmul.f32 %v1721_v11, %v974_v24  ;;  %v1004_v38 = vmul.f32 %v1723_v26, %v974_v24  ;;  %v1735_v12 = vld [vmem:[%s2247_s1 + $0x25] ss:$0 sm:$0xff]  ;;  %v1737_v24 = vld [vmem:[%s2247_s1 + $0x26] ss:$0 sm:$0xff] }
  0x49   : > { %v873_v18 = vadd.f32 %v870_v37, %v852_v17  ;;  %v1005_v39 = vmul.f32 %v1723_v26, %v995_v30  ;;  %v1016_v41 = vunpack.c.l.bf16 %v1015_v27  ;;  %v933_v43 = vsel %vm510_vm6, %v931_v19, %v932_v14  ;;  %v1731_v19 = vld [vmem:[%s2247_s1 + $0x23] ss:$0 sm:$0xff] }
  0x4a   : > { %v895_v32 = vadd.f32 %v890_v52, %v874_v22  ;;  %v988_v44 = vrot.slane %v984_v25, 2  ;;  %v1026_v45 = vmul.f32 %v1725_v31, %v995_v30  ;;  %v968_v48 = vsel %vm400_vm1, %v966_v29, %v967_v34  ;;  %v1155_v25 = vld [vmem:[%s1945_s14 + $0x14] sm:$0xc] }
  0x4b   : > { %v894_v36 = vadd.f32 %v891_v3, %v873_v18  ;;  %v987_v1 = vrot.slane %v983_v35, 2  ;;  %v1025_v49 = vmul.f32 %v1725_v31, %v1016_v41  ;;  %v1008_v53 = vrot.slane %v1004_v38, 3  ;;  %v1739_v38 = vld [vmem:[%s2247_s1 + $0x27] ss:$0 sm:$0xff] }
  0x4c   : > { %v916_v42 = vadd.f32 %v911_v13, %v895_v32  ;;  %v1009_v54 = vrot.slane %v1005_v39, 3  ;;  %v1037_v55 = vunpack.c.h.bf16 %v2099_v40  ;;  %v1030_v58 = vrot.slane %v1026_v45, 4  ;;  %v1733_v40 = vld [vmem:[%s2247_s1 + $0x24] ss:$0 sm:$0xff]  ;;  %v1134_v13 = vld [vmem:[%s1945_s14 + $0x18] sm:$0x7] }
  0x4d   : > { %v915_v47 = vadd.f32 %v912_v33, %v894_v36  ;;  %v1029_v57 = vrot.slane %v1025_v49, 4  ;;  %v1046_v59 = vmul.f32 %v1727_v46, %v1016_v41  ;;  %v1058_v62 = vunpack.c.l.bf16 %v1057_v50  ;;  %v2169_v39 = vld [vmem:[%s1945_s14 + $0x18] sm:$0xff]   ;;  %v1741_v45 = vld [vmem:[%s2247_s1 + $0x28] ss:$0 sm:$0xff]  ;;  %v1197_v49 = vld [vmem:[%s1945_s14 + $0x14] sm:$0x8] }
  0x4e   : > { %v937_v52 = vadd.f32 %v932_v14, %v916_v42  ;;  %v1047_v61 = vmul.f32 %v1727_v46, %v1037_v55  ;;  %v1068_v63 = vmul.f32 %v1729_v51, %v1037_v55  ;;  %v989_v4 = vsel %vm422_vm2, %v987_v1, %v988_v44 }
  0x4f   : > { %v936_v56 = vadd.f32 %v933_v43, %v915_v47  ;;  %v1010_v5 = vsel %vm444_vm3, %v1008_v53, %v1009_v54  ;;  %v1067_v6 = vmul.f32 %v1729_v51, %v1058_v62  ;;  %v1031_v9 = vsel %vm466_vm4, %v1029_v57, %v1030_v58  ;;  %v1234_v62 = vld [vmem:[%s1945_s14 + $0x1c] sm:$0x3] }
  0x50   : > { %v951_v60 = vadd.f32 %v949_v28, %v937_v52  ;;  %v1079_v10 = vunpack.c.l.bf16 %v1078_v0  ;;  %v1093_v11 = vunpack.c.l.bf16 %v1092_v2  ;;  %v1050_v15 = vrot.slane %v1046_v59, 5 }
  0x51   : > { %v950_v37 = vadd.f32 %v948_v20, %v936_v56  ;;  %v1051_v16 = vrot.slane %v1047_v61, 5  ;;  %v1072_v17 = vrot.slane %v1068_v63, 6  ;;  %v1071_v21 = vrot.slane %v1067_v6, 6  ;;  %v1218_v56 = vld [vmem:[%s1945_s14 + $0x18] sm:$0xf] }
  0x52   : > { %v972_v3 = vadd.f32 %v967_v34, %v951_v60  ;;  %v1102_v22 = vmul.f32 %v1733_v40, %v1037_v55  ;;  %v1114_v23 = vunpack.c.l.bf16 %v1113_v7  ;;  %v1103_v27 = vmul.f32 %v1733_v40, %v1093_v11  ;;  %v1743_v61 = vld [vmem:[%s2247_s1 + $0x29] ss:$0 sm:$0xff]  ;;  %v1219_v6 = vld [vmem:[%s1945_s14 + $0x1c] sm:$0x1]  ;;  %v1255_v7 = vld [vmem:[%s1945_s14 + $0x18] sm:$0xe] }
  0x53   : > { %v971_v8 = vadd.f32 %v968_v48, %v950_v37  ;;  %v1124_v18 = vmul.f32 %v1735_v12, %v1093_v11  ;;  %v1135_v28 = vunpack.c.l.bf16 %v1134_v13  ;;  %v1088_v30 = vmul.f32 %v1731_v19, %v1037_v55 }
  0x54   : > { %v993_v14 = vadd.f32 %v988_v44, %v972_v3  ;;  %v1089_v31 = vmul.f32 %v1731_v19, %v1079_v10  ;;  %v1123_v32 = vmul.f32 %v1735_v12, %v1114_v23  ;;  %v1052_v34 = vsel %vm488_vm5, %v1050_v15, %v1051_v16  ;;  %v1747_v12 = vld [vmem:[%s2247_s1 + $0x2b] ss:$0 sm:$0xff] }
  0x55   : > { %v992_v20 = vadd.f32 %v989_v4, %v971_v8  ;;  %v1144_v35 = vmul.f32 %v1737_v24, %v1114_v23  ;;  %v1156_v36 = vunpack.c.l.bf16 %v1155_v25  ;;  %v1073_v42 = vsel %vm510_vm6, %v1071_v21, %v1072_v17  ;;  %v1297_v23 = vld [vmem:[%s1945_s14 + $0x18] sm:$0xc] }
  0x56   : > { %v1014_v26 = vadd.f32 %v1009_v54, %v993_v14  ;;  %v1106_v43 = vrot.slane %v1102_v22, 1  ;;  %v1145_v44 = vmul.f32 %v1737_v24, %v1135_v28  ;;  %v1107_v47 = vrot.slane %v1103_v27, 1  ;;  %v1749_v22 = vld [vmem:[%s2247_s1 + $0x2c] ss:$0 sm:$0xff] }
  0x57   : > { %v1013_v29 = vadd.f32 %v1010_v5, %v992_v20  ;;  %v1127_v48 = vrot.slane %v1123_v32, 2  ;;  %v1128_v1 = vrot.slane %v1124_v18, 2  ;;  %v1165_v51 = vmul.f32 %v1739_v38, %v1156_v36  ;;  %v1751_v32 = vld [vmem:[%s2247_s1 + $0x2d] ss:$0 sm:$0xff] }
  0x58   : > { %v1035_v33 = vadd.f32 %v1030_v58, %v1014_v26  ;;  %v1166_v52 = vmul.f32 %v1739_v38, %v1135_v28  ;;  %v1177_v53 = vunpack.c.l.bf16 %v2169_v39  ;;  %v1148_v55 = vrot.slane %v1144_v35, 3  ;;  %v1745_v26 = vld [vmem:[%s2247_s1 + $0x2a] ss:$0 sm:$0xff] }
  0x59   : > { %v1034_v41 = vadd.f32 %v1031_v9, %v1013_v29  ;;  %v1149_v58 = vrot.slane %v1145_v44, 3  ;;  %v1186_v59 = vmul.f32 %v1741_v45, %v1156_v36  ;;  %v1198_v60 = vunpack.c.l.bf16 %v1197_v49  ;;  %v1753_v44 = vld [vmem:[%s2247_s1 + $0x2e] ss:$0 sm:$0xff] }
  0x5a   : > { %v1056_v46 = vadd.f32 %v1051_v16, %v1035_v33  ;;  %v1108_v0 = vsel %vm400_vm1, %v1106_v43, %v1107_v47  ;;  %v1129_v2 = vsel %vm422_vm2, %v1127_v48, %v1128_v1  ;;  %v1187_v37 = vmul.f32 %v1741_v45, %v1177_v53  ;;  %v1276_v16 = vld [vmem:[%s1945_s14 + $0x1c] sm:$0x7] }
  0x5b   : > { %v1055_v50 = vadd.f32 %v1052_v34, %v1034_v41  ;;  %v1169_v4 = vrot.slane %v1165_v51, 4  ;;  %v1170_v5 = vrot.slane %v1166_v52, 4  ;;  %v1220_v40 = vunpack.c.l.bf16 %v1218_v56 }
  0x5c   : > { %v1077_v54 = vadd.f32 %v1072_v17, %v1056_v46  ;;  %v1207_v9 = vmul.f32 %v1743_v61, %v1198_v60  ;;  %v1208_v10 = vmul.f32 %v1743_v61, %v1177_v53  ;;  %v1235_v11 = vunpack.c.l.bf16 %v1234_v62 }
  0x5d   : > { %v1076_v57 = vadd.f32 %v1073_v42, %v1055_v50  ;;  %v1150_v14 = vsel %vm444_vm3, %v1148_v55, %v1149_v58  ;;  %v1190_v15 = vrot.slane %v1186_v59, 5  ;;  %v1191_v19 = vrot.slane %v1187_v37, 5 }
  0x5e   : > { %v1091_v63 = vadd.f32 %v1089_v31, %v1077_v54  ;;  %v1221_v20 = vunpack.c.l.bf16 %v1219_v6  ;;  %v1256_v21 = vunpack.c.l.bf16 %v1255_v7  ;;  %v1171_v25 = vsel %vm466_vm4, %v1169_v4, %v1170_v5 }
  0x5f   : > { %v1090_v3 = vadd.f32 %v1088_v30, %v1076_v57  ;;  %v1244_v27 = vmul.f32 %v1747_v12, %v1220_v40  ;;  %v1245_v18 = vmul.f32 %v1747_v12, %v1235_v11  ;;  %v1211_v29 = vrot.slane %v1207_v9, 6  ;;  %v1755_v57 = vld [vmem:[%s2247_s1 + $0x2f] ss:$0 sm:$0xff] }
  0x60   : > { %v1112_v8 = vadd.f32 %v1107_v47, %v1091_v63  ;;  %v1212_v30 = vrot.slane %v1208_v10, 6  ;;  %v1277_v31 = vunpack.c.l.bf16 %v1276_v16  ;;  %v1265_v34 = vmul.f32 %v1749_v22, %v1256_v21 }
  0x61   : > { %v1111_v13 = vadd.f32 %v1108_v0, %v1090_v3  ;;  %v1266_v35 = vmul.f32 %v1749_v22, %v1235_v11  ;;  %v1298_v36 = vunpack.c.l.bf16 %v1297_v23  ;;  %v1192_v41 = vsel %vm488_vm5, %v1190_v15, %v1191_v19  ;;  %v1757_v0 = vld [vmem:[%s2247_s1 + $0x30] ss:$0 sm:$0xff] }
  0x62   : > { %v1133_v17 = vadd.f32 %v1128_v1, %v1112_v8  ;;  %v1230_v42 = vmul.f32 %v1745_v26, %v1220_v40  ;;  %v1231_v43 = vmul.f32 %v1745_v26, %v1221_v20  ;;  %v1248_v46 = vrot.slane %v1244_v27, 1  ;;  %v1339_v1 = vld [vmem:[%s1945_s14 + $0x18] sm:$0x8] }
  0x63   : > { %v1132_v24 = vadd.f32 %v1129_v2, %v1111_v13  ;;  %v1249_v47 = vrot.slane %v1245_v18, 1  ;;  %v1286_v48 = vmul.f32 %v1751_v32, %v1256_v21  ;;  %v1213_v50 = vsel %vm510_vm6, %v1211_v29, %v1212_v30  ;;  %v1758_v18 = vld [vmem:[%s2248_s2] ss:$0 sm:$0xff] }
  0x64   : > { %v1154_v28 = vadd.f32 %v1149_v58, %v1133_v17  ;;  %v1287_v51 = vmul.f32 %v1751_v32, %v1277_v31  ;;  %v1319_v52 = vunpack.c.h.bf16 %v2169_v39  ;;  %v1269_v54 = vrot.slane %v1265_v34, 2 }
  0x65   : > { %v1153_v33 = vadd.f32 %v1150_v14, %v1132_v24  ;;  %v1270_v55 = vrot.slane %v1266_v35, 2  ;;  %v1307_v56 = vmul.f32 %v1753_v44, %v1298_v36  ;;  %v1308_v59 = vmul.f32 %v1753_v44, %v1277_v31 }
  0x66   : > { %v1175_v38 = vadd.f32 %v1170_v5, %v1154_v28  ;;  %v1340_v60 = vunpack.c.l.bf16 %v1339_v1  ;;  %v1250_v62 = vsel %vm400_vm1, %v1248_v46, %v1249_v47  ;;  %v1290_v63 = vrot.slane %v1286_v48, 3 }
  0x67   : > { %v1174_v45 = vadd.f32 %v1171_v25, %v1153_v33  ;;  %v1291_v2 = vrot.slane %v1287_v51, 3  ;;  %v1328_v37 = vmul.f32 %v1755_v57, %v1298_v36  ;;  %v1329_v3 = vmul.f32 %v1755_v57, %v1319_v52 }
  0x68   : > { %v1196_v49 = vadd.f32 %v1191_v19, %v1175_v38  ;;  %v1271_v5 = vsel %vm422_vm2, %v1269_v54, %v1270_v55  ;;  %v1311_v6 = vrot.slane %v1307_v56, 4  ;;  %v1312_v7 = vrot.slane %v1308_v59, 4 }
  0x69   : > { %v1195_v53 = vadd.f32 %v1192_v41, %v1174_v45  ;;  %v1349_v8 = vmul.f32 %v1757_v0, %v1340_v60  ;;  %v1350_v9 = vmul.f32 %v1757_v0, %v1319_v52  ;;  %v1292_v12 = vsel %vm444_vm3, %v1290_v63, %v1291_v2  ;;  %v1769_v45 = vld [vmem:[%s2252_s6] ss:$0 sm:$0xff] }
  0x6a   : > { %v1217_v58 = vadd.f32 %v1212_v30, %v1196_v49  ;;  %v1332_v13 = vrot.slane %v1328_v37, 5  ;;  %v1333_v14 = vrot.slane %v1329_v3, 5  ;;  %v1313_v17 = vsel %vm466_vm4, %v1311_v6, %v1312_v7  ;;  %v1759_v30 = vld [vmem:[%s2249_s3] ss:$0 sm:$0xff] }
  0x6b   : > { %v1216_v61 = vadd.f32 %v1213_v50, %v1195_v53  ;;  %v1353_v19 = vrot.slane %v1349_v8, 6  ;;  %v1354_v20 = vrot.slane %v1350_v9, 6 }
  0x6c   : > { %v1233_v39 = vadd.f32 %v1231_v43, %v1217_v58  ;;  %v1334_v23 = vsel %vm488_vm5, %v1332_v13, %v1333_v14  ;;  %v1381_v43 = vld [vmem:[#allocation2 + $0x8] sm:$0x3] }
  0x6d   : > { %v1232_v4 = vadd.f32 %v1230_v42, %v1216_v61  ;;  %v1355_v26 = vsel %vm510_vm6, %v1353_v19, %v1354_v20  ;;  %v1768_v42 = vld [vmem:[%s2251_s5] ss:$0 sm:$0xff] }
  0x6e   : > { %v1254_v40 = vadd.f32 %v1249_v47, %v1233_v39 }
  0x6f   : > { %v1253_v10 = vadd.f32 %v1250_v62, %v1232_v4 }
  0x70   : > { %v1275_v11 = vadd.f32 %v1270_v55, %v1254_v40 }
  0x71   : > { %v1274_v15 = vadd.f32 %v1271_v5, %v1253_v10 }
  0x72   : > { %v1296_v16 = vadd.f32 %v1291_v2, %v1275_v11 }
  0x73   : > { %v1295_v21 = vadd.f32 %v1292_v12, %v1274_v15 }
  0x74   : > { %v1317_v22 = vadd.f32 %v1312_v7, %v1296_v16 }
  0x75   : > { %v1316_v24 = vadd.f32 %v1313_v17, %v1295_v21 }
  0x76   : > { %v1338_v25 = vadd.f32 %v1333_v14, %v1317_v22 }
  0x77   : > { %v1337_v27 = vadd.f32 %v1334_v23, %v1316_v24 }
  0x78   : > { %v1359_v28 = vadd.f32 %v1354_v20, %v1338_v25 }
  0x79   : > { %v1358_v29 = vadd.f32 %v1355_v26, %v1337_v27 }
  0x7a   : > { %v1368_v31 = vmul.f32 %v1758_v18, %v1359_v28 }
  0x7b   : > { %v1367_v32 = vmul.f32 %v1758_v18, %v1358_v29 }
  0x7c   : > { %v1377_v33 = vadd.f32 %v1759_v30, %v1368_v31 }
  0x7d   : > { %v1376_v34 = vadd.f32 %v1759_v30, %v1367_v32 }
  0x7e   : > { %v1379_v35 = vmax.f32 %v1377_v33, 0.0 }
  0x7f   : > { %v1378_v36 = vmax.f32 %v1376_v34, 0.0 }
  0x81   : > { %v1382_v38 = vpack.c.bf16 %v1379_v35, %v1378_v36 }
  0x83   : > { %1804 = vmatmul.mubr.bf16.vlgmr.msra.gmra.mrb[0].mxu0 %v1382_v38 }
 0x156   : > { %v1481_v41 = vpop.f32.mrb[0].mxu0 }
 0x157   : > { %v1805_v44 = vpop.f32.mrb[1].mxu0  ;;  %v1504_v47 = vmul.f32 %v1768_v42, %v1481_v41 }
 0x158   : > { %v1484_v46 = vpop.f32.mrb[2].mxu0 }
 0x159   : > { %v1489_v48 = vadd.f32 %v1484_v46, %v1381_v43  ;;  %v1806_v1 = vpop.f32.mrb[3].mxu0  ;;  %v1513_v49 = vadd.f32 %v1769_v45, %v1504_v47 }
 0x15b   : > { %1491 = vst [vmem:[#allocation2 + $0x8] sm:$0x3] %v1489_v48  ;;  %v1515_v50 = vmax.f32 %v1513_v49, 0.0 }
 0x15d   : > { %v1776_v51 = vpack.c.bf16 %v1515_v50, %v1515_v50 }
 0x15f   : > { %1525 = vst [vmem:[%s365_s29] sm:$0xf] %v1776_v51 }
 0x162   : > { %v1496_v52 = vld [vmem:[#allocation2 + $0x8] sm:$0x3] }
 0x163   : > { %v1505_v53 = vmul.f32 %v1768_v42, %v1496_v52 }
 0x165   : > { %v1514_v54 = vadd.f32 %v1769_v45, %v1505_v53 }
 0x167   : > { %v1516_v55 = vmax.f32 %v1514_v54, 0.0 }
 0x169   : > { %v1777_v56 = vpack.c.bf16 %v1516_v55, %v1516_v55 }
 0x16b   : > { %1526 = vst [vmem:[%s365_s29 + $0x4] sm:$0x1] %v1777_v56 }
 0x16c PF: > { %s17_s26 = sadd.s32 1, %s1863_s26   ;;  %s2254_s24 = smov %s1859_s25 }
 0x16d   : > { %p14_p5 = scmp.ge.s32.totalorder %s17_s26, 4   ;;  %s2255_s25 = smov %s2257_s27 }
 0x16f   :  { %16 = sbr.rel (!%p14_p5) target bundleno = 2 (0x2), region = 146 }

// kernel: cpm_forward.30
= control target key start
LH: loop header
LB: loop body
LE: loop exit
PB: predicated region body
PF: predicated region fallthrough
CT: control target
= control target key end

     0   :  { %s2748_s24 = smov 0   ;;  %s2750_s25 = smov 0   ;;  %s4126_s0 = inlined_call_operand.vmem [shape: bf16[2,64,256], index: 0, kind: input, shape index: {}]   ;;  %s4127_s1 = inlined_call_operand.vmem [shape: f32[49,1,256], index: 1, kind: input, shape index: {}]   ;;  %s4128_s2 = inlined_call_operand.vmem [shape: f32[1,256], index: 2, kind: input, shape index: {}]   ;;  %s4129_s3 = inlined_call_operand.vmem [shape: f32[1,256], index: 3, kind: input, shape index: {}]   ;;  %s4130_s4 = inlined_call_operand.vmem [shape: bf16[256,128], index: 4, kind: input, shape index: {}]   ;;  %s4131_s5 = inlined_call_operand.vmem [shape: f32[1,128], index: 5, kind: input, shape index: {}]   ;;  %s4132_s6 = inlined_call_operand.vmem [shape: f32[1,128], index: 6, kind: input, shape index: {}]   ;;  %s4133_s7 = inlined_call_operand.vmem [shape: bf16[2,10,128], index: 7, kind: output, shape index: {}]  }
   0x1   :  { %s2752_s26 = smov 0  }
   0x2 LB: > { %s29_s27 = sadd.s32 1, %s2701_s25  ;;  %p2541_p0 = scmp.ge.s32.totalorder %s2705_s26, 1  ;;  %s2705_s26 = sphi %s2752_s26, %s17_s26   ;;  %s2701_s25 = sphi %s2750_s25, %s4533_s25   ;;  %s2697_s24 = sphi %s2748_s24, %s4532_s24  }
   0x3   : > { %p31_p1 = scmp.ge.s32.totalorder %s29_s27, 2  ;;  %p297_p2 = scmp.lt.s32.totalorder %s2705_s26, 3 }
   0x5   : > { %s4535_s27 = smov (%p31_p1, %s29_s27), 0  ;;  %p298_p3 = pnand %p2541_p0, %p297_p2 }
   0x7   : > { %301 = sbr.rel (%p298_p3) target bundleno = 529 (0x211), region = 48 }
   0xe   : > { %v2667_v0 = vld [vmem:[%s4130_s4 + $0x40] sm:$0xff]   ;;  %v2669_v2 = vld [vmem:[%s4130_s4 + $0x48] sm:$0xff]   ;;  %p351_p4 = scmp.lt.s32.totalorder %s2697_s24, 1  ;;  %v2671_v4 = vld [vmem:[%s4130_s4 + $0x50] sm:$0xff]   ;;  %v401_v5 = vlaneseq  ;;  %vm439_vm0 = vcmask 1046528   ;;  %vm478_vm1 = vcmask 1045504  }
   0xf   : > { %v2668_v1 = vld [vmem:[%s4130_s4] sm:$0xff]   ;;  %2620 = vmatprep.subr.bf16.mxu0 %v2667_v0  ;;  %v2670_v3 = vld [vmem:[%s4130_s4 + $0x8] sm:$0xff]   ;;  %v2672_v6 = vld [vmem:[%s4130_s4 + $0x10] sm:$0xff]   ;;  %vm517_vm2 = vcmask 1044480   ;;  %vm556_vm3 = vcmask 1043456   ;;  %vm595_vm4 = vcmask 1042432  }
  0x10   : > { %2621 = vmatpush3.bf16.msra.mxu0 %v2668_v1  ;;  %s4537_s24 = smov (!%p351_p4, %s2697_s24), 1  ;;  %v2673_v7 = vld [vmem:[%s4130_s4 + $0x58] sm:$0xff]   ;;  %v402_v8 = vshrl.u32 %v401_v5, 7  ;;  %v2675_v10 = vld [vmem:[%s4130_s4 + $0x60] sm:$0xff]   ;;  %v2677_v13 = vld [vmem:[%s4130_s4 + $0x68] sm:$0xff]   ;;  %vm634_vm5 = vcmask 1041408  }
  0x11   : > { %2622 = vmatprep.subr.bf16.mxu0 %v2669_v2  ;;  %s2616_s19 = sshll.u32 %s4537_s24, 6  ;;  %v2674_v9 = vld [vmem:[%s4130_s4 + $0x18] sm:$0xff]   ;;  %v2676_v11 = vld [vmem:[%s4130_s4 + $0x20] sm:$0xff]   ;;  %v2678_v28 = vld [vmem:[%s4130_s4 + $0x28] sm:$0xff]  }
  0x12   : > { %s2799_s30 = scalar_lea.vmem %s4126_s0, %s2616_s19  ;;  %v2804_v12 = vsub.s32 0, %v402_v8  ;;  %v2809_v14 = vsub.s32 1, %v402_v8  ;;  %v399_v17 = vld [vmem:[%s4127_s1] sm:$0x3]  ;;  %v2546_v22 = vld [vmem:[%s4127_s1 + $0x2] sm:$0x3] }
  0x13   : > { %v2812_v15 = vld [vmem:[%s2799_s30] sm:$0xff]  ;;  %v2815_v16 = vld [vmem:[%s2799_s30 + $0x8] sm:$0x11]  ;;  %v2679_v34 = vld [vmem:[%s4130_s4 + $0x70] sm:$0xff]   ;;  %s2617_s19 = sshll.u32 %s4537_s24, 3 }
  0x14   : > { %2623 = vmatpush3.bf16.msra.mxu0 %v2670_v3  ;;  %4251 = vst [vmem:[#allocation3_spill] sm:$0xff] %v2804_v12  ;;  %v4134_v18 = vunpack.c.l.bf16 %v2812_v15  ;;  %v396_v19 = vunpack.c.h.bf16 %v2812_v15  ;;  %v398_v20 = vunpack.c.h.bf16 %v2815_v16  ;;  %v2824_v21 = vld [vmem:[%s2799_s30 + $0x8] sm:$0x33]  ;;  %v454_v23 = vld [vmem:[%s2799_s30] sm:$0xee]  ;;  %v408_v25 = vrot.slane %v399_v17, %v2809_v14  ;;  %v2680_v49 = vld [vmem:[%s4130_s4 + $0x30] sm:$0xff]   ;;  %s385_s22 = scalar_lea.vmem %s4133_s7, %s2617_s19 }
  0x15   : > { %2624 = vmatprep.subr.bf16.mxu0 %v2671_v4  ;;  %v417_v26 = vunpack.c.h.bf16 %v2824_v21  ;;  %v2547_v27 = vld [vmem:[%s4127_s1 + $0x4] sm:$0x3]  ;;  %v2840_v29 = vrot.slane %v2546_v22, %v2804_v12  ;;  %v428_v30 = vrot.slane %v2546_v22, %v2809_v14  ;;  %v455_v31 = vunpack.c.l.bf16 %v454_v23  ;;  %v2844_v33 = vld [vmem:[%s2799_s30 + $0x8] sm:$0x77]  ;;  %v2548_v39 = vld [vmem:[%s4127_s1 + $0x6] sm:$0x3] }
  0x16   : > { %v456_v32 = vunpack.c.h.bf16 %v454_v23  ;;  %v2850_v35 = vrot.slane %v399_v17, %v2804_v12  ;;  %v412_v36 = vmul.f32 %v408_v25, %v396_v19  ;;  %v2853_v37 = vrot.slane %v2547_v27, %v2804_v12  ;;  %v532_v48 = vld [vmem:[%s2799_s30] sm:$0xcc]  ;;  %v2681_v54 = vld [vmem:[%s4130_s4 + $0x78] sm:$0xff]   ;;  %v2549_v59 = vld [vmem:[%s4127_s1 + $0x8] sm:$0x3] }
  0x17   : > { %v467_v38 = vrot.slane %v2547_v27, %v2809_v14  ;;  %v414_v40 = vmul.f32 %v408_v25, %v398_v20  ;;  %v2862_v41 = vmul.f32 %v2840_v29, %v4134_v18  ;;  %v432_v42 = vmul.f32 %v428_v30, %v396_v19  ;;  %v571_v4 = vld [vmem:[%s2799_s30 + $0x8] sm:$0xff] }
  0x18   : > { %2625 = vmatpush3.bf16.msra.mxu0 %v2672_v6  ;;  %v434_v43 = vmul.f32 %v428_v30, %v417_v26  ;;  %v2865_v44 = vmul.f32 %v2853_v37, %v455_v31  ;;  %v495_v47 = vunpack.c.h.bf16 %v2844_v33  ;;  %v2874_v53 = vrot.slane %v2548_v39, %v2804_v12  ;;  %v2550_v5 = vld [vmem:[%s4127_s1 + $0xa] sm:$0x3]  ;;  %v2682_v6 = vld [vmem:[%s4130_s4 + $0x38] sm:$0xff]  }
  0x19   : > { %2626 = vmatprep.subr.bf16.mxu0 %v2673_v7  ;;  %v471_v45 = vmul.f32 %v467_v38, %v456_v32  ;;  %v473_v46 = vmul.f32 %v467_v38, %v417_v26  ;;  %v443_v51 = vrot.slane %v432_v42, 1  ;;  %v506_v58 = vrot.slane %v2548_v39, %v2809_v14  ;;  %v610_v26 = vld [vmem:[%s2799_s30] sm:$0x88] }
  0x1a   : > { %v444_v52 = vrot.slane %v434_v43, 1  ;;  %v2886_v62 = vmul.f32 %v2874_v53, %v455_v31  ;;  %v533_v63 = vunpack.c.l.bf16 %v532_v48  ;;  %v545_v19 = vrot.slane %v2549_v59, %v2809_v14 }
  0x1b   : > { %v482_v55 = vrot.slane %v471_v45, 2  ;;  %v483_v56 = vrot.slane %v473_v46, 2  ;;  %v510_v2 = vmul.f32 %v506_v58, %v456_v32  ;;  %v512_v3 = vmul.f32 %v506_v58, %v495_v47  ;;  %v2551_v32 = vld [vmem:[%s4127_s1 + $0xc] sm:$0x3]  ;;  %v2552_v58 = vld [vmem:[%s4127_s1 + $0xe] sm:$0x3] }
  0x1c   : > { %2627 = vmatpush3.bf16.msra.mxu0 %v2674_v9  ;;  %v445_v60 = vsel %vm439_vm0, %v443_v51, %v444_v52  ;;  %v453_v61 = vadd.f32 %v444_v52, %v414_v40  ;;  %v534_v9 = vunpack.c.h.bf16 %v532_v48  ;;  %v573_v23 = vunpack.c.h.bf16 %v571_v4  ;;  %v2924_v51 = vld [vmem:[%s2799_s30 + $0x10] sm:$0x11] }
  0x1d   : > { %2628 = vmatprep.subr.bf16.mxu0 %v2675_v10  ;;  %v451_v0 = vadd.f32 %v445_v60, %v412_v36  ;;  %v484_v1 = vsel %vm478_vm1, %v482_v55, %v483_v56  ;;  %v2898_v10 = vrot.slane %v2549_v59, %v2804_v12  ;;  %v522_v17 = vrot.slane %v512_v3, 3 }
  0x1e   : > { %v492_v8 = vadd.f32 %v483_v56, %v453_v61  ;;  %v2906_v25 = vrot.slane %v2550_v5, %v2804_v12  ;;  %v549_v30 = vmul.f32 %v545_v19, %v534_v9  ;;  %v551_v31 = vmul.f32 %v545_v19, %v495_v47 }
  0x1f   : > { %v2903_v22 = vmul.f32 %v2898_v10, %v533_v63  ;;  %v584_v38 = vrot.slane %v2550_v5, %v2809_v14  ;;  %v611_v43 = vunpack.c.l.bf16 %v610_v26  ;;  %v612_v45 = vunpack.c.h.bf16 %v610_v26  ;;  %v2553_v5 = vld [vmem:[%s4127_s1 + $0x10] sm:$0x3] }
  0x20   : > { %2629 = vmatpush3.bf16.msra.mxu0 %v2676_v11  ;;  %v490_v11 = vadd.f32 %v484_v1, %v451_v0  ;;  %v2916_v39 = vmul.f32 %v2906_v25, %v533_v63  ;;  %v560_v40 = vrot.slane %v549_v30, 4  ;;  %v561_v42 = vrot.slane %v551_v31, 4 }
  0x21   : > { %2630 = vmatprep.subr.bf16.mxu0 %v2677_v13  ;;  %v521_v13 = vrot.slane %v510_v2, 3  ;;  %v2918_v46 = vunpack.c.l.bf16 %v571_v4  ;;  %v588_v47 = vmul.f32 %v584_v38, %v534_v9  ;;  %v590_v48 = vmul.f32 %v584_v38, %v573_v23  ;;  %v2938_v4 = vld [vmem:[%s2799_s30 + $0x10] sm:$0x33] }
  0x22   : > { %v623_v56 = vrot.slane %v2551_v32, %v2809_v14  ;;  %v651_v3 = vunpack.c.h.bf16 %v2924_v51 }
  0x23   : > { %v523_v27 = vsel %vm517_vm2, %v521_v13, %v522_v17  ;;  %v599_v60 = vrot.slane %v588_v47, 5  ;;  %v600_v61 = vrot.slane %v590_v48, 5  ;;  %v711_v13 = vld [vmem:[%s2799_s30 + $0x8] sm:$0xee] }
  0x24   : > { %2631 = vmatpush3.bf16.msra.mxu0 %v2678_v28  ;;  %v531_v28 = vadd.f32 %v522_v17, %v492_v8  ;;  %v529_v36 = vadd.f32 %v523_v27, %v490_v11  ;;  %v627_v1 = vmul.f32 %v623_v56, %v612_v45  ;;  %v629_v2 = vmul.f32 %v623_v56, %v573_v23 }
  0x25   : > { %2632 = vmatprep.subr.bf16.mxu0 %v2679_v34  ;;  %v662_v11 = vrot.slane %v2552_v58, %v2809_v14  ;;  %v2948_v27 = vrot.slane %v2552_v58, %v2804_v12  ;;  %v713_v48 = vunpack.c.h.bf16 %v711_v13  ;;  %v963_v34 = vld [vmem:[%s2799_s30 + $0x10] sm:$0xee] }
  0x26   : > { %v570_v55 = vadd.f32 %v561_v42, %v531_v28  ;;  %v638_v19 = vrot.slane %v627_v1, 6  ;;  %v639_v26 = vrot.slane %v629_v2, 6  ;;  %v2554_v28 = vld [vmem:[%s4127_s1 + $0x12] sm:$0x3]  ;;  %v3039_v1 = vld [vmem:[%s2799_s30 + $0x18] sm:$0x33] }
  0x27   : > { %v666_v30 = vmul.f32 %v662_v11, %v573_v23  ;;  %v668_v31 = vmul.f32 %v662_v11, %v651_v3  ;;  %4254 = vst [vmem:[#allocation6_spill] sm:$0xff] %v3039_v1  ;;  %v927_v57 = vunpack.c.h.bf16 %v3039_v1  ;;  %v3126_v1 = vld [vmem:[%s2799_s30 + $0x20] sm:$0x11] }
  0x28   : > { %2633 = vmatpush3.bf16.msra.mxu0 %v2680_v49  ;;  %v2921_v49 = vrot.slane %v2551_v32, %v2804_v12  ;;  %v609_v8 = vadd.f32 %v600_v61, %v570_v55  ;;  %v675_v32 = vunpack.c.h.bf16 %v2938_v4  ;;  %v640_v38 = vsel %vm634_vm5, %v638_v19, %v639_v26  ;;  %4269 = vst [vmem:[#allocation21_spill] sm:$0xff] %v3126_v1 }
  0x29   : > { %2634 = vmatprep.subr.bf16.mxu0 %v2681_v54  ;;  %v562_v54 = vsel %vm556_vm3, %v560_v40, %v561_v42  ;;  %v686_v42 = vrot.slane %v2553_v5, %v2809_v14 }
  0x2a   : > { %v568_v59 = vadd.f32 %v562_v54, %v529_v36  ;;  %v2933_v63 = vmul.f32 %v2921_v49, %v611_v43  ;;  %v2955_v36 = vrot.slane %v2553_v5, %v2804_v12  ;;  %v648_v40 = vadd.f32 %v639_v26, %v609_v8 }
  0x2b   : > { %v712_v43 = vunpack.c.l.bf16 %v711_v13  ;;  %v2964_v54 = vrot.slane %v2554_v28, %v2804_v12  ;;  %v690_v56 = vmul.f32 %v686_v42, %v573_v23  ;;  %v692_v58 = vmul.f32 %v686_v42, %v675_v32 }
  0x2c   : > { %2635 = vmatpush3.bf16.msra.mxu0 %v2682_v6  ;;  %v601_v6 = vsel %vm595_vm4, %v599_v60, %v600_v61  ;;  %v2961_v47 = vmul.f32 %v2955_v36, %v2918_v46  ;;  %v672_v55 = vadd.f32 %v668_v31, %v648_v40  ;;  %v2968_v60 = vld [vmem:[%s2799_s30 + $0x10] sm:$0x77] }
  0x2d   : > { %v607_v17 = vadd.f32 %v601_v6, %v568_v59  ;;  %v724_v59 = vrot.slane %v2554_v28, %v2809_v14  ;;  %v2555_v61 = vld [vmem:[%s4127_s1 + $0x14] sm:$0x3]  ;;  %v2976_v5 = vmul.f32 %v2964_v54, %v712_v43  ;;  %v700_v6 = vrot.slane %v690_v56, 1  ;;  %v787_v28 = vld [vmem:[%s2799_s30 + $0x8] sm:$0xcc] }
  0x2e   : > { %v701_v23 = vrot.slane %v692_v58, 1  ;;  %v2981_v19 = vrot.slane %v2555_v61, %v2804_v12  ;;  %v762_v26 = vrot.slane %v2555_v61, %v2809_v14  ;;  %v2556_v58 = vld [vmem:[%s4127_s1 + $0x16] sm:$0x3]  ;;  %v788_v3 = vunpack.c.l.bf16 %v787_v28 }
  0x2f   : > { %v646_v45 = vadd.f32 %v640_v38, %v607_v17  ;;  %v728_v8 = vmul.f32 %v724_v59, %v713_v48  ;;  %v730_v11 = vmul.f32 %v724_v59, %v675_v32  ;;  %v751_v17 = vunpack.c.h.bf16 %v2968_v60  ;;  %v825_v59 = vld [vmem:[%s2799_s30 + $0x10] sm:$0xff] }
  0x30   : > { %v710_v31 = vadd.f32 %v701_v23, %v672_v55  ;;  %v766_v32 = vmul.f32 %v762_v26, %v713_v48  ;;  %v2557_v55 = vld [vmem:[%s4127_s1 + $0x18] sm:$0x3]  ;;  %v3022_v0 = vunpack.c.l.bf16 %v825_v59 }
  0x31   : > { %v670_v2 = vadd.f32 %v666_v30, %v646_v45  ;;  %v702_v30 = vsel %vm439_vm0, %v700_v6, %v701_v23  ;;  %v738_v38 = vrot.slane %v728_v8, 2  ;;  %v739_v40 = vrot.slane %v730_v11, 2 }
  0x32   : > { %v2987_v45 = vmul.f32 %v2981_v19, %v712_v43  ;;  %v768_v56 = vmul.f32 %v762_v26, %v751_v17  ;;  %v789_v6 = vunpack.c.h.bf16 %v787_v28  ;;  %v776_v48 = vrot.slane %v766_v32, 3 }
  0x33   : > { %v708_v42 = vadd.f32 %v702_v30, %v670_v2  ;;  %v740_v61 = vsel %vm478_vm1, %v738_v38, %v739_v40  ;;  %v748_v13 = vadd.f32 %v739_v40, %v710_v31  ;;  %v3000_v11 = vrot.slane %v2556_v58, %v2804_v12  ;;  %v863_v31 = vld [vmem:[%s2799_s30 + $0x8] sm:$0x88] }
  0x34   : > { %v777_v23 = vrot.slane %v768_v56, 3  ;;  %v800_v26 = vrot.slane %v2556_v58, %v2809_v14  ;;  %v827_v30 = vunpack.c.h.bf16 %v825_v59  ;;  %v3006_v40 = vrot.slane %v2557_v55, %v2804_v12  ;;  %v2558_v58 = vld [vmem:[%s4127_s1 + $0x1a] sm:$0x3] }
  0x35   : > { %v746_v2 = vadd.f32 %v740_v61, %v708_v42  ;;  %v838_v42 = vrot.slane %v2557_v55, %v2809_v14  ;;  %v3010_v56 = vmul.f32 %v3000_v11, %v788_v3  ;;  %v3025_v52 = vrot.slane %v2558_v58, %v2804_v12 }
  0x36   : > { %v778_v28 = vsel %vm517_vm2, %v776_v48, %v777_v23  ;;  %v786_v38 = vadd.f32 %v777_v23, %v748_v13  ;;  %v804_v61 = vmul.f32 %v800_v26, %v789_v6  ;;  %v806_v8 = vmul.f32 %v800_v26, %v751_v17 }
  0x37   : > { %v784_v32 = vadd.f32 %v778_v28, %v746_v2  ;;  %v3016_v43 = vmul.f32 %v3006_v40, %v788_v3  ;;  %v842_v13 = vmul.f32 %v838_v42, %v789_v6  ;;  %v844_v48 = vmul.f32 %v838_v42, %v827_v30  ;;  %v3020_v28 = vld [vmem:[%s2799_s30 + $0x18] sm:$0x11] }
  0x38   : > { %v864_v23 = vunpack.c.l.bf16 %v863_v31  ;;  %v814_v9 = vrot.slane %v804_v61, 4  ;;  %v815_v55 = vrot.slane %v806_v8, 4  ;;  %v865_v2 = vunpack.c.h.bf16 %v863_v31  ;;  %4252 = vst [vmem:[#allocation4_spill] sm:$0xff] %v3020_v28  ;;  %v2559_v8 = vld [vmem:[%s4127_s1 + $0x1c] sm:$0x3] }
  0x39   : > { %v852_v17 = vrot.slane %v842_v13, 5  ;;  %v853_v26 = vrot.slane %v844_v48, 5  ;;  %v876_v61 = vrot.slane %v2558_v58, %v2809_v14  ;;  %v903_v48 = vunpack.c.h.bf16 %v3020_v28  ;;  %v3068_v28 = vld [vmem:[%s2799_s30 + $0x18] sm:$0x77] }
  0x3a   : > { %v816_v6 = vsel %vm556_vm3, %v814_v9, %v815_v55  ;;  %v824_v42 = vadd.f32 %v815_v55, %v786_v38  ;;  %v3035_v13 = vmul.f32 %v3025_v52, %v864_v23  ;;  %v2560_v9 = vld [vmem:[%s4127_s1 + $0x1e] sm:$0x3]  ;;  %v3048_v23 = vrot.slane %v2559_v8, %v2804_v12  ;;  %4259 = vst [vmem:[#allocation11_spill] sm:$0xff] %v3068_v28 }
  0x3b   : > { %v822_v31 = vadd.f32 %v816_v6, %v784_v32  ;;  %v854_v59 = vsel %vm595_vm4, %v852_v17, %v853_v26  ;;  %v880_v55 = vmul.f32 %v876_v61, %v865_v2  ;;  %v882_v3 = vmul.f32 %v876_v61, %v827_v30  ;;  %v2561_v2 = vld [vmem:[%s4127_s1 + $0x20] sm:$0x3] }
  0x3c   : > { %4253 = vst [vmem:[#allocation5_spill] sm:$0xff] %v3035_v13  ;;  %v862_v58 = vadd.f32 %v853_v26, %v824_v42  ;;  %4255 = vst [vmem:[#allocation7_spill] sm:$0xff] %v3048_v23  ;;  %v914_v6 = vrot.slane %v2559_v8, %v2809_v14  ;;  %v3053_v50 = vrot.slane %v2560_v9, %v2804_v12 }
  0x3d   : > { %v860_v32 = vadd.f32 %v854_v59, %v822_v31  ;;  %v890_v20 = vrot.slane %v880_v55, 6  ;;  %v891_v7 = vrot.slane %v882_v3, 6  ;;  %v938_v61 = vrot.slane %v2560_v9, %v2809_v14 }
  0x3e   : > { %4256 = vst [vmem:[#allocation8_spill] sm:$0xff] %v3053_v50  ;;  %v918_v26 = vmul.f32 %v914_v6, %v827_v30  ;;  %v920_v42 = vmul.f32 %v914_v6, %v903_v48  ;;  %v964_v31 = vunpack.c.l.bf16 %v963_v34  ;;  %v3062_v3 = vmul.f32 %v3053_v50, %v3022_v0  ;;  %v2562_v48 = vld [vmem:[%s4127_s1 + $0x22] sm:$0x3] }
  0x3f   : > { %v892_v59 = vsel %vm634_vm5, %v890_v20, %v891_v7  ;;  %v900_v8 = vadd.f32 %v891_v7, %v862_v58  ;;  %v965_v55 = vunpack.c.h.bf16 %v963_v34  ;;  %v942_v38 = vmul.f32 %v938_v61, %v827_v30  ;;  %v1039_v7 = vld [vmem:[%s2799_s30 + $0x10] sm:$0xcc] }
  0x40   : > { %4257 = vst [vmem:[#allocation9_spill] sm:$0xff] %v3062_v3  ;;  %v898_v17 = vadd.f32 %v892_v59, %v860_v32  ;;  %v944_v24 = vmul.f32 %v938_v61, %v927_v57  ;;  %v3065_v18 = vrot.slane %v2561_v2, %v2804_v12  ;;  %v976_v34 = vrot.slane %v2561_v2, %v2809_v14  ;;  %v1077_v3 = vld [vmem:[%s2799_s30 + $0x18] sm:$0xff] }
  0x41   : > { %v924_v20 = vadd.f32 %v920_v42, %v900_v8  ;;  %v952_v30 = vrot.slane %v942_v38, 1  ;;  %v1003_v50 = vunpack.c.h.bf16 %v3068_v28  ;;  %v3081_v23 = vrot.slane %v2562_v48, %v2804_v12 }
  0x42   : > { %4258 = vst [vmem:[#allocation10_spill] sm:$0xff] %v3065_v18  ;;  %v922_v58 = vadd.f32 %v918_v26, %v898_v17  ;;  %v953_v32 = vrot.slane %v944_v24, 1  ;;  %v3077_v6 = vmul.f32 %v3065_v18, %v964_v31  ;;  %v980_v61 = vmul.f32 %v976_v34, %v965_v55  ;;  %v2563_v24 = vld [vmem:[%s4127_s1 + $0x24] sm:$0x3] }
  0x43   : > { %v982_v59 = vmul.f32 %v976_v34, %v927_v57  ;;  %4261 = vst [vmem:[#allocation13_spill] sm:$0xff] %v3081_v23  ;;  %v1014_v38 = vrot.slane %v2562_v48, %v2809_v14  ;;  %v3091_v34 = vmul.f32 %v3081_v23, %v964_v31  ;;  %v1040_v18 = vunpack.c.l.bf16 %v1039_v7  ;;  %v2564_v48 = vld [vmem:[%s4127_s1 + $0x26] sm:$0x3] }
  0x44   : > { %4260 = vst [vmem:[#allocation12_spill] sm:$0xff] %v3077_v6  ;;  %v954_v8 = vsel %vm439_vm0, %v952_v30, %v953_v32  ;;  %v962_v2 = vadd.f32 %v953_v32, %v924_v20  ;;  %v990_v57 = vrot.slane %v980_v61, 2  ;;  %v1041_v42 = vunpack.c.h.bf16 %v1039_v7 }
  0x45   : > { %v960_v17 = vadd.f32 %v954_v8, %v922_v58  ;;  %v991_v26 = vrot.slane %v982_v59, 2  ;;  %4262 = vst [vmem:[#allocation14_spill] sm:$0xff] %v3091_v34  ;;  %v1018_v9 = vmul.f32 %v1014_v38, %v965_v55  ;;  %v1020_v13 = vmul.f32 %v1014_v38, %v1003_v50 }
  0x46   : > { %v3100_v32 = vrot.slane %v2563_v24, %v2804_v12  ;;  %v1052_v59 = vrot.slane %v2563_v24, %v2809_v14  ;;  %v1079_v38 = vunpack.c.h.bf16 %v1077_v3  ;;  %v3108_v23 = vrot.slane %v2564_v48, %v2804_v12 }
  0x47   : > { %v992_v20 = vsel %vm478_vm1, %v990_v57, %v991_v26  ;;  %v1000_v30 = vadd.f32 %v991_v26, %v962_v2  ;;  %v1028_v61 = vrot.slane %v1018_v9, 3  ;;  %v1029_v55 = vrot.slane %v1020_v13, 3  ;;  %v1115_v2 = vld [vmem:[%s2799_s30 + $0x10] sm:$0x88]  ;;  %v2565_v13 = vld [vmem:[%s4127_s1 + $0x28] sm:$0x3] }
  0x48   : > { %4263 = vst [vmem:[#allocation15_spill] sm:$0xff] %v3100_v32  ;;  %v998_v31 = vadd.f32 %v992_v20, %v960_v17  ;;  %v3105_v8 = vmul.f32 %v3100_v32, %v1040_v18  ;;  %4265 = vst [vmem:[#allocation17_spill] sm:$0xff] %v3108_v23  ;;  %v1056_v58 = vmul.f32 %v1052_v59, %v1041_v42  ;;  %v1116_v28 = vunpack.c.l.bf16 %v1115_v2 }
  0x49   : > { %v1030_v57 = vsel %vm517_vm2, %v1028_v61, %v1029_v55  ;;  %v1038_v26 = vadd.f32 %v1029_v55, %v1000_v30  ;;  %v1058_v17 = vmul.f32 %v1052_v59, %v1003_v50  ;;  %v1090_v20 = vrot.slane %v2564_v48, %v2809_v14 }
  0x4a   : > { %4264 = vst [vmem:[#allocation16_spill] sm:$0xff] %v3105_v8  ;;  %v1036_v24 = vadd.f32 %v1030_v57, %v998_v31  ;;  %v3118_v7 = vmul.f32 %v3108_v23, %v1040_v18  ;;  %v1066_v6 = vrot.slane %v1056_v58, 4  ;;  %v1117_v61 = vunpack.c.h.bf16 %v1115_v2 }
  0x4b   : > { %v1067_v32 = vrot.slane %v1058_v17, 4  ;;  %v3120_v30 = vunpack.c.l.bf16 %v1077_v3  ;;  %v1094_v55 = vmul.f32 %v1090_v20, %v1041_v42  ;;  %v1096_v50 = vmul.f32 %v1090_v20, %v1079_v38  ;;  %v2566_v3 = vld [vmem:[%s4127_s1 + $0x2a] sm:$0x3] }
  0x4c   : > { %4266 = vst [vmem:[#allocation18_spill] sm:$0xff] %v3118_v7  ;;  %v3123_v59 = vrot.slane %v2565_v13, %v2804_v12  ;;  %v1128_v58 = vrot.slane %v2565_v13, %v2809_v14  ;;  %v2568_v7 = vld [vmem:[%s4127_s1 + $0x2e] sm:$0x3] }
  0x4d   : > { %4267 = vst [vmem:[#allocation19_spill] sm:$0xff] %v3120_v30  ;;  %v1068_v48 = vsel %vm556_vm3, %v1066_v6, %v1067_v32  ;;  %v1076_v18 = vadd.f32 %v1067_v32, %v1038_v26  ;;  %v1104_v2 = vrot.slane %v1094_v55, 5  ;;  %v1105_v57 = vrot.slane %v1096_v50, 5  ;;  %v3140_v32 = vld [vmem:[%s2799_s30 + $0x20] sm:$0x33] }
  0x4e   : > { %4268 = vst [vmem:[#allocation20_spill] sm:$0xff] %v3123_v59  ;;  %v1074_v42 = vadd.f32 %v1068_v48, %v1036_v24  ;;  %v3135_v17 = vmul.f32 %v3123_v59, %v1116_v28  ;;  %v1132_v9 = vmul.f32 %v1128_v58, %v1117_v61  ;;  %v1134_v31 = vmul.f32 %v1128_v58, %v1079_v38  ;;  %v2567_v26 = vld [vmem:[%s4127_s1 + $0x2c] sm:$0x3]  ;;  %v1215_v50 = vld [vmem:[%s2799_s30 + $0x18] sm:$0xee] }
  0x4f   : > { %v1155_v6 = vunpack.c.h.bf16 %v3126_v1  ;;  %4271 = vst [vmem:[#allocation23_spill] sm:$0xff] %v3140_v32  ;;  %v1106_v13 = vsel %vm595_vm4, %v1104_v2, %v1105_v57  ;;  %v1114_v24 = vadd.f32 %v1105_v57, %v1076_v18  ;;  %v1166_v28 = vrot.slane %v2566_v3, %v2809_v14 }
  0x50   : > { %4270 = vst [vmem:[#allocation22_spill] sm:$0xff] %v3135_v17  ;;  %v1112_v48 = vadd.f32 %v1106_v13, %v1074_v42  ;;  %v1142_v20 = vrot.slane %v1132_v9, 6  ;;  %v1143_v61 = vrot.slane %v1134_v31, 6  ;;  %v3150_v58 = vrot.slane %v2566_v3, %v2804_v12 }
  0x51   : > { %v1170_v8 = vmul.f32 %v1166_v28, %v1079_v38  ;;  %v1172_v34 = vmul.f32 %v1166_v28, %v1155_v6  ;;  %v1179_v18 = vunpack.c.h.bf16 %v3140_v32  ;;  %v3157_v2 = vrot.slane %v2567_v26, %v2804_v12 }
  0x52   : > { %4272 = vst [vmem:[#allocation24_spill] sm:$0xff] %v3150_v58  ;;  %v1144_v57 = vsel %vm634_vm5, %v1142_v20, %v1143_v61  ;;  %v1152_v42 = vadd.f32 %v1143_v61, %v1114_v24  ;;  %v1190_v9 = vrot.slane %v2567_v26, %v2809_v14  ;;  %v1216_v31 = vunpack.c.l.bf16 %v1215_v50  ;;  %v3170_v20 = vld [vmem:[%s2799_s30 + $0x20] sm:$0x77]  ;;  %v2569_v26 = vld [vmem:[%s4127_s1 + $0x30] sm:$0x3] }
  0x53   : > { %4273 = vst [vmem:[#allocation25_spill] sm:$0xff] %v3157_v2  ;;  %v1150_v3 = vadd.f32 %v1144_v57, %v1112_v48  ;;  %v3163_v13 = vmul.f32 %v3157_v2, %v3120_v30  ;;  %v1217_v55 = vunpack.c.h.bf16 %v1215_v50  ;;  %v3166_v1 = vrot.slane %v2568_v7, %v2804_v12  ;;  %4276 = vst [vmem:[#allocation28_spill] sm:$0xff] %v3170_v20 }
  0x54   : > { %v1176_v6 = vadd.f32 %v1172_v34, %v1152_v42  ;;  %v1194_v28 = vmul.f32 %v1190_v9, %v1079_v38  ;;  %v1196_v58 = vmul.f32 %v1190_v9, %v1179_v18  ;;  %v1228_v59 = vrot.slane %v2568_v7, %v2809_v14  ;;  %v2570_v7 = vld [vmem:[%s4127_s1 + $0x32] sm:$0x3] }
  0x55   : > { %4274 = vst [vmem:[#allocation26_spill] sm:$0xff] %v3163_v13  ;;  %4275 = vst [vmem:[#allocation27_spill] sm:$0xff] %v3166_v1  ;;  %v1174_v48 = vadd.f32 %v1170_v8, %v1150_v3  ;;  %v3178_v61 = vmul.f32 %v3166_v1, %v1216_v31  ;;  %v1255_v9 = vunpack.c.h.bf16 %v3170_v20  ;;  %v3183_v2 = vrot.slane %v2569_v26, %v2804_v12  ;;  %v1291_v8 = vld [vmem:[%s2799_s30 + $0x18] sm:$0xcc]  ;;  %v1329_v13 = vld [vmem:[%s2799_s30 + $0x20] sm:$0xff] }
  0x56   : > { %v1204_v34 = vrot.slane %v1194_v28, 1  ;;  %v1205_v38 = vrot.slane %v1196_v58, 1  ;;  %v1232_v57 = vmul.f32 %v1228_v59, %v1217_v55  ;;  %v1234_v42 = vmul.f32 %v1228_v59, %v1179_v18 }
  0x57   : > { %4277 = vst [vmem:[#allocation29_spill] sm:$0xff] %v3178_v61  ;;  %4278 = vst [vmem:[#allocation30_spill] sm:$0xff] %v3183_v2  ;;  %v1266_v24 = vrot.slane %v2569_v26, %v2809_v14  ;;  %v3189_v58 = vmul.f32 %v3183_v2, %v1216_v31  ;;  %v1292_v23 = vunpack.c.l.bf16 %v1291_v8  ;;  %v3241_v61 = vld [vmem:[%s2799_s30 + $0x28] sm:$0x33] }
  0x58   : > { %v1206_v3 = vsel %vm439_vm0, %v1204_v34, %v1205_v38  ;;  %v1214_v50 = vadd.f32 %v1205_v38, %v1176_v6  ;;  %v1242_v1 = vrot.slane %v1232_v57, 2  ;;  %v1243_v32 = vrot.slane %v1234_v42, 2  ;;  %v2571_v6 = vld [vmem:[%s4127_s1 + $0x34] sm:$0x3]  ;;  %4288 = vst [vmem:[#allocation40_spill] sm:$0xff] %v3241_v61 }
  0x59   : > { %v1212_v28 = vadd.f32 %v1206_v3, %v1174_v48  ;;  %4279 = vst [vmem:[#allocation31_spill] sm:$0xff] %v3189_v58  ;;  %v1270_v59 = vmul.f32 %v1266_v24, %v1217_v55  ;;  %v1272_v18 = vmul.f32 %v1266_v24, %v1255_v9  ;;  %v1293_v34 = vunpack.c.h.bf16 %v1291_v8 }
  0x5a   : > { %v1244_v26 = vsel %vm478_vm1, %v1242_v1, %v1243_v32  ;;  %v1252_v17 = vadd.f32 %v1243_v32, %v1214_v50  ;;  %v3202_v57 = vrot.slane %v2570_v7, %v2804_v12  ;;  %v1304_v42 = vrot.slane %v2570_v7, %v2809_v14  ;;  %v1367_v32 = vld [vmem:[%s2799_s30 + $0x18] sm:$0x88]  ;;  %v2572_v7 = vld [vmem:[%s4127_s1 + $0x36] sm:$0x3] }
  0x5b   : > { %v1250_v48 = vadd.f32 %v1244_v26, %v1212_v28  ;;  %v1280_v55 = vrot.slane %v1270_v59, 3  ;;  %v1281_v24 = vrot.slane %v1272_v18, 3  ;;  %v1331_v1 = vunpack.c.h.bf16 %v1329_v13 }
  0x5c   : > { %4280 = vst [vmem:[#allocation32_spill] sm:$0xff] %v3202_v57  ;;  %v3208_v3 = vrot.slane %v2571_v6, %v2804_v12  ;;  %v1342_v28 = vrot.slane %v2571_v6, %v2809_v14  ;;  %v3212_v18 = vmul.f32 %v3202_v57, %v1292_v23  ;;  %v1308_v26 = vmul.f32 %v1304_v42, %v1293_v34 }
  0x5d   : > { %v1282_v50 = vsel %vm517_vm2, %v1280_v55, %v1281_v24  ;;  %v1290_v8 = vadd.f32 %v1281_v24, %v1252_v17  ;;  %v1310_v38 = vmul.f32 %v1304_v42, %v1255_v9  ;;  %v1368_v24 = vunpack.c.l.bf16 %v1367_v32 }
  0x5e   : > { %4281 = vst [vmem:[#allocation33_spill] sm:$0xff] %v3208_v3  ;;  %v1288_v59 = vadd.f32 %v1282_v50, %v1250_v48  ;;  %4282 = vst [vmem:[#allocation34_spill] sm:$0xff] %v3212_v18  ;;  %v3218_v31 = vmul.f32 %v3208_v3, %v1292_v23  ;;  %v1346_v17 = vmul.f32 %v1342_v28, %v1293_v34  ;;  %v1318_v2 = vrot.slane %v1308_v26, 4  ;;  %v3222_v50 = vld [vmem:[%s2799_s30 + $0x28] sm:$0x11] }
  0x5f   : > { %v1348_v55 = vmul.f32 %v1342_v28, %v1331_v1  ;;  %v1319_v6 = vrot.slane %v1310_v38, 4  ;;  %v1369_v48 = vunpack.c.h.bf16 %v1367_v32  ;;  %4284 = vst [vmem:[#allocation36_spill] sm:$0xff] %v3222_v50  ;;  %v3224_v57 = vunpack.c.l.bf16 %v1329_v13  ;;  %v2573_v38 = vld [vmem:[%s4127_s1 + $0x38] sm:$0x3]  ;;  %v1467_v18 = vld [vmem:[%s2799_s30 + $0x20] sm:$0xee] }
  0x60   : > { %4283 = vst [vmem:[#allocation35_spill] sm:$0xff] %v3218_v31  ;;  %v1356_v9 = vrot.slane %v1346_v17, 5  ;;  %v3227_v20 = vrot.slane %v2572_v7, %v2804_v12  ;;  %v1380_v26 = vrot.slane %v2572_v7, %v2809_v14  ;;  %v1431_v3 = vunpack.c.h.bf16 %v3241_v61  ;;  %v3270_v31 = vld [vmem:[%s2799_s30 + $0x28] sm:$0x77] }
  0x61   : > { %4285 = vst [vmem:[#allocation37_spill] sm:$0xff] %v3224_v57  ;;  %v1357_v42 = vrot.slane %v1348_v55, 5  ;;  %v1320_v34 = vsel %vm556_vm3, %v1318_v2, %v1319_v6  ;;  %v1328_v28 = vadd.f32 %v1319_v6, %v1290_v8  ;;  %v1407_v55 = vunpack.c.h.bf16 %v3222_v50  ;;  %v2574_v2 = vld [vmem:[%s4127_s1 + $0x3a] sm:$0x3]  ;;  %4293 = vst [vmem:[#allocation45_spill] sm:$0xff] %v3270_v31 }
  0x62   : > { %4286 = vst [vmem:[#allocation38_spill] sm:$0xff] %v3227_v20  ;;  %v1326_v32 = vadd.f32 %v1320_v34, %v1288_v59  ;;  %v3237_v17 = vmul.f32 %v3227_v20, %v1368_v24  ;;  %v1384_v6 = vmul.f32 %v1380_v26, %v1369_v48  ;;  %v1386_v23 = vmul.f32 %v1380_v26, %v1331_v1  ;;  %v2575_v48 = vld [vmem:[%s4127_s1 + $0x3c] sm:$0x3] }
  0x63   : > { %v1358_v13 = vsel %vm595_vm4, %v1356_v9, %v1357_v42  ;;  %v1366_v7 = vadd.f32 %v1357_v42, %v1328_v28  ;;  %v3250_v24 = vrot.slane %v2573_v38, %v2804_v12  ;;  %v1418_v34 = vrot.slane %v2573_v38, %v2809_v14 }
  0x64   : > { %4287 = vst [vmem:[#allocation39_spill] sm:$0xff] %v3237_v17  ;;  %v1364_v59 = vadd.f32 %v1358_v13, %v1326_v32  ;;  %v1394_v58 = vrot.slane %v1384_v6, 6  ;;  %v1395_v20 = vrot.slane %v1386_v23, 6  ;;  %v3255_v30 = vrot.slane %v2574_v2, %v2804_v12  ;;  %v3328_v17 = vld [vmem:[%s2799_s30 + $0x30] sm:$0x11] }
  0x65   : > { %4289 = vst [vmem:[#allocation41_spill] sm:$0xff] %v3250_v24  ;;  %v1422_v42 = vmul.f32 %v1418_v34, %v1331_v1  ;;  %v1424_v28 = vmul.f32 %v1418_v34, %v1407_v55  ;;  %v1442_v26 = vrot.slane %v2574_v2, %v2809_v14  ;;  %v1468_v32 = vunpack.c.l.bf16 %v1467_v18  ;;  %v2576_v55 = vld [vmem:[%s4127_s1 + $0x3e] sm:$0x3]  ;;  %4303 = vst [vmem:[#allocation55_spill] sm:$0xff] %v3328_v17 }
  0x66   : > { %4290 = vst [vmem:[#allocation42_spill] sm:$0xff] %v3255_v30  ;;  %v1396_v13 = vsel %vm634_vm5, %v1394_v58, %v1395_v20  ;;  %v1404_v38 = vadd.f32 %v1395_v20, %v1366_v7  ;;  %v3264_v23 = vmul.f32 %v3255_v30, %v3224_v57  ;;  %v1469_v6 = vunpack.c.h.bf16 %v1467_v18  ;;  %v1543_v20 = vld [vmem:[%s2799_s30 + $0x20] sm:$0xcc] }
  0x67   : > { %v1402_v9 = vadd.f32 %v1396_v13, %v1364_v59  ;;  %v1446_v8 = vmul.f32 %v1442_v26, %v1331_v1  ;;  %v1448_v50 = vmul.f32 %v1442_v26, %v1431_v3  ;;  %v3267_v24 = vrot.slane %v2575_v48, %v2804_v12 }
  0x68   : > { %4291 = vst [vmem:[#allocation43_spill] sm:$0xff] %v3264_v23  ;;  %v1428_v58 = vadd.f32 %v1424_v28, %v1404_v38  ;;  %v1480_v18 = vrot.slane %v2575_v48, %v2809_v14  ;;  %v1507_v30 = vunpack.c.h.bf16 %v3270_v31  ;;  %v3283_v57 = vrot.slane %v2576_v55, %v2804_v12  ;;  %v1581_v23 = vld [vmem:[%s2799_s30 + $0x28] sm:$0xff] }
  0x69   : > { %4292 = vst [vmem:[#allocation44_spill] sm:$0xff] %v3267_v24  ;;  %v1426_v7 = vadd.f32 %v1422_v42, %v1402_v9  ;;  %v1456_v1 = vrot.slane %v1446_v8, 1  ;;  %v1457_v59 = vrot.slane %v1448_v50, 1  ;;  %v3279_v34 = vmul.f32 %v3267_v24, %v1468_v32  ;;  %v2577_v50 = vld [vmem:[%s4127_s1 + $0x40] sm:$0x3] }
  0x6a   : > { %v1484_v26 = vmul.f32 %v1480_v18, %v1469_v6  ;;  %v1486_v13 = vmul.f32 %v1480_v18, %v1431_v3  ;;  %4295 = vst [vmem:[#allocation47_spill] sm:$0xff] %v3283_v57  ;;  %v1518_v8 = vrot.slane %v2576_v55, %v2809_v14  ;;  %v3293_v18 = vmul.f32 %v3283_v57, %v1468_v32  ;;  %v2578_v55 = vld [vmem:[%s4127_s1 + $0x42] sm:$0x3] }
  0x6b   : > { %4294 = vst [vmem:[#allocation46_spill] sm:$0xff] %v3279_v34  ;;  %v1458_v38 = vsel %vm439_vm0, %v1456_v1, %v1457_v59  ;;  %v1466_v48 = vadd.f32 %v1457_v59, %v1428_v58  ;;  %v1544_v61 = vunpack.c.l.bf16 %v1543_v20  ;;  %v1545_v28 = vunpack.c.h.bf16 %v1543_v20 }
  0x6c   : > { %v1464_v9 = vadd.f32 %v1458_v38, %v1426_v7  ;;  %v1494_v3 = vrot.slane %v1484_v26, 2  ;;  %v1495_v42 = vrot.slane %v1486_v13, 2  ;;  %4296 = vst [vmem:[#allocation48_spill] sm:$0xff] %v3293_v18  ;;  %v1522_v2 = vmul.f32 %v1518_v8, %v1469_v6 }
  0x6d   : > { %v1524_v24 = vmul.f32 %v1518_v8, %v1507_v30  ;;  %v3302_v59 = vrot.slane %v2577_v50, %v2804_v12  ;;  %v1556_v13 = vrot.slane %v2577_v50, %v2809_v14  ;;  %v1583_v8 = vunpack.c.h.bf16 %v1581_v23 }
  0x6e   : > { %v1496_v58 = vsel %vm478_vm1, %v1494_v3, %v1495_v42  ;;  %v1504_v1 = vadd.f32 %v1495_v42, %v1466_v48  ;;  %v1532_v26 = vrot.slane %v1522_v2, 3  ;;  %v3310_v57 = vrot.slane %v2578_v55, %v2804_v12  ;;  %v1619_v48 = vld [vmem:[%s2799_s30 + $0x20] sm:$0x88] }
  0x6f   : > { %4297 = vst [vmem:[#allocation49_spill] sm:$0xff] %v3302_v59  ;;  %v1502_v32 = vadd.f32 %v1496_v58, %v1464_v9  ;;  %v1533_v6 = vrot.slane %v1524_v24, 3  ;;  %v3307_v38 = vmul.f32 %v3302_v59, %v1544_v61  ;;  %v1560_v7 = vmul.f32 %v1556_v13, %v1545_v28  ;;  %v2579_v24 = vld [vmem:[%s4127_s1 + $0x44] sm:$0x3] }
  0x70   : > { %4299 = vst [vmem:[#allocation51_spill] sm:$0xff] %v3310_v57  ;;  %v1562_v9 = vmul.f32 %v1556_v13, %v1507_v30  ;;  %v1594_v58 = vrot.slane %v2578_v55, %v2809_v14  ;;  %v3320_v20 = vmul.f32 %v3310_v57, %v1544_v61  ;;  %v1620_v31 = vunpack.c.l.bf16 %v1619_v48 }
  0x71   : > { %4298 = vst [vmem:[#allocation50_spill] sm:$0xff] %v3307_v38  ;;  %v1534_v3 = vsel %vm517_vm2, %v1532_v26, %v1533_v6  ;;  %v1542_v42 = vadd.f32 %v1533_v6, %v1504_v1  ;;  %v1570_v34 = vrot.slane %v1560_v7, 4  ;;  %v1621_v26 = vunpack.c.h.bf16 %v1619_v48 }
  0x72   : > { %v1540_v50 = vadd.f32 %v1534_v3, %v1502_v32  ;;  %4300 = vst [vmem:[#allocation52_spill] sm:$0xff] %v3320_v20  ;;  %v1571_v59 = vrot.slane %v1562_v9, 4  ;;  %v3322_v1 = vunpack.c.l.bf16 %v1581_v23  ;;  %v1598_v6 = vmul.f32 %v1594_v58, %v1545_v28  ;;  %v2580_v23 = vld [vmem:[%s4127_s1 + $0x46] sm:$0x3]  ;;  %v2582_v20 = vld [vmem:[%s4127_s1 + $0x4a] sm:$0x3] }
  0x73   : > { %v1600_v30 = vmul.f32 %v1594_v58, %v1583_v8  ;;  %v3325_v13 = vrot.slane %v2579_v24, %v2804_v12  ;;  %v1632_v7 = vrot.slane %v2579_v24, %v2809_v14 }
  0x74   : > { %4301 = vst [vmem:[#allocation53_spill] sm:$0xff] %v3322_v1  ;;  %v1572_v55 = vsel %vm556_vm3, %v1570_v34, %v1571_v59  ;;  %v1580_v61 = vadd.f32 %v1571_v59, %v1542_v42  ;;  %v1608_v48 = vrot.slane %v1598_v6, 5  ;;  %v1659_v34 = vunpack.c.h.bf16 %v3328_v17  ;;  %v3342_v59 = vld [vmem:[%s2799_s30 + $0x30] sm:$0x33]  ;;  %v2581_v42 = vld [vmem:[%s4127_s1 + $0x48] sm:$0x3] }
  0x75   : > { %4302 = vst [vmem:[#allocation54_spill] sm:$0xff] %v3325_v13  ;;  %v1578_v28 = vadd.f32 %v1572_v55, %v1540_v50  ;;  %v1609_v3 = vrot.slane %v1600_v30, 5  ;;  %v3337_v9 = vmul.f32 %v3325_v13, %v1620_v31  ;;  %v1636_v2 = vmul.f32 %v1632_v7, %v1621_v26  ;;  %4305 = vst [vmem:[#allocation57_spill] sm:$0xff] %v3342_v59  ;;  %v1719_v30 = vld [vmem:[%s2799_s30 + $0x28] sm:$0xee] }
  0x76   : > { %v1638_v32 = vmul.f32 %v1632_v7, %v1583_v8  ;;  %v1670_v31 = vrot.slane %v2580_v23, %v2809_v14  ;;  %v3352_v7 = vrot.slane %v2580_v23, %v2804_v12  ;;  %v1721_v6 = vunpack.c.h.bf16 %v1719_v30 }
  0x77   : > { %4304 = vst [vmem:[#allocation56_spill] sm:$0xff] %v3337_v9  ;;  %v1610_v24 = vsel %vm595_vm4, %v1608_v48, %v1609_v3  ;;  %v1618_v50 = vadd.f32 %v1609_v3, %v1580_v61  ;;  %v1646_v58 = vrot.slane %v1636_v2, 6  ;;  %v1683_v61 = vunpack.c.h.bf16 %v3342_v59 }
  0x78   : > { %v1616_v55 = vadd.f32 %v1610_v24, %v1578_v28  ;;  %v1647_v26 = vrot.slane %v1638_v32, 6  ;;  %4306 = vst [vmem:[#allocation58_spill] sm:$0xff] %v3352_v7  ;;  %v1674_v38 = vmul.f32 %v1670_v31, %v1583_v8  ;;  %v1676_v18 = vmul.f32 %v1670_v31, %v1659_v34 }
  0x79   : > { %v3359_v48 = vrot.slane %v2581_v42, %v2804_v12  ;;  %v1694_v2 = vrot.slane %v2581_v42, %v2809_v14  ;;  %v1720_v32 = vunpack.c.l.bf16 %v1719_v30  ;;  %v3368_v17 = vrot.slane %v2582_v20, %v2804_v12  ;;  %v2583_v42 = vld [vmem:[%s4127_s1 + $0x4c] sm:$0x3] }
  0x7a   : > { %v1648_v3 = vsel %vm634_vm5, %v1646_v58, %v1647_v26  ;;  %v1656_v28 = vadd.f32 %v1647_v26, %v1618_v50  ;;  %v1732_v13 = vrot.slane %v2582_v20, %v2809_v14  ;;  %v3372_v58 = vld [vmem:[%s2799_s30 + $0x30] sm:$0x77]  ;;  %v1770_v50 = vrot.slane %v2583_v42, %v2809_v14  ;;  %v2584_v20 = vld [vmem:[%s4127_s1 + $0x4e] sm:$0x3] }
  0x7b   : > { %4307 = vst [vmem:[#allocation59_spill] sm:$0xff] %v3359_v48  ;;  %v1654_v23 = vadd.f32 %v1648_v3, %v1616_v55  ;;  %v3365_v24 = vmul.f32 %v3359_v48, %v3322_v1  ;;  %4309 = vst [vmem:[#allocation61_spill] sm:$0xff] %v3368_v17  ;;  %v1698_v31 = vmul.f32 %v1694_v2, %v1583_v8 }
  0x7c   : > { %v1680_v34 = vadd.f32 %v1676_v18, %v1656_v28  ;;  %v1700_v7 = vmul.f32 %v1694_v2, %v1683_v61  ;;  %4310 = vst [vmem:[#allocation62_spill] sm:$0xff] %v3372_v58  ;;  %v3380_v26 = vmul.f32 %v3368_v17, %v1720_v32  ;;  %v1736_v3 = vmul.f32 %v1732_v13, %v1721_v6 }
  0x7d   : > { %4308 = vst [vmem:[#allocation60_spill] sm:$0xff] %v3365_v24  ;;  %v1678_v55 = vadd.f32 %v1674_v38, %v1654_v23  ;;  %v1708_v18 = vrot.slane %v1698_v31, 1  ;;  %v1738_v28 = vmul.f32 %v1732_v13, %v1683_v61  ;;  %v1759_v2 = vunpack.c.h.bf16 %v3372_v58  ;;  %v1795_v38 = vld [vmem:[%s2799_s30 + $0x28] sm:$0xcc]  ;;  %v1833_v24 = vld [vmem:[%s2799_s30 + $0x30] sm:$0xff] }
  0x7e   : > { %4311 = vst [vmem:[#allocation63_spill] sm:$0xff] %v3380_v26  ;;  %v1709_v8 = vrot.slane %v1700_v7, 1  ;;  %v3385_v48 = vrot.slane %v2583_v42, %v2804_v12  ;;  %v1746_v17 = vrot.slane %v1736_v3, 2  ;;  %v1774_v13 = vmul.f32 %v1770_v50, %v1721_v6  ;;  %v3443_v26 = vld [vmem:[%s2799_s30 + $0x38] sm:$0x33] }
  0x7f   : > { %v1747_v59 = vrot.slane %v1738_v28, 2  ;;  %v1776_v61 = vmul.f32 %v1770_v50, %v1759_v2  ;;  %v1796_v57 = vunpack.c.l.bf16 %v1795_v38  ;;  %v3404_v3 = vrot.slane %v2584_v20, %v2804_v12  ;;  %4322 = vst [vmem:[#allocation74_spill] sm:$0xff] %v3443_v26 }
  0x80   : > { %4312 = vst [vmem:[#allocation64_spill] sm:$0xff] %v3385_v48  ;;  %v1710_v23 = vsel %vm439_vm0, %v1708_v18, %v1709_v8  ;;  %v1718_v30 = vadd.f32 %v1709_v8, %v1680_v34  ;;  %v3391_v7 = vmul.f32 %v3385_v48, %v1720_v32  ;;  %v1797_v18 = vunpack.c.h.bf16 %v1795_v38  ;;  %v2585_v34 = vld [vmem:[%s4127_s1 + $0x50] sm:$0x3] }
  0x81   : > { %v1716_v31 = vadd.f32 %v1710_v23, %v1678_v55  ;;  %v1748_v42 = vsel %vm478_vm1, %v1746_v17, %v1747_v59  ;;  %v1784_v6 = vrot.slane %v1774_v13, 3  ;;  %v1785_v50 = vrot.slane %v1776_v61, 3  ;;  %4314 = vst [vmem:[#allocation66_spill] sm:$0xff] %v3404_v3 }
  0x82   : > { %4313 = vst [vmem:[#allocation65_spill] sm:$0xff] %v3391_v7  ;;  %v1756_v9 = vadd.f32 %v1747_v59, %v1718_v30  ;;  %v1808_v28 = vrot.slane %v2584_v20, %v2809_v14  ;;  %v1835_v17 = vunpack.c.h.bf16 %v1833_v24  ;;  %v1871_v59 = vld [vmem:[%s2799_s30 + $0x28] sm:$0x88]  ;;  %v3410_v23 = vrot.slane %v2585_v34, %v2804_v12  ;;  %v2586_v20 = vld [vmem:[%s4127_s1 + $0x52] sm:$0x3] }
  0x83   : > { %v1754_v55 = vadd.f32 %v1748_v42, %v1716_v31  ;;  %v1786_v30 = vsel %vm517_vm2, %v1784_v6, %v1785_v50  ;;  %v1846_v31 = vrot.slane %v2585_v34, %v2809_v14  ;;  %v3414_v61 = vmul.f32 %v3404_v3, %v1796_v57 }
  0x84   : > { %v1794_v38 = vadd.f32 %v1785_v50, %v1756_v9  ;;  %4315 = vst [vmem:[#allocation67_spill] sm:$0xff] %v3410_v23  ;;  %v1812_v42 = vmul.f32 %v1808_v28, %v1797_v18  ;;  %v1814_v8 = vmul.f32 %v1808_v28, %v1759_v2  ;;  %v3420_v32 = vmul.f32 %v3410_v23, %v1796_v57 }
  0x85   : > { %v1792_v13 = vadd.f32 %v1786_v30, %v1754_v55  ;;  %4316 = vst [vmem:[#allocation68_spill] sm:$0xff] %v3414_v61  ;;  %v1850_v9 = vmul.f32 %v1846_v31, %v1797_v18  ;;  %v1852_v6 = vmul.f32 %v1846_v31, %v1835_v17  ;;  %v1872_v50 = vunpack.c.l.bf16 %v1871_v59  ;;  %v3424_v30 = vld [vmem:[%s2799_s30 + $0x38] sm:$0x11]  ;;  %v1974_v61 = vld [vmem:[%s2799_s30 + $0x30] sm:$0xee] }
  0x86   : > { %4317 = vst [vmem:[#allocation69_spill] sm:$0xff] %v3420_v32  ;;  %v1822_v48 = vrot.slane %v1812_v42, 4  ;;  %v1823_v34 = vrot.slane %v1814_v8, 4  ;;  %v1873_v55 = vunpack.c.h.bf16 %v1871_v59  ;;  %4318 = vst [vmem:[#allocation70_spill] sm:$0xff] %v3424_v30  ;;  %v3426_v3 = vunpack.c.l.bf16 %v1833_v24  ;;  %v2587_v8 = vld [vmem:[%s4127_s1 + $0x54] sm:$0x3] }
  0x87   : > { %v1860_v2 = vrot.slane %v1850_v9, 5  ;;  %v1861_v28 = vrot.slane %v1852_v6, 5  ;;  %v3429_v58 = vrot.slane %v2586_v20, %v2804_v12  ;;  %v1884_v42 = vrot.slane %v2586_v20, %v2809_v14  ;;  %v3472_v32 = vld [vmem:[%s2799_s30 + $0x38] sm:$0x77] }
  0x88   : > { %4319 = vst [vmem:[#allocation71_spill] sm:$0xff] %v3426_v3  ;;  %v1824_v18 = vsel %vm556_vm3, %v1822_v48, %v1823_v34  ;;  %v1832_v31 = vadd.f32 %v1823_v34, %v1794_v38  ;;  %v1914_v6 = vunpack.c.h.bf16 %v3424_v30  ;;  %v2588_v48 = vld [vmem:[%s4127_s1 + $0x56] sm:$0x3]  ;;  %v1938_v23 = vunpack.c.h.bf16 %v3443_v26  ;;  %4327 = vst [vmem:[#allocation79_spill] sm:$0xff] %v3472_v32 }
  0x89   : > { %4320 = vst [vmem:[#allocation72_spill] sm:$0xff] %v3429_v58  ;;  %v1830_v59 = vadd.f32 %v1824_v18, %v1792_v13  ;;  %v1862_v24 = vsel %vm595_vm4, %v1860_v2, %v1861_v28  ;;  %v3439_v9 = vmul.f32 %v3429_v58, %v1872_v50  ;;  %v1888_v34 = vmul.f32 %v1884_v42, %v1873_v55  ;;  %v2589_v55 = vld [vmem:[%s4127_s1 + $0x58] sm:$0x3] }
  0x8a   : > { %v1870_v20 = vadd.f32 %v1861_v28, %v1832_v31  ;;  %v1890_v57 = vmul.f32 %v1884_v42, %v1835_v17  ;;  %v3452_v50 = vrot.slane %v2587_v8, %v2804_v12  ;;  %v1925_v18 = vrot.slane %v2587_v8, %v2809_v14 }
  0x8b   : > { %4321 = vst [vmem:[#allocation73_spill] sm:$0xff] %v3439_v9  ;;  %v1868_v13 = vadd.f32 %v1862_v24, %v1830_v59  ;;  %v1898_v7 = vrot.slane %v1888_v34, 6  ;;  %v3457_v1 = vrot.slane %v2588_v48, %v2804_v12  ;;  %v1949_v42 = vrot.slane %v2588_v48, %v2809_v14 }
  0x8c   : > { %4323 = vst [vmem:[#allocation75_spill] sm:$0xff] %v3452_v50  ;;  %v1899_v58 = vrot.slane %v1890_v57, 6  ;;  %v1929_v28 = vmul.f32 %v1925_v18, %v1835_v17  ;;  %v1931_v31 = vmul.f32 %v1925_v18, %v1914_v6  ;;  %v1975_v59 = vunpack.c.l.bf16 %v1974_v61  ;;  %v2590_v6 = vld [vmem:[%s4127_s1 + $0x5a] sm:$0x3] }
  0x8d   : > { %4324 = vst [vmem:[#allocation76_spill] sm:$0xff] %v3457_v1  ;;  %v3466_v57 = vmul.f32 %v3457_v1, %v3426_v3  ;;  %v1976_v34 = vunpack.c.h.bf16 %v1974_v61  ;;  %v1953_v38 = vmul.f32 %v1949_v42, %v1835_v17  ;;  %v1955_v30 = vmul.f32 %v1949_v42, %v1938_v23 }
  0x8e   : > { %v1900_v24 = vsel %vm634_vm5, %v1898_v7, %v1899_v58  ;;  %v1908_v8 = vadd.f32 %v1899_v58, %v1870_v20  ;;  %v3469_v50 = vrot.slane %v2589_v55, %v2804_v12  ;;  %v1987_v61 = vrot.slane %v2589_v55, %v2809_v14  ;;  %v2050_v58 = vld [vmem:[%s2799_s30 + $0x30] sm:$0xcc] }
  0x8f   : > { %4325 = vst [vmem:[#allocation77_spill] sm:$0xff] %v3466_v57  ;;  %v1906_v2 = vadd.f32 %v1900_v24, %v1868_v13  ;;  %v1963_v17 = vrot.slane %v1953_v38, 1  ;;  %v1964_v13 = vrot.slane %v1955_v30, 1  ;;  %v2014_v1 = vunpack.c.h.bf16 %v3472_v32  ;;  %v2591_v30 = vld [vmem:[%s4127_s1 + $0x5c] sm:$0x3] }
  0x90   : > { %4326 = vst [vmem:[#allocation78_spill] sm:$0xff] %v3469_v50  ;;  %v1935_v7 = vadd.f32 %v1931_v31, %v1908_v8  ;;  %v3481_v18 = vmul.f32 %v3469_v50, %v1975_v59  ;;  %v1991_v42 = vmul.f32 %v1987_v61, %v1976_v34  ;;  %v1993_v24 = vmul.f32 %v1987_v61, %v1938_v23  ;;  %v3498_v57 = vld [vmem:[%s2799_s30 + $0x38] sm:$0xff] }
  0x91   : > { %v1933_v20 = vadd.f32 %v1929_v28, %v1906_v2  ;;  %v3485_v3 = vrot.slane %v2590_v6, %v2804_v12  ;;  %v1965_v8 = vsel %vm439_vm0, %v1963_v17, %v1964_v13  ;;  %v2025_v38 = vrot.slane %v2590_v6, %v2809_v14  ;;  %v2592_v6 = vld [vmem:[%s4127_s1 + $0x5e] sm:$0x3] }
  0x92   : > { %4328 = vst [vmem:[#allocation80_spill] sm:$0xff] %v3481_v18  ;;  %v1973_v55 = vadd.f32 %v1964_v13, %v1935_v7  ;;  %v2001_v23 = vrot.slane %v1991_v42, 2  ;;  %v2002_v28 = vrot.slane %v1993_v24, 2  ;;  %v2051_v26 = vunpack.c.l.bf16 %v2050_v58 }
  0x93   : > { %4329 = vst [vmem:[#allocation81_spill] sm:$0xff] %v3485_v3  ;;  %v1971_v2 = vadd.f32 %v1965_v8, %v1933_v20  ;;  %v3495_v61 = vmul.f32 %v3485_v3, %v1975_v59  ;;  %v2029_v48 = vmul.f32 %v2025_v38, %v1976_v34  ;;  %v2031_v50 = vmul.f32 %v2025_v38, %v2014_v1 }
  0x94   : > { %v2052_v31 = vunpack.c.h.bf16 %v2050_v58  ;;  %v2003_v7 = vsel %vm478_vm1, %v2001_v23, %v2002_v28  ;;  %v2011_v17 = vadd.f32 %v2002_v28, %v1973_v55  ;;  %v3506_v13 = vrot.slane %v2591_v30, %v2804_v12  ;;  %v2126_v55 = vld [vmem:[%s2799_s30 + $0x30] sm:$0x88] }
  0x95   : > { %v2009_v59 = vadd.f32 %v2003_v7, %v1971_v2  ;;  %v2039_v34 = vrot.slane %v2029_v48, 3  ;;  %v2040_v42 = vrot.slane %v2031_v50, 3  ;;  %v2063_v24 = vrot.slane %v2591_v30, %v2809_v14  ;;  %v2593_v50 = vld [vmem:[%s4127_s1 + $0x60] sm:$0x3] }
  0x96   : > { %4330 = vst [vmem:[#allocation82_spill] sm:$0xff] %v3506_v13  ;;  %v3511_v8 = vmul.f32 %v3506_v13, %v2051_v26  ;;  %v2090_v38 = vunpack.c.h.bf16 %v3498_v57  ;;  %v3515_v23 = vrot.slane %v2592_v6, %v2804_v12  ;;  %v2101_v7 = vrot.slane %v2592_v6, %v2809_v14 }
  0x97   : > { %v2041_v28 = vsel %vm517_vm2, %v2039_v34, %v2040_v42  ;;  %v2049_v20 = vadd.f32 %v2040_v42, %v2011_v17  ;;  %v2067_v3 = vmul.f32 %v2063_v24, %v2052_v31  ;;  %v2069_v2 = vmul.f32 %v2063_v24, %v2014_v1 }
  0x98   : > { %v2047_v30 = vadd.f32 %v2041_v28, %v2009_v59  ;;  %v3525_v58 = vmul.f32 %v3515_v23, %v2051_v26  ;;  %v2127_v32 = vunpack.c.l.bf16 %v2126_v55  ;;  %v2128_v9 = vunpack.c.h.bf16 %v2126_v55  ;;  %v3534_v59 = vld [vmem:[%s4128_s2] sm:$0x3] }
  0x99   : > { %v2077_v18 = vrot.slane %v2067_v3, 4  ;;  %v2078_v13 = vrot.slane %v2069_v2, 4  ;;  %v2105_v34 = vmul.f32 %v2101_v7, %v2052_v31  ;;  %v2107_v1 = vmul.f32 %v2101_v7, %v2090_v38  ;;  %4331 = vst [vmem:[#allocation83_spill] sm:$0xff] %v3534_v59  ;;  %v3542_v31 = vld [vmem:[%s4129_s3] sm:$0x3] }
  0x9a   : > { %v3529_v42 = vrot.slane %v2593_v50, %v2804_v12  ;;  %v2139_v24 = vrot.slane %v2593_v50, %v2809_v14  ;;  %4332 = vst [vmem:[#allocation84_spill] sm:$0xff] %v3542_v31  ;;  %v4467_v12 = vld [vmem:[#allocation65_spill] sm:$0xff] }
  0x9b   : > { %v2079_v26 = vsel %vm556_vm3, %v2077_v18, %v2078_v13  ;;  %v2087_v3 = vadd.f32 %v2078_v13, %v2049_v20  ;;  %v2115_v28 = vrot.slane %v2105_v34, 5  ;;  %v2116_v2 = vrot.slane %v2107_v1, 5 }
  0x9c   : > { %v2085_v55 = vadd.f32 %v2079_v26, %v2047_v30  ;;  %v3545_v7 = vmul.f32 %v3529_v42, %v2127_v32  ;;  %v2143_v17 = vmul.f32 %v2139_v24, %v2128_v9  ;;  %v2145_v6 = vmul.f32 %v2139_v24, %v2090_v38 }
  0x9d   : > { %v2173_v18 = vrot.slane %v3534_v59, %v2809_v14  ;;  %v2117_v20 = vsel %vm595_vm4, %v2115_v28, %v2116_v2  ;;  %v2125_v13 = vadd.f32 %v2116_v2, %v2087_v3  ;;  %v2189_v30 = vrot.slane %v3542_v31, %v2809_v14  ;;  %v4451_v31 = vld [vmem:[#allocation64_spill] sm:$0xff] }
  0x9e   : > { %v2123_v34 = vadd.f32 %v2117_v20, %v2085_v55  ;;  %v2153_v1 = vrot.slane %v2143_v17, 6  ;;  %v2154_v26 = vrot.slane %v2145_v6, 6  ;;  %v4333_v32 = vunpack.c.l.bf16 %v2812_v15 }
  0x9f   : > { %v4334_v9 = vunpack.c.l.bf16 %v2815_v16  ;;  %v4335_v24 = vunpack.c.l.bf16 %v2824_v21  ;;  %v4337_v14 = vunpack.c.l.bf16 %v2844_v33 }
  0xa0   : > { %v411_v48 = vmul.f32 %v2850_v35, %v4333_v32  ;;  %v2155_v15 = vsel %vm634_vm5, %v2153_v1, %v2154_v26  ;;  %v2163_v6 = vadd.f32 %v2154_v26, %v2125_v13  ;;  %v4339_v13 = vrot.slane %v2862_v41, 1 }
  0xa1   : > { %v413_v38 = vmul.f32 %v2850_v35, %v4334_v9  ;;  %v433_v3 = vmul.f32 %v2840_v29, %v4335_v24  ;;  %v4336_v28 = vmov %v4335_v24  ;;  %v511_v17 = vmul.f32 %v2874_v53, %v4337_v14 }
  0xa2   : > { %v472_v2 = vmul.f32 %v2853_v37, %v4336_v28  ;;  %v4338_v55 = vmov %v4337_v14  ;;  %v589_v35 = vmul.f32 %v2906_v25, %v2918_v46  ;;  %v2161_v20 = vadd.f32 %v2155_v15, %v2123_v34 }
  0xa3   : > { %v550_v16 = vmul.f32 %v2898_v10, %v4338_v55  ;;  %v441_v29 = vrot.slane %v433_v3, 1  ;;  %v519_v21 = vrot.slane %v511_v17, 3  ;;  %v2179_v9 = vmul.f32 %v2173_v18, %v2163_v6 }
  0xa4   : > { %v480_v32 = vrot.slane %v472_v2, 2  ;;  %v597_v24 = vrot.slane %v589_v35, 5  ;;  %v628_v53 = vmul.f32 %v2921_v49, %v2918_v46  ;;  %v2177_v28 = vmul.f32 %v2173_v18, %v2161_v20 }
  0xa5   : > { %v558_v37 = vrot.slane %v550_v16, 4  ;;  %v442_v33 = vsel %vm439_vm0, %v4339_v13, %v441_v29  ;;  %v452_v1 = vadd.f32 %v441_v29, %v413_v38  ;;  %v4340_v10 = vrot.slane %v2865_v44, 2 }
  0xa6   : > { %v2195_v34 = vadd.f32 %v2189_v30, %v2179_v9  ;;  %v450_v26 = vadd.f32 %v442_v33, %v411_v48  ;;  %v4341_v3 = vrot.slane %v2886_v62, 3  ;;  %v4342_v14 = vrot.slane %v2903_v22, 4 }
  0xa7   : > { %v481_v25 = vsel %vm478_vm1, %v4340_v10, %v480_v32  ;;  %v2193_v18 = vadd.f32 %v2189_v30, %v2177_v28  ;;  %v491_v17 = vadd.f32 %v480_v32, %v452_v1  ;;  %v4343_v41 = vrot.slane %v2916_v39, 5 }
  0xa8   : > { %v520_v2 = vsel %vm517_vm2, %v4341_v3, %v519_v21  ;;  %v559_v49 = vsel %vm556_vm3, %v4342_v14, %v558_v37  ;;  %v636_v15 = vrot.slane %v628_v53, 6  ;;  %v2199_v44 = vmax.f32 %v2195_v34, 0.0 }
  0xa9   : > { %v598_v38 = vsel %vm595_vm4, %v4343_v41, %v597_v24  ;;  %v489_v6 = vadd.f32 %v481_v25, %v450_v26  ;;  %v665_v48 = vmul.f32 %v2948_v27, %v2918_v46  ;;  %v4344_v62 = vunpack.c.l.bf16 %v2924_v51 }
  0xaa   : > { %v2197_v16 = vmax.f32 %v2193_v18, 0.0  ;;  %v530_v22 = vadd.f32 %v519_v21, %v491_v17  ;;  %v4345_v35 = vrot.slane %v2933_v63, 6  ;;  %v4346_v39 = vunpack.c.l.bf16 %v2938_v4  ;;  %v4356_v17 = vld [vmem:[#allocation4_spill] sm:$0xff] }
  0xab   : > { %v667_v55 = vmul.f32 %v2948_v27, %v4344_v62  ;;  %v528_v29 = vadd.f32 %v520_v2, %v489_v6  ;;  %v4348_v46 = vunpack.c.l.bf16 %v2968_v60  ;;  %v3614_v13 = vmul.f32 %v3006_v40, %v3022_v0 }
  0xac   : > { %v637_v30 = vsel %vm634_vm5, %v4345_v35, %v636_v15  ;;  %v691_v20 = vmul.f32 %v2955_v36, %v4346_v39  ;;  %v4347_v32 = vmov %v4346_v39  ;;  %v2203_v63 = vpack.c.bf16 %v2199_v44, %v2197_v16 }
  0xad   : > { %v729_v9 = vmul.f32 %v2964_v54, %v4347_v32  ;;  %v767_v51 = vmul.f32 %v2981_v19, %v4348_v46  ;;  %v4349_v27 = vmov %v4348_v46  ;;  %v569_v53 = vadd.f32 %v558_v37, %v530_v22  ;;  %v4363_v22 = vld [vmem:[#allocation5_spill] sm:$0xff] }
  0xae   : > { %v805_v21 = vmul.f32 %v3000_v11, %v4349_v27  ;;  %v698_v28 = vrot.slane %v691_v20, 1  ;;  %v567_v36 = vadd.f32 %v559_v49, %v528_v29  ;;  %2364 = vmatprep.mubr.bf16.mxu0 %v2203_v63  ;;  %v4350_v10 = vrot.slane %v2961_v47, 1  ;;  %v4367_v20 = vld [vmem:[#allocation13_spill] sm:$0xff] }
  0xaf   : > { %v736_v33 = vrot.slane %v729_v9, 2  ;;  %v774_v4 = vrot.slane %v767_v51, 3  ;;  %v608_v54 = vadd.f32 %v597_v24, %v569_v53  ;;  %v850_v60 = vrot.slane %v3614_v13, 5  ;;  %v4369_v9 = vld [vmem:[#allocation15_spill] sm:$0xff]  ;;  %v4371_v63 = vld [vmem:[#allocation17_spill] sm:$0xff] }
  0xb0   : > { %v812_v1 = vrot.slane %v805_v21, 4  ;;  %v699_v19 = vsel %vm439_vm0, %v4350_v10, %v698_v28  ;;  %v881_v11 = vmul.f32 %v3025_v52, %v3022_v0  ;;  %v606_v37 = vadd.f32 %v598_v38, %v567_v36  ;;  %v4355_v52 = vld [vmem:[#allocation7_spill] sm:$0xff]  ;;  %v4358_v38 = vld [vmem:[#allocation6_spill] sm:$0xff]  ;;  %v4372_v10 = vld [vmem:[#allocation20_spill] sm:$0xff] }
  0xb1   : > { %v4351_v25 = vrot.slane %v2976_v5, 2  ;;  %v4352_v34 = vrot.slane %v2987_v45, 3  ;;  %v4353_v24 = vrot.slane %v3010_v56, 4  ;;  %v647_v3 = vadd.f32 %v636_v15, %v608_v54  ;;  %v4360_v56 = vld [vmem:[#allocation8_spill] sm:$0xff] }
  0xb2   : > { %v4354_v2 = vrot.slane %v3016_v43, 5  ;;  %v888_v49 = vrot.slane %v881_v11, 6  ;;  %v3636_v18 = vmul.f32 %v4355_v52, %v3022_v0  ;;  %v645_v5 = vadd.f32 %v637_v30, %v606_v37  ;;  %v4362_v43 = vld [vmem:[#allocation10_spill] sm:$0xff]  ;;  %v4365_v30 = vld [vmem:[#allocation11_spill] sm:$0xff] }
  0xb3   : > { %v737_v40 = vsel %vm478_vm1, %v4351_v25, %v736_v33  ;;  %v775_v26 = vsel %vm517_vm2, %v4352_v34, %v774_v4  ;;  %v813_v47 = vsel %vm556_vm3, %v4353_v24, %v812_v1  ;;  %v4357_v41 = vunpack.c.l.bf16 %v4356_v17  ;;  %v4373_v25 = vld [vmem:[#allocation9_spill] sm:$0xff]  ;;  %v4375_v24 = vld [vmem:[#allocation12_spill] sm:$0xff] }
  0xb4   : > { %v851_v14 = vsel %vm595_vm4, %v4354_v2, %v850_v60  ;;  %v4359_v44 = vunpack.c.l.bf16 %v4358_v38  ;;  %v671_v16 = vadd.f32 %v667_v55, %v647_v3  ;;  %v4364_v35 = vrot.slane %v4363_v22, 6  ;;  %v4370_v55 = vld [vmem:[#allocation19_spill] sm:$0xff] }
  0xb5   : > { %v919_v45 = vmul.f32 %v4355_v52, %v4357_v41  ;;  %v4366_v39 = vunpack.c.l.bf16 %v4365_v30  ;;  %v669_v51 = vadd.f32 %v665_v48, %v645_v5  ;;  %v3668_v53 = vmul.f32 %v4371_v63, %v4370_v55  ;;  %v4377_v5 = vld [vmem:[#allocation14_spill] sm:$0xff]  ;;  %v4379_v41 = vld [vmem:[#allocation16_spill] sm:$0xff] }
  0xb6   : > { %v3644_v6 = vmul.f32 %v4360_v56, %v4359_v44  ;;  %v4361_v15 = vmov %v4359_v44  ;;  %v889_v0 = vsel %vm634_vm5, %v4364_v35, %v888_v49  ;;  %v709_v13 = vadd.f32 %v698_v28, %v671_v16  ;;  %v4383_v16 = vld [vmem:[#allocation24_spill] sm:$0xff]  ;;  %v4384_v35 = vld [vmem:[#allocation21_spill] sm:$0xff] }
  0xb7   : > { %v3649_v62 = vmul.f32 %v4362_v43, %v4361_v15  ;;  %v3657_v29 = vmul.f32 %v4367_v20, %v4366_v39  ;;  %v4368_v32 = vmov %v4366_v39  ;;  %v3674_v11 = vmul.f32 %v4372_v10, %v4370_v55 }
  0xb8   : > { %v3662_v46 = vmul.f32 %v4369_v9, %v4368_v32  ;;  %v950_v27 = vrot.slane %v3644_v6, 1  ;;  %v707_v37 = vadd.f32 %v699_v19, %v669_v51  ;;  %v4374_v48 = vrot.slane %v4373_v25, 1  ;;  %v4388_v51 = vld [vmem:[#allocation23_spill] sm:$0xff] }
  0xb9   : > { %v988_v21 = vrot.slane %v3649_v62, 2  ;;  %v1026_v36 = vrot.slane %v3657_v29, 3  ;;  %v4376_v3 = vrot.slane %v4375_v24, 2  ;;  %v4235_v28 = vrot.slane %v3668_v53, 5  ;;  %v4393_v24 = vld [vmem:[#allocation28_spill] sm:$0xff] }
  0xba   : > { %v4241_v54 = vrot.slane %v3662_v46, 4  ;;  %v951_v34 = vsel %vm439_vm0, %v4374_v48, %v950_v27  ;;  %v747_v52 = vadd.f32 %v736_v33, %v709_v13  ;;  %v4378_v17 = vrot.slane %v4377_v5, 3  ;;  %v4381_v33 = vld [vmem:[#allocation18_spill] sm:$0xff]  ;;  %v4390_v13 = vld [vmem:[#allocation25_spill] sm:$0xff] }
  0xbb   : > { %v3684_v2 = vsel %vm478_vm1, %v4376_v3, %v988_v21  ;;  %v4380_v38 = vrot.slane %v4379_v41, 4  ;;  %v4234_v56 = vrot.slane %v3674_v11, 6  ;;  %v745_v6 = vadd.f32 %v737_v40, %v707_v37  ;;  %v4386_v40 = vld [vmem:[#allocation22_spill] sm:$0xff]  ;;  %v4392_v37 = vld [vmem:[#allocation27_spill] sm:$0xff] }
  0xbc   : > { %v3692_v19 = vsel %vm517_vm2, %v4378_v17, %v1026_v36  ;;  %v4382_v15 = vrot.slane %v4381_v33, 5  ;;  %v3711_v22 = vmul.f32 %v4383_v16, %v4370_v55  ;;  %v4385_v30 = vunpack.c.l.bf16 %v4384_v35  ;;  %v4395_v3 = vld [vmem:[#allocation30_spill] sm:$0xff]  ;;  %v4397_v17 = vld [vmem:[#allocation32_spill] sm:$0xff]  ;;  %v4399_v33 = vld [vmem:[#allocation33_spill] sm:$0xff] }
  0xbd   : > { %v3699_v44 = vsel %vm556_vm3, %v4380_v38, %v4241_v54  ;;  %v785_v20 = vadd.f32 %v774_v4, %v747_v52  ;;  %v4387_v32 = vrot.slane %v4386_v40, 6  ;;  %v4389_v63 = vunpack.c.l.bf16 %v4388_v51  ;;  %v4398_v38 = vld [vmem:[#allocation37_spill] sm:$0xff] }
  0xbe   : > { %v3707_v43 = vsel %vm595_vm4, %v4382_v15, %v4235_v28  ;;  %v3716_v39 = vmul.f32 %v4383_v16, %v4385_v30  ;;  %v783_v48 = vadd.f32 %v775_v26, %v745_v6  ;;  %v4394_v4 = vunpack.c.l.bf16 %v4393_v24  ;;  %v4400_v26 = vld [vmem:[#allocation38_spill] sm:$0xff] }
  0xbf   : > { %v3723_v9 = vsel %vm634_vm5, %v4387_v32, %v4234_v56  ;;  %v3728_v10 = vmul.f32 %v4390_v13, %v4389_v63  ;;  %v4391_v55 = vmov %v4389_v63  ;;  %v3747_v15 = vmul.f32 %v4399_v33, %v4398_v38 }
  0xc0   : > { %v3733_v25 = vmul.f32 %v4392_v37, %v4391_v55  ;;  %v3738_v52 = vmul.f32 %v4395_v3, %v4394_v4  ;;  %v4396_v5 = vmov %v4394_v4  ;;  %v823_v16 = vadd.f32 %v812_v1, %v785_v20  ;;  %v4401_v55 = vld [vmem:[#allocation26_spill] sm:$0xff]  ;;  %v4403_v37 = vld [vmem:[#allocation29_spill] sm:$0xff] }
  0xc1   : > { %v3743_v41 = vmul.f32 %v4397_v17, %v4396_v5  ;;  %v4233_v35 = vrot.slane %v3728_v10, 1  ;;  %v3753_v6 = vmul.f32 %v4400_v26, %v4398_v38  ;;  %v821_v40 = vadd.f32 %v813_v47, %v783_v48  ;;  %v4407_v17 = vld [vmem:[#allocation34_spill] sm:$0xff]  ;;  %v4409_v26 = vld [vmem:[#allocation35_spill] sm:$0xff] }
  0xc2   : > { %v4232_v30 = vrot.slane %v3733_v25, 2  ;;  %v4230_v32 = vrot.slane %v3738_v52, 3  ;;  %v4229_v63 = vrot.slane %v3747_v15, 5  ;;  %v861_v13 = vadd.f32 %v850_v60, %v823_v16  ;;  %v4405_v60 = vld [vmem:[#allocation31_spill] sm:$0xff] }
  0xc3   : > { %v4228_v51 = vrot.slane %v3743_v41, 4  ;;  %v4402_v1 = vrot.slane %v4401_v55, 1  ;;  %v4404_v24 = vrot.slane %v4403_v37, 2  ;;  %v4231_v48 = vrot.slane %v3753_v6, 6 }
  0xc4   : > { %v859_v4 = vadd.f32 %v851_v14, %v821_v40  ;;  %v4406_v3 = vrot.slane %v4405_v60, 3  ;;  %v4408_v33 = vrot.slane %v4407_v17, 4  ;;  %v4410_v55 = vrot.slane %v4409_v26, 5  ;;  %v4413_v60 = vld [vmem:[#allocation41_spill] sm:$0xff]  ;;  %v4414_v17 = vld [vmem:[#allocation36_spill] sm:$0xff] }
  0xc5   : > { %v3763_v20 = vsel %vm439_vm0, %v4402_v1, %v4233_v35  ;;  %v3770_v47 = vsel %vm478_vm1, %v4404_v24, %v4232_v30  ;;  %v899_v40 = vadd.f32 %v888_v49, %v861_v13  ;;  %v4411_v1 = vld [vmem:[#allocation39_spill] sm:$0xff]  ;;  %v4418_v49 = vld [vmem:[#allocation42_spill] sm:$0xff] }
  0xc6   : > { %v3778_v5 = vsel %vm517_vm2, %v4406_v3, %v4230_v32  ;;  %v3785_v16 = vsel %vm556_vm3, %v4408_v33, %v4228_v51  ;;  %v3792_v14 = vsel %vm595_vm4, %v4410_v55, %v4229_v63  ;;  %v4412_v37 = vrot.slane %v4411_v1, 6  ;;  %v4416_v55 = vld [vmem:[#allocation40_spill] sm:$0xff]  ;;  %v4427_v35 = vld [vmem:[#allocation51_spill] sm:$0xff] }
  0xc7   : > { %v3803_v3 = vmul.f32 %v4413_v60, %v4398_v38  ;;  %v4415_v33 = vunpack.c.l.bf16 %v4414_v17  ;;  %v897_v26 = vadd.f32 %v889_v0, %v859_v4  ;;  %v4417_v63 = vunpack.c.l.bf16 %v4416_v55  ;;  %v4420_v32 = vld [vmem:[#allocation44_spill] sm:$0xff]  ;;  %v4423_v38 = vld [vmem:[#allocation47_spill] sm:$0xff]  ;;  %v4426_v4 = vld [vmem:[#allocation53_spill] sm:$0xff] }
  0xc8   : > { %v3799_v24 = vsel %vm634_vm5, %v4412_v37, %v4231_v48  ;;  %v4421_v48 = vld [vmem:[#allocation45_spill] sm:$0xff]  ;;  %v923_v17 = vadd.f32 %v919_v45, %v899_v40  ;;  %v4428_v55 = vld [vmem:[#allocation54_spill] sm:$0xff] }
  0xc9   : > { %v3808_v51 = vmul.f32 %v4413_v60, %v4415_v33  ;;  %v3813_v13 = vmul.f32 %v4418_v49, %v4417_v63  ;;  %v4419_v1 = vmov %v4417_v63  ;;  %v4422_v50 = vunpack.c.l.bf16 %v4421_v48  ;;  %v4425_v33 = vld [vmem:[#allocation49_spill] sm:$0xff] }
  0xca   : > { %v3818_v37 = vmul.f32 %v4420_v32, %v4419_v1  ;;  %v3832_v63 = vmul.f32 %v4427_v35, %v4426_v4  ;;  %v3836_v49 = vmul.f32 %v4428_v55, %v4426_v4  ;;  %v921_v32 = vadd.f32 %v3636_v18, %v897_v26  ;;  %v4431_v26 = vld [vmem:[#allocation46_spill] sm:$0xff] }
  0xcb   : > { %v3823_v30 = vmul.f32 %v4423_v38, %v4422_v50  ;;  %v4424_v60 = vmov %v4422_v50  ;;  %v4236_v1 = vrot.slane %v3813_v13, 1  ;;  %v961_v48 = vadd.f32 %v950_v27, %v923_v17  ;;  %v4433_v17 = vld [vmem:[#allocation48_spill] sm:$0xff] }
  0xcc   : > { %v3828_v0 = vmul.f32 %v4425_v33, %v4424_v60  ;;  %v4237_v50 = vrot.slane %v3818_v37, 2  ;;  %v4239_v38 = vrot.slane %v3832_v63, 5  ;;  %v4242_v35 = vrot.slane %v3836_v49, 6  ;;  %v4429_v33 = vld [vmem:[#allocation43_spill] sm:$0xff] }
  0xcd   : > { %v4240_v45 = vrot.slane %v3823_v30, 3  ;;  %v959_v60 = vadd.f32 %v951_v34, %v921_v32  ;;  %v4430_v55 = vrot.slane %v4429_v33, 1  ;;  %v4432_v56 = vrot.slane %v4431_v26, 2  ;;  %v4435_v33 = vld [vmem:[#allocation50_spill] sm:$0xff] }
  0xce   : > { %v4238_v40 = vrot.slane %v3828_v0, 4  ;;  %v4434_v28 = vrot.slane %v4433_v17, 3  ;;  %v999_v32 = vadd.f32 %v988_v21, %v961_v48  ;;  %v4441_v48 = vld [vmem:[#allocation58_spill] sm:$0xff] }
  0xcf   : > { %v3850_v18 = vsel %vm439_vm0, %v4430_v55, %v4236_v1  ;;  %v3857_v27 = vsel %vm478_vm1, %v4432_v56, %v4237_v50  ;;  %v4436_v55 = vrot.slane %v4435_v33, 4  ;;  %v4437_v56 = vld [vmem:[#allocation52_spill] sm:$0xff]  ;;  %v997_v21 = vadd.f32 %v3684_v2, %v959_v60  ;;  %v4448_v2 = vld [vmem:[#allocation61_spill] sm:$0xff] }
  0xd0   : > { %v3864_v34 = vsel %vm517_vm2, %v4434_v28, %v4240_v45  ;;  %v4438_v26 = vrot.slane %v4437_v56, 5  ;;  %v4439_v28 = vld [vmem:[#allocation56_spill] sm:$0xff]  ;;  %v3892_v33 = vmul.f32 %v4441_v48, %v4426_v4  ;;  %v4446_v45 = vld [vmem:[#allocation59_spill] sm:$0xff]  ;;  %v4449_v4 = vld [vmem:[#allocation62_spill] sm:$0xff] }
  0xd1   : > { %v3873_v1 = vsel %vm556_vm3, %v4436_v55, %v4238_v40  ;;  %v4440_v17 = vrot.slane %v4439_v28, 6  ;;  %v4442_v55 = vld [vmem:[#allocation55_spill] sm:$0xff]  ;;  %v1037_v28 = vadd.f32 %v1026_v36, %v999_v32 }
  0xd2   : > { %v3880_v50 = vsel %vm595_vm4, %v4438_v26, %v4239_v38  ;;  %v4443_v40 = vunpack.c.l.bf16 %v4442_v55  ;;  %v4444_v26 = vld [vmem:[#allocation57_spill] sm:$0xff]  ;;  %v4454_v36 = vld [vmem:[#allocation71_spill] sm:$0xff] }
  0xd3   : > { %v3887_v62 = vsel %vm634_vm5, %v4440_v17, %v4242_v35  ;;  %v4445_v38 = vunpack.c.l.bf16 %v4444_v26  ;;  %v4450_v35 = vunpack.c.l.bf16 %v4449_v4  ;;  %v4457_v26 = vld [vmem:[#allocation72_spill] sm:$0xff]  ;;  %v4464_v4 = vld [vmem:[#allocation63_spill] sm:$0xff] }
  0xd4   : > { %v3897_v56 = vmul.f32 %v4441_v48, %v4443_v40  ;;  %v4453_v48 = vld [vmem:[#allocation66_spill] sm:$0xff] }
  0xd5   : > { %v3902_v54 = vmul.f32 %v4446_v45, %v4445_v38  ;;  %v4447_v17 = vmov %v4445_v38  ;;  %v3914_v55 = vmul.f32 %v4451_v31, %v4450_v35  ;;  %v4452_v40 = vmov %v4450_v35  ;;  %v4455_v38 = vld [vmem:[#allocation67_spill] sm:$0xff] }
  0xd6   : > { %v3909_v60 = vmul.f32 %v4448_v2, %v4447_v17  ;;  %v3919_v59 = vmul.f32 %v4453_v48, %v4452_v40  ;;  %v1035_v45 = vadd.f32 %v3692_v19, %v997_v21  ;;  %v3925_v32 = vmul.f32 %v4455_v38, %v4454_v36  ;;  %v4460_v21 = vld [vmem:[#allocation60_spill] sm:$0xff] }
  0xd7   : > { %v4247_v29 = vrot.slane %v3902_v54, 1  ;;  %v3929_v17 = vmul.f32 %v4457_v26, %v4454_v36  ;;  %v4459_v31 = vrot.slane %v3662_v46, 4  ;;  %v4461_v48 = vrot.slane %v4460_v21, 1  ;;  %v4470_v26 = vld [vmem:[#allocation68_spill] sm:$0xff] }
  0xd8   : > { %4456 = vst [vmem:[#allocation7_spill] sm:$0xff] %v3925_v32  ;;  %v4248_v2 = vrot.slane %v3909_v60, 2  ;;  %v1073_v19 = vadd.f32 %v3699_v44, %v1035_v45  ;;  %v4465_v40 = vrot.slane %v4464_v4, 2  ;;  %v4466_v45 = vrot.slane %v3914_v55, 3  ;;  %v4473_v4 = vld [vmem:[#allocation69_spill] sm:$0xff] }
  0xd9   : > { %4458 = vst [vmem:[#allocation4_spill] sm:$0xff] %v3929_v17  ;;  %v1075_v35 = vadd.f32 %v4459_v31, %v1037_v28  ;;  %v3942_v38 = vsel %vm439_vm0, %v4461_v48, %v4247_v29  ;;  %v4463_v28 = vrot.slane %v3668_v53, 5  ;;  %v4468_v21 = vrot.slane %v4467_v12, 3 }
  0xda   : > { %4462 = vst [vmem:[#allocation6_spill] sm:$0xff] %v3942_v38  ;;  %v1745_v44 = vsel %vm478_vm1, %v4465_v40, %v4248_v2  ;;  %v4469_v29 = vrot.slane %v3919_v59, 4  ;;  %v4471_v38 = vrot.slane %v4470_v26, 4  ;;  %v1111_v53 = vadd.f32 %v3707_v43, %v1073_v19  ;;  %v4477_v2 = vld [vmem:[#allocation73_spill] sm:$0xff]  ;;  %v4480_v26 = vld [vmem:[#allocation75_spill] sm:$0xff] }
  0xdb   : > { %v1113_v31 = vadd.f32 %v4463_v28, %v1075_v35  ;;  %v1783_v48 = vsel %vm517_vm2, %v4468_v21, %v4466_v45  ;;  %v4472_v35 = vrot.slane %v3925_v32, 5  ;;  %v4474_v28 = vrot.slane %v4473_v4, 5 }
  0xdc   : > { %v3963_v46 = vsel %vm556_vm3, %v4471_v38, %v4469_v29  ;;  %v4476_v12 = vrot.slane %v3929_v17, 6  ;;  %v4478_v45 = vrot.slane %v4477_v2, 6  ;;  %v3982_v29 = vmul.f32 %v4480_v26, %v4454_v36  ;;  %v4483_v38 = vld [vmem:[#allocation70_spill] sm:$0xff] }
  0xdd   : > { %v3971_v40 = vsel %vm595_vm4, %v4474_v28, %v4472_v35  ;;  %v4482_v43 = vrot.slane %v3674_v11, 6  ;;  %v4484_v32 = vunpack.c.l.bf16 %v4483_v38  ;;  %v4485_v35 = vld [vmem:[#allocation74_spill] sm:$0xff]  ;;  %v1149_v36 = vadd.f32 %v3723_v9, %v1111_v53  ;;  %v4492_v11 = vld [vmem:[#allocation81_spill] sm:$0xff] }
  0xde   : > { %4475 = vst [vmem:[#allocation8_spill] sm:$0xff] %v3971_v40  ;;  %v3978_v21 = vsel %vm634_vm5, %v4478_v45, %v4476_v12  ;;  %4481 = vst [vmem:[#allocation5_spill] sm:$0xff] %v3982_v29  ;;  %v4486_v28 = vunpack.c.l.bf16 %v4485_v35  ;;  %v4487_v40 = vld [vmem:[#allocation76_spill] sm:$0xff]  ;;  %v4489_v12 = vld [vmem:[#allocation78_spill] sm:$0xff] }
  0xdf   : > { %4479 = vst [vmem:[#allocation10_spill] sm:$0xff] %v3978_v21  ;;  %v1151_v19 = vadd.f32 %v4482_v43, %v1113_v31  ;;  %v1930_v4 = vmul.f32 %v4480_v26, %v4484_v32  ;;  %v4490_v29 = vld [vmem:[#allocation79_spill] sm:$0xff]  ;;  %v4494_v32 = vld [vmem:[#allocation82_spill] sm:$0xff] }
  0xe0   : > { %v3992_v17 = vmul.f32 %v4487_v40, %v4486_v28  ;;  %v4488_v2 = vmov %v4486_v28  ;;  %v4491_v21 = vunpack.c.l.bf16 %v4490_v29  ;;  %v4495_v40 = vunpack.c.l.bf16 %v3498_v57 }
  0xe1   : > { %v3997_v45 = vmul.f32 %v4489_v12, %v4488_v2  ;;  %v1175_v35 = vadd.f32 %v3716_v39, %v1151_v19  ;;  %v1173_v29 = vadd.f32 %v3711_v22, %v1149_v36  ;;  %v4498_v19 = vld [vmem:[#allocation77_spill] sm:$0xff]  ;;  %v4502_v36 = vrot.slane %v3495_v61, 3 }
  0xe2   : > { %v4003_v31 = vmul.f32 %v4492_v11, %v4491_v21  ;;  %v4493_v43 = vmov %v4491_v21  ;;  %v4013_v38 = vmul.f32 %v3515_v23, %v4495_v40  ;;  %v1961_v28 = vrot.slane %v3992_v17, 1 }
  0xe3   : > { %v4008_v26 = vmul.f32 %v4494_v32, %v4493_v43  ;;  %v1999_v9 = vrot.slane %v3997_v45, 2  ;;  %v4496_v53 = vmov %v4495_v40  ;;  %v4497_v11 = vrot.slane %v3728_v10, 1  ;;  %v4500_v43 = vld [vmem:[#allocation80_spill] sm:$0xff] }
  0xe4   : > { %v4021_v21 = vmul.f32 %v3529_v42, %v4496_v53  ;;  %v2037_v2 = vrot.slane %v4003_v31, 3  ;;  %v2113_v23 = vrot.slane %v4013_v38, 5  ;;  %v4499_v17 = vrot.slane %v4498_v19, 1 }
  0xe5   : > { %v2075_v12 = vrot.slane %v4008_v26, 4  ;;  %v1213_v39 = vadd.f32 %v4497_v11, %v1175_v35  ;;  %v4501_v57 = vrot.slane %v4500_v43, 2  ;;  %v1211_v22 = vadd.f32 %v3763_v20, %v1173_v29 }
  0xe6   : > { %v1962_v45 = vsel %vm439_vm0, %v4499_v17, %v1961_v28  ;;  %v2151_v32 = vrot.slane %v4021_v21, 6  ;;  %v2038_v31 = vsel %vm517_vm2, %v4502_v36, %v2037_v2  ;;  %v4503_v26 = vrot.slane %v3511_v8, 4 }
  0xe7   : > { %v2000_v42 = vsel %vm478_vm1, %v4501_v57, %v1999_v9  ;;  %v4504_v40 = vrot.slane %v3525_v58, 5  ;;  %v4505_v35 = vrot.slane %v3733_v25, 2  ;;  %v4506_v11 = vrot.slane %v3545_v7, 6 }
  0xe8   : > { %v2076_v10 = vsel %vm556_vm3, %v4503_v26, %v2075_v12  ;;  %v1249_v20 = vadd.f32 %v3770_v47, %v1211_v22  ;;  %v4507_v61 = vrot.slane %v3738_v52, 3  ;;  %v4508_v19 = vrot.slane %v3743_v41, 4 }
  0xe9   : > { %v2114_v38 = vsel %vm595_vm4, %v4504_v40, %v2113_v23  ;;  %v1251_v53 = vadd.f32 %v4505_v35, %v1213_v39  ;;  %v2152_v21 = vsel %vm634_vm5, %v4506_v11, %v2151_v32  ;;  %v4509_v43 = vrot.slane %v3747_v15, 5 }
  0xea   : > { %v1287_v8 = vadd.f32 %v3778_v5, %v1249_v20  ;;  %v4510_v7 = vrot.slane %v3753_v6, 6  ;;  %v4511_v5 = vrot.slane %v3813_v13, 1  ;;  %v4515_v13 = vrot.slane %v3832_v63, 5  ;;  %v4518_v20 = vld [vmem:[#allocation6_spill] sm:$0xff] }
  0xeb   : > { %v1289_v29 = vadd.f32 %v4507_v61, %v1251_v53 }
  0xec   : > { %v1325_v58 = vadd.f32 %v3785_v16, %v1287_v8  ;;  %v4512_v16 = vrot.slane %v3818_v37, 2  ;;  %v4516_v37 = vrot.slane %v3836_v49, 6 }
  0xed   : > { %v1327_v17 = vadd.f32 %v4508_v19, %v1289_v29  ;;  %v4521_v19 = vrot.slane %v3919_v59, 4 }
  0xee   : > { %v1363_v39 = vadd.f32 %v3792_v14, %v1325_v58  ;;  %v4513_v14 = vrot.slane %v3823_v30, 3 }
  0xef   : > { %v1365_v25 = vadd.f32 %v4509_v43, %v1327_v17  ;;  %v4522_v17 = vld [vmem:[#allocation7_spill] sm:$0xff] }
  0xf0   : > { %v1401_v47 = vadd.f32 %v3799_v24, %v1363_v39  ;;  %v4514_v24 = vrot.slane %v3828_v0, 4 }
  0xf1   : > { %v1403_v57 = vadd.f32 %v4510_v7, %v1365_v25  ;;  %v4525_v25 = vld [vmem:[#allocation4_spill] sm:$0xff] }
  0xf2   : > { %v1425_v22 = vadd.f32 %v3803_v3, %v1401_v47  ;;  %v4526_v39 = vrot.slane %v4525_v25, 6  ;;  %v4528_v47 = vld [vmem:[#allocation5_spill] sm:$0xff] }
  0xf3   : > { %v1427_v52 = vadd.f32 %v3808_v51, %v1403_v57 }
  0xf4   : > { %v1463_v36 = vadd.f32 %v3850_v18, %v1425_v22 }
  0xf5   : > { %v1465_v41 = vadd.f32 %v4511_v5, %v1427_v52 }
  0xf6   : > { %v1501_v26 = vadd.f32 %v3857_v27, %v1463_v36 }
  0xf7   : > { %v1503_v15 = vadd.f32 %v4512_v16, %v1465_v41  ;;  %v4529_v16 = vld [vmem:[#allocation3_spill] sm:$0xff] }
  0xf8   : > { %v1539_v40 = vadd.f32 %v3864_v34, %v1501_v26  ;;  %v4517_v34 = vrot.slane %v3902_v54, 1  ;;  %v4524_v54 = vld [vmem:[#allocation8_spill] sm:$0xff] }
  0xf9   : > { %v1541_v6 = vadd.f32 %v4513_v14, %v1503_v15  ;;  %v4530_v15 = vld [vmem:[#allocation83_spill] sm:$0xff] }
  0xfa   : > { %v1577_v3 = vadd.f32 %v3873_v1, %v1539_v40  ;;  %v4519_v1 = vrot.slane %v3909_v60, 2  ;;  %v4527_v60 = vld [vmem:[#allocation10_spill] sm:$0xff]  ;;  %v2169_v26 = vrot.slane %v4530_v15, %v4529_v16  ;;  %v4531_v40 = vld [vmem:[#allocation84_spill] sm:$0xff] }
  0xfb   : > { %v1579_v51 = vadd.f32 %v4514_v24, %v1541_v6  ;;  %v2185_v24 = vrot.slane %v4531_v40, %v4529_v16 }
  0xfc   : > { %v1615_v18 = vadd.f32 %v3880_v50, %v1577_v3  ;;  %v4520_v50 = vrot.slane %v3914_v55, 3 }
  0xfd   : > { %v1617_v35 = vadd.f32 %v4515_v13, %v1579_v51 }
  0xfe   : > { %v1653_v27 = vadd.f32 %v3887_v62, %v1615_v18 }
  0xff   : > { %v1655_v53 = vadd.f32 %v4516_v37, %v1617_v35  ;;  %v2611_v37 = vld [vmem:[%s4132_s6] ss:$0 sm:$0xff] }
 0x100   : > { %v1677_v11 = vadd.f32 %v3892_v33, %v1653_v27  ;;  %v4523_v33 = vrot.slane %v4522_v17, 5 }
 0x101   : > { %v1679_v30 = vadd.f32 %v3897_v56, %v1655_v53 }
 0x102   : > { %v1715_v61 = vadd.f32 %v4518_v20, %v1677_v11 }
 0x103   : > { %v1717_v0 = vadd.f32 %v4517_v34, %v1679_v30 }
 0x104   : > { %v1753_v29 = vadd.f32 %v1745_v44, %v1715_v61 }
 0x105   : > { %v1755_v63 = vadd.f32 %v4519_v1, %v1717_v0 }
 0x106   : > { %v1791_v49 = vadd.f32 %v1783_v48, %v1753_v29 }
 0x107   : > { %v1793_v8 = vadd.f32 %v4520_v50, %v1755_v63 }
 0x108   : > { %v1829_v56 = vadd.f32 %v3963_v46, %v1791_v49 }
 0x109   : > { %v1831_v62 = vadd.f32 %v4521_v19, %v1793_v8 }
 0x10a   : > { %v1867_v43 = vadd.f32 %v4524_v54, %v1829_v56 }
 0x10b   : > { %v1869_v58 = vadd.f32 %v4523_v33, %v1831_v62 }
 0x10c   : > { %v1905_v57 = vadd.f32 %v4527_v60, %v1867_v43 }
 0x10d   : > { %v1907_v7 = vadd.f32 %v4526_v39, %v1869_v58 }
 0x10e   : > { %v1932_v55 = vadd.f32 %v4528_v47, %v1905_v57 }
 0x10f   : > { %v1934_v44 = vadd.f32 %v1930_v4, %v1907_v7 }
 0x110   : > { %v1970_v48 = vadd.f32 %v1962_v45, %v1932_v55 }
 0x111   : > { %v1972_v52 = vadd.f32 %v1961_v28, %v1934_v44 }
 0x112   : > { %v2008_v59 = vadd.f32 %v2000_v42, %v1970_v48 }
 0x113   : > { %v2010_v22 = vadd.f32 %v1999_v9, %v1972_v52 }
 0x114   : > { %v2046_v41 = vadd.f32 %v2038_v31, %v2008_v59 }
 0x115   : > { %v2048_v5 = vadd.f32 %v2037_v2, %v2010_v22 }
 0x116   : > { %v2084_v36 = vadd.f32 %v2076_v10, %v2046_v41 }
 0x117   : > { %v2086_v46 = vadd.f32 %v2075_v12, %v2048_v5  ;;  %v2707_v12 = vmov 0.0  }
 0x118   : > { %v2122_v6 = vadd.f32 %v2114_v38, %v2084_v36  ;;  %392 = vst [vmem:[#allocation2 + $0x8] sm:$0x3] %v2707_v12 }
 0x119   : > { %v2124_v14 = vadd.f32 %v2113_v23, %v2086_v46 }
 0x11a   : > { %v2160_v4 = vadd.f32 %v2152_v21, %v2122_v6 }
 0x11b   : > { %v2162_v51 = vadd.f32 %v2151_v32, %v2124_v14  ;;  %v2610_v32 = vld [vmem:[%s4131_s5] ss:$0 sm:$0xff] }
 0x11c   : > { %v2176_v13 = vmul.f32 %v2169_v26, %v2160_v4 }
 0x11d   : > { %v2178_v3 = vmul.f32 %v2169_v26, %v2162_v51 }
 0x11e   : > { %v2192_v45 = vadd.f32 %v2185_v24, %v2176_v13 }
 0x11f   : > { %v2194_v28 = vadd.f32 %v2185_v24, %v2178_v3  ;;  %v2201_v21 = vld [vmem:[#allocation2 + $0x8] sm:$0x3] }
 0x120   : > { %v2196_v42 = vmax.f32 %v2192_v45, 0.0 }
 0x121   : > { %v2198_v9 = vmax.f32 %v2194_v28, 0.0 }
 0x123   : > { %v2202_v2 = vpack.c.bf16 %v2198_v9, %v2196_v42 }
 0x125   : > { %2365 = vmatmul.mubr.bf16.vlgmr.msra.gmra.mrb[0].mxu0 %v2202_v2 }
 0x1f8   : > { %v2636_v31 = vpop.f32.mrb[0].mxu0 }
 0x1f9   : > { %v2637_v10 = vpop.f32.mrb[1].mxu0 }
 0x1fa   : > { %v2638_v23 = vadd.f32 %v2637_v10, %v2636_v31  ;;  %v2639_v38 = vpop.f32.mrb[2].mxu0 }
 0x1fb   : > { %v2640_v35 = vpop.f32.mrb[3].mxu0 }
 0x1fc   : > { %v2641_v18 = vadd.f32 %v2640_v35, %v2639_v38  ;;  %v2389_v53 = vmul.f32 %v2638_v23, %v2610_v32 }
 0x1fe   : > { %v2374_v27 = vadd.f32 %v2641_v18, %v2201_v21  ;;  %v2398_v30 = vadd.f32 %v2611_v37, %v2389_v53 }
 0x200   : > { %2376 = vst [vmem:[#allocation2 + $0x8] sm:$0x3] %v2374_v27  ;;  %v2400_v11 = vmax.f32 %v2398_v30, 0.0 }
 0x202   : > { %v2618_v34 = vpack.c.bf16 %v2400_v11, %v2400_v11 }
 0x204   : > { %2410 = vst [vmem:[%s385_s22] sm:$0xf] %v2618_v34 }
 0x207   : > { %v2381_v0 = vld [vmem:[#allocation2 + $0x8] sm:$0x3] }
 0x208   : > { %v2390_v20 = vmul.f32 %v2610_v32, %v2381_v0 }
 0x20a   : > { %v2399_v61 = vadd.f32 %v2611_v37, %v2390_v20 }
 0x20c   : > { %v2401_v1 = vmax.f32 %v2399_v61, 0.0 }
 0x20e   : > { %v2619_v63 = vpack.c.bf16 %v2401_v1, %v2401_v1 }
 0x210   : > { %2411 = vst [vmem:[%s385_s22 + $0x4] sm:$0x1] %v2619_v63 }
 0x211 PF: > { %s17_s26 = sadd.s32 1, %s2705_s26   ;;  %s4532_s24 = smov %s2701_s25 }
 0x212   : > { %p14_p5 = scmp.ge.s32.totalorder %s17_s26, 4   ;;  %s4533_s25 = smov %s4535_s27 }
 0x214   :  { %16 = sbr.rel (!%p14_p5) target bundleno = 2 (0x2), region = 146 }

// kernel: cpm_forward.41
= control target key start
LH: loop header
LB: loop body
LE: loop exit
PB: predicated region body
PF: predicated region fallthrough
CT: control target
= control target key end

     0   :  { %14 = vsyncpa [#allocation4], 0  ;;  %s1324_s0 = inlined_call_operand.vmem [shape: bf16[2,4,128], index: 0, kind: input, shape index: {}]   ;;  %s1325_s1 = inlined_call_operand.vmem [shape: f32[1,1,128], index: 1, kind: input, shape index: {}]   ;;  %s1326_s2 = inlined_call_operand.vmem [shape: f32[1,128], index: 2, kind: input, shape index: {}]   ;;  %s1327_s3 = inlined_call_operand.vmem [shape: f32[1,128], index: 3, kind: input, shape index: {}]   ;;  %s1328_s4 = inlined_call_operand.vmem [shape: bf16[128,128], index: 4, kind: input, shape index: {}]   ;;  %s1329_s5 = inlined_call_operand.vmem [shape: f32[1,128], index: 5, kind: input, shape index: {}]   ;;  %s1330_s6 = inlined_call_operand.vmem [shape: f32[1,128], index: 6, kind: input, shape index: {}]   ;;  %s1331_s7 = inlined_call_operand.vmem [shape: bf16[128,8], index: 7, kind: input, shape index: {}]   ;;  %s1332_s8 = inlined_call_operand.vmem [shape: f32[1,8], index: 8, kind: input, shape index: {}]   ;;  %s1333_s9 = inlined_call_operand.hbm [shape: f32[2,4,8], index: 9, kind: output, shape index: {}]  }
   0x1   :  { %16 = vsyncpa [#allocation4 + $0x1], 0  ;;  %s1127_s30 = smov 0   ;;  %s1129_s10 = smov 0  }
   0x2   :  { %s1131_s11 = smov 0   ;;  %s1133_s12 = smov 0  }
   0x3   :  { %s1135_s13 = smov 0   ;;  %s1137_s14 = smov 0  }
   0x4 LB: > { %s826_s15 = sadd.s32 4294967295, %s1072_s14   ;;  %s827_s16 = sadd.s32 4294967294, %s1072_s14   ;;  %s1072_s14 = sphi %s1137_s14, %s22_s14   ;;  %s1068_s13 = sphi %s1135_s13, %s1340_s13   ;;  %s1064_s12 = sphi %s1133_s12, %s1339_s12   ;;  %s1060_s11 = sphi %s1131_s11, %s1338_s11   ;;  %s1056_s10 = sphi %s1129_s10, %s1337_s10   ;;  %s1052_s30 = sphi %s1127_s30, %s1336_s30  }
   0x5   : > { %s34_s17 = sadd.s32 1, %s1068_s13  ;;  %s257_s18 = sadd.s32 1, %s1060_s11 }
   0x6   : > { %p36_p0 = scmp.ge.s32.totalorder %s34_s17, 2  ;;  %p267_p1 = scmp.ne.s32.totalorder %s1060_s11, %s1056_s10 }
   0x7   : > { %p268_p2 = scmp.eq.s32.totalorder %s826_s15, 1  ;;  %p273_p3 = scmp.ne.s32.totalorder %s1056_s10, %s1052_s30 }
   0x8   : > { %s1342_s17 = smov (%p36_p0, %s34_s17), 0  ;;  %p274_p5 = scmp.eq.s32.totalorder %s827_s16, 1 }
   0x9   : > { %p1167_p4 = por %p268_p2, %p267_p1  ;;  %s254_s20 = ssub.s32 %s1068_s13, %s1342_s17 }
   0xa   : > { %p834_p6 = scmp.ge.s32.totalorder %s1072_s14, 1  ;;  %p255_p7 = scmp.eq.s32.totalorder %s254_s20, 0 }
   0xb   : > { %p1174_p8 = por %p274_p5, %p273_p3  ;;  %p341_p9 = scmp.lt.s32.totalorder %s1072_s14, 3 }
   0xc   : > { %s1180_s22 = scalar_select %p255_p7, %s1060_s11, %s257_s18  }
   0xd   : > { %p342_p10 = pnand %p834_p6, %p341_p9 }
   0xe   : > { %v978_v0 = vld [vmem:[%s1328_s4] sm:$0xff] (!%p342_p10)   ;;  %v1074_v1 = vmov (!%p342_p10), 0.0   ;;  %v979_v2 = vld [vmem:[%s1328_s4 + $0x8] sm:$0xff] (!%p342_p10)   ;;  %vm1075_vm0 = vmmov (!%p342_p10), 0   ;;  %p393_p11 = scmp.lt.s32.totalorder (!%p342_p10), %s1064_s12, 1  ;;  %v980_v3 = vld [vmem:[%s1328_s4 + $0x10] sm:$0xff] (!%p342_p10)  }
   0xf   : > { %345 = sbr.rel (%p342_p10) target bundleno = 505 (0x1f9), region = 56  ;;  %881 = vmatprep.subr.bf16.mxu0 (!%p342_p10), %v1074_v1  ;;  %420 = vst [vmem:[#allocation2] sm:$0xf] (!%p342_p10), %v1074_v1  ;;  %901 = vmatprep.subr.bf16.mxu1 (!%p342_p10), %v1074_v1  ;;  %v981_v4 = vld [vmem:[%s1328_s4 + $0x18] sm:$0xff] (!%p342_p10)   ;;  %v837_v7 = vld [vmem:[%s1325_s1] ss:$0 sm:$0xff] (!%p342_p10) }
  0x10   : > { %882 = vmatpush3.bf16.msra.mxu0 (!%p342_p10), %v978_v0  ;;  %897 = vmatprep.mubr.msk.bf16.mxu0 (!%p342_p10), %vm1075_vm0, %v1074_v1  ;;  %v986_v8 = vld [vmem:[%s1331_s7] sm:$0xff] (!%p342_p10)   ;;  %v987_v11 = vld [vmem:[%s1331_s7 + $0x8] sm:$0xff] (!%p342_p10)   ;;  %v988_v13 = vld [vmem:[%s1331_s7 + $0x10] sm:$0xff] (!%p342_p10)   ;;  %s390_s26 = sand.u32 (!%p342_p10), 1, %s1056_s10   ;;  %s860_s16 = sshll.u32 (!%p342_p10), %s1064_s12, 6  ;;  %vm689_vm1 = vcmask (!%p342_p10), 60416  }
  0x11   : > { %883 = vmatprep.subr.bf16.mxu0 (!%p342_p10), %v1074_v1  ;;  %917 = vmatprep.mubr.msk.bf16.mxu1 (!%p342_p10), %vm1075_vm0, %v1074_v1  ;;  %v982_v9 = vld [vmem:[%s1328_s4 + $0x20] sm:$0xff] (!%p342_p10)   ;;  %v983_v15 = vld [vmem:[%s1328_s4 + $0x28] sm:$0xff] (!%p342_p10)   ;;  %v984_v18 = vld [vmem:[%s1328_s4 + $0x30] sm:$0xff] (!%p342_p10)   ;;  %s835_s28 = sshll.u32 (!%p342_p10), %s390_s26, 2  ;;  %s1277_s24 = scalar_lea.hbm (!%p342_p10), %s1333_s9, %s860_s16 }
  0x12   : > { %v838_v10 = vld [vmem:[%s1326_s2] ss:$0 sm:$0xff] (!%p342_p10)  ;;  %902 = vmatpush3.bf16.msra.mxu1 (!%p342_p10), %v986_v8  ;;  %v985_v20 = vld [vmem:[%s1328_s4 + $0x38] sm:$0xff] (!%p342_p10)   ;;  %v991_v24 = vld [vmem:[%s1331_s7 + $0x28] sm:$0xff] (!%p342_p10)  }
  0x13   : > { %903 = vmatprep.subr.bf16.mxu1 (!%p342_p10), %v1074_v1  ;;  %v839_v16 = vld [vmem:[%s1327_s3] ss:$0 sm:$0xff] (!%p342_p10)  ;;  %v989_v22 = vld [vmem:[%s1331_s7 + $0x18] sm:$0xff] (!%p342_p10)   ;;  %v992_v25 = vld [vmem:[%s1331_s7 + $0x30] sm:$0xff] (!%p342_p10)  }
  0x14   : > { %884 = vmatpush3.bf16.msra.mxu0 (!%p342_p10), %v979_v2  ;;  %v990_v23 = vld [vmem:[%s1331_s7 + $0x20] sm:$0xff] (!%p342_p10)   ;;  %v993_v26 = vld [vmem:[%s1331_s7 + $0x38] sm:$0xff] (!%p342_p10)  }
  0x15   : > { %885 = vmatprep.subr.bf16.mxu0 (!%p342_p10), %v1074_v1  ;;  %v848_v33 = vld [vmem:[%s1329_s5] ss:$0 sm:$0xff] (!%p342_p10) }
  0x16   : > { %s394_s27 = scalar_select %p393_p11, %s1064_s12, 1  ;;  %904 = vmatpush3.bf16.msra.mxu1 %v987_v11  ;;  %v448_v27 = vld [vmem:[#allocation2] sm:$0xf] }
  0x17   : > { %905 = vmatprep.subr.bf16.mxu1 %v1074_v1  ;;  %v849_v35 = vld [vmem:[%s1330_s6] ss:$0 sm:$0xff]  ;;  %s692_s12 = scalar_lea.sflag [#allocation4], %s390_s26 }
  0x18   : > { %s836_s15 = sshll.u32 %s394_s27, 1  ;;  %886 = vmatpush3.bf16.msra.mxu0 %v980_v3  ;;  %v850_v40 = vld [vmem:[%s1332_s8] ss:$0 sm:$0xff] }
  0x19   : > { %s399_s20 = scalar_lea.vmem %s1324_s0, %s836_s15  ;;  %887 = vmatprep.subr.bf16.mxu0 %v1074_v1  ;;  %s392_s15 = scalar_lea.vmem [#allocation3], %s835_s28 }
  0x1a   : > { %v421_v5 = vld [vmem:[%s399_s20] sm:$0x3]  ;;  %906 = vmatpush3.bf16.msra.mxu1 %v988_v13  ;;  %s705_s18 = sshll.u32 %s392_s15, 4  ;;  %s1076_s28 = smov [#allocation3]   ;;  %s1279_s18 = int_to_ptr.vmem [resolvable:$true] %s705_s18 }
  0x1b   : > { %v422_v6 = vunpack.c.l.bf16 %v421_v5  ;;  %907 = vmatprep.subr.bf16.mxu1 %v1074_v1  ;;  %s994_s25 = scalar_lea.vmem %s1279_s18, 64  ;;  %s998_s29 = sshll.u32 %s1076_s28, 4  ;;  %s999_s29 = int_to_ptr.vmem [resolvable:$false] %s998_s29 }
  0x1c   : > { %888 = vmatpush3.bf16.msra.mxu0 %v981_v4  ;;  %p995_p12 = scmp.ne.s32.totalorder %s1279_s18, %s994_s25  ;;  %s1000_s27 = scalar_lea.vmem %s999_s29, 128 }
  0x1d   : > { %v430_v12 = vmul.f32 %v837_v7, %v422_v6  ;;  %889 = vmatprep.subr.bf16.mxu0 %v1074_v1  ;;  %p1001_p1 = scmp.lt.s32.totalorder %s1279_s18, %s999_s29  ;;  %p1002_p2 = scmp.lt.s32.totalorder %s1000_s27, %s994_s25 }
  0x1e   : > { %908 = vmatpush3.bf16.msra.mxu1 %v989_v22  ;;  %p996_p13 = pnand %p995_p12, %p1167_p4 }
  0x1f   : > { %v438_v14 = vmul.f32 %v838_v10, %v430_v12  ;;  %909 = vmatprep.subr.bf16.mxu1 %v1074_v1  ;;  %p1003_p3 = por %p1002_p2, %p1001_p1 }
  0x20   : > { %890 = vmatpush3.bf16.msra.mxu0 %v982_v9  ;;  %p997_p0 = pneg %p996_p13 }
  0x21   : > { %891 = vmatprep.subr.bf16.mxu0 %v1074_v1  ;;  %v446_v17 = vadd.f32 %v839_v16, %v438_v14 }
  0x22   : > { %910 = vmatpush3.bf16.msra.mxu1 %v990_v23  ;;  %p1004_p5 = pnand %p1003_p3, %p997_p0 }
  0x23   : > { %v447_v19 = vmax.f32 %v446_v17, 0.0  ;;  %911 = vmatprep.subr.bf16.mxu1 %v1074_v1 }
  0x24   : > { %892 = vmatpush3.bf16.msra.mxu0 %v983_v15 }
  0x25   : > { %893 = vmatprep.subr.bf16.mxu0 %v1074_v1  ;;  %v449_v21 = vpack.c.bf16 %v447_v19, %v447_v19 }
  0x26   : > { %912 = vmatpush3.bf16.msra.mxu1 %v991_v24 }
  0x27   : > { %913 = vmatprep.subr.bf16.mxu1 %v1074_v1 }
  0x28   : > { %894 = vmatpush3.bf16.msra.mxu0 %v984_v18 }
  0x29   : > { %895 = vmatprep.subr.bf16.mxu0 %v1074_v1 }
  0x2a   : > { %914 = vmatpush3.bf16.msra.mxu1 %v992_v25 }
  0x2b   : > { %915 = vmatprep.subr.bf16.mxu1 %v1074_v1 }
  0x2c   : > { %896 = vmatpush3.bf16.msra.mxu0 %v985_v20 }
  0x2e   : > { %916 = vmatpush3.bf16.msra.mxu1 %v993_v26 }
  0x2f   : > { %898 = vmatmul.mubr.bf16.vlgmr.msra.gmra.mrb[0].mxu0 %v449_v21 }
 0x102   : > { %v548_v28 = vpop.f32.mrb[0].mxu0 }
 0x103   : > { %v554_v29 = vadd.f32 %v548_v28, %v448_v27  ;;  %v899_v30 = vpop.f32.mrb[1].mxu0 }
 0x104   : > { %v551_v31 = vpop.f32.mrb[2].mxu0 }
 0x105   : > { %555 = vst [vmem:[#allocation2] sm:$0xf] %v554_v29  ;;  %v900_v32 = vpop.f32.mrb[3].mxu0 }
 0x10c   : > { %v559_v34 = vld [vmem:[#allocation2] sm:$0xf] }
 0x10d   : > { %v567_v36 = vmul.f32 %v848_v33, %v559_v34 }
 0x10f   : > { %v575_v37 = vadd.f32 %v849_v35, %v567_v36 }
 0x111   : > { %v576_v38 = vmax.f32 %v575_v37, 0.0 }
 0x113   : > { %v577_v39 = vpack.c.bf16 %v576_v38, %v576_v38 }
 0x115   : > { %918 = vmatmul.mubr.bf16.vlgmr.msra.gmra.mrb[0].mxu1 %v577_v39 }
 0x1e8   : > { %v683_v41 = vpop.f32.mrb[0].mxu1 }
 0x1e9   : > { %v684_v42 = vadd.f32 %v850_v40, %v683_v41  ;;  %v919_v43 = vpop.f32.mrb[1].mxu1 }
 0x1ea   : > { %v686_v44 = vpop.f32.mrb[2].mxu1 }
 0x1eb   : > { %v920_v45 = vpop.f32.mrb[3].mxu1  ;;  %690 = vst.msk [vmem:[%s392_s15] sm:$0xf] %vm689_vm1, %v684_v42 }
 0x1ec   : > { %1007 = shalt.err (!%p1004_p5)
}
 0x1ed   : > { %s1008_s26 = scalar_lea.hbm %s1277_s24, 64  ;;  %s1012_s20 = scalar_lea.hbm %s1333_s9, 128 }
 0x1ee   : > { %p1009_p6 = scmp.ne.s32.totalorder %s1277_s24, %s1008_s26  ;;  %p1013_p10 = scmp.lt.u32.totalorder %s1277_s24, %s1333_s9 }
 0x1ef   : > { %p1014_p11 = scmp.lt.u32.totalorder %s1012_s20, %s1008_s26  ;;  %p1016_p13 = scmp.lt.u32.totalorder %s1008_s26, %s1277_s24 }
 0x1f0   : > { %p1010_p7 = pnand %p1009_p6, %p1167_p4 }
 0x1f1   : > { %p1015_p12 = por %p1014_p11, %p1013_p10 }
 0x1f2   : > { %p1011_p9 = pneg %p1010_p7 }
 0x1f3   : > { %p1017_p0 = por %p1016_p13, %p1015_p12 }
 0x1f5   : > { %p1018_p1 = pnand %p1017_p0, %p1011_p9 }
 0x1f7   : > { %1021 = shalt.err (!%p1018_p1)
}
 0x1f8   : > { %921 = dma.vmem_to_hbm [thread:$0]  (%p1167_p4), %s1279_s18, 64, %s1277_s24, %s692_s12  }
 0x1f9 PF: > { %p927_p2 = scmp.ge.s32.totalorder %s1072_s14, 2  ;;  %s717_s25 = sand.u32 1, %s1052_s30  }
 0x1fa   : > { %s718_s29 = scalar_lea.sflag [#allocation4], %s717_s25 }
 0x1fb   : > { %p924_p3 = pnand %p927_p2, %p1174_p8 }
 0x1fd   : > { %1047 = dma.done.wait (!%p924_p3), %s718_s29, 64  }
 0x1fe   : > { %1049 = vsyncadd (!%p924_p3), %s718_s29, 4294967232  ;;  %s22_s14 = sadd.s32 1, %s1072_s14   ;;  %s1336_s30 = smov %s1056_s10 }
 0x1ff   : > { %p19_p5 = scmp.ge.s32.totalorder %s22_s14, 4   ;;  %s1337_s10 = smov %s1060_s11 }
 0x200   : > { %s1338_s11 = smov %s1180_s22  ;;  %s1339_s12 = smov %s1068_s13 }
 0x201   : > { %s1340_s13 = smov %s1342_s17  ;;  %21 = sbr.rel (!%p19_p5) target bundleno = 4 (0x4), region = 111 }
 0x208   :  { %723 = vsyncpa [#allocation4], 1 }
 0x209   :  { %725 = vsyncpa [#allocation4 + $0x1], 1 }

</bundles_post_ra>
